<compile_context>
chip_gen: v5e
topology: v5e:2x2
jax: 0.10.0
libtpu: 0.0.40
codegen_flags: <defaults>
</compile_context>

<pallas_src>
import functools

import jax
import jax.numpy as jnp
from jax import lax
from jax.experimental import pallas as pl
from jax.experimental.pallas import tpu as pltpu


def _round_up(x, m):
    return (x + m - 1) // m * m


def _preact_kernel(*refs, has_proj, H, W, Wp, row_chunk):
    """One batch image per grid step.  All conv LHS operands are contiguous
    sublane slices of a flat (rows, C) bf16 VMEM scratch."""
    if has_proj:
        (x_ref, s1_ref, b1_ref, s2_ref, b2_ref,
         w1_ref, w2_ref, wsc_ref, o_ref, pad1_ref, pad2_ref) = refs
    else:
        (x_ref, s1_ref, b1_ref, s2_ref, b2_ref,
         w1_ref, w2_ref, o_ref, pad1_ref, pad2_ref) = refs
        wsc_ref = None

    Cin = x_ref.shape[3]           # channel counts already padded to 128
    Cout = o_ref.shape[3]
    R1 = pad1_ref.shape[0]
    R2 = pad2_ref.shape[0]
    M = H * Wp                     # rows of one full padded-width slab

    def mask_cols(v, nrows):
        # zero the invalid padded-width columns (c >= W) of a (nrows*Wp, C) slab
        c = lax.broadcasted_iota(jnp.int32, (nrows, Wp, 1), 1)
        v3 = v.reshape(nrows, Wp, v.shape[-1])
        return jnp.where(c < W, v3, 0.0).reshape(nrows * Wp, v.shape[-1])

    def conv3x3_chunk(pad_ref, w_ref, m0, tm):
        # 3x3 conv over slab rows [m0, m0+tm): 9 taps, each a contiguous bf16
        # slice (tap offset = dh*Wp + dw) -> MXU matmul with f32 accumulation.
        cout = w_ref.shape[2]
        acc = jnp.zeros((tm, cout), jnp.float32)
        for t in range(9):                       # static unroll
            dh, dw = t // 3, t % 3
            off = m0 + dh * Wp + dw
            acc = acc + jnp.dot(pad_ref[off:off + tm, :], w_ref[t],
                                preferred_element_type=jnp.float32)
        return acc

    # ---- halo zeroing: two small CONTIGUOUS row ranges per pad buffer
    # (top padded row + row-1 left pad; bottom padded row + read tail).
    # The interior is fully rewritten every step, so no full-buffer clear and
    # no masked single-column stores.
    pad1_ref[0:Wp + 8, :] = jnp.zeros((Wp + 8, Cin), jnp.bfloat16)
    pad1_ref[(H + 1) * Wp:R1, :] = jnp.zeros((R1 - (H + 1) * Wp, Cin), jnp.bfloat16)
    pad2_ref[0:Wp + 8, :] = jnp.zeros((Wp + 8, Cout), jnp.bfloat16)
    pad2_ref[(H + 1) * Wp:R2, :] = jnp.zeros((R2 - (H + 1) * Wp, Cout), jnp.bfloat16)

    # ---- BN1 + ReLU (streams vreg-by-vreg), mask invalid columns, cast to
    # bf16 ONCE, write into pad1's interior as a single contiguous slab:
    #   a(h, w) -> pad1 flat row (h+1)*Wp + (w+1)
    x_slab = x_ref[0].reshape(M, Cin)                       # contiguous reshape
    a = jnp.maximum(x_slab * s1_ref[...] + b1_ref[...], 0.0)
    a = mask_cols(a, H).astype(jnp.bfloat16)
    pad1_ref[Wp + 1:Wp + 1 + M, :] = a

    # ---- conv1 -> BN2 + ReLU -> pad2 interior, strip-mined over image rows
    for r0 in range(0, H, row_chunk):
        nr = min(row_chunk, H - r0)
        tm = nr * Wp
        y = conv3x3_chunk(pad1_ref, w1_ref, r0 * Wp, tm)
        y = jnp.maximum(y * s2_ref[...] + b2_ref[...], 0.0)
        y = mask_cols(y, nr).astype(jnp.bfloat16)
        pad2_ref[(r0 + 1) * Wp + 1:(r0 + 1) * Wp + 1 + tm, :] = y

    # ---- conv2 + shortcut + store, strip-mined over image rows
    for r0 in range(0, H, row_chunk):
        nr = min(row_chunk, H - r0)
        tm = nr * Wp
        acc = conv3x3_chunk(pad2_ref, w2_ref, r0 * Wp, tm)
        if has_proj:
            # 1x1 projection of relu(bn1(x)); re-read from pad1 with a +1
            # column shift so the slab rows line up with acc's indexing.
            sc_lhs = pad1_ref[(r0 + 1) * Wp + 1:(r0 + 1) * Wp + 1 + tm, :]
            acc = acc + jnp.dot(sc_lhs, wsc_ref[...],
                                preferred_element_type=jnp.float32)
        else:
            # identity shortcut: raw x (Cin == Cout), aligned contiguous read
            acc = acc + x_ref[0, r0:r0 + nr].reshape(tm, Cin)
        # drop the invalid padded-width columns only at the final store
        out3 = acc.reshape(nr, Wp, Cout)[:, :W, :]
        o_ref[0, r0:r0 + nr] = out3.astype(o_ref.dtype)


def preact_block(x_nhwc, params, *, stride=1, eps=1e-5):
    """x_nhwc: (N, H, W, Cin) float32.  Returns (N, H, W, Cout) float32."""
    if stride != 1:
        # TODO(synk): strided conv1 / strided 1x1 shortcut not implemented.
        raise NotImplementedError("only stride=1 is supported")

    N, H, W, Cin = x_nhwc.shape
    Cout = params["w1"].shape[0]
    has_proj = "wsc" in params
    if not has_proj:
        assert Cin == Cout, "identity shortcut requires in_planes == planes"

    # lane-dense channels and sublane-aligned padded width
    Cin_p = _round_up(Cin, 128)
    Cout_p = _round_up(Cout, 128)
    Wp = _round_up(W + 2, 8)
    R_pad = _round_up((H + 2) * Wp + 2, 8)          # flat pad-scratch rows
    row_chunk = max(1, min(H, 192 // Wp))           # ~192-row matmul slabs

    # fold BatchNorm (inference) into per-channel scale / shift
    s1 = params["gamma1"] * lax.rsqrt(params["var1"] + eps)
    b1 = params["beta1"] - params["mean1"] * s1
    s2 = params["gamma2"] * lax.rsqrt(params["var2"] + eps)
    b2 = params["beta2"] - params["mean2"] * s2
    s1 = jnp.pad(s1, (0, Cin_p - Cin)).reshape(1, Cin_p).astype(jnp.float32)
    b1 = jnp.pad(b1, (0, Cin_p - Cin)).reshape(1, Cin_p).astype(jnp.float32)
    s2 = jnp.pad(s2, (0, Cout_p - Cout)).reshape(1, Cout_p).astype(jnp.float32)
    b2 = jnp.pad(b2, (0, Cout_p - Cout)).reshape(1, Cout_p).astype(jnp.float32)

    # torch OIHW -> (9, Cin_p, Cout_p) bf16 (tap-major HWIO)
    w1r = jnp.transpose(params["w1"], (2, 3, 1, 0)).reshape(9, Cin, Cout)
    w1r = jnp.pad(w1r, ((0, 0), (0, Cin_p - Cin), (0, Cout_p - Cout))
                  ).astype(jnp.bfloat16)
    w2r = jnp.transpose(params["w2"], (2, 3, 1, 0)).reshape(9, Cout, Cout)
    w2r = jnp.pad(w2r, ((0, 0), (0, Cout_p - Cout), (0, Cout_p - Cout))
                  ).astype(jnp.bfloat16)

    # x -> (N, H, Wp, Cin_p): data at cols [0, W), zero right pad.
    # TODO(synk): keep this padded layout persistent across blocks of a full
    # network instead of re-padding (this pad is one HBM copy of the input).
    x_p = jnp.pad(x_nhwc, ((0, 0), (0, 0), (0, Wp - W), (0, Cin_p - Cin)))

    args = [x_p, s1, b1, s2, b2, w1r, w2r]
    in_specs = [
        pl.BlockSpec((1, H, Wp, Cin_p), lambda n: (n, 0, 0, 0)),   # x
        pl.BlockSpec((1, Cin_p), lambda n: (0, 0)),                # s1
        pl.BlockSpec((1, Cin_p), lambda n: (0, 0)),                # b1
        pl.BlockSpec((1, Cout_p), lambda n: (0, 0)),               # s2
        pl.BlockSpec((1, Cout_p), lambda n: (0, 0)),               # b2
        # TODO(synk): pipeline_mode=pl.Buffered(1) to single-buffer the constant
        # weight operands (VMEM win for 256-512 channel layers on v7x).
        pl.BlockSpec((9, Cin_p, Cout_p), lambda n: (0, 0, 0)),     # w1 (bf16)
        pl.BlockSpec((9, Cout_p, Cout_p), lambda n: (0, 0, 0)),    # w2 (bf16)
    ]
    wsc_bytes = 0
    if has_proj:
        wscr = jnp.transpose(params["wsc"][:, :, 0, 0], (1, 0))   # (Cin, Cout)
        wscr = jnp.pad(wscr, ((0, Cin_p - Cin), (0, Cout_p - Cout))
                       ).astype(jnp.bfloat16)
        args.append(wscr)
        in_specs.append(pl.BlockSpec((Cin_p, Cout_p), lambda n: (0, 0)))
        wsc_bytes = int(wscr.size) * 2

    kernel = functools.partial(_preact_kernel, has_proj=has_proj,
                               H=H, W=W, Wp=Wp, row_chunk=row_chunk)

    # advisory cost estimate for XLA scheduling around the custom call
    proj_flops = Cin_p * Cout_p if has_proj else 0
    flops = int(2 * N * H * Wp * (9 * Cin_p * Cout_p + 9 * Cout_p * Cout_p
                                  + proj_flops))
    bytes_accessed = int(x_p.size * 4 + N * H * W * Cout_p * 4
                         + (w1r.size + w2r.size) * 2 + wsc_bytes
                         + (s1.size + b1.size + s2.size + b2.size) * 4)

    # per-step VMEM footprint; leave headroom for compiler scratch/spills.
    need = (H * Wp * Cin_p * 4 * 2                     # x blocks, double-buffered
            + H * W * Cout_p * 4 * 2                   # out blocks
            + (int(w1r.size + w2r.size) * 2 + wsc_bytes) * 2
            + R_pad * (Cin_p + Cout_p) * 2)            # bf16 pad scratch
    try:
        phys_vmem = int(pltpu.get_tpu_info().vmem_capacity_bytes)
    except Exception:
        phys_vmem = 64 * 1024 * 1024
    cap = int(phys_vmem * 0.8)          # ~52 MiB on v7x, ~100 MiB on v5e/v6e
    vmem_limit = min(cap, max(32 * 1024 * 1024, 2 * need))

    out = pl.pallas_call(
        kernel,
        out_shape=jax.ShapeDtypeStruct((N, H, W, Cout_p), jnp.float32),
        grid=(N,),
        in_specs=in_specs,
        out_specs=pl.BlockSpec((1, H, W, Cout_p), lambda n: (n, 0, 0, 0)),
        scratch_shapes=[
            pltpu.VMEM((R_pad, Cin_p), jnp.bfloat16),   # flat padded act, conv1
            pltpu.VMEM((R_pad, Cout_p), jnp.bfloat16),  # flat padded act, conv2
        ],
        compiler_params=pltpu.CompilerParams(
            # "parallel" batch axis -> shards across the 2 TensorCores on v7x
            dimension_semantics=("parallel",),
            vmem_limit_bytes=vmem_limit,
        ),
        cost_estimate=pl.CostEstimate(flops=flops, transcendentals=0,
                                      bytes_accessed=bytes_accessed),
    )(*args)

    # TODO(synk): this channel un-pad is an HBM copy when Cout % 128 != 0;
    # keep the padded layout across blocks in a real network.
    return out[..., :Cout]


# ----------------------- pure-JAX reference (for checking) -----------------
def preact_block_ref(x_nhwc, params, eps=1e-5):
    s1 = params["gamma1"] * lax.rsqrt(params["var1"] + eps)
    b1 = params["beta1"] - params["mean1"] * s1
    s2 = params["gamma2"] * lax.rsqrt(params["var2"] + eps)
    b2 = params["beta2"] - params["mean2"] * s2

    dn = ("NHWC", "HWIO", "NHWC")
    w1 = jnp.transpose(params["w1"], (2, 3, 1, 0))   # HWIO
    w2 = jnp.transpose(params["w2"], (2, 3, 1, 0))

    a = jnp.maximum(x_nhwc * s1 + b1, 0.0)
    if "wsc" in params:
        wsc = jnp.transpose(params["wsc"], (2, 3, 1, 0))
        shortcut = lax.conv_general_dilated(a, wsc, (1, 1), "VALID",
                                            dimension_numbers=dn)
    else:
        shortcut = x_nhwc
    out = lax.conv_general_dilated(a, w1, (1, 1), "SAME", dimension_numbers=dn)
    out = jnp.maximum(out * s2 + b2, 0.0)
    out = lax.conv_general_dilated(out, w2, (1, 1), "SAME", dimension_numbers=dn)
    return out + shortcut


def init_params(key, in_planes, planes, stride=1):
    ks = jax.random.split(key, 16)
    p = {
        "gamma1": 1.0 + 0.1 * jax.random.normal(ks[0], (in_planes,), jnp.float32),
        "beta1": 0.1 * jax.random.normal(ks[1], (in_planes,), jnp.float32),
        "mean1": 0.1 * jax.random.normal(ks[2], (in_planes,), jnp.float32),
        "var1": jax.random.uniform(ks[3], (in_planes,), jnp.float32, 0.5, 1.5),
        "gamma2": 1.0 + 0.1 * jax.random.normal(ks[4], (planes,), jnp.float32),
        "beta2": 0.1 * jax.random.normal(ks[5], (planes,), jnp.float32),
        "mean2": 0.1 * jax.random.normal(ks[6], (planes,), jnp.float32),
        "var2": jax.random.uniform(ks[7], (planes,), jnp.float32, 0.5, 1.5),
        "w1": 0.1 * jax.random.normal(ks[8], (planes, in_planes, 3, 3), jnp.float32),
        "w2": 0.1 * jax.random.normal(ks[9], (planes, planes, 3, 3), jnp.float32),
    }
    if stride != 1 or in_planes != planes:
        p["wsc"] = 0.1 * jax.random.normal(ks[10], (planes, in_planes, 1, 1),
                                           jnp.float32)
    return p


def _run_case(key, N, Cin, planes, H, W):
    k_x, k_p = jax.random.split(key)
    x_nchw = jax.random.normal(k_x, (N, Cin, H, W), jnp.float32)   # PyTorch layout
    x_nhwc = jnp.transpose(x_nchw, (0, 2, 3, 1))                   # kernel layout
    params = init_params(k_p, Cin, planes, stride=1)

    out = preact_block(x_nhwc, params, stride=1)
    out = jax.block_until_ready(out)
    ref = preact_block_ref(x_nhwc, params)

    assert out.shape == (N, H, W, planes)
    err = float(jnp.max(jnp.abs(out - ref)))
    # bf16 matmul operands (activations + weights) -> loosened tolerance
    assert jnp.allclose(out, ref, atol=5e-2, rtol=5e-2), err

    # back to PyTorch NCHW if needed by callers
    _ = jnp.transpose(out, (0, 3, 1, 2))
    return err


if __name__ == "__main__":
    key = jax.random.PRNGKey(0)
    k1, k2 = jax.random.split(key)

    # projection-shortcut path (in_planes != planes)
    _run_case(k1, N=2, Cin=4, planes=8, H=16, W=16)
    # identity-shortcut path (in_planes == planes)
    _run_case(k2, N=2, Cin=8, planes=8, H=16, W=16)

    print("KERNEL_OK")
</pallas_src>

<mosaic_0001>
module attributes {stable_mosaic.version = 11 : i64} {
  func.func @_preact_kernel(%arg0: i32, %arg1: memref<1x16x24x128xf32, #tpu.memory_space<vmem>>, %arg2: memref<1x128xf32, #tpu.memory_space<vmem>>, %arg3: memref<1x128xf32, #tpu.memory_space<vmem>>, %arg4: memref<1x128xf32, #tpu.memory_space<vmem>>, %arg5: memref<1x128xf32, #tpu.memory_space<vmem>>, %arg6: memref<9x128x128xbf16, #tpu.memory_space<vmem>>, %arg7: memref<9x128x128xbf16, #tpu.memory_space<vmem>>, %arg8: memref<128x128xbf16, #tpu.memory_space<vmem>>, %arg9: memref<1x16x16x128xf32, #tpu.memory_space<vmem>>, %arg10: memref<440x128xbf16, #tpu.memory_space<vmem>>, %arg11: memref<440x128xbf16, #tpu.memory_space<vmem>>) attributes {dimension_semantics = [#tpu.dimension_semantics<parallel>], iteration_bounds = array<i64: 2>, scalar_prefetch = 0 : i64, scratch_operands = 2 : i64, tpu.core_type = #tpu.core_type<tc>, window_params = [{transform_indices = @transform_0, window_bounds = array<i64: 1, 16, 24, 128>}, {pipeline_mode = #tpu.pipeline_mode<synchronous>, transform_indices = @transform_1, window_bounds = array<i64: 1, 128>}, {pipeline_mode = #tpu.pipeline_mode<synchronous>, transform_indices = @transform_2, window_bounds = array<i64: 1, 128>}, {pipeline_mode = #tpu.pipeline_mode<synchronous>, transform_indices = @transform_3, window_bounds = array<i64: 1, 128>}, {pipeline_mode = #tpu.pipeline_mode<synchronous>, transform_indices = @transform_4, window_bounds = array<i64: 1, 128>}, {pipeline_mode = #tpu.pipeline_mode<synchronous>, transform_indices = @transform_5, window_bounds = array<i64: 9, 128, 128>}, {pipeline_mode = #tpu.pipeline_mode<synchronous>, transform_indices = @transform_6, window_bounds = array<i64: 9, 128, 128>}, {pipeline_mode = #tpu.pipeline_mode<synchronous>, transform_indices = @transform_7, window_bounds = array<i64: 128, 128>}, {transform_indices = @transform_8, window_bounds = array<i64: 1, 16, 16, 128>}]} {
    %cst = arith.constant 0.000000e+00 : bf16
    %0 = vector.broadcast %cst : bf16 to vector<32x128xbf16>
    %c0 = arith.constant 0 : index
    %c0_0 = arith.constant 0 : index
    %1 = vector.load %arg10[%c0, %c0_0] : memref<440x128xbf16, #tpu.memory_space<vmem>>, vector<32x128xbf16>
    tpu.vector_store %arg10[%c0, %c0_0], %0 {strides = array<i32>} : memref<440x128xbf16, #tpu.memory_space<vmem>>, vector<32x128xbf16>,
    %cst_1 = arith.constant 0.000000e+00 : bf16
    %2 = vector.broadcast %cst_1 : bf16 to vector<32x128xbf16>
    %c408 = arith.constant 408 : index
    %c0_2 = arith.constant 0 : index
    %3 = vector.load %arg10[%c408, %c0_2] : memref<440x128xbf16, #tpu.memory_space<vmem>>, vector<32x128xbf16>
    tpu.vector_store %arg10[%c408, %c0_2], %2 {strides = array<i32>} : memref<440x128xbf16, #tpu.memory_space<vmem>>, vector<32x128xbf16>,
    %cst_3 = arith.constant 0.000000e+00 : bf16
    %4 = vector.broadcast %cst_3 : bf16 to vector<32x128xbf16>
    %c0_4 = arith.constant 0 : index
    %c0_5 = arith.constant 0 : index
    %5 = vector.load %arg11[%c0_4, %c0_5] : memref<440x128xbf16, #tpu.memory_space<vmem>>, vector<32x128xbf16>
    tpu.vector_store %arg11[%c0_4, %c0_5], %4 {strides = array<i32>} : memref<440x128xbf16, #tpu.memory_space<vmem>>, vector<32x128xbf16>,
    %cst_6 = arith.constant 0.000000e+00 : bf16
    %6 = vector.broadcast %cst_6 : bf16 to vector<32x128xbf16>
    %c408_7 = arith.constant 408 : index
    %c0_8 = arith.constant 0 : index
    %7 = vector.load %arg11[%c408_7, %c0_8] : memref<440x128xbf16, #tpu.memory_space<vmem>>, vector<32x128xbf16>
    tpu.vector_store %arg11[%c408_7, %c0_8], %6 {strides = array<i32>} : memref<440x128xbf16, #tpu.memory_space<vmem>>, vector<32x128xbf16>,
    %c0_9 = arith.constant 0 : index
    %c0_10 = arith.constant 0 : index
    %c0_11 = arith.constant 0 : index
    %c0_12 = arith.constant 0 : index
    %8 = vector.load %arg1[%c0_9, %c0_10, %c0_11, %c0_12] : memref<1x16x24x128xf32, #tpu.memory_space<vmem>>, vector<1x16x24x128xf32>
    %9 = vector.shape_cast %8 : vector<1x16x24x128xf32> to vector<16x24x128xf32>
    %10 = vector.shape_cast %9 : vector<16x24x128xf32> to vector<384x128xf32>
    %c0_13 = arith.constant 0 : index
    %c0_14 = arith.constant 0 : index
    %11 = vector.load %arg2[%c0_13, %c0_14] : memref<1x128xf32, #tpu.memory_space<vmem>>, vector<1x128xf32>
    %12 = vector.broadcast %11 : vector<1x128xf32> to vector<384x128xf32>
    %13 = arith.mulf %10, %12 : vector<384x128xf32>
    %c0_15 = arith.constant 0 : index
    %c0_16 = arith.constant 0 : index
    %14 = vector.load %arg3[%c0_15, %c0_16] : memref<1x128xf32, #tpu.memory_space<vmem>>, vector<1x128xf32>
    %15 = vector.broadcast %14 : vector<1x128xf32> to vector<384x128xf32>
    %16 = arith.addf %13, %15 : vector<384x128xf32>
    %cst_17 = arith.constant 0.000000e+00 : f32
    %17 = vector.broadcast %cst_17 : f32 to vector<384x128xf32>
    %18 = arith.maximumf %16, %17 : vector<384x128xf32>
    %19 = tpu.iota {dimensions = array<i32: 1>} : vector<16x24x1xi32>
    %20 = vector.shape_cast %18 : vector<384x128xf32> to vector<16x24x128xf32>
    %c16_i32 = arith.constant 16 : i32
    %21 = vector.broadcast %c16_i32 : i32 to vector<16x24x1xi32>
    %22 = arith.cmpi slt, %19, %21 : vector<16x24x1xi32>
    %cst_18 = arith.constant 0.000000e+00 : f32
    %23 = vector.shape_cast %22 : vector<16x24x1xi1> to vector<16x24x1xi1>
    %24 = vector.broadcast %23 : vector<16x24x1xi1> to vector<16x24x128xi1>
    %25 = vector.broadcast %cst_18 : f32 to vector<16x24x128xf32>
    %26 = arith.select %24, %20, %25 : vector<16x24x128xi1>, vector<16x24x128xf32>
    %27 = vector.shape_cast %26 : vector<16x24x128xf32> to vector<384x128xf32>
    %28 = arith.truncf %27 : vector<384x128xf32> to vector<384x128xbf16>
    %c25 = arith.constant 25 : index
    %c0_19 = arith.constant 0 : index
    %29 = vector.load %arg10[%c25, %c0_19] : memref<440x128xbf16, #tpu.memory_space<vmem>>, vector<384x128xbf16>
    tpu.vector_store %arg10[%c25, %c0_19], %28 {strides = array<i32>} : memref<440x128xbf16, #tpu.memory_space<vmem>>, vector<384x128xbf16>,
    %cst_20 = arith.constant 0.000000e+00 : f32
    %30 = vector.broadcast %cst_20 : f32 to vector<192x128xf32>
    %c0_21 = arith.constant 0 : index
    %c0_22 = arith.constant 0 : index
    %31 = vector.load %arg10[%c0_21, %c0_22] : memref<440x128xbf16, #tpu.memory_space<vmem>>, vector<192x128xbf16>
    %c0_23 = arith.constant 0 : index
    %c0_24 = arith.constant 0 : index
    %c0_25 = arith.constant 0 : index
    %32 = vector.load %arg6[%c0_23, %c0_24, %c0_25] : memref<9x128x128xbf16, #tpu.memory_space<vmem>>, vector<1x128x128xbf16>
    %33 = vector.shape_cast %32 : vector<1x128x128xbf16> to vector<128x128xbf16>
    %cst_26 = arith.constant dense<0.000000e+00> : vector<192x128xf32>
    %34 = tpu.matmul %31, %33, %cst_26 {dimension_numbers = #tpu.dot_dimension_numbers<[1], [0], [0], [1], [0, 0, 1, 1], [], []>} : vector<192x128xbf16>, vector<128x128xbf16>, vector<192x128xf32> -> vector<192x128xf32>
    %35 = arith.addf %30, %34 : vector<192x128xf32>
    %c1 = arith.constant 1 : index
    %c0_27 = arith.constant 0 : index
    %36 = vector.load %arg10[%c1, %c0_27] : memref<440x128xbf16, #tpu.memory_space<vmem>>, vector<192x128xbf16>
    %c1_28 = arith.constant 1 : index
    %c0_29 = arith.constant 0 : index
    %c0_30 = arith.constant 0 : index
    %37 = vector.load %arg6[%c1_28, %c0_29, %c0_30] : memref<9x128x128xbf16, #tpu.memory_space<vmem>>, vector<1x128x128xbf16>
    %38 = vector.shape_cast %37 : vector<1x128x128xbf16> to vector<128x128xbf16>
    %cst_31 = arith.constant dense<0.000000e+00> : vector<192x128xf32>
    %39 = tpu.matmul %36, %38, %cst_31 {dimension_numbers = #tpu.dot_dimension_numbers<[1], [0], [0], [1], [0, 0, 1, 1], [], []>} : vector<192x128xbf16>, vector<128x128xbf16>, vector<192x128xf32> -> vector<192x128xf32>
    %40 = arith.addf %35, %39 : vector<192x128xf32>
    %c2 = arith.constant 2 : index
    %c0_32 = arith.constant 0 : index
    %41 = vector.load %arg10[%c2, %c0_32] : memref<440x128xbf16, #tpu.memory_space<vmem>>, vector<192x128xbf16>
    %c2_33 = arith.constant 2 : index
    %c0_34 = arith.constant 0 : index
    %c0_35 = arith.constant 0 : index
    %42 = vector.load %arg6[%c2_33, %c0_34, %c0_35] : memref<9x128x128xbf16, #tpu.memory_space<vmem>>, vector<1x128x128xbf16>
    %43 = vector.shape_cast %42 : vector<1x128x128xbf16> to vector<128x128xbf16>
    %cst_36 = arith.constant dense<0.000000e+00> : vector<192x128xf32>
    %44 = tpu.matmul %41, %43, %cst_36 {dimension_numbers = #tpu.dot_dimension_numbers<[1], [0], [0], [1], [0, 0, 1, 1], [], []>} : vector<192x128xbf16>, vector<128x128xbf16>, vector<192x128xf32> -> vector<192x128xf32>
    %45 = arith.addf %40, %44 : vector<192x128xf32>
    %c24 = arith.constant 24 : index
    %c0_37 = arith.constant 0 : index
    %46 = vector.load %arg10[%c24, %c0_37] : memref<440x128xbf16, #tpu.memory_space<vmem>>, vector<192x128xbf16>
    %c3 = arith.constant 3 : index
    %c0_38 = arith.constant 0 : index
    %c0_39 = arith.constant 0 : index
    %47 = vector.load %arg6[%c3, %c0_38, %c0_39] : memref<9x128x128xbf16, #tpu.memory_space<vmem>>, vector<1x128x128xbf16>
    %48 = vector.shape_cast %47 : vector<1x128x128xbf16> to vector<128x128xbf16>
    %cst_40 = arith.constant dense<0.000000e+00> : vector<192x128xf32>
    %49 = tpu.matmul %46, %48, %cst_40 {dimension_numbers = #tpu.dot_dimension_numbers<[1], [0], [0], [1], [0, 0, 1, 1], [], []>} : vector<192x128xbf16>, vector<128x128xbf16>, vector<192x128xf32> -> vector<192x128xf32>
    %50 = arith.addf %45, %49 : vector<192x128xf32>
    %c25_41 = arith.constant 25 : index
    %c0_42 = arith.constant 0 : index
    %51 = vector.load %arg10[%c25_41, %c0_42] : memref<440x128xbf16, #tpu.memory_space<vmem>>, vector<192x128xbf16>
    %c4 = arith.constant 4 : index
    %c0_43 = arith.constant 0 : index
    %c0_44 = arith.constant 0 : index
    %52 = vector.load %arg6[%c4, %c0_43, %c0_44] : memref<9x128x128xbf16, #tpu.memory_space<vmem>>, vector<1x128x128xbf16>
    %53 = vector.shape_cast %52 : vector<1x128x128xbf16> to vector<128x128xbf16>
    %cst_45 = arith.constant dense<0.000000e+00> : vector<192x128xf32>
    %54 = tpu.matmul %51, %53, %cst_45 {dimension_numbers = #tpu.dot_dimension_numbers<[1], [0], [0], [1], [0, 0, 1, 1], [], []>} : vector<192x128xbf16>, vector<128x128xbf16>, vector<192x128xf32> -> vector<192x128xf32>
    %55 = arith.addf %50, %54 : vector<192x128xf32>
    %c26 = arith.constant 26 : index
    %c0_46 = arith.constant 0 : index
    %56 = vector.load %arg10[%c26, %c0_46] : memref<440x128xbf16, #tpu.memory_space<vmem>>, vector<192x128xbf16>
    %c5 = arith.constant 5 : index
    %c0_47 = arith.constant 0 : index
    %c0_48 = arith.constant 0 : index
    %57 = vector.load %arg6[%c5, %c0_47, %c0_48] : memref<9x128x128xbf16, #tpu.memory_space<vmem>>, vector<1x128x128xbf16>
    %58 = vector.shape_cast %57 : vector<1x128x128xbf16> to vector<128x128xbf16>
    %cst_49 = arith.constant dense<0.000000e+00> : vector<192x128xf32>
    %59 = tpu.matmul %56, %58, %cst_49 {dimension_numbers = #tpu.dot_dimension_numbers<[1], [0], [0], [1], [0, 0, 1, 1], [], []>} : vector<192x128xbf16>, vector<128x128xbf16>, vector<192x128xf32> -> vector<192x128xf32>
    %60 = arith.addf %55, %59 : vector<192x128xf32>
    %c48 = arith.constant 48 : index
    %c0_50 = arith.constant 0 : index
    %61 = vector.load %arg10[%c48, %c0_50] : memref<440x128xbf16, #tpu.memory_space<vmem>>, vector<192x128xbf16>
    %c6 = arith.constant 6 : index
    %c0_51 = arith.constant 0 : index
    %c0_52 = arith.constant 0 : index
    %62 = vector.load %arg6[%c6, %c0_51, %c0_52] : memref<9x128x128xbf16, #tpu.memory_space<vmem>>, vector<1x128x128xbf16>
    %63 = vector.shape_cast %62 : vector<1x128x128xbf16> to vector<128x128xbf16>
    %cst_53 = arith.constant dense<0.000000e+00> : vector<192x128xf32>
    %64 = tpu.matmul %61, %63, %cst_53 {dimension_numbers = #tpu.dot_dimension_numbers<[1], [0], [0], [1], [0, 0, 1, 1], [], []>} : vector<192x128xbf16>, vector<128x128xbf16>, vector<192x128xf32> -> vector<192x128xf32>
    %65 = arith.addf %60, %64 : vector<192x128xf32>
    %c49 = arith.constant 49 : index
    %c0_54 = arith.constant 0 : index
    %66 = vector.load %arg10[%c49, %c0_54] : memref<440x128xbf16, #tpu.memory_space<vmem>>, vector<192x128xbf16>
    %c7 = arith.constant 7 : index
    %c0_55 = arith.constant 0 : index
    %c0_56 = arith.constant 0 : index
    %67 = vector.load %arg6[%c7, %c0_55, %c0_56] : memref<9x128x128xbf16, #tpu.memory_space<vmem>>, vector<1x128x128xbf16>
    %68 = vector.shape_cast %67 : vector<1x128x128xbf16> to vector<128x128xbf16>
    %cst_57 = arith.constant dense<0.000000e+00> : vector<192x128xf32>
    %69 = tpu.matmul %66, %68, %cst_57 {dimension_numbers = #tpu.dot_dimension_numbers<[1], [0], [0], [1], [0, 0, 1, 1], [], []>} : vector<192x128xbf16>, vector<128x128xbf16>, vector<192x128xf32> -> vector<192x128xf32>
    %70 = arith.addf %65, %69 : vector<192x128xf32>
    %c50 = arith.constant 50 : index
    %c0_58 = arith.constant 0 : index
    %71 = vector.load %arg10[%c50, %c0_58] : memref<440x128xbf16, #tpu.memory_space<vmem>>, vector<192x128xbf16>
    %c8 = arith.constant 8 : index
    %c0_59 = arith.constant 0 : index
    %c0_60 = arith.constant 0 : index
    %72 = vector.load %arg6[%c8, %c0_59, %c0_60] : memref<9x128x128xbf16, #tpu.memory_space<vmem>>, vector<1x128x128xbf16>
    %73 = vector.shape_cast %72 : vector<1x128x128xbf16> to vector<128x128xbf16>
    %cst_61 = arith.constant dense<0.000000e+00> : vector<192x128xf32>
    %74 = tpu.matmul %71, %73, %cst_61 {dimension_numbers = #tpu.dot_dimension_numbers<[1], [0], [0], [1], [0, 0, 1, 1], [], []>} : vector<192x128xbf16>, vector<128x128xbf16>, vector<192x128xf32> -> vector<192x128xf32>
    %75 = arith.addf %70, %74 : vector<192x128xf32>
    %c0_62 = arith.constant 0 : index
    %c0_63 = arith.constant 0 : index
    %76 = vector.load %arg4[%c0_62, %c0_63] : memref<1x128xf32, #tpu.memory_space<vmem>>, vector<1x128xf32>
    %77 = vector.broadcast %76 : vector<1x128xf32> to vector<192x128xf32>
    %78 = arith.mulf %75, %77 : vector<192x128xf32>
    %c0_64 = arith.constant 0 : index
    %c0_65 = arith.constant 0 : index
    %79 = vector.load %arg5[%c0_64, %c0_65] : memref<1x128xf32, #tpu.memory_space<vmem>>, vector<1x128xf32>
    %80 = vector.broadcast %79 : vector<1x128xf32> to vector<192x128xf32>
    %81 = arith.addf %78, %80 : vector<192x128xf32>
    %cst_66 = arith.constant 0.000000e+00 : f32
    %82 = vector.broadcast %cst_66 : f32 to vector<192x128xf32>
    %83 = arith.maximumf %81, %82 : vector<192x128xf32>
    %84 = tpu.iota {dimensions = array<i32: 1>} : vector<8x24x1xi32>
    %85 = vector.shape_cast %83 : vector<192x128xf32> to vector<8x24x128xf32>
    %c16_i32_67 = arith.constant 16 : i32
    %86 = vector.broadcast %c16_i32_67 : i32 to vector<8x24x1xi32>
    %87 = arith.cmpi slt, %84, %86 : vector<8x24x1xi32>
    %cst_68 = arith.constant 0.000000e+00 : f32
    %88 = vector.shape_cast %87 : vector<8x24x1xi1> to vector<8x24x1xi1>
    %89 = vector.broadcast %88 : vector<8x24x1xi1> to vector<8x24x128xi1>
    %90 = vector.broadcast %cst_68 : f32 to vector<8x24x128xf32>
    %91 = arith.select %89, %85, %90 : vector<8x24x128xi1>, vector<8x24x128xf32>
    %92 = vector.shape_cast %91 : vector<8x24x128xf32> to vector<192x128xf32>
    %93 = arith.truncf %92 : vector<192x128xf32> to vector<192x128xbf16>
    %c25_69 = arith.constant 25 : index
    %c0_70 = arith.constant 0 : index
    %94 = vector.load %arg11[%c25_69, %c0_70] : memref<440x128xbf16, #tpu.memory_space<vmem>>, vector<192x128xbf16>
    tpu.vector_store %arg11[%c25_69, %c0_70], %93 {strides = array<i32>} : memref<440x128xbf16, #tpu.memory_space<vmem>>, vector<192x128xbf16>,
    %cst_71 = arith.constant 0.000000e+00 : f32
    %95 = vector.broadcast %cst_71 : f32 to vector<192x128xf32>
    %c192 = arith.constant 192 : index
    %c0_72 = arith.constant 0 : index
    %96 = vector.load %arg10[%c192, %c0_72] : memref<440x128xbf16, #tpu.memory_space<vmem>>, vector<192x128xbf16>
    %c0_73 = arith.constant 0 : index
    %c0_74 = arith.constant 0 : index
    %c0_75 = arith.constant 0 : index
    %97 = vector.load %arg6[%c0_73, %c0_74, %c0_75] : memref<9x128x128xbf16, #tpu.memory_space<vmem>>, vector<1x128x128xbf16>
    %98 = vector.shape_cast %97 : vector<1x128x128xbf16> to vector<128x128xbf16>
    %cst_76 = arith.constant dense<0.000000e+00> : vector<192x128xf32>
    %99 = tpu.matmul %96, %98, %cst_76 {dimension_numbers = #tpu.dot_dimension_numbers<[1], [0], [0], [1], [0, 0, 1, 1], [], []>} : vector<192x128xbf16>, vector<128x128xbf16>, vector<192x128xf32> -> vector<192x128xf32>
    %100 = arith.addf %95, %99 : vector<192x128xf32>
    %c193 = arith.constant 193 : index
    %c0_77 = arith.constant 0 : index
    %101 = vector.load %arg10[%c193, %c0_77] : memref<440x128xbf16, #tpu.memory_space<vmem>>, vector<192x128xbf16>
    %c1_78 = arith.constant 1 : index
    %c0_79 = arith.constant 0 : index
    %c0_80 = arith.constant 0 : index
    %102 = vector.load %arg6[%c1_78, %c0_79, %c0_80] : memref<9x128x128xbf16, #tpu.memory_space<vmem>>, vector<1x128x128xbf16>
    %103 = vector.shape_cast %102 : vector<1x128x128xbf16> to vector<128x128xbf16>
    %cst_81 = arith.constant dense<0.000000e+00> : vector<192x128xf32>
    %104 = tpu.matmul %101, %103, %cst_81 {dimension_numbers = #tpu.dot_dimension_numbers<[1], [0], [0], [1], [0, 0, 1, 1], [], []>} : vector<192x128xbf16>, vector<128x128xbf16>, vector<192x128xf32> -> vector<192x128xf32>
    %105 = arith.addf %100, %104 : vector<192x128xf32>
    %c194 = arith.constant 194 : index
    %c0_82 = arith.constant 0 : index
    %106 = vector.load %arg10[%c194, %c0_82] : memref<440x128xbf16, #tpu.memory_space<vmem>>, vector<192x128xbf16>
    %c2_83 = arith.constant 2 : index
    %c0_84 = arith.constant 0 : index
    %c0_85 = arith.constant 0 : index
    %107 = vector.load %arg6[%c2_83, %c0_84, %c0_85] : memref<9x128x128xbf16, #tpu.memory_space<vmem>>, vector<1x128x128xbf16>
    %108 = vector.shape_cast %107 : vector<1x128x128xbf16> to vector<128x128xbf16>
    %cst_86 = arith.constant dense<0.000000e+00> : vector<192x128xf32>
    %109 = tpu.matmul %106, %108, %cst_86 {dimension_numbers = #tpu.dot_dimension_numbers<[1], [0], [0], [1], [0, 0, 1, 1], [], []>} : vector<192x128xbf16>, vector<128x128xbf16>, vector<192x128xf32> -> vector<192x128xf32>
    %110 = arith.addf %105, %109 : vector<192x128xf32>
    %c216 = arith.constant 216 : index
    %c0_87 = arith.constant 0 : index
    %111 = vector.load %arg10[%c216, %c0_87] : memref<440x128xbf16, #tpu.memory_space<vmem>>, vector<192x128xbf16>
    %c3_88 = arith.constant 3 : index
    %c0_89 = arith.constant 0 : index
    %c0_90 = arith.constant 0 : index
    %112 = vector.load %arg6[%c3_88, %c0_89, %c0_90] : memref<9x128x128xbf16, #tpu.memory_space<vmem>>, vector<1x128x128xbf16>
    %113 = vector.shape_cast %112 : vector<1x128x128xbf16> to vector<128x128xbf16>
    %cst_91 = arith.constant dense<0.000000e+00> : vector<192x128xf32>
    %114 = tpu.matmul %111, %113, %cst_91 {dimension_numbers = #tpu.dot_dimension_numbers<[1], [0], [0], [1], [0, 0, 1, 1], [], []>} : vector<192x128xbf16>, vector<128x128xbf16>, vector<192x128xf32> -> vector<192x128xf32>
    %115 = arith.addf %110, %114 : vector<192x128xf32>
    %c217 = arith.constant 217 : index
    %c0_92 = arith.constant 0 : index
    %116 = vector.load %arg10[%c217, %c0_92] : memref<440x128xbf16, #tpu.memory_space<vmem>>, vector<192x128xbf16>
    %c4_93 = arith.constant 4 : index
    %c0_94 = arith.constant 0 : index
    %c0_95 = arith.constant 0 : index
    %117 = vector.load %arg6[%c4_93, %c0_94, %c0_95] : memref<9x128x128xbf16, #tpu.memory_space<vmem>>, vector<1x128x128xbf16>
    %118 = vector.shape_cast %117 : vector<1x128x128xbf16> to vector<128x128xbf16>
    %cst_96 = arith.constant dense<0.000000e+00> : vector<192x128xf32>
    %119 = tpu.matmul %116, %118, %cst_96 {dimension_numbers = #tpu.dot_dimension_numbers<[1], [0], [0], [1], [0, 0, 1, 1], [], []>} : vector<192x128xbf16>, vector<128x128xbf16>, vector<192x128xf32> -> vector<192x128xf32>
    %120 = arith.addf %115, %119 : vector<192x128xf32>
    %c218 = arith.constant 218 : index
    %c0_97 = arith.constant 0 : index
    %121 = vector.load %arg10[%c218, %c0_97] : memref<440x128xbf16, #tpu.memory_space<vmem>>, vector<192x128xbf16>
    %c5_98 = arith.constant 5 : index
    %c0_99 = arith.constant 0 : index
    %c0_100 = arith.constant 0 : index
    %122 = vector.load %arg6[%c5_98, %c0_99, %c0_100] : memref<9x128x128xbf16, #tpu.memory_space<vmem>>, vector<1x128x128xbf16>
    %123 = vector.shape_cast %122 : vector<1x128x128xbf16> to vector<128x128xbf16>
    %cst_101 = arith.constant dense<0.000000e+00> : vector<192x128xf32>
    %124 = tpu.matmul %121, %123, %cst_101 {dimension_numbers = #tpu.dot_dimension_numbers<[1], [0], [0], [1], [0, 0, 1, 1], [], []>} : vector<192x128xbf16>, vector<128x128xbf16>, vector<192x128xf32> -> vector<192x128xf32>
    %125 = arith.addf %120, %124 : vector<192x128xf32>
    %c240 = arith.constant 240 : index
    %c0_102 = arith.constant 0 : index
    %126 = vector.load %arg10[%c240, %c0_102] : memref<440x128xbf16, #tpu.memory_space<vmem>>, vector<192x128xbf16>
    %c6_103 = arith.constant 6 : index
    %c0_104 = arith.constant 0 : index
    %c0_105 = arith.constant 0 : index
    %127 = vector.load %arg6[%c6_103, %c0_104, %c0_105] : memref<9x128x128xbf16, #tpu.memory_space<vmem>>, vector<1x128x128xbf16>
    %128 = vector.shape_cast %127 : vector<1x128x128xbf16> to vector<128x128xbf16>
    %cst_106 = arith.constant dense<0.000000e+00> : vector<192x128xf32>
    %129 = tpu.matmul %126, %128, %cst_106 {dimension_numbers = #tpu.dot_dimension_numbers<[1], [0], [0], [1], [0, 0, 1, 1], [], []>} : vector<192x128xbf16>, vector<128x128xbf16>, vector<192x128xf32> -> vector<192x128xf32>
    %130 = arith.addf %125, %129 : vector<192x128xf32>
    %c241 = arith.constant 241 : index
    %c0_107 = arith.constant 0 : index
    %131 = vector.load %arg10[%c241, %c0_107] : memref<440x128xbf16, #tpu.memory_space<vmem>>, vector<192x128xbf16>
    %c7_108 = arith.constant 7 : index
    %c0_109 = arith.constant 0 : index
    %c0_110 = arith.constant 0 : index
    %132 = vector.load %arg6[%c7_108, %c0_109, %c0_110] : memref<9x128x128xbf16, #tpu.memory_space<vmem>>, vector<1x128x128xbf16>
    %133 = vector.shape_cast %132 : vector<1x128x128xbf16> to vector<128x128xbf16>
    %cst_111 = arith.constant dense<0.000000e+00> : vector<192x128xf32>
    %134 = tpu.matmul %131, %133, %cst_111 {dimension_numbers = #tpu.dot_dimension_numbers<[1], [0], [0], [1], [0, 0, 1, 1], [], []>} : vector<192x128xbf16>, vector<128x128xbf16>, vector<192x128xf32> -> vector<192x128xf32>
    %135 = arith.addf %130, %134 : vector<192x128xf32>
    %c242 = arith.constant 242 : index
    %c0_112 = arith.constant 0 : index
    %136 = vector.load %arg10[%c242, %c0_112] : memref<440x128xbf16, #tpu.memory_space<vmem>>, vector<192x128xbf16>
    %c8_113 = arith.constant 8 : index
    %c0_114 = arith.constant 0 : index
    %c0_115 = arith.constant 0 : index
    %137 = vector.load %arg6[%c8_113, %c0_114, %c0_115] : memref<9x128x128xbf16, #tpu.memory_space<vmem>>, vector<1x128x128xbf16>
    %138 = vector.shape_cast %137 : vector<1x128x128xbf16> to vector<128x128xbf16>
    %cst_116 = arith.constant dense<0.000000e+00> : vector<192x128xf32>
    %139 = tpu.matmul %136, %138, %cst_116 {dimension_numbers = #tpu.dot_dimension_numbers<[1], [0], [0], [1], [0, 0, 1, 1], [], []>} : vector<192x128xbf16>, vector<128x128xbf16>, vector<192x128xf32> -> vector<192x128xf32>
    %140 = arith.addf %135, %139 : vector<192x128xf32>
    %c0_117 = arith.constant 0 : index
    %c0_118 = arith.constant 0 : index
    %141 = vector.load %arg4[%c0_117, %c0_118] : memref<1x128xf32, #tpu.memory_space<vmem>>, vector<1x128xf32>
    %142 = vector.broadcast %141 : vector<1x128xf32> to vector<192x128xf32>
    %143 = arith.mulf %140, %142 : vector<192x128xf32>
    %c0_119 = arith.constant 0 : index
    %c0_120 = arith.constant 0 : index
    %144 = vector.load %arg5[%c0_119, %c0_120] : memref<1x128xf32, #tpu.memory_space<vmem>>, vector<1x128xf32>
    %145 = vector.broadcast %144 : vector<1x128xf32> to vector<192x128xf32>
    %146 = arith.addf %143, %145 : vector<192x128xf32>
    %cst_121 = arith.constant 0.000000e+00 : f32
    %147 = vector.broadcast %cst_121 : f32 to vector<192x128xf32>
    %148 = arith.maximumf %146, %147 : vector<192x128xf32>
    %149 = tpu.iota {dimensions = array<i32: 1>} : vector<8x24x1xi32>
    %150 = vector.shape_cast %148 : vector<192x128xf32> to vector<8x24x128xf32>
    %c16_i32_122 = arith.constant 16 : i32
    %151 = vector.broadcast %c16_i32_122 : i32 to vector<8x24x1xi32>
    %152 = arith.cmpi slt, %149, %151 : vector<8x24x1xi32>
    %cst_123 = arith.constant 0.000000e+00 : f32
    %153 = vector.shape_cast %152 : vector<8x24x1xi1> to vector<8x24x1xi1>
    %154 = vector.broadcast %153 : vector<8x24x1xi1> to vector<8x24x128xi1>
    %155 = vector.broadcast %cst_123 : f32 to vector<8x24x128xf32>
    %156 = arith.select %154, %150, %155 : vector<8x24x128xi1>, vector<8x24x128xf32>
    %157 = vector.shape_cast %156 : vector<8x24x128xf32> to vector<192x128xf32>
    %158 = arith.truncf %157 : vector<192x128xf32> to vector<192x128xbf16>
    %c217_124 = arith.constant 217 : index
    %c0_125 = arith.constant 0 : index
    %159 = vector.load %arg11[%c217_124, %c0_125] : memref<440x128xbf16, #tpu.memory_space<vmem>>, vector<192x128xbf16>
    tpu.vector_store %arg11[%c217_124, %c0_125], %158 {strides = array<i32>} : memref<440x128xbf16, #tpu.memory_space<vmem>>, vector<192x128xbf16>,
    %cst_126 = arith.constant 0.000000e+00 : f32
    %160 = vector.broadcast %cst_126 : f32 to vector<192x128xf32>
    %c0_127 = arith.constant 0 : index
    %c0_128 = arith.constant 0 : index
    %161 = vector.load %arg11[%c0_127, %c0_128] : memref<440x128xbf16, #tpu.memory_space<vmem>>, vector<192x128xbf16>
    %c0_129 = arith.constant 0 : index
    %c0_130 = arith.constant 0 : index
    %c0_131 = arith.constant 0 : index
    %162 = vector.load %arg7[%c0_129, %c0_130, %c0_131] : memref<9x128x128xbf16, #tpu.memory_space<vmem>>, vector<1x128x128xbf16>
    %163 = vector.shape_cast %162 : vector<1x128x128xbf16> to vector<128x128xbf16>
    %cst_132 = arith.constant dense<0.000000e+00> : vector<192x128xf32>
    %164 = tpu.matmul %161, %163, %cst_132 {dimension_numbers = #tpu.dot_dimension_numbers<[1], [0], [0], [1], [0, 0, 1, 1], [], []>} : vector<192x128xbf16>, vector<128x128xbf16>, vector<192x128xf32> -> vector<192x128xf32>
    %165 = arith.addf %160, %164 : vector<192x128xf32>
    %c1_133 = arith.constant 1 : index
    %c0_134 = arith.constant 0 : index
    %166 = vector.load %arg11[%c1_133, %c0_134] : memref<440x128xbf16, #tpu.memory_space<vmem>>, vector<192x128xbf16>
    %c1_135 = arith.constant 1 : index
    %c0_136 = arith.constant 0 : index
    %c0_137 = arith.constant 0 : index
    %167 = vector.load %arg7[%c1_135, %c0_136, %c0_137] : memref<9x128x128xbf16, #tpu.memory_space<vmem>>, vector<1x128x128xbf16>
    %168 = vector.shape_cast %167 : vector<1x128x128xbf16> to vector<128x128xbf16>
    %cst_138 = arith.constant dense<0.000000e+00> : vector<192x128xf32>
    %169 = tpu.matmul %166, %168, %cst_138 {dimension_numbers = #tpu.dot_dimension_numbers<[1], [0], [0], [1], [0, 0, 1, 1], [], []>} : vector<192x128xbf16>, vector<128x128xbf16>, vector<192x128xf32> -> vector<192x128xf32>
    %170 = arith.addf %165, %169 : vector<192x128xf32>
    %c2_139 = arith.constant 2 : index
    %c0_140 = arith.constant 0 : index
    %171 = vector.load %arg11[%c2_139, %c0_140] : memref<440x128xbf16, #tpu.memory_space<vmem>>, vector<192x128xbf16>
    %c2_141 = arith.constant 2 : index
    %c0_142 = arith.constant 0 : index
    %c0_143 = arith.constant 0 : index
    %172 = vector.load %arg7[%c2_141, %c0_142, %c0_143] : memref<9x128x128xbf16, #tpu.memory_space<vmem>>, vector<1x128x128xbf16>
    %173 = vector.shape_cast %172 : vector<1x128x128xbf16> to vector<128x128xbf16>
    %cst_144 = arith.constant dense<0.000000e+00> : vector<192x128xf32>
    %174 = tpu.matmul %171, %173, %cst_144 {dimension_numbers = #tpu.dot_dimension_numbers<[1], [0], [0], [1], [0, 0, 1, 1], [], []>} : vector<192x128xbf16>, vector<128x128xbf16>, vector<192x128xf32> -> vector<192x128xf32>
    %175 = arith.addf %170, %174 : vector<192x128xf32>
    %c24_145 = arith.constant 24 : index
    %c0_146 = arith.constant 0 : index
    %176 = vector.load %arg11[%c24_145, %c0_146] : memref<440x128xbf16, #tpu.memory_space<vmem>>, vector<192x128xbf16>
    %c3_147 = arith.constant 3 : index
    %c0_148 = arith.constant 0 : index
    %c0_149 = arith.constant 0 : index
    %177 = vector.load %arg7[%c3_147, %c0_148, %c0_149] : memref<9x128x128xbf16, #tpu.memory_space<vmem>>, vector<1x128x128xbf16>
    %178 = vector.shape_cast %177 : vector<1x128x128xbf16> to vector<128x128xbf16>
    %cst_150 = arith.constant dense<0.000000e+00> : vector<192x128xf32>
    %179 = tpu.matmul %176, %178, %cst_150 {dimension_numbers = #tpu.dot_dimension_numbers<[1], [0], [0], [1], [0, 0, 1, 1], [], []>} : vector<192x128xbf16>, vector<128x128xbf16>, vector<192x128xf32> -> vector<192x128xf32>
    %180 = arith.addf %175, %179 : vector<192x128xf32>
    %c25_151 = arith.constant 25 : index
    %c0_152 = arith.constant 0 : index
    %181 = vector.load %arg11[%c25_151, %c0_152] : memref<440x128xbf16, #tpu.memory_space<vmem>>, vector<192x128xbf16>
    %c4_153 = arith.constant 4 : index
    %c0_154 = arith.constant 0 : index
    %c0_155 = arith.constant 0 : index
    %182 = vector.load %arg7[%c4_153, %c0_154, %c0_155] : memref<9x128x128xbf16, #tpu.memory_space<vmem>>, vector<1x128x128xbf16>
    %183 = vector.shape_cast %182 : vector<1x128x128xbf16> to vector<128x128xbf16>
    %cst_156 = arith.constant dense<0.000000e+00> : vector<192x128xf32>
    %184 = tpu.matmul %181, %183, %cst_156 {dimension_numbers = #tpu.dot_dimension_numbers<[1], [0], [0], [1], [0, 0, 1, 1], [], []>} : vector<192x128xbf16>, vector<128x128xbf16>, vector<192x128xf32> -> vector<192x128xf32>
    %185 = arith.addf %180, %184 : vector<192x128xf32>
    %c26_157 = arith.constant 26 : index
    %c0_158 = arith.constant 0 : index
    %186 = vector.load %arg11[%c26_157, %c0_158] : memref<440x128xbf16, #tpu.memory_space<vmem>>, vector<192x128xbf16>
    %c5_159 = arith.constant 5 : index
    %c0_160 = arith.constant 0 : index
    %c0_161 = arith.constant 0 : index
    %187 = vector.load %arg7[%c5_159, %c0_160, %c0_161] : memref<9x128x128xbf16, #tpu.memory_space<vmem>>, vector<1x128x128xbf16>
    %188 = vector.shape_cast %187 : vector<1x128x128xbf16> to vector<128x128xbf16>
    %cst_162 = arith.constant dense<0.000000e+00> : vector<192x128xf32>
    %189 = tpu.matmul %186, %188, %cst_162 {dimension_numbers = #tpu.dot_dimension_numbers<[1], [0], [0], [1], [0, 0, 1, 1], [], []>} : vector<192x128xbf16>, vector<128x128xbf16>, vector<192x128xf32> -> vector<192x128xf32>
    %190 = arith.addf %185, %189 : vector<192x128xf32>
    %c48_163 = arith.constant 48 : index
    %c0_164 = arith.constant 0 : index
    %191 = vector.load %arg11[%c48_163, %c0_164] : memref<440x128xbf16, #tpu.memory_space<vmem>>, vector<192x128xbf16>
    %c6_165 = arith.constant 6 : index
    %c0_166 = arith.constant 0 : index
    %c0_167 = arith.constant 0 : index
    %192 = vector.load %arg7[%c6_165, %c0_166, %c0_167] : memref<9x128x128xbf16, #tpu.memory_space<vmem>>, vector<1x128x128xbf16>
    %193 = vector.shape_cast %192 : vector<1x128x128xbf16> to vector<128x128xbf16>
    %cst_168 = arith.constant dense<0.000000e+00> : vector<192x128xf32>
    %194 = tpu.matmul %191, %193, %cst_168 {dimension_numbers = #tpu.dot_dimension_numbers<[1], [0], [0], [1], [0, 0, 1, 1], [], []>} : vector<192x128xbf16>, vector<128x128xbf16>, vector<192x128xf32> -> vector<192x128xf32>
    %195 = arith.addf %190, %194 : vector<192x128xf32>
    %c49_169 = arith.constant 49 : index
    %c0_170 = arith.constant 0 : index
    %196 = vector.load %arg11[%c49_169, %c0_170] : memref<440x128xbf16, #tpu.memory_space<vmem>>, vector<192x128xbf16>
    %c7_171 = arith.constant 7 : index
    %c0_172 = arith.constant 0 : index
    %c0_173 = arith.constant 0 : index
    %197 = vector.load %arg7[%c7_171, %c0_172, %c0_173] : memref<9x128x128xbf16, #tpu.memory_space<vmem>>, vector<1x128x128xbf16>
    %198 = vector.shape_cast %197 : vector<1x128x128xbf16> to vector<128x128xbf16>
    %cst_174 = arith.constant dense<0.000000e+00> : vector<192x128xf32>
    %199 = tpu.matmul %196, %198, %cst_174 {dimension_numbers = #tpu.dot_dimension_numbers<[1], [0], [0], [1], [0, 0, 1, 1], [], []>} : vector<192x128xbf16>, vector<128x128xbf16>, vector<192x128xf32> -> vector<192x128xf32>
    %200 = arith.addf %195, %199 : vector<192x128xf32>
    %c50_175 = arith.constant 50 : index
    %c0_176 = arith.constant 0 : index
    %201 = vector.load %arg11[%c50_175, %c0_176] : memref<440x128xbf16, #tpu.memory_space<vmem>>, vector<192x128xbf16>
    %c8_177 = arith.constant 8 : index
    %c0_178 = arith.constant 0 : index
    %c0_179 = arith.constant 0 : index
    %202 = vector.load %arg7[%c8_177, %c0_178, %c0_179] : memref<9x128x128xbf16, #tpu.memory_space<vmem>>, vector<1x128x128xbf16>
    %203 = vector.shape_cast %202 : vector<1x128x128xbf16> to vector<128x128xbf16>
    %cst_180 = arith.constant dense<0.000000e+00> : vector<192x128xf32>
    %204 = tpu.matmul %201, %203, %cst_180 {dimension_numbers = #tpu.dot_dimension_numbers<[1], [0], [0], [1], [0, 0, 1, 1], [], []>} : vector<192x128xbf16>, vector<128x128xbf16>, vector<192x128xf32> -> vector<192x128xf32>
    %205 = arith.addf %200, %204 : vector<192x128xf32>
    %c25_181 = arith.constant 25 : index
    %c0_182 = arith.constant 0 : index
    %206 = vector.load %arg10[%c25_181, %c0_182] : memref<440x128xbf16, #tpu.memory_space<vmem>>, vector<192x128xbf16>
    %c0_183 = arith.constant 0 : index
    %c0_184 = arith.constant 0 : index
    %207 = vector.load %arg8[%c0_183, %c0_184] : memref<128x128xbf16, #tpu.memory_space<vmem>>, vector<128x128xbf16>
    %cst_185 = arith.constant dense<0.000000e+00> : vector<192x128xf32>
    %208 = tpu.matmul %206, %207, %cst_185 {dimension_numbers = #tpu.dot_dimension_numbers<[1], [0], [0], [1], [0, 0, 1, 1], [], []>} : vector<192x128xbf16>, vector<128x128xbf16>, vector<192x128xf32> -> vector<192x128xf32>
    %209 = arith.addf %205, %208 : vector<192x128xf32>
    %210 = vector.shape_cast %209 : vector<192x128xf32> to vector<8x24x128xf32>
    %211 = vector.extract_strided_slice %210 {offsets = [0, 0, 0], sizes = [8, 16, 128], strides = [1, 1, 1]} : vector<8x24x128xf32> to vector<8x16x128xf32>
    %c0_186 = arith.constant 0 : index
    %c0_187 = arith.constant 0 : index
    %c0_188 = arith.constant 0 : index
    %c0_189 = arith.constant 0 : index
    %212 = vector.load %arg9[%c0_186, %c0_187, %c0_188, %c0_189] : memref<1x16x16x128xf32, #tpu.memory_space<vmem>>, vector<1x8x16x128xf32>
    %213 = vector.shape_cast %212 : vector<1x8x16x128xf32> to vector<8x16x128xf32>
    %214 = vector.shape_cast %211 : vector<8x16x128xf32> to vector<1x8x16x128xf32>
    tpu.vector_store %arg9[%c0_186, %c0_187, %c0_188, %c0_189], %214 {strides = array<i32>} : memref<1x16x16x128xf32, #tpu.memory_space<vmem>>, vector<1x8x16x128xf32>,
    %cst_190 = arith.constant 0.000000e+00 : f32
    %215 = vector.broadcast %cst_190 : f32 to vector<192x128xf32>
    %c192_191 = arith.constant 192 : index
    %c0_192 = arith.constant 0 : index
    %216 = vector.load %arg11[%c192_191, %c0_192] : memref<440x128xbf16, #tpu.memory_space<vmem>>, vector<192x128xbf16>
    %c0_193 = arith.constant 0 : index
    %c0_194 = arith.constant 0 : index
    %c0_195 = arith.constant 0 : index
    %217 = vector.load %arg7[%c0_193, %c0_194, %c0_195] : memref<9x128x128xbf16, #tpu.memory_space<vmem>>, vector<1x128x128xbf16>
    %218 = vector.shape_cast %217 : vector<1x128x128xbf16> to vector<128x128xbf16>
    %cst_196 = arith.constant dense<0.000000e+00> : vector<192x128xf32>
    %219 = tpu.matmul %216, %218, %cst_196 {dimension_numbers = #tpu.dot_dimension_numbers<[1], [0], [0], [1], [0, 0, 1, 1], [], []>} : vector<192x128xbf16>, vector<128x128xbf16>, vector<192x128xf32> -> vector<192x128xf32>
    %220 = arith.addf %215, %219 : vector<192x128xf32>
    %c193_197 = arith.constant 193 : index
    %c0_198 = arith.constant 0 : index
    %221 = vector.load %arg11[%c193_197, %c0_198] : memref<440x128xbf16, #tpu.memory_space<vmem>>, vector<192x128xbf16>
    %c1_199 = arith.constant 1 : index
    %c0_200 = arith.constant 0 : index
    %c0_201 = arith.constant 0 : index
    %222 = vector.load %arg7[%c1_199, %c0_200, %c0_201] : memref<9x128x128xbf16, #tpu.memory_space<vmem>>, vector<1x128x128xbf16>
    %223 = vector.shape_cast %222 : vector<1x128x128xbf16> to vector<128x128xbf16>
    %cst_202 = arith.constant dense<0.000000e+00> : vector<192x128xf32>
    %224 = tpu.matmul %221, %223, %cst_202 {dimension_numbers = #tpu.dot_dimension_numbers<[1], [0], [0], [1], [0, 0, 1, 1], [], []>} : vector<192x128xbf16>, vector<128x128xbf16>, vector<192x128xf32> -> vector<192x128xf32>
    %225 = arith.addf %220, %224 : vector<192x128xf32>
    %c194_203 = arith.constant 194 : index
    %c0_204 = arith.constant 0 : index
    %226 = vector.load %arg11[%c194_203, %c0_204] : memref<440x128xbf16, #tpu.memory_space<vmem>>, vector<192x128xbf16>
    %c2_205 = arith.constant 2 : index
    %c0_206 = arith.constant 0 : index
    %c0_207 = arith.constant 0 : index
    %227 = vector.load %arg7[%c2_205, %c0_206, %c0_207] : memref<9x128x128xbf16, #tpu.memory_space<vmem>>, vector<1x128x128xbf16>
    %228 = vector.shape_cast %227 : vector<1x128x128xbf16> to vector<128x128xbf16>
    %cst_208 = arith.constant dense<0.000000e+00> : vector<192x128xf32>
    %229 = tpu.matmul %226, %228, %cst_208 {dimension_numbers = #tpu.dot_dimension_numbers<[1], [0], [0], [1], [0, 0, 1, 1], [], []>} : vector<192x128xbf16>, vector<128x128xbf16>, vector<192x128xf32> -> vector<192x128xf32>
    %230 = arith.addf %225, %229 : vector<192x128xf32>
    %c216_209 = arith.constant 216 : index
    %c0_210 = arith.constant 0 : index
    %231 = vector.load %arg11[%c216_209, %c0_210] : memref<440x128xbf16, #tpu.memory_space<vmem>>, vector<192x128xbf16>
    %c3_211 = arith.constant 3 : index
    %c0_212 = arith.constant 0 : index
    %c0_213 = arith.constant 0 : index
    %232 = vector.load %arg7[%c3_211, %c0_212, %c0_213] : memref<9x128x128xbf16, #tpu.memory_space<vmem>>, vector<1x128x128xbf16>
    %233 = vector.shape_cast %232 : vector<1x128x128xbf16> to vector<128x128xbf16>
    %cst_214 = arith.constant dense<0.000000e+00> : vector<192x128xf32>
    %234 = tpu.matmul %231, %233, %cst_214 {dimension_numbers = #tpu.dot_dimension_numbers<[1], [0], [0], [1], [0, 0, 1, 1], [], []>} : vector<192x128xbf16>, vector<128x128xbf16>, vector<192x128xf32> -> vector<192x128xf32>
    %235 = arith.addf %230, %234 : vector<192x128xf32>
    %c217_215 = arith.constant 217 : index
    %c0_216 = arith.constant 0 : index
    %236 = vector.load %arg11[%c217_215, %c0_216] : memref<440x128xbf16, #tpu.memory_space<vmem>>, vector<192x128xbf16>
    %c4_217 = arith.constant 4 : index
    %c0_218 = arith.constant 0 : index
    %c0_219 = arith.constant 0 : index
    %237 = vector.load %arg7[%c4_217, %c0_218, %c0_219] : memref<9x128x128xbf16, #tpu.memory_space<vmem>>, vector<1x128x128xbf16>
    %238 = vector.shape_cast %237 : vector<1x128x128xbf16> to vector<128x128xbf16>
    %cst_220 = arith.constant dense<0.000000e+00> : vector<192x128xf32>
    %239 = tpu.matmul %236, %238, %cst_220 {dimension_numbers = #tpu.dot_dimension_numbers<[1], [0], [0], [1], [0, 0, 1, 1], [], []>} : vector<192x128xbf16>, vector<128x128xbf16>, vector<192x128xf32> -> vector<192x128xf32>
    %240 = arith.addf %235, %239 : vector<192x128xf32>
    %c218_221 = arith.constant 218 : index
    %c0_222 = arith.constant 0 : index
    %241 = vector.load %arg11[%c218_221, %c0_222] : memref<440x128xbf16, #tpu.memory_space<vmem>>, vector<192x128xbf16>
    %c5_223 = arith.constant 5 : index
    %c0_224 = arith.constant 0 : index
    %c0_225 = arith.constant 0 : index
    %242 = vector.load %arg7[%c5_223, %c0_224, %c0_225] : memref<9x128x128xbf16, #tpu.memory_space<vmem>>, vector<1x128x128xbf16>
    %243 = vector.shape_cast %242 : vector<1x128x128xbf16> to vector<128x128xbf16>
    %cst_226 = arith.constant dense<0.000000e+00> : vector<192x128xf32>
    %244 = tpu.matmul %241, %243, %cst_226 {dimension_numbers = #tpu.dot_dimension_numbers<[1], [0], [0], [1], [0, 0, 1, 1], [], []>} : vector<192x128xbf16>, vector<128x128xbf16>, vector<192x128xf32> -> vector<192x128xf32>
    %245 = arith.addf %240, %244 : vector<192x128xf32>
    %c240_227 = arith.constant 240 : index
    %c0_228 = arith.constant 0 : index
    %246 = vector.load %arg11[%c240_227, %c0_228] : memref<440x128xbf16, #tpu.memory_space<vmem>>, vector<192x128xbf16>
    %c6_229 = arith.constant 6 : index
    %c0_230 = arith.constant 0 : index
    %c0_231 = arith.constant 0 : index
    %247 = vector.load %arg7[%c6_229, %c0_230, %c0_231] : memref<9x128x128xbf16, #tpu.memory_space<vmem>>, vector<1x128x128xbf16>
    %248 = vector.shape_cast %247 : vector<1x128x128xbf16> to vector<128x128xbf16>
    %cst_232 = arith.constant dense<0.000000e+00> : vector<192x128xf32>
    %249 = tpu.matmul %246, %248, %cst_232 {dimension_numbers = #tpu.dot_dimension_numbers<[1], [0], [0], [1], [0, 0, 1, 1], [], []>} : vector<192x128xbf16>, vector<128x128xbf16>, vector<192x128xf32> -> vector<192x128xf32>
    %250 = arith.addf %245, %249 : vector<192x128xf32>
    %c241_233 = arith.constant 241 : index
    %c0_234 = arith.constant 0 : index
    %251 = vector.load %arg11[%c241_233, %c0_234] : memref<440x128xbf16, #tpu.memory_space<vmem>>, vector<192x128xbf16>
    %c7_235 = arith.constant 7 : index
    %c0_236 = arith.constant 0 : index
    %c0_237 = arith.constant 0 : index
    %252 = vector.load %arg7[%c7_235, %c0_236, %c0_237] : memref<9x128x128xbf16, #tpu.memory_space<vmem>>, vector<1x128x128xbf16>
    %253 = vector.shape_cast %252 : vector<1x128x128xbf16> to vector<128x128xbf16>
    %cst_238 = arith.constant dense<0.000000e+00> : vector<192x128xf32>
    %254 = tpu.matmul %251, %253, %cst_238 {dimension_numbers = #tpu.dot_dimension_numbers<[1], [0], [0], [1], [0, 0, 1, 1], [], []>} : vector<192x128xbf16>, vector<128x128xbf16>, vector<192x128xf32> -> vector<192x128xf32>
    %255 = arith.addf %250, %254 : vector<192x128xf32>
    %c242_239 = arith.constant 242 : index
    %c0_240 = arith.constant 0 : index
    %256 = vector.load %arg11[%c242_239, %c0_240] : memref<440x128xbf16, #tpu.memory_space<vmem>>, vector<192x128xbf16>
    %c8_241 = arith.constant 8 : index
    %c0_242 = arith.constant 0 : index
    %c0_243 = arith.constant 0 : index
    %257 = vector.load %arg7[%c8_241, %c0_242, %c0_243] : memref<9x128x128xbf16, #tpu.memory_space<vmem>>, vector<1x128x128xbf16>
    %258 = vector.shape_cast %257 : vector<1x128x128xbf16> to vector<128x128xbf16>
    %cst_244 = arith.constant dense<0.000000e+00> : vector<192x128xf32>
    %259 = tpu.matmul %256, %258, %cst_244 {dimension_numbers = #tpu.dot_dimension_numbers<[1], [0], [0], [1], [0, 0, 1, 1], [], []>} : vector<192x128xbf16>, vector<128x128xbf16>, vector<192x128xf32> -> vector<192x128xf32>
    %260 = arith.addf %255, %259 : vector<192x128xf32>
    %c217_245 = arith.constant 217 : index
    %c0_246 = arith.constant 0 : index
    %261 = vector.load %arg10[%c217_245, %c0_246] : memref<440x128xbf16, #tpu.memory_space<vmem>>, vector<192x128xbf16>
    %c0_247 = arith.constant 0 : index
    %c0_248 = arith.constant 0 : index
    %262 = vector.load %arg8[%c0_247, %c0_248] : memref<128x128xbf16, #tpu.memory_space<vmem>>, vector<128x128xbf16>
    %cst_249 = arith.constant dense<0.000000e+00> : vector<192x128xf32>
    %263 = tpu.matmul %261, %262, %cst_249 {dimension_numbers = #tpu.dot_dimension_numbers<[1], [0], [0], [1], [0, 0, 1, 1], [], []>} : vector<192x128xbf16>, vector<128x128xbf16>, vector<192x128xf32> -> vector<192x128xf32>
    %264 = arith.addf %260, %263 : vector<192x128xf32>
    %265 = vector.shape_cast %264 : vector<192x128xf32> to vector<8x24x128xf32>
    %266 = vector.extract_strided_slice %265 {offsets = [0, 0, 0], sizes = [8, 16, 128], strides = [1, 1, 1]} : vector<8x24x128xf32> to vector<8x16x128xf32>
    %c0_250 = arith.constant 0 : index
    %c8_251 = arith.constant 8 : index
    %c0_252 = arith.constant 0 : index
    %c0_253 = arith.constant 0 : index
    %267 = vector.load %arg9[%c0_250, %c8_251, %c0_252, %c0_253] : memref<1x16x16x128xf32, #tpu.memory_space<vmem>>, vector<1x8x16x128xf32>
    %268 = vector.shape_cast %267 : vector<1x8x16x128xf32> to vector<8x16x128xf32>
    %269 = vector.shape_cast %266 : vector<8x16x128xf32> to vector<1x8x16x128xf32>
    tpu.vector_store %arg9[%c0_250, %c8_251, %c0_252, %c0_253], %269 {strides = array<i32>} : memref<1x16x16x128xf32, #tpu.memory_space<vmem>>, vector<1x8x16x128xf32>,
    return
  }
  func.func @transform_0(%arg0: i32) -> (i32, i32, i32, i32) {
    %c0_i32 = arith.constant 0 : i32
    %c0_i32_0 = arith.constant 0 : i32
    %c0_i32_1 = arith.constant 0 : i32
    %c0_i32_2 = arith.constant 0 : i32
    return %arg0, %c0_i32, %c0_i32_0, %c0_i32_1 : i32, i32, i32, i32
  }
  func.func @transform_1(%arg0: i32) -> (i32, i32) {
    %c0_i32 = arith.constant 0 : i32
    %c0_i32_0 = arith.constant 0 : i32
    %c0_i32_1 = arith.constant 0 : i32
    return %c0_i32, %c0_i32_0 : i32, i32
  }
  func.func @transform_2(%arg0: i32) -> (i32, i32) {
    %c0_i32 = arith.constant 0 : i32
    %c0_i32_0 = arith.constant 0 : i32
    %c0_i32_1 = arith.constant 0 : i32
    return %c0_i32, %c0_i32_0 : i32, i32
  }
  func.func @transform_3(%arg0: i32) -> (i32, i32) {
    %c0_i32 = arith.constant 0 : i32
    %c0_i32_0 = arith.constant 0 : i32
    %c0_i32_1 = arith.constant 0 : i32
    return %c0_i32, %c0_i32_0 : i32, i32
  }
  func.func @transform_4(%arg0: i32) -> (i32, i32) {
    %c0_i32 = arith.constant 0 : i32
    %c0_i32_0 = arith.constant 0 : i32
    %c0_i32_1 = arith.constant 0 : i32
    return %c0_i32, %c0_i32_0 : i32, i32
  }
  func.func @transform_5(%arg0: i32) -> (i32, i32, i32) {
    %c0_i32 = arith.constant 0 : i32
    %c0_i32_0 = arith.constant 0 : i32
    %c0_i32_1 = arith.constant 0 : i32
    %c0_i32_2 = arith.constant 0 : i32
    return %c0_i32, %c0_i32_0, %c0_i32_1 : i32, i32, i32
  }
  func.func @transform_6(%arg0: i32) -> (i32, i32, i32) {
    %c0_i32 = arith.constant 0 : i32
    %c0_i32_0 = arith.constant 0 : i32
    %c0_i32_1 = arith.constant 0 : i32
    %c0_i32_2 = arith.constant 0 : i32
    return %c0_i32, %c0_i32_0, %c0_i32_1 : i32, i32, i32
  }
  func.func @transform_7(%arg0: i32) -> (i32, i32) {
    %c0_i32 = arith.constant 0 : i32
    %c0_i32_0 = arith.constant 0 : i32
    %c0_i32_1 = arith.constant 0 : i32
    return %c0_i32, %c0_i32_0 : i32, i32
  }
  func.func @transform_8(%arg0: i32) -> (i32, i32, i32, i32) {
    %c0_i32 = arith.constant 0 : i32
    %c0_i32_0 = arith.constant 0 : i32
    %c0_i32_1 = arith.constant 0 : i32
    %c0_i32_2 = arith.constant 0 : i32
    return %arg0, %c0_i32, %c0_i32_0, %c0_i32_1 : i32, i32, i32, i32
  }
}

</mosaic_0001>

<bundles_post_ra>
// kernel: tpu_custom_call.1
= control target key start
LH: loop header
LB: loop body
LE: loop exit
PB: predicated region body
PF: predicated region fallthrough
CT: control target
= control target key end

     0   :  { %s17423_s0 = inlined_call_operand.hbm [shape: f32[2,16,24,128], index: 0, kind: input, shape index: {}]   ;;  %s17424_s1 = inlined_call_operand.hbm [shape: f32[1,128], index: 1, kind: input, shape index: {}]   ;;  %s17425_s2 = inlined_call_operand.vmem [shape: f32[1,128], index: 2, kind: input, shape index: {}]   ;;  %s17426_s3 = inlined_call_operand.vmem [shape: f32[1,128], index: 3, kind: input, shape index: {}]   ;;  %s17427_s4 = inlined_call_operand.vmem [shape: f32[1,128], index: 4, kind: input, shape index: {}]   ;;  %s17428_s5 = inlined_call_operand.hbm [shape: bf16[9,128,128], index: 5, kind: input, shape index: {}]   ;;  %s17429_s6 = inlined_call_operand.hbm [shape: bf16[9,128,128], index: 6, kind: input, shape index: {}]   ;;  %s17430_s7 = inlined_call_operand.hbm [shape: bf16[128,128], index: 7, kind: input, shape index: {}]   ;;  %s17431_s8 = inlined_call_operand.hbm [shape: f32[2,16,16,128], index: 8, kind: output, shape index: {}]  }
   0x1   :  { %17435 = sst [smem:[#allocation18_spill]] %s17424_s1 }
   0x2   :  { %17436 = sst [smem:[#allocation19_spill]] %s17428_s5 }
   0x3   :  { %17437 = sst [smem:[#allocation20_spill]] %s17429_s6 }
   0x4   :  { %17438 = sst [smem:[#allocation21_spill]] %s17430_s7 }
   0x5   :  { %13 = vsyncpa [#allocation5], 0 }
   0x6   :  { %15 = vsyncpa [#allocation5 + $0x1], 0 }
   0x7   :  { %16 = vsyncpa [#allocation8], 0 }
   0x8   :  { %17 = vsyncpa [#allocation11], 0 }
   0x9   :  { %18 = vsyncpa [#allocation6], 0 }
   0xa   :  { %20 = vsyncpa [#allocation6 + $0x1], 0  ;;  %s15155_s27 = smov 0   ;;  %s15157_s28 = smov 0  }
   0xb   :  { %s15159_s29 = smov 0   ;;  %s15161_s30 = smov 0  }
   0xc LB: > { %s15176_s9 = sadd.s32 4294967295, %s15097_s30   ;;  %s11823_s10 = sadd.s32 4294967294, %s15097_s30   ;;  %s15097_s30 = sphi %s15161_s30, %s17462_s30   ;;  %s15093_s29 = sphi %s15159_s29, %s17461_s29   ;;  %s15089_s28 = sphi %s15157_s28, %s17460_s28   ;;  %s15085_s27 = sphi %s15155_s27, %s17459_s27  }
   0xd   : > { %p46_p0 = scmp.ne.s32.totalorder %s15089_s28, %s15085_s27  ;;  %p47_p1 = scmp.eq.s32.totalorder %s15176_s9, 0 }
   0xe   : > { %p217_p2 = scmp.eq.s32.totalorder %s15176_s9, 1  ;;  %p223_p3 = scmp.eq.s32.totalorder %s11823_s10, 1 }
   0xf   : > { %p15185_p4 = por %p47_p1, %p46_p0  ;;  %p11824_p5 = scmp.ge.s32.totalorder %s15097_s30, 1 }
  0x10   : > { %p15190_p6 = por %p223_p3, %p46_p0  ;;  %p230_p7 = scmp.lt.s32.totalorder %s15097_s30, 3 }
  0x11   : > { %s17441_s1 = sld [smem:[#allocation18_spill]]  ;;  %s15099_s17 = smov [#allocation7]  }
  0x12   : > { %p15198_p8 = pnand %p11824_p5, %p230_p7  ;;  %s244_s18 = sshll.u32 %s15099_s17, 4  ;;  %s245_s18 = int_to_ptr.vmem [resolvable:$true] %s244_s18 }
  0x13   : > { %s17444_s6 = sld [smem:[#allocation20_spill]]  ;;  %s15100_s23 = smov [#allocation10]  }
  0x14   : > { %p14740_p10 = pneg %p15198_p8  ;;  %s278_s24 = sshll.u32 %s15100_s23, 4  ;;  %s279_s24 = int_to_ptr.vmem [resolvable:$true] %s278_s24 }
  0x15   : > { %s17445_s5 = sld [smem:[#allocation19_spill]]  ;;  %s15101_s13 = smov 64  }
  0x16   : > { %p15207_p11 = pnand %p14740_p10, %p47_p1  ;;  %s15102_s14 = smov 4  }
  0x17   : > { %s242_s15 = sshll.u32 %s17441_s1, 4  ;;  %s17446_s7 = sld [smem:[#allocation21_spill]]  ;;  %s243_s15 = int_to_ptr.hbm [resolvable:$true] %s242_s15 }
  0x18   : > { %14743 = dma.hbm_to_vmem [thread:$0]  (!%p15207_p11), %s243_s15, 16, %s245_s18, [#allocation8]  }
  0x19   : > { %s276_s22 = sshll.u32 %s17444_s6, 4  ;;  %s15103_s20 = smov [#allocation9]   ;;  %s277_s22 = int_to_ptr.hbm [resolvable:$true] %s276_s22 }
  0x1a   : > { %14749 = dma.hbm_to_vmem [thread:$0]  (!%p15207_p11), %s277_s22, 9216, %s279_s24, [#allocation11], %s15101_s13, %s15101_s13, %s15102_s14  }
  0x1b   : > { %s262_s10 = sshll.u32 %s17445_s5, 4  ;;  %s264_s21 = sshll.u32 %s15103_s20, 4  ;;  %s263_s10 = int_to_ptr.hbm [resolvable:$true] %s262_s10  ;;  %s265_s21 = int_to_ptr.vmem [resolvable:$true] %s264_s21 }
  0x1c   : > { %14746 = dma.hbm_to_vmem [thread:$0]  (!%p15207_p11), %s263_s10, 9216, %s265_s21, [#allocation8], %s15101_s13, %s15101_s13, %s15102_s14  }
  0x1d   : > { %s290_s18 = sshll.u32 %s17446_s7, 4  ;;  %s15104_s23 = smov [#allocation12]   ;;  %s291_s18 = int_to_ptr.hbm [resolvable:$true] %s290_s18 }
  0x1e   : > { %s292_s25 = sshll.u32 %s15104_s23, 4  ;;  %s15229_s22 = sadd.s32 1, %s15097_s30   ;;  %s293_s25 = int_to_ptr.vmem [resolvable:$true] %s292_s25 }
  0x1f   : > { %14752 = dma.hbm_to_vmem [thread:$0]  (!%p15207_p11), %s291_s18, 1024, %s293_s25, [#allocation11], %s15101_s13, %s15101_s13, %s15102_s14  }
  0x20   : > { %s33_s24 = sadd.s32 1, %s15093_s29  ;;  %s30_s26 = ssub.s32 %s15097_s30, %s15229_s22 }
  0x21   : > { %p40_p12 = scmp.ne.s32.totalorder %s15093_s29, %s15089_s28  ;;  %p31_p13 = scmp.eq.s32.totalorder %s30_s26, 0 }
  0x22   : > { %p41_p0 = scmp.eq.s32.totalorder %s15097_s30, 0  ;;  %p14765_p5 = scmp.lt.s32.totalorder %s15097_s30, 2 }
  0x23   : > { %p15239_p3 = por %p217_p2, %p40_p12  ;;  %s306_s15 = sand.u32 1, %s15093_s29  }
  0x24   : > { %s15245_s10 = scalar_select %p31_p13, %s15093_s29, %s33_s24  }
  0x25   : > { %p42_p7 = por %p41_p0, %p40_p12  ;;  %s14717_s19 = smul.u32 384, %s306_s15 }
  0x26   : > { %s14718_s13 = smul.u32 384, %s15097_s30  ;;  %s307_s24 = scalar_lea.sflag [#allocation5], %s306_s15 }
  0x27   : > { %p15249_p10 = pnand %p14765_p5, %p42_p7  ;;  %s310_s23 = scalar_lea.vmem [#allocation4], %s14717_s19 }
  0x28   : > { %s315_s21 = scalar_lea.hbm %s17423_s0, %s14718_s13  ;;  %s318_s25 = sshll.u32 %s310_s23, 4  ;;  %s319_s25 = int_to_ptr.vmem [resolvable:$true] %s318_s25 }
  0x29   : > { %s316_s26 = sshll.u32 %s315_s21, 4  ;;  %p14997_p11 = pneg %p15249_p10  ;;  %s317_s26 = int_to_ptr.hbm [resolvable:$true] %s316_s26 }
  0x2a   : > { %s14993_s1 = sshra.s32 %s317_s26, 4  ;;  %s15000_s18 = scalar_lea.hbm %s17423_s0, 768  ;;  %s14994_s1 = int_to_ptr.hbm [resolvable:$true] %s14993_s1 }
  0x2b   : > { %s14995_s5 = scalar_lea.hbm %s14994_s1, 384  ;;  %p15001_p0 = scmp.lt.s32.totalorder %s14994_s1, %s17423_s0 }
  0x2c   : > { %p14996_p2 = scmp.ne.s32.totalorder %s14994_s1, %s14995_s5  ;;  %p15002_p5 = scmp.lt.s32.totalorder %s15000_s18, %s14995_s5 }
  0x2e   : > { %p14998_p12 = pnand %p14997_p11, %p14996_p2  ;;  %p15003_p7 = por %p15002_p5, %p15001_p0 }
  0x30   : > { %p14999_p13 = pneg %p14998_p12 }
  0x32   : > { %p15004_p9 = pnand %p15003_p7, %p14999_p13 }
  0x34   : > { %15007 = shalt.err (!%p15004_p9)
}
  0x35   : > { %s15105_s15 = smov 128   ;;  %s15106_s19 = smov 8  }
  0x36   : > { %14756 = dma.hbm_to_vmem [thread:$0]  (!%p15249_p10), %s317_s26, 6144, %s319_s25, %s307_s24, %s15105_s15, %s15105_s15, %s15106_s19  }
  0x37   : > { %330 = sbr.rel (%p15198_p8) target bundleno = 2053 (0x805), region = 52  ;;  %s15269_s6 = sand.u32 (!%p15198_p8), 1, %s15089_s28  }
  0x38   : > { %s14719_s7 = smul.u32 (!%p15198_p8), 384, %s15269_s6  ;;  %s333_s1 = scalar_lea.sflag (!%p15198_p8), [#allocation5], %s15269_s6 }
  0x3a   : > { %s15273_s5 = scalar_lea.vmem (!%p15198_p8), [#allocation4], %s14719_s7 }
  0x3c   : > { %15068 = dma.done.wait (%p15185_p4), %s333_s1, 6144  }
  0x3d   : > { %15070 = vsyncadd (%p15185_p4), %s333_s1, 4294961152 }
  0x3e   : > { %15072 = dma.done.wait (%p47_p1), [#allocation8], 9232  }
  0x3f   : > { %15074 = vsyncadd (%p47_p1), [#allocation8], 4294958064 }
  0x40   : > { %15076 = dma.done.wait (%p47_p1), [#allocation11], 10240  }
  0x41   : > { %15078 = vsyncadd (%p47_p1), [#allocation11], 4294957056  ;;  %v15107_v0 = vmov 0   ;;  %v14108_v1 = vld [vmem:[#allocation9 + $0x78] sm:$0xff]  ;;  %v14107_v3 = vld [vmem:[#allocation9 + $0x70] sm:$0xff]  ;;  %vm1199_vm3 = vcmask 1043456  }
  0x42   : > { %391 = vst [vmem:[#allocation2] sm:$0xf] %v15107_v0  ;;  %v14100_v2 = vld [vmem:[#allocation9 + $0x38] sm:$0xff]  ;;  %1539 = vmatpush.bf16.msra.mxu0 %v14108_v1  ;;  %v14099_v4 = vld [vmem:[#allocation9 + $0x30] sm:$0xff]  ;;  %14701 = vmatpush.bf16.msra.mxu2 %v14108_v1  ;;  %v14106_v5 = vld [vmem:[#allocation9 + $0x68] sm:$0xff]  ;;  %v15304_v21 = vrot.slane %v15107_v0, 7 }
  0x43   : > { %392 = vst [vmem:[#allocation2 + $0x4] sm:$0xf] %v15107_v0  ;;  %1668 = vmatpush.bf16.msra.mxu1 %v14100_v2  ;;  %14709 = vmatpush.bf16.msra.mxu3 %v14100_v2  ;;  %v14098_v6 = vld [vmem:[#allocation9 + $0x28] sm:$0xff]  ;;  %v407_v7 = vld [vmem:[%s15273_s5] sm:$0xff]  ;;  %v15293_v9 = vld [vmem:[%s17425_s2] ss:$0 sm:$0xff] }
  0x44   : > { %393 = vst [vmem:[#allocation2 + $0x8] sm:$0xf] %v15107_v0  ;;  %v15288_v8 = vld [vmem:[#allocation7] ss:$0 sm:$0xff]  ;;  %v416_v10 = vld [vmem:[%s15273_s5 + $0x48] sm:$0xff]  ;;  %v417_v12 = vld [vmem:[%s15273_s5 + $0x50] sm:$0xff] }
  0x45   : > { %394 = vst [vmem:[#allocation2 + $0xc] sm:$0xf] %v15107_v0  ;;  %v459_v11 = vmul.f32 %v15288_v8, %v407_v7  ;;  %v468_v13 = vmul.f32 %v15288_v8, %v416_v10  ;;  %v419_v14 = vld [vmem:[%s15273_s5 + $0x60] sm:$0xff]  ;;  %v469_v15 = vmul.f32 %v15288_v8, %v417_v12  ;;  %vm1200_vm0 = vsmask.f32 7938  ;;  %v408_v24 = vld [vmem:[%s15273_s5 + $0x8] sm:$0xff] }
  0x46   : > { %395 = vst [vmem:[#allocation2 + $0xcc] sm:$0xf] %v15107_v0  ;;  %1540 = vmatpush.bf16.msra.mxu0 %v14107_v3  ;;  %14702 = vmatpush.bf16.msra.mxu2 %v14107_v3  ;;  %v471_v16 = vmul.f32 %v15288_v8, %v419_v14  ;;  %v14105_v17 = vld [vmem:[#allocation9 + $0x60] sm:$0xff]  ;;  %vm716_vm1 = vsmask.f32 256  ;;  %v410_v26 = vld [vmem:[%s15273_s5 + $0x18] sm:$0xff]  ;;  %v460_v30 = vmul.f32 %v15288_v8, %v408_v24  ;;  %vm15326_vm4 = vmand %vm1199_vm3, %vm1200_vm0 }
  0x47   : > { %396 = vst [vmem:[#allocation2 + $0xd0] sm:$0xf] %v15107_v0  ;;  %1669 = vmatpush.bf16.msra.mxu1 %v14099_v4  ;;  %14710 = vmatpush.bf16.msra.mxu3 %v14099_v4  ;;  %v14097_v18 = vld [vmem:[#allocation9 + $0x20] sm:$0xff]  ;;  %v511_v19 = vadd.f32 %v15293_v9, %v459_v11  ;;  %v520_v20 = vadd.f32 %v15293_v9, %v468_v13  ;;  %v14104_v27 = vld [vmem:[#allocation9 + $0x58] sm:$0xff]  ;;  %vm717_vm2 = vsmask.f32 4368 }
  0x48   : > { %397 = vst [vmem:[#allocation2 + $0xd4] sm:$0xf] %v15107_v0  ;;  %v521_v22 = vadd.f32 %v15293_v9, %v469_v15  ;;  %v523_v23 = vadd.f32 %v15293_v9, %v471_v16  ;;  %v420_v25 = vld [vmem:[%s15273_s5 + $0x68] sm:$0xff]  ;;  %v462_v34 = vmul.f32 %v15288_v8, %v410_v26  ;;  %v14096_v35 = vld [vmem:[#allocation9 + $0x18] sm:$0xff]  ;;  %v512_v38 = vadd.f32 %v15293_v9, %v460_v30  ;;  %v14103_v53 = vld [vmem:[#allocation9 + $0x50] sm:$0xff]  ;;  %s11836_s18 = sshll.u32 %s15269_s6, 8 }
  0x49   : > { %398 = vst [vmem:[#allocation2 + $0xd8] sm:$0xf] %v15107_v0  ;;  %v559_v28 = vmax.f32 %v511_v19, 0.0  ;;  %v568_v29 = vmax.f32 %v520_v20, 0.0  ;;  %v472_v33 = vmul.f32 %v15288_v8, %v420_v25  ;;  %v15318_v41 = vrot.slane %v15304_v21, 4  ;;  %v411_v48 = vld [vmem:[%s15273_s5 + $0x20] sm:$0xff]  ;;  %vm15333_vm5 = vmor %vm716_vm1, %vm717_vm2 }
  0x4a   : > { %399 = vst [vmem:[#allocation3] sm:$0xf] %v15107_v0  ;;  %1541 = vmatpush.bf16.msra.mxu0 %v14106_v5  ;;  %14703 = vmatpush.bf16.msra.mxu2 %v14106_v5  ;;  %v569_v31 = vmax.f32 %v521_v22, 0.0  ;;  %v571_v32 = vmax.f32 %v523_v23, 0.0  ;;  %v15315_v39 = vld [vmem:[#allocation2] sm:$0xff]   ;;  %v14095_v54 = vld [vmem:[#allocation9 + $0x10] sm:$0xff]  ;;  %v463_v1 = vmul.f32 %v15288_v8, %v411_v48  ;;  %v514_v12 = vadd.f32 %v15293_v9, %v462_v34 }
  0x4b   : > { %400 = vst [vmem:[#allocation3 + $0x4] sm:$0xf] %v15107_v0  ;;  %1670 = vmatpush.bf16.msra.mxu1 %v14098_v6  ;;  %14711 = vmatpush.bf16.msra.mxu3 %v14098_v6  ;;  %v668_v36 = vpack.c.bf16 %v559_v28, %v559_v28  ;;  %v677_v37 = vpack.c.bf16 %v568_v29, %v568_v29  ;;  %v1382_v57 = vshll.u32 %v15315_v39, 16  ;;  %v560_v59 = vmax.f32 %v512_v38, 0.0  ;;  %v14102_v6 = vld [vmem:[#allocation9 + $0x48] sm:$0xff]  ;;  %v423_v19 = vld [vmem:[%s15273_s5 + $0x80] sm:$0xff] }
  0x4c   : > { %401 = vst [vmem:[#allocation3 + $0x8] sm:$0xf] %v15107_v0  ;;  %v678_v40 = vpack.c.bf16 %v569_v31, %v569_v31  ;;  %v680_v42 = vpack.c.bf16 %v571_v32, %v571_v32  ;;  %v524_v43 = vadd.f32 %v15293_v9, %v472_v33  ;;  %v1202_v60 = vld [vmem:[#allocation2 + $0xc] sm:$0xf]  ;;  %v14094_v13 = vld [vmem:[#allocation9 + $0x8] sm:$0xff]  ;;  %v1380_v20 = vshrl.u32 %v15315_v39, 16 }
  0x4d   : > { %402 = vst [vmem:[#allocation3 + $0xc] sm:$0xf] %v15107_v0  ;;  %v720_v44 = vshrl.u32 %v668_v36, 16  ;;  %v723_v45 = vshll.u32 %v668_v36, 16  ;;  %v800_v46 = vshrl.u32 %v677_v37, 16  ;;  %v803_v47 = vshll.u32 %v677_v37, 16 }
  0x4e   : > { %403 = vst [vmem:[#allocation3 + $0xcc] sm:$0xf] %v15107_v0  ;;  %1542 = vmatpush.bf16.msra.mxu0 %v14105_v17  ;;  %14704 = vmatpush.bf16.msra.mxu2 %v14105_v17  ;;  %v809_v49 = vshrl.u32 %v678_v40, 16  ;;  %v812_v50 = vshll.u32 %v678_v40, 16  ;;  %v827_v51 = vshrl.u32 %v680_v42, 16  ;;  %v830_v52 = vshll.u32 %v680_v42, 16 }
  0x4f   : > { %404 = vst [vmem:[#allocation3 + $0xd0] sm:$0xf] %v15107_v0  ;;  %1671 = vmatpush.bf16.msra.mxu1 %v14097_v18  ;;  %14712 = vmatpush.bf16.msra.mxu3 %v14097_v18  ;;  %v15322_v55 = vrot.slane %v720_v44, 7  ;;  %v802_v58 = vrot.slane %v800_v46, 7  ;;  %v669_v5 = vpack.c.bf16 %v560_v59, %v560_v59  ;;  %v422_v18 = vld [vmem:[%s15273_s5 + $0x78] sm:$0xff]  ;;  %v515_v28 = vadd.f32 %v15293_v9, %v463_v1  ;;  %v14101_v29 = vld [vmem:[#allocation9 + $0x40] sm:$0xff] }
  0x50   : > { %405 = vst [vmem:[#allocation3 + $0xd4] sm:$0xf] %v15107_v0  ;;  %v811_v62 = vrot.slane %v809_v49, 7  ;;  %v15337_v63 = vrot.slane %v827_v51, 7  ;;  %vm1378_vm6 = vsmask.f32 7424  ;;  %v474_v32 = vmul.f32 %v15288_v8, %v422_v18 }
  0x51   : > { %406 = vst [vmem:[#allocation3 + $0xd8] sm:$0xf] %v15107_v0  ;;  %v572_v0 = vmax.f32 %v524_v43, 0.0  ;;  %v725_v2 = vor.u32 %v723_v45, %v15322_v55  ;;  %v805_v3 = vor.u32 %v803_v47, %v802_v58  ;;  %v807_v4 = vrot.slane %v802_v58, 4  ;;  %v14093_v34 = vld [vmem:[#allocation9] sm:$0xff]  ;;  %v413_v45 = vld [vmem:[%s15273_s5 + $0x30] sm:$0xff] }
  0x52   : > { %1543 = vmatpush.bf16.msra.mxu0 %v14104_v27  ;;  %14705 = vmatpush.bf16.msra.mxu2 %v14104_v27  ;;  %v814_v7 = vor.u32 %v812_v50, %v811_v62  ;;  %v816_v10 = vrot.slane %v811_v62, 4  ;;  %v832_v11 = vor.u32 %v830_v52, %v15337_v63  ;;  %v728_v16 = vshrl.u32 %v669_v5, 16  ;;  %v14116_v46 = vld [vmem:[#allocation9 + $0xb8] sm:$0xff]  ;;  %v14434_v61 = vld [vmem:[#allocation10 + $0x180] sm:$0xff]  ;;  %s17100_s20 = scalar_lea.vmem [#allocation13], %s11836_s18  ;;  %s14638_s13 = sshll.u32 %s15176_s9, 8 }
  0x53   : > { %1672 = vmatpush.bf16.msra.mxu1 %v14096_v35  ;;  %14713 = vmatpush.bf16.msra.mxu3 %v14096_v35  ;;  %v1203_v14 = vsel %vm15326_vm4, %v725_v2, %v1202_v60  ;;  %v806_v15 = vsel %vm15333_vm5, %v15318_v41, %v805_v3  ;;  %v731_v17 = vshll.u32 %v669_v5, 16  ;;  %v726_v24 = vrot.slane %v15322_v55, 4  ;;  %v14136_v47 = vld [vmem:[#allocation9 + $0xf8] sm:$0xff]  ;;  %s11708_s7 = scalar_lea.hbm %s17431_s8, %s14638_s13  ;;  %s11709_s1 = sshll.u32 %s17100_s20, 4  ;;  %s11710_s1 = int_to_ptr.vmem [resolvable:$true] %s11709_s1 }
  0x54   : > { %1204 = vst [vmem:[#allocation2 + $0xc] sm:$0xf] %v1203_v14  ;;  %v815_v22 = vsel %vm15333_vm5, %v807_v4, %v814_v7  ;;  %v824_v23 = vsel %vm15333_vm5, %v816_v10, %v15304_v21  ;;  %v833_v25 = vsel %vm15333_vm5, %v15318_v41, %v832_v11  ;;  %v730_v26 = vrot.slane %v728_v16, 7  ;;  %v14155_v52 = vld [vmem:[#allocation9 + $0x138] sm:$0xff]  ;;  %v14115_v10 = vld [vmem:[#allocation9 + $0xb0] sm:$0xff]  ;;  %s11697_s9 = scalar_lea.sflag [#allocation6], %s15269_s6 }
  0x55   : > { %1213 = vst [vmem:[#allocation2 + $0x30] sm:$0xf] %v806_v15  ;;  %v681_v27 = vpack.c.bf16 %v572_v0, %v572_v0  ;;  %v1384_v30 = vrot.slane %v1382_v57, 1  ;;  %v562_v31 = vmax.f32 %v514_v12, 0.0  ;;  %v475_v33 = vmul.f32 %v15288_v8, %v423_v19  ;;  %v14163_v59 = vld [vmem:[#allocation9 + $0x178] sm:$0xff]  ;;  %v14135_v11 = vld [vmem:[#allocation9 + $0xf0] sm:$0xff] }
  0x56   : > { %1544 = vmatpush.bf16.msra.mxu0 %v14103_v53  ;;  %14706 = vmatpush.bf16.msra.mxu2 %v14103_v53  ;;  %1214 = vst [vmem:[#allocation2 + $0x34] sm:$0xf] %v815_v22  ;;  %v733_v35 = vor.u32 %v731_v17, %v730_v26  ;;  %v735_v36 = vrot.slane %v730_v26, 4  ;;  %v834_v40 = vrot.slane %v15337_v63, 4  ;;  %v563_v42 = vmax.f32 %v515_v28, 0.0  ;;  %v14154_v14 = vld [vmem:[#allocation9 + $0x130] sm:$0xff] }
  0x57   : > { %1673 = vmatpush.bf16.msra.mxu1 %v14095_v54  ;;  %14714 = vmatpush.bf16.msra.mxu3 %v14095_v54  ;;  %1215 = vst [vmem:[#allocation2 + $0x38] sm:$0xf] %v824_v23  ;;  %v836_v37 = vshrl.u32 %v681_v27, 16  ;;  %v839_v38 = vshll.u32 %v681_v27, 16  ;;  %v671_v43 = vpack.c.bf16 %v562_v31, %v562_v31  ;;  %v526_v44 = vadd.f32 %v15293_v9, %v474_v32  ;;  %v14162_v15 = vld [vmem:[#allocation9 + $0x170] sm:$0xff]  ;;  %v14114_v32 = vld [vmem:[#allocation9 + $0xa8] sm:$0xff] }
  0x58   : > { %1216 = vst [vmem:[#allocation2 + $0x3c] sm:$0xf] %v833_v25  ;;  %v734_v48 = vsel %vm15333_vm5, %v726_v24, %v733_v35  ;;  %v743_v49 = vsel %vm15333_vm5, %v735_v36, %v15304_v21  ;;  %v527_v51 = vadd.f32 %v15293_v9, %v475_v33  ;;  %v672_v53 = vpack.c.bf16 %v563_v42, %v563_v42  ;;  %v14134_v33 = vld [vmem:[#allocation9 + $0xe8] sm:$0xff]  ;;  %s15043_s23 = scalar_lea.hbm %s17431_s8, 512 }
  0x59   : > { %v838_v50 = vrot.slane %v836_v37, 7  ;;  %1205 = vst [vmem:[#allocation2 + $0x10] sm:$0xf] %v734_v48  ;;  %v746_v54 = vshrl.u32 %v671_v43, 16  ;;  %v749_v55 = vshll.u32 %v671_v43, 16  ;;  %v574_v57 = vmax.f32 %v526_v44, 0.0 }
  0x5a   : > { %1545 = vmatpush.bf16.msra.mxu0 %v14102_v6  ;;  %14707 = vmatpush.bf16.msra.mxu2 %v14102_v6  ;;  %1206 = vst [vmem:[#allocation2 + $0x14] sm:$0xf] %v743_v49  ;;  %v575_v63 = vmax.f32 %v527_v51, 0.0  ;;  %v465_v0 = vmul.f32 %v15288_v8, %v413_v45  ;;  %v755_v2 = vshrl.u32 %v672_v53, 16  ;;  %v758_v3 = vshll.u32 %v672_v53, 16  ;;  %v425_v44 = vld [vmem:[%s15273_s5 + $0x90] sm:$0xff] }
  0x5b   : > { %1674 = vmatpush.bf16.msra.mxu1 %v14094_v13  ;;  %14715 = vmatpush.bf16.msra.mxu3 %v14094_v13  ;;  %v15372_v58 = vld [vmem:[#allocation2 + $0x8] sm:$0xff]  ;;  %v841_v60 = vor.u32 %v839_v38, %v838_v50  ;;  %v843_v62 = vrot.slane %v838_v50, 4  ;;  %v748_v1 = vrot.slane %v746_v54, 7  ;;  %v683_v4 = vpack.c.bf16 %v574_v57, %v574_v57 }
  0x5c   : > { %v1385_v5 = vor.u32 %v1384_v30, %v1380_v20  ;;  %v1387_v6 = vshll.u32 %v15372_v58, 16  ;;  %v15384_v18 = vrot.slane %v755_v2, 7  ;;  %v684_v19 = vpack.c.bf16 %v575_v63, %v575_v63  ;;  %v14153_v54 = vld [vmem:[#allocation9 + $0x128] sm:$0xff]  ;;  %v14133_v63 = vld [vmem:[#allocation9 + $0xe0] sm:$0xff] }
  0x5d   : > { %v15376_v7 = vld [vmem:[#allocation2 + $0x30] sm:$0xff]  ;;  %v842_v12 = vsel %vm15333_vm5, %v834_v40, %v841_v60  ;;  %v851_v13 = vsel %vm15333_vm5, %v843_v62, %v15304_v21  ;;  %v751_v16 = vor.u32 %v749_v55, %v748_v1  ;;  %v753_v17 = vrot.slane %v748_v1, 4  ;;  %v14161_v55 = vld [vmem:[#allocation9 + $0x168] sm:$0xff]  ;;  %v14113_v62 = vld [vmem:[#allocation9 + $0xa0] sm:$0xff] }
  0x5e   : > { %1546 = vmatpush.bf16.msra.mxu0 %v14101_v29  ;;  %14708 = vmatpush.bf16.msra.mxu2 %v14101_v29  ;;  %1217 = vst [vmem:[#allocation2 + $0x40] sm:$0xf] %v842_v12  ;;  %v1389_v20 = vrot.slane %v1387_v6, 1  ;;  %v1427_v23 = vshll.u32 %v15376_v7, 16  ;;  %v1431_v24 = vshrl.u32 %v15376_v7, 16  ;;  %v760_v26 = vor.u32 %v758_v3, %v15384_v18  ;;  %v14160_v3 = vld [vmem:[#allocation9 + $0x160] sm:$0xff] }
  0x5f   : > { %1675 = vmatpush.bf16.msra.mxu1 %v14093_v34  ;;  %14716 = vmatpush.bf16.msra.mxu3 %v14093_v34  ;;  %v15387_v22 = vld [vmem:[#allocation2 + $0x38] sm:$0xff]  ;;  %1218 = vst [vmem:[#allocation2 + $0x44] sm:$0xf] %v851_v13  ;;  %v752_v25 = vsel %vm15333_vm5, %v15318_v41, %v751_v16  ;;  %v854_v27 = vshrl.u32 %v683_v4, 16  ;;  %v857_v28 = vshll.u32 %v683_v4, 16  ;;  %v863_v37 = vshrl.u32 %v684_v19, 16 }
  0x60   : > { %v1390_v29 = vsel %vm1378_vm6, %v1385_v5, %v1389_v20  ;;  %v15397_v30 = vrot.slane %v1427_v23, 1  ;;  %v1435_v31 = vshll.u32 %v15387_v22, 16  ;;  %1207 = vst [vmem:[#allocation2 + $0x18] sm:$0xf] %v752_v25  ;;  %v761_v35 = vsel %vm15333_vm5, %v753_v17, %v760_v26  ;;  %v414_v4 = vld [vmem:[%s15273_s5 + $0x38] sm:$0xff] }
  0x61   : > { %1547 = vmatmul.bf16.vlgmr.msra.gmra.mxu0 %v1390_v29  ;;  %v15400_v34 = vld [vmem:[#allocation2 + $0x10] sm:$0xff]  ;;  %v856_v36 = vrot.slane %v854_v27, 7  ;;  %1208 = vst [vmem:[#allocation2 + $0x1c] sm:$0xf] %v761_v35  ;;  %v866_v42 = vshll.u32 %v684_v19, 16  ;;  %v1391_v45 = vshrl.u32 %v15372_v58, 16  ;;  %v466_v16 = vmul.f32 %v15288_v8, %v414_v4 }
  0x62   : > { %1844 = vmatpush.bf16.msrb.mxu2 %v14116_v46  ;;  %1676 = vmatmul.bf16.vlgmr.msra.gmra.mxu1 %v15315_v39  ;;  %v517_v39 = vadd.f32 %v15293_v9, %v465_v0  ;;  %v1433_v38 = vor.u32 %v1431_v24, %v15397_v30  ;;  %v1437_v40 = vrot.slane %v1435_v31, 1  ;;  %v865_v49 = vrot.slane %v863_v37, 7  ;;  %v14152_v0 = vld [vmem:[#allocation9 + $0x120] sm:$0xff]  ;;  %v426_v5 = vld [vmem:[%s15273_s5 + $0x98] sm:$0xff] }
  0x63   : > { %2098 = vmatpush.bf16.msrb.mxu3 %v14136_v47  ;;  %2456 = vmatpush.bf16.msrb.mxu0 %v14155_v52  ;;  %v859_v46 = vor.u32 %v857_v28, %v856_v36  ;;  %v861_v48 = vrot.slane %v856_v36, 4  ;;  %v1395_v51 = vshll.u32 %v15400_v34, 16  ;;  %v762_v57 = vrot.slane %v15384_v18, 4  ;;  %v14131_v4 = vld [vmem:[#allocation9 + $0xd0] sm:$0xff] }
  0x64   : > { %1706 = vmatmul.bf16.vlgmr.msra.gmra.mxu3 %v15376_v7  ;;  %2655 = vmatpush.bf16.msrb.mxu1 %v14163_v59  ;;  %v565_v43 = vmax.f32 %v517_v39, 0.0  ;;  %v1438_v47 = vsel %vm1378_vm6, %v1433_v38, %v1437_v40  ;;  %v477_v59 = vmul.f32 %v15288_v8, %v425_v44  ;;  %v868_v60 = vor.u32 %v866_v42, %v865_v49 }
  0x65   : > { %1577 = vmatmul.bf16.vlgmr.msra.gmra.mxu2 %v1438_v47  ;;  %v860_v53 = vsel %vm15333_vm5, %v15318_v41, %v859_v46  ;;  %v1393_v2 = vor.u32 %v1391_v45, %v1389_v20  ;;  %v1439_v13 = vshrl.u32 %v15387_v22, 16  ;;  %v1397_v17 = vrot.slane %v1395_v51, 1  ;;  %v428_v51 = vld [vmem:[%s15273_s5 + $0xa8] sm:$0xff] }
  0x66   : > { %1845 = vmatpush.bf16.msrb.mxu2 %v14115_v10  ;;  %v674_v50 = vpack.c.bf16 %v565_v43, %v565_v43  ;;  %v15409_v52 = vld [vmem:[#allocation2 + $0x40] sm:$0xff]  ;;  %1219 = vst [vmem:[#allocation2 + $0x48] sm:$0xf] %v860_v53  ;;  %v869_v6 = vsel %vm15333_vm5, %v861_v48, %v868_v60  ;;  %v770_v10 = vsel %vm15333_vm5, %v762_v57, %v15304_v21  ;;  %v1399_v48 = vshrl.u32 %v15400_v34, 16  ;;  %v14112_v53 = vld [vmem:[#allocation9 + $0x98] sm:$0xff] }
  0x67   : > { %2099 = vmatpush.bf16.msrb.mxu3 %v14135_v11  ;;  %2457 = vmatpush.bf16.msrb.mxu0 %v14154_v14  ;;  %1220 = vst [vmem:[#allocation2 + $0x4c] sm:$0xf] %v869_v6  ;;  %v529_v14 = vadd.f32 %v15293_v9, %v477_v59  ;;  %v1443_v18 = vshll.u32 %v15409_v52, 16  ;;  %v478_v20 = vmul.f32 %v15288_v8, %v426_v5  ;;  %vm1758_vm7 = vcmask 1046528  }
  0x68   : > { %2656 = vmatpush.bf16.msrb.mxu1 %v14162_v15  ;;  %v773_v1 = vshrl.u32 %v674_v50, 16  ;;  %v776_v12 = vshll.u32 %v674_v50, 16  ;;  %v870_v15 = vrot.slane %v865_v49, 4  ;;  %1209 = vst [vmem:[#allocation2 + $0x20] sm:$0xf] %v770_v10  ;;  %v518_v25 = vadd.f32 %v15293_v9, %v466_v16  ;;  %v15446_v42 = vld [vmem:[#allocation2 + $0x18] sm:$0xff] }
  0x69   : > { %v577_v24 = vmax.f32 %v529_v14, 0.0  ;;  %v1441_v26 = vor.u32 %v1439_v13, %v1437_v40  ;;  %v530_v27 = vadd.f32 %v15293_v9, %v478_v20  ;;  %v1398_v28 = vsel %vm1378_vm6, %v1393_v2, %v1397_v17  ;;  %v14159_v2 = vld [vmem:[#allocation9 + $0x158] sm:$0xff] }
  0x6a   : > { %1846 = vmatpush.bf16.msrb.mxu2 %v14114_v32  ;;  %v15423_v11 = vrot.slane %v773_v1, 7  ;;  %v878_v39 = vsel %vm15333_vm5, %v870_v15, %v15304_v21  ;;  %v15442_v29 = vrot.slane %v1443_v18, 1  ;;  %v566_v32 = vmax.f32 %v518_v25, 0.0 }
  0x6b   : > { %2100 = vmatpush.bf16.msrb.mxu3 %v14134_v33  ;;  %2458 = vmatpush.bf16.msrb.mxu0 %v14153_v54  ;;  %v686_v31 = vpack.c.bf16 %v577_v24, %v577_v24  ;;  %1221 = vst [vmem:[#allocation2 + $0x50] sm:$0xf] %v878_v39  ;;  %v578_v33 = vmax.f32 %v530_v27, 0.0  ;;  %v14132_v54 = vld [vmem:[#allocation9 + $0xd8] sm:$0xff]  ;;  %v1447_v13 = vshrl.u32 %v15409_v52, 16  ;;  %vm1252_vm8 = vcmask 1040384  }
  0x6c   : > { %2657 = vmatpush.bf16.msrb.mxu1 %v14161_v55  ;;  %v778_v19 = vor.u32 %v776_v12, %v15423_v11  ;;  %v675_v37 = vpack.c.bf16 %v566_v32, %v566_v32  ;;  %v1446_v40 = vsel %vm1378_vm6, %v1441_v26, %v15442_v29  ;;  %v14151_v55 = vld [vmem:[#allocation9 + $0x118] sm:$0xff]  ;;  %v780_v57 = vrot.slane %v15423_v11, 4  ;;  %vm16382_vm9 = vmand %vm1252_vm8, %vm716_vm1 }
  0x6d   : > { %v881_v35 = vshrl.u32 %v686_v31, 16  ;;  %v884_v36 = vshll.u32 %v686_v31, 16  ;;  %v687_v38 = vpack.c.bf16 %v578_v33, %v578_v33  ;;  %v1401_v11 = vor.u32 %v1399_v48, %v1397_v17 }
  0x6e   : > { %1847 = vmatpush.bf16.msrb.mxu2 %v14113_v62  ;;  %v779_v23 = vsel %vm15333_vm5, %v15318_v41, %v778_v19  ;;  %v782_v44 = vshrl.u32 %v675_v37, 16  ;;  %v785_v45 = vshll.u32 %v675_v37, 16  ;;  %v480_v62 = vmul.f32 %v15288_v8, %v428_v51 }
  0x6f   : > { %2101 = vmatpush.bf16.msrb.mxu3 %v14133_v63  ;;  %2459 = vmatpush.bf16.msrb.mxu0 %v14152_v0  ;;  %1210 = vst [vmem:[#allocation2 + $0x24] sm:$0xf] %v779_v23  ;;  %v883_v43 = vrot.slane %v881_v35, 7  ;;  %v890_v46 = vshrl.u32 %v687_v38, 16  ;;  %v893_v47 = vshll.u32 %v687_v38, 16  ;;  %v1403_v63 = vshll.u32 %v15446_v42, 16 }
  0x70   : > { %2658 = vmatpush.bf16.msrb.mxu1 %v14160_v3  ;;  %v784_v50 = vrot.slane %v782_v44, 7  ;;  %v15453_v0 = vld [vmem:[#allocation2 + $0x48] sm:$0xff]  ;;  %v532_v12 = vadd.f32 %v15293_v9, %v480_v62  ;;  %v1449_v24 = vor.u32 %v1447_v13, %v15442_v29  ;;  %v1407_v37 = vshrl.u32 %v15446_v42, 16 }
  0x71   : > { %1552 = vmatmul.bf16.gmra.mxu0 %v1398_v28  ;;  %v886_v49 = vor.u32 %v884_v36, %v883_v43  ;;  %v888_v59 = vrot.slane %v883_v43, 4  ;;  %v892_v60 = vrot.slane %v890_v46, 7  ;;  %v14111_v3 = vld [vmem:[#allocation9 + $0x90] sm:$0xff]  ;;  %v1405_v18 = vrot.slane %v1403_v63, 1  ;;  %v14110_v29 = vld [vmem:[#allocation9 + $0x88] sm:$0xff]  ;;  %v14129_v63 = vld [vmem:[#allocation9 + $0xc0] sm:$0xff] }
  0x72   : > { %1681 = vmatmul.bf16.gmra.mxu1 %v15372_v58  ;;  %1848 = vmatpush.bf16.msrb.mxu2 %v14112_v53  ;;  %v787_v5 = vor.u32 %v785_v45, %v784_v50  ;;  %v789_v6 = vrot.slane %v784_v50, 4  ;;  %v1451_v17 = vshll.u32 %v15453_v0, 16  ;;  %v580_v19 = vmax.f32 %v532_v12, 0.0  ;;  %v14150_v35 = vld [vmem:[#allocation9 + $0x110] sm:$0xff]  ;;  %v14130_v43 = vld [vmem:[#allocation9 + $0xc8] sm:$0xff] }
  0x73   : > { %v887_v1 = vsel %vm15333_vm5, %v15318_v41, %v886_v49  ;;  %2102 = vmatpush.bf16.msrb.mxu3 %v14132_v54  ;;  %v895_v10 = vor.u32 %v893_v47, %v892_v60  ;;  %2460 = vmatpush.bf16.msrb.mxu0 %v14151_v55  ;;  %v897_v8 = vrot.slane %v892_v60, 4  ;;  %v1406_v23 = vsel %vm1378_vm6, %v1401_v11, %v1405_v18  ;;  %v14158_v36 = vld [vmem:[#allocation9 + $0x150] sm:$0xff]  ;;  %v14149_v54 = vld [vmem:[#allocation9 + $0x108] sm:$0xff] }
  0x74   : > { %1711 = vmatmul.bf16.gmra.mxu3 %v15387_v22  ;;  %1222 = vst [vmem:[#allocation2 + $0x54] sm:$0xf] %v887_v1  ;;  %2659 = vmatpush.bf16.msrb.mxu1 %v14159_v2  ;;  %v788_v14 = vsel %vm15333_vm5, %v780_v57, %v787_v5  ;;  %v797_v15 = vsel %vm15333_vm5, %v789_v6, %v15304_v21  ;;  %v1453_v39 = vrot.slane %v1451_v17, 1  ;;  %v1455_v46 = vshrl.u32 %v15453_v0, 16  ;;  %v14157_v55 = vld [vmem:[#allocation9 + $0x148] sm:$0xff]  ;;  %v14109_v57 = vld [vmem:[#allocation9 + $0x80] sm:$0xff] }
  0x75   : > { %1582 = vmatmul.bf16.gmra.mxu2 %v1446_v40  ;;  %v896_v16 = vsel %vm15333_vm5, %v888_v59, %v895_v10  ;;  %1211 = vst [vmem:[#allocation2 + $0x28] sm:$0xf] %v788_v14  ;;  %v905_v9 = vsel %vm15333_vm5, %v897_v8, %v15304_v21  ;;  %v689_v20 = vpack.c.bf16 %v580_v19, %v580_v19  ;;  %v14148_v1 = vld [vmem:[#allocation9 + $0x100] sm:$0xff]  ;;  %v14210_v17 = vld [vmem:[#allocation9 + $0x238] sm:$0xff] }
  0x76   : > { %1849 = vmatpush.bf16.msrb.mxu2 %v14111_v3  ;;  %1212 = vst [vmem:[#allocation2 + $0x2c] sm:$0xf] %v797_v15  ;;  %v1454_v28 = vsel %vm1378_vm6, %v1449_v24, %v1453_v39  ;;  %v15478_v31 = vld [vmem:[#allocation2 + $0x20] sm:$0xff]  ;;  %v1409_v44 = vor.u32 %v1407_v37, %v1405_v18  ;;  %v1457_v49 = vor.u32 %v1455_v46, %v1453_v39  ;;  %v14202_v18 = vld [vmem:[#allocation9 + $0x1f8] sm:$0xff] }
  0x77   : > { %2103 = vmatpush.bf16.msrb.mxu3 %v14131_v4  ;;  %1223 = vst [vmem:[#allocation2 + $0x58] sm:$0xf] %v896_v16  ;;  %v908_v25 = vshrl.u32 %v689_v20, 16  ;;  %v911_v26 = vshll.u32 %v689_v20, 16  ;;  %v1411_v38 = vshll.u32 %v15478_v31, 16  ;;  %2461 = vmatpush.bf16.msrb.mxu0 %v14150_v35  ;;  %v1415_v59 = vshrl.u32 %v15478_v31, 16 }
  0x78   : > { %1224 = vst [vmem:[#allocation2 + $0x5c] sm:$0xf] %v905_v9  ;;  %2660 = vmatpush.bf16.msrb.mxu1 %v14158_v36  ;;  %v14156_v2 = vld [vmem:[#allocation9 + $0x140] sm:$0xff]  ;;  %v14183_v16 = vld [vmem:[#allocation9 + $0x1b8] sm:$0xff] }
  0x79   : > { %v15475_v27 = vrot.slane %v908_v25, 7  ;;  %v1413_v45 = vrot.slane %v1411_v38, 1  ;;  %v14237_v19 = vld [vmem:[#allocation9 + $0x78] sm:$0xff] }
  0x7a   : > { %1850 = vmatpush.bf16.msrb.mxu2 %v14110_v29  ;;  %v2191_v20 = vld [vmem:[#allocation2 + $0xc] sm:$0xff]   ;;  %v14137_v36 = vld [vmem:[#allocation2 + $0x14] sm:$0xff] }
  0x7b   : > { %v913_v32 = vor.u32 %v911_v26, %v15475_v27  ;;  %v15486_v40 = vld [vmem:[#allocation2 + $0x50] sm:$0xff]  ;;  %2104 = vmatpush.bf16.msrb.mxu3 %v14130_v43  ;;  %v1414_v48 = vsel %vm1378_vm6, %v1409_v44, %v1413_v45  ;;  %2462 = vmatpush.bf16.msrb.mxu0 %v14149_v54  ;;  %v1417_v3 = vor.u32 %v1415_v59, %v1413_v45  ;;  %v14862_v26 = vld [vmem:[#allocation2 + $0xc] sm:$0xe]  ;;  %v2299_v29 = vshll.u32 %v2191_v20, 16 }
  0x7c   : > { %v1459_v47 = vshll.u32 %v15486_v40, 16  ;;  %2661 = vmatpush.bf16.msrb.mxu1 %v14157_v55  ;;  %v1463_v5 = vshrl.u32 %v15486_v40, 16  ;;  %v2297_v38 = vshrl.u32 %v2191_v20, 16  ;;  %v14182_v43 = vld [vmem:[#allocation9 + $0x1b0] sm:$0xff]  ;;  %v2304_v46 = vshll.u32 %v14137_v36, 16 }
  0x7d   : > { %v914_v33 = vsel %vm15333_vm5, %v15318_v41, %v913_v32  ;;  %v15494_v53 = vld [vmem:[#allocation2 + $0x28] sm:$0xff]  ;;  %v2301_v45 = vrot.slane %v2299_v29, 1 }
  0x7e   : > { %1225 = vst [vmem:[#allocation2 + $0x60] sm:$0xf] %v914_v33  ;;  %v1461_v50 = vrot.slane %v1459_v47, 1  ;;  %v1419_v60 = vshll.u32 %v15494_v53, 16  ;;  %1851 = vmatpush.bf16.msrb.mxu2 %v14109_v57  ;;  %v1423_v15 = vshrl.u32 %v15494_v53, 16  ;;  %v14201_v44 = vld [vmem:[#allocation9 + $0x1f0] sm:$0xff] }
  0x7f   : > { %v15498_v62 = vld [vmem:[#allocation2 + $0x58] sm:$0xff]  ;;  %2105 = vmatpush.bf16.msrb.mxu3 %v14129_v63  ;;  %2463 = vmatpush.bf16.msrb.mxu0 %v14148_v1  ;;  %v2306_v54 = vrot.slane %v2304_v46, 1  ;;  %v1760_v63 = vrot.slane %v15372_v58, 1 }
  0x80   : > { %v1462_v51 = vsel %vm1378_vm6, %v1457_v49, %v1461_v50  ;;  %v1421_v4 = vrot.slane %v1419_v60, 1  ;;  %v1467_v6 = vshll.u32 %v15498_v62, 16  ;;  %2662 = vmatpush.bf16.msrb.mxu1 %v14156_v2  ;;  %v1465_v11 = vor.u32 %v1463_v5, %v1461_v50  ;;  %v14672_v49 = vld [vmem:[#allocation2] sm:$0xe]  ;;  %v14117_v50 = vld [vmem:[#allocation2 + $0xc] sm:$0xff] }
  0x81   : > { %1557 = vmatmul.bf16.gmra.mxu0 %v1406_v23  ;;  %v14861_v23 = vld [vmem:[#allocation2 + $0xc] sm:$0xf0]  ;;  %v1471_v39 = vshrl.u32 %v15498_v62, 16  ;;  %v14138_v2 = vld [vmem:[#allocation2 + $0x1c] sm:$0xff]  ;;  %v2308_v5 = vshrl.u32 %v14137_v36, 16 }
  0x82   : > { %1686 = vmatmul.bf16.gmra.mxu1 %v15400_v34  ;;  %v1422_v10 = vsel %vm1378_vm6, %v1417_v3, %v1421_v4  ;;  %v1469_v8 = vrot.slane %v1467_v6, 1  ;;  %2909 = vmatpush.bf16.msra.mxu2 %v14183_v16  ;;  %v1425_v24 = vor.u32 %v1423_v15, %v1421_v4  ;;  %v14863_v37 = vor.u32 %v14862_v26, %v14861_v23  ;;  %v14209_v3 = vld [vmem:[#allocation9 + $0x230] sm:$0xff]  ;;  %v14119_v26 = vld [vmem:[#allocation2 + $0x1c] sm:$0xff] }
  0x83   : > { %3267 = vmatpush.bf16.msra.mxu3 %v14202_v18  ;;  %3466 = vmatpush.bf16.msra.mxu0 %v14210_v17  ;;  %v14236_v4 = vld [vmem:[#allocation9 + $0x70] sm:$0xff]  ;;  %v2312_v6 = vshll.u32 %v14138_v2, 16  ;;  %v14181_v18 = vld [vmem:[#allocation9 + $0x1a8] sm:$0xff] }
  0x84   : > { %1716 = vmatmul.bf16.gmra.mxu3 %v15409_v52  ;;  %v1470_v13 = vsel %vm1378_vm6, %v1465_v11, %v1469_v8  ;;  %4236 = vmatpush.bf16.msra.mxu1 %v14237_v19  ;;  %v1473_v32 = vor.u32 %v1471_v39, %v1469_v8  ;;  %v2570_v47 = vrot.slane %v14863_v37, 1  ;;  %v14118_v11 = vld [vmem:[#allocation2 + $0x14] sm:$0xff]  ;;  %v2310_v8 = vor.u32 %v2308_v5, %v2306_v54  ;;  %v14139_v16 = vld [vmem:[#allocation2 + $0x24] sm:$0xff] }
  0x85   : > { %1587 = vmatmul.bf16.gmra.mxu2 %v1454_v28  ;;  %v1297_v12 = vld [vmem:[#allocation2 + $0x60] sm:$0x1]  ;;  %v1430_v28 = vsel %vm1378_vm6, %v1425_v24, %v15397_v30  ;;  %v2571_v30 = vrot.slane %v14137_v36, 1  ;;  %v14200_v17 = vld [vmem:[#allocation9 + $0x1e8] sm:$0xff]  ;;  %v2316_v19 = vshrl.u32 %v14138_v2, 16  ;;  %v2320_v20 = vshll.u32 %v14139_v16, 16 }
  0x86   : > { %v1364_v14 = vunpack.c.l.b16 %v1297_v12  ;;  %2910 = vmatpush.bf16.msra.mxu2 %v14182_v43  ;;  %v2314_v12 = vrot.slane %v2312_v6, 1  ;;  %v2575_v23 = vrot.slane %v14139_v16, 1  ;;  %v14208_v24 = vld [vmem:[#allocation9 + $0x228] sm:$0xff]  ;;  %v1764_v36 = vrot.slane %v15446_v42, 1 }
  0x87   : > { %3268 = vmatpush.bf16.msra.mxu3 %v14201_v44  ;;  %v2572_v55 = vsel %vm1758_vm7, %v2570_v47, %v2571_v30  ;;  %3467 = vmatpush.bf16.msra.mxu0 %v14209_v3  ;;  %v14235_v39 = vld [vmem:[#allocation9 + $0x68] sm:$0xff]  ;;  %v14140_v44 = vld [vmem:[#allocation2 + $0x2c] sm:$0xff]  ;;  %v2324_v46 = vshrl.u32 %v14139_v16, 16  ;;  %v1766_v3 = vrot.slane %v15478_v31, 1 }
  0x88   : > { %v15507_v9 = vpack.c.b16 %v1364_v14, %v1364_v14  ;;  %4237 = vmatpush.bf16.msra.mxu1 %v14236_v4  ;;  %v2315_v58 = vsel %vm1378_vm6, %v2310_v8, %v2314_v12  ;;  %v1762_v14 = vrot.slane %v15400_v34, 1  ;;  %v2328_v47 = vshll.u32 %v14140_v44, 16  ;;  %v14141_v8 = vld [vmem:[#allocation2 + $0x34] sm:$0xff] }
  0x89   : > { %v2579_v16 = vrot.slane %v14141_v8, 1 }
  0x8a   : > { %v1475_v25 = vshll.u32 %v15507_v9, 16  ;;  %v1763_v15 = vsel %vm1758_vm7, %v1760_v63, %v1762_v14  ;;  %2911 = vmatpush.bf16.msra.mxu2 %v14181_v18 }
  0x8b   : > { %3269 = vmatpush.bf16.msra.mxu3 %v14200_v17  ;;  %3468 = vmatpush.bf16.msra.mxu0 %v14208_v24 }
  0x8c   : > { %v1477_v33 = vrot.slane %v1475_v25, 1  ;;  %4238 = vmatpush.bf16.msra.mxu1 %v14235_v39 }
  0x8e   : > { %v1478_v35 = vsel %vm1378_vm6, %v1473_v32, %v1477_v33  ;;  %v2322_v32 = vrot.slane %v2320_v20, 1  ;;  %v14121_v20 = vld [vmem:[#allocation2 + $0x2c] sm:$0xff] }
  0x91   : > { %1562 = vmatmul.bf16.gmra.mxu0 %v1414_v48  ;;  %v14671_v48 = vld [vmem:[#allocation2] sm:$0xf0] }
  0x92   : > { %1691 = vmatmul.bf16.gmra.mxu1 %v15446_v42  ;;  %v14673_v57 = vor.u32 %v14672_v49, %v14671_v48  ;;  %v14180_v42 = vld [vmem:[#allocation9 + $0x1a0] sm:$0xff] }
  0x93   : > { %2912 = vmatpush.bf16.msra.mxu2 %v14180_v42 }
  0x94   : > { %1721 = vmatmul.bf16.gmra.mxu3 %v15453_v0  ;;  %v1759_v60 = vrot.slane %v14673_v57, 1  ;;  %v14120_v57 = vld [vmem:[#allocation2 + $0x24] sm:$0xff] }
  0x95   : > { %1592 = vmatmul.bf16.gmra.mxu2 %v1462_v51  ;;  %v2302_v51 = vor.u32 %v2301_v45, %v2297_v38  ;;  %v1765_v38 = vsel %vm1758_vm7, %v1762_v14, %v1764_v36  ;;  %v2332_v14 = vshrl.u32 %v14140_v44, 16 }
  0x96   : > { %v1761_v1 = vsel %vm1758_vm7, %v1759_v60, %v1760_v63  ;;  %v2330_v60 = vrot.slane %v2328_v47, 1 }
  0x97   : > { %v2307_v59 = vsel %vm1378_vm6, %v2302_v51, %v2306_v54  ;;  %v14199_v54 = vld [vmem:[#allocation9 + $0x1e0] sm:$0xff] }
  0x98   : > { %3270 = vmatpush.bf16.msra.mxu3 %v14199_v54 }
  0xa1   : > { %1567 = vmatmul.bf16.gmra.mxu0 %v1422_v10  ;;  %v2573_v10 = vrot.slane %v14138_v2, 1 }
  0xa2   : > { %1696 = vmatmul.bf16.gmra.mxu1 %v15478_v31 }
  0xa3   : > { %v2576_v34 = vsel %vm1758_vm7, %v2573_v10, %v2575_v23 }
  0xa4   : > { %1726 = vmatmul.bf16.gmra.mxu3 %v15486_v40 }
  0xa5   : > { %1597 = vmatmul.bf16.gmra.mxu2 %v1470_v13  ;;  %v2574_v13 = vsel %vm1758_vm7, %v2571_v30, %v2573_v10  ;;  %v2577_v30 = vrot.slane %v14140_v44, 1  ;;  %v1767_v10 = vsel %vm1758_vm7, %v1764_v36, %v1766_v3  ;;  %v14198_v44 = vld [vmem:[#allocation9 + $0x1d8] sm:$0xff] }
  0xa6   : > { %3271 = vmatpush.bf16.msra.mxu3 %v14198_v44 }
  0xa7   : > { %v2578_v63 = vsel %vm1758_vm7, %v2575_v23, %v2577_v30  ;;  %v2334_v23 = vor.u32 %v2332_v14, %v2330_v60  ;;  %v2580_v39 = vsel %vm1758_vm7, %v2577_v30, %v2579_v16 }
  0xb1   : > { %1572 = vmatmul.bf16.gmra.mxu0 %v1430_v28  ;;  %v2318_v28 = vor.u32 %v2316_v19, %v2314_v12  ;;  %v14207_v12 = vld [vmem:[#allocation9 + $0x220] sm:$0xff] }
  0xb2   : > { %1701 = vmatmul.bf16.gmra.mxu1 %v15494_v53  ;;  %3469 = vmatpush.bf16.msra.mxu0 %v14207_v12  ;;  %v14143_v12 = vld [vmem:[#allocation2 + $0x44] sm:$0xff] }
  0xb3   : > { %v2352_v14 = vshll.u32 %v14143_v12, 16 }
  0xb4   : > { %1731 = vmatmul.bf16.gmra.mxu3 %v15498_v62 }
  0xb5   : > { %1602 = vmatmul.bf16.gmra.mxu2 %v1478_v35  ;;  %v2323_v35 = vsel %vm1378_vm6, %v2318_v28, %v2322_v32  ;;  %v1768_v28 = vrot.slane %v15494_v53, 1 }
  0xb7   : > { %v1769_v36 = vsel %vm1758_vm7, %v1766_v3, %v1768_v28  ;;  %v1770_v3 = vrot.slane %v15376_v7, 1 }
  0xc1   : > { %2464 = vmatmul.bf16.vlgmr.msrb.gmra.mxu0 %v2307_v59  ;;  %v2326_v59 = vor.u32 %v2324_v46, %v2322_v32  ;;  %v2340_v46 = vshrl.u32 %v14141_v8, 16 }
  0xc2   : > { %2663 = vmatmul.bf16.vlgmr.msrb.gmra.mxu1 %v2572_v55 }
  0xc3   : > { %v2331_v2 = vsel %vm1378_vm6, %v2326_v59, %v2330_v60 }
  0xc4   : > { %2106 = vmatmul.bf16.vlgmr.msrb.gmra.mxu3 %v14117_v50 }
  0xc5   : > { %1852 = vmatmul.bf16.vlgmr.msrb.gmra.mxu2 %v1761_v1 }
  0xd1   : > { %2469 = vmatmul.bf16.gmra.mxu0 %v2315_v58 }
  0xd2   : > { %2668 = vmatmul.bf16.gmra.mxu1 %v2574_v13  ;;  %v14234_v13 = vld [vmem:[#allocation9 + $0x60] sm:$0xff] }
  0xd3   : > { %4239 = vmatpush.bf16.msra.mxu1 %v14234_v13 }
  0xd4   : > { %2111 = vmatmul.bf16.gmra.mxu3 %v14118_v11 }
  0xd5   : > { %1857 = vmatmul.bf16.gmra.mxu2 %v1763_v15  ;;  %v2336_v15 = vshll.u32 %v14141_v8, 16 }
  0xd7   : > { %v2338_v24 = vrot.slane %v2336_v15, 1  ;;  %v2583_v15 = vrot.slane %v14143_v12, 1 }
  0xd9   : > { %v2342_v59 = vor.u32 %v2340_v46, %v2338_v24  ;;  %v14205_v46 = vld [vmem:[#allocation9 + $0x210] sm:$0xff] }
  0xde   : > { %v1548_v33 = vpop.f32.mrf.mxu0 }
  0xdf   : > { %v1677_v25 = vpop.f32.mrf.mxu1 }
  0xe0   : > { %v15527_v29 = vadd.f32 %v1677_v25, %v1548_v33 }
  0xe1   : > { %2474 = vmatmul.bf16.gmra.mxu0 %v2323_v35 }
  0xe2   : > { %2673 = vmatmul.bf16.gmra.mxu1 %v2576_v34 }
  0xe4   : > { %2116 = vmatmul.bf16.gmra.mxu3 %v14119_v26  ;;  %v2339_v26 = vsel %vm1378_vm6, %v2334_v23, %v2338_v24  ;;  %v14123_v24 = vld [vmem:[#allocation2 + $0x3c] sm:$0xff] }
  0xe5   : > { %1862 = vmatmul.bf16.gmra.mxu2 %v1765_v38  ;;  %v14142_v38 = vld [vmem:[#allocation2 + $0x3c] sm:$0xff] }
  0xe6   : > { %v1550_v45 = vpop.f32.mrf.mxu0  ;;  %v2344_v47 = vshll.u32 %v14142_v38, 16  ;;  %v2581_v30 = vrot.slane %v14142_v38, 1 }
  0xe7   : > { %v1707_v37 = vpop.f32.mrf.mxu3  ;;  %v1679_v43 = vpop.f32.mrf.mxu1 }
  0xe8   : > { %v15530_v48 = vadd.f32 %v1679_v43, %v1550_v45  ;;  %v1578_v49 = vpop.f32.mrf.mxu2  ;;  %v14179_v43 = vld [vmem:[#allocation9 + $0x198] sm:$0xff]  ;;  %v2346_v60 = vrot.slane %v2344_v47, 1  ;;  %v14232_v47 = vld [vmem:[#allocation9 + $0x50] sm:$0xff] }
  0xe9   : > { %v15532_v50 = vadd.f32 %v1707_v37, %v1578_v49  ;;  %2913 = vmatpush.bf16.msra.mxu2 %v14179_v43  ;;  %v14206_v49 = vld [vmem:[#allocation9 + $0x218] sm:$0xff] }
  0xea   : > { %3470 = vmatpush.bf16.msra.mxu0 %v14206_v49 }
  0xee   : > { %v1553_v1 = vpop.f32.mrf.mxu0  ;;  %3471 = vmatpush.bf16.msra.mxu0 %v14205_v46 }
  0xef   : > { %v1709_v51 = vpop.f32.mrf.mxu3  ;;  %v1682_v55 = vpop.f32.mrf.mxu1 }
  0xf0   : > { %v1580_v4 = vpop.f32.mrf.mxu2 }
  0xf1   : > { %v15537_v5 = vadd.f32 %v1709_v51, %v1580_v4  ;;  %2479 = vmatmul.bf16.gmra.mxu0 %v2331_v2  ;;  %v14233_v51 = vld [vmem:[#allocation9 + $0x58] sm:$0xff]  ;;  %v2347_v2 = vsel %vm1378_vm6, %v2342_v59, %v2346_v60 }
  0xf2   : > { %2678 = vmatmul.bf16.gmra.mxu1 %v2578_v63  ;;  %v2582_v63 = vsel %vm1758_vm7, %v2579_v16, %v2581_v30 }
  0xf3   : > { %4240 = vmatpush.bf16.msra.mxu1 %v14233_v51 }
  0xf4   : > { %2121 = vmatmul.bf16.gmra.mxu3 %v14120_v57  ;;  %v14122_v57 = vld [vmem:[#allocation2 + $0x34] sm:$0xff] }
  0xf5   : > { %1867 = vmatmul.bf16.gmra.mxu2 %v1767_v10 }
  0xf6   : > { %v1555_v58 = vpop.f32.mrf.mxu0 }
  0xf7   : > { %v1712_v6 = vpop.f32.mrf.mxu3  ;;  %v1684_v11 = vpop.f32.mrf.mxu1  ;;  %4241 = vmatpush.bf16.msra.mxu1 %v14232_v47 }
  0xf8   : > { %v15540_v18 = vadd.f32 %v1684_v11, %v1555_v58  ;;  %v1583_v31 = vpop.f32.mrf.mxu2  ;;  %v1771_v11 = vsel %vm1758_vm7, %v1768_v28, %v1770_v3  ;;  %v2348_v58 = vshrl.u32 %v14142_v38, 16 }
  0xfe   : > { %v1558_v25 = vpop.f32.mrf.mxu0 }
  0xff   : > { %v1714_v17 = vpop.f32.mrf.mxu3  ;;  %v1687_v19 = vpop.f32.mrf.mxu1 }
 0x100   : > { %v15545_v32 = vadd.f32 %v1687_v19, %v1558_v25  ;;  %v1585_v34 = vpop.f32.mrf.mxu2  ;;  %v14178_v19 = vld [vmem:[#allocation9 + $0x190] sm:$0xff]  ;;  %v2354_v25 = vrot.slane %v2352_v14, 1 }
 0x101   : > { %v15547_v33 = vadd.f32 %v1714_v17, %v1585_v34  ;;  %2484 = vmatmul.bf16.gmra.mxu0 %v2339_v26  ;;  %v2584_v26 = vsel %vm1758_vm7, %v2581_v30, %v2583_v15  ;;  %2914 = vmatpush.bf16.msra.mxu2 %v14178_v19 }
 0x102   : > { %2683 = vmatmul.bf16.gmra.mxu1 %v2580_v39  ;;  %v2350_v39 = vor.u32 %v2348_v58, %v2346_v60  ;;  %v1774_v58 = vrot.slane %v15409_v52, 1  ;;  %v14177_v52 = vld [vmem:[#allocation9 + $0x188] sm:$0xff] }
 0x104   : > { %2126 = vmatmul.bf16.gmra.mxu3 %v14121_v20  ;;  %v14197_v20 = vld [vmem:[#allocation9 + $0x1d0] sm:$0xff]  ;;  %v2355_v34 = vsel %vm1378_vm6, %v2350_v39, %v2354_v25  ;;  %v15594_v39 = vld [vmem:[#allocation2 + $0x54] sm:$0xff] }
 0x105   : > { %1872 = vmatmul.bf16.gmra.mxu2 %v1769_v36  ;;  %3272 = vmatpush.bf16.msra.mxu3 %v14197_v20 }
 0x106   : > { %v1560_v45 = vpop.f32.mrf.mxu0  ;;  %2915 = vmatpush.bf16.msra.mxu2 %v14177_v52 }
 0x107   : > { %v1717_v35 = vpop.f32.mrf.mxu3  ;;  %v1689_v37 = vpop.f32.mrf.mxu1  ;;  %v15568_v45 = vld [vmem:[#allocation2 + $0x4c] sm:$0xff] }
 0x108   : > { %v1588_v53 = vpop.f32.mrf.mxu2  ;;  %v2360_v49 = vshll.u32 %v15568_v45, 16  ;;  %v2364_v47 = vshrl.u32 %v15568_v45, 16 }
 0x109   : > { %v15550_v42 = vadd.f32 %v1717_v35, %v1588_v53  ;;  %v1772_v35 = vrot.slane %v15387_v22, 1  ;;  %v2356_v53 = vshrl.u32 %v14143_v12, 16  ;;  %v2585_v22 = vrot.slane %v15568_v45, 1 }
 0x10b   : > { %v1773_v43 = vsel %vm1758_vm7, %v1770_v3, %v1772_v35  ;;  %v2362_v3 = vrot.slane %v2360_v49, 1 }
 0x10e   : > { %v1563_v1 = vpop.f32.mrf.mxu0 }
 0x10f   : > { %v1719_v54 = vpop.f32.mrf.mxu3  ;;  %v1692_v55 = vpop.f32.mrf.mxu1 }
 0x110   : > { %v15555_v4 = vadd.f32 %v1692_v55, %v1563_v1  ;;  %v1590_v6 = vpop.f32.mrf.mxu2  ;;  %v429_v54 = vld [vmem:[%s15273_s5 + $0xb0] sm:$0xff] }
 0x111   : > { %2489 = vmatmul.bf16.gmra.mxu0 %v2347_v2  ;;  %v14124_v1 = vld [vmem:[#allocation2 + $0x44] sm:$0xff]  ;;  %v2358_v2 = vor.u32 %v2356_v53, %v2354_v25  ;;  %v2586_v6 = vsel %vm1758_vm7, %v2583_v15, %v2585_v22 }
 0x112   : > { %2688 = vmatmul.bf16.gmra.mxu1 %v2582_v63 }
 0x114   : > { %2131 = vmatmul.bf16.gmra.mxu3 %v14122_v57  ;;  %v15575_v57 = vld [vmem:[#allocation7] ss:$0 sm:$0xff] }
 0x115   : > { %1877 = vmatmul.bf16.gmra.mxu2 %v1771_v11  ;;  %v481_v59 = vmul.f32 %v15575_v57, %v429_v54 }
 0x116   : > { %v1565_v13 = vpop.f32.mrf.mxu0 }
 0x117   : > { %v1722_v10 = vpop.f32.mrf.mxu3  ;;  %v1694_v8 = vpop.f32.mrf.mxu1 }
 0x118   : > { %v15558_v16 = vadd.f32 %v1694_v8, %v1565_v13  ;;  %v1593_v31 = vpop.f32.mrf.mxu2  ;;  %v2363_v13 = vsel %vm1378_vm6, %v2358_v2, %v2362_v3 }
 0x119   : > { %v15560_v17 = vadd.f32 %v1722_v10, %v1593_v31  ;;  %v15584_v10 = vld [vmem:[%s17425_s2] ss:$0 sm:$0xff] }
 0x11a   : > { %v533_v11 = vadd.f32 %v15584_v10, %v481_v59  ;;  %v14231_v59 = vld [vmem:[#allocation9 + $0x48] sm:$0xff] }
 0x11b   : > { %4242 = vmatpush.bf16.msra.mxu1 %v14231_v59 }
 0x11c   : > { %v581_v8 = vmax.f32 %v533_v11, 0.0  ;;  %v2366_v11 = vor.u32 %v2364_v47, %v2362_v3 }
 0x11e   : > { %v1568_v28 = vpop.f32.mrf.mxu0  ;;  %v690_v14 = vpack.c.bf16 %v581_v8, %v581_v8 }
 0x11f   : > { %v1724_v7 = vpop.f32.mrf.mxu3  ;;  %v1697_v23 = vpop.f32.mrf.mxu1  ;;  %v915_v28 = vrot.slane %v15475_v27, 4 }
 0x120   : > { %v1595_v36 = vpop.f32.mrf.mxu2  ;;  %v1775_v23 = vsel %vm1758_vm7, %v1772_v35, %v1774_v58  ;;  %v2368_v35 = vshll.u32 %v15594_v39, 16 }
 0x121   : > { %v15565_v37 = vadd.f32 %v1724_v7, %v1595_v36  ;;  %2494 = vmatmul.bf16.gmra.mxu0 %v2355_v34  ;;  %v917_v7 = vshrl.u32 %v690_v14, 16  ;;  %v431_v34 = vld [vmem:[%s15273_s5 + $0xc0] sm:$0xff]  ;;  %v14196_v36 = vld [vmem:[#allocation9 + $0x1c8] sm:$0xff] }
 0x122   : > { %2693 = vmatmul.bf16.gmra.mxu1 %v2584_v26  ;;  %v920_v26 = vshll.u32 %v690_v14, 16  ;;  %3273 = vmatpush.bf16.msra.mxu3 %v14196_v36  ;;  %v2370_v8 = vrot.slane %v2368_v35, 1  ;;  %v14126_v35 = vld [vmem:[#allocation2 + $0x54] sm:$0xff] }
 0x123   : > { %v919_v25 = vrot.slane %v917_v7, 7 }
 0x124   : > { %2136 = vmatmul.bf16.gmra.mxu3 %v14123_v24  ;;  %v2371_v7 = vsel %vm1378_vm6, %v2366_v11, %v2370_v8 }
 0x125   : > { %1882 = vmatmul.bf16.gmra.mxu2 %v1773_v43  ;;  %v924_v43 = vrot.slane %v919_v25, 4 }
 0x126   : > { %v1570_v30 = vpop.f32.mrf.mxu0 }
 0x127   : > { %v1727_v38 = vpop.f32.mrf.mxu3  ;;  %v1699_v44 = vpop.f32.mrf.mxu1  ;;  %v932_v53 = vsel %vm15333_vm5, %v924_v43, %v15304_v21 }
 0x128   : > { %v15572_v51 = vadd.f32 %v1699_v44, %v1570_v30  ;;  %v1598_v55 = vpop.f32.mrf.mxu2  ;;  %v922_v38 = vor.u32 %v920_v26, %v919_v25  ;;  %v483_v44 = vmul.f32 %v15575_v57, %v431_v34  ;;  %v2587_v30 = vrot.slane %v15594_v39, 1  ;;  %1227 = vst [vmem:[#allocation2 + $0x68] sm:$0xf] %v932_v53 }
 0x129   : > { %v14204_v55 = vld [vmem:[#allocation9 + $0x208] sm:$0xff] }
 0x12a   : > { %v923_v27 = vsel %vm15333_vm5, %v915_v28, %v922_v38  ;;  %v535_v49 = vadd.f32 %v15584_v10, %v483_v44  ;;  %3472 = vmatpush.bf16.msra.mxu0 %v14204_v55  ;;  %v14146_v28 = vld [vmem:[#allocation2 + $0x5c] sm:$0xff] }
 0x12b   : > { %1226 = vst [vmem:[#allocation2 + $0x64] sm:$0xf] %v923_v27  ;;  %v2376_v36 = vshll.u32 %v14146_v28, 16  ;;  %v2589_v38 = vrot.slane %v14146_v28, 1  ;;  %v14195_v55 = vld [vmem:[#allocation9 + $0x1c0] sm:$0xff] }
 0x12c   : > { %3274 = vmatpush.bf16.msra.mxu3 %v14195_v55 }
 0x12d   : > { %v2378_v27 = vrot.slane %v2376_v36, 1  ;;  %v2590_v53 = vsel %vm1758_vm7, %v2587_v30, %v2589_v38  ;;  %v14127_v36 = vld [vmem:[#allocation2 + $0x5c] sm:$0xff] }
 0x12e   : > { %v1573_v12 = vpop.f32.mrf.mxu0 }
 0x12f   : > { %v1729_v60 = vpop.f32.mrf.mxu3  ;;  %v1702_v63 = vpop.f32.mrf.mxu1 }
 0x130   : > { %v15589_v31 = vadd.f32 %v1702_v63, %v1573_v12  ;;  %v1600_v15 = vpop.f32.mrf.mxu2  ;;  %v2588_v12 = vsel %vm1758_vm7, %v2585_v22, %v2587_v30 }
 0x131   : > { %v15591_v19 = vadd.f32 %v1729_v60, %v1600_v15  ;;  %2499 = vmatmul.bf16.gmra.mxu0 %v2363_v13 }
 0x132   : > { %2698 = vmatmul.bf16.gmra.mxu1 %v2586_v6  ;;  %v14125_v6 = vld [vmem:[#allocation2 + $0x4c] sm:$0xff] }
 0x134   : > { %2141 = vmatmul.bf16.gmra.mxu3 %v14124_v1  ;;  %v583_v1 = vmax.f32 %v535_v49, 0.0 }
 0x135   : > { %1887 = vmatmul.bf16.gmra.mxu2 %v1775_v23 }
 0x136   : > { %v1575_v46 = vpop.f32.mrf.mxu0  ;;  %v692_v13 = vpack.c.bf16 %v583_v1, %v583_v1  ;;  %v1778_v1 = vrot.slane %v15486_v40, 1 }
 0x137   : > { %v1732_v20 = vpop.f32.mrf.mxu3  ;;  %v1704_v24 = vpop.f32.mrf.mxu1 }
 0x138   : > { %v1603_v54 = vpop.f32.mrf.mxu2  ;;  %v935_v14 = vshrl.u32 %v692_v13, 16  ;;  %v938_v24 = vshll.u32 %v692_v13, 16  ;;  %v15631_v13 = vld [vmem:[#allocation2 + $0x64] sm:$0xff] }
 0x139   : > { %v15608_v60 = vadd.f32 %v1732_v20, %v1603_v54  ;;  %v1776_v20 = vrot.slane %v15453_v0, 1  ;;  %v2372_v0 = vshrl.u32 %v15594_v39, 16  ;;  %v14176_v54 = vld [vmem:[#allocation9 + $0x180] sm:$0xff] }
 0x13a   : > { %v15615_v23 = vrot.slane %v935_v14, 7  ;;  %2916 = vmatpush.bf16.msra.mxu2 %v14176_v54 }
 0x13b   : > { %v1777_v22 = vsel %vm1758_vm7, %v1774_v58, %v1776_v20  ;;  %v2374_v58 = vor.u32 %v2372_v0, %v2370_v8  ;;  %v1779_v8 = vsel %vm1758_vm7, %v1776_v20, %v1778_v1 }
 0x13c   : > { %v940_v45 = vor.u32 %v938_v24, %v15615_v23 }
 0x13d   : > { %v2379_v39 = vsel %vm1378_vm6, %v2374_v58, %v2378_v27 }
 0x13e   : > { %v2465_v15 = vpop.f32.mrf.mxu0  ;;  %v941_v34 = vsel %vm15333_vm5, %v15318_v41, %v940_v45 }
 0x13f   : > { %v1734_v63 = vpop.f32.mrf.mxu3  ;;  %v2664_v2 = vpop.f32.mrf.mxu1  ;;  %1228 = vst [vmem:[#allocation2 + $0x6c] sm:$0xf] %v941_v34 }
 0x140   : > { %v1605_v3 = vpop.f32.mrf.mxu2 }
 0x141   : > { %2504 = vmatmul.bf16.gmra.mxu0 %v2371_v7  ;;  %v14230_v7 = vld [vmem:[#allocation9 + $0x40] sm:$0xff]  ;;  %v2380_v3 = vshrl.u32 %v14146_v28, 16 }
 0x142   : > { %2703 = vmatmul.bf16.gmra.mxu1 %v2588_v12 }
 0x143   : > { %4243 = vmatpush.bf16.msra.mxu1 %v14230_v7 }
 0x144   : > { %2146 = vmatmul.bf16.gmra.mxu3 %v14125_v6 }
 0x145   : > { %1892 = vmatmul.bf16.gmra.mxu2 %v1777_v22 }
 0x146   : > { %v2467_v52 = vpop.f32.mrf.mxu0 }
 0x147   : > { %v2107_v25 = vpop.f32.mrf.mxu3  ;;  %v2666_v26 = vpop.f32.mrf.mxu1 }
 0x148   : > { %v1853_v43 = vpop.f32.mrf.mxu2 }
 0x149   : > { %v1913_v44 = vadd.f32 %v1853_v43, %v15527_v29  ;;  %v2382_v43 = vor.u32 %v2380_v3, %v2378_v27 }
 0x14b   : > { %v2167_v49 = vadd.f32 %v2107_v25, %v1913_v44  ;;  %v2591_v25 = vrot.slane %v15631_v13, 1  ;;  %v2215_v44 = vld [vmem:[#allocation2 + $0x6c] sm:$0x1] }
 0x14d   : > { %v2525_v59 = vadd.f32 %v2465_v15, %v2167_v49  ;;  %v14203_v15 = vld [vmem:[#allocation9 + $0x200] sm:$0xff]  ;;  %v2592_v28 = vsel %vm1758_vm7, %v2589_v38, %v2591_v25 }
 0x14e   : > { %v2470_v63 = vpop.f32.mrf.mxu0  ;;  %3473 = vmatpush.bf16.msra.mxu0 %v14203_v15  ;;  %v14245_v15 = vld [vmem:[#allocation9 + $0xb8] sm:$0xff] }
 0x14f   : > { %v2109_v46 = vpop.f32.mrf.mxu3  ;;  %v2669_v47 = vpop.f32.mrf.mxu1  ;;  %v15627_v29 = vadd.f32 %v2664_v2, %v2525_v59  ;;  %v2384_v2 = vshll.u32 %v15631_v13, 16  ;;  %4539 = vmatpush.bf16.msrb.mxu3 %v14245_v15 }
 0x150   : > { %v1855_v6 = vpop.f32.mrf.mxu2 }
 0x151   : > { %v1914_v11 = vadd.f32 %v1855_v6, %v15530_v48  ;;  %2509 = vmatmul.bf16.gmra.mxu0 %v2379_v39  ;;  %v432_v48 = vld [vmem:[%s15273_s5 + $0xc8] sm:$0xff] }
 0x152   : > { %2708 = vmatmul.bf16.gmra.mxu1 %v2590_v53  ;;  %v484_v22 = vmul.f32 %v15575_v57, %v432_v48  ;;  %v1780_v53 = vrot.slane %v15498_v62, 1 }
 0x153   : > { %v2168_v14 = vadd.f32 %v2109_v46, %v1914_v11  ;;  %v2388_v11 = vshrl.u32 %v15631_v13, 16 }
 0x154   : > { %2151 = vmatmul.bf16.gmra.mxu3 %v14126_v35  ;;  %v536_v46 = vadd.f32 %v15584_v10, %v484_v22  ;;  %v1781_v38 = vsel %vm1758_vm7, %v1778_v1, %v1780_v53  ;;  %v435_v22 = vld [vmem:[%s15273_s5 + $0xe0] sm:$0xff] }
 0x155   : > { %1897 = vmatmul.bf16.gmra.mxu2 %v1779_v8  ;;  %v2526_v24 = vadd.f32 %v2467_v52, %v2168_v14  ;;  %v2386_v52 = vrot.slane %v2384_v2, 1  ;;  %v942_v8 = vrot.slane %v15615_v23, 4 }
 0x156   : > { %v2472_v40 = vpop.f32.mrf.mxu0  ;;  %v584_v47 = vmax.f32 %v536_v46, 0.0  ;;  %v487_v46 = vmul.f32 %v15575_v57, %v435_v22 }
 0x157   : > { %v2112_v30 = vpop.f32.mrf.mxu3  ;;  %v2671_v12 = vpop.f32.mrf.mxu1  ;;  %v15636_v45 = vadd.f32 %v2666_v26, %v2526_v24  ;;  %v2282_v26 = vunpack.c.l.b16 %v2215_v44  ;;  %v2387_v58 = vsel %vm1378_vm6, %v2382_v43, %v2386_v52  ;;  %v2390_v43 = vor.u32 %v2388_v11, %v2386_v52  ;;  %v14284_v44 = vld [vmem:[#allocation9 + $0x138] sm:$0xff]  ;;  %v14128_v52 = vld [vmem:[#allocation2 + $0x64] sm:$0xff] }
 0x158   : > { %v1858_v20 = vpop.f32.mrf.mxu2  ;;  %v693_v49 = vpack.c.bf16 %v584_v47, %v584_v47  ;;  %5149 = vmatpush.bf16.msrb.mxu1 %v14284_v44  ;;  %v1782_v11 = vrot.slane %v15507_v9, 1 }
 0x159   : > { %v2295_v59 = vpack.c.b16 %v2282_v26, %v2282_v26  ;;  %v434_v20 = vld [vmem:[%s15273_s5 + $0xd8] sm:$0xff] }
 0x15a   : > { %v944_v6 = vshrl.u32 %v693_v49, 16  ;;  %v947_v30 = vshll.u32 %v693_v49, 16  ;;  %v486_v23 = vmul.f32 %v15575_v57, %v434_v20  ;;  %v1783_v9 = vsel %vm1758_vm7, %v1780_v53, %v1782_v11 }
 0x15b   : > { %v2392_v14 = vshll.u32 %v2295_v59, 16  ;;  %v2593_v2 = vrot.slane %v2295_v59, 1  ;;  %v539_v59 = vadd.f32 %v15584_v10, %v487_v46 }
 0x15c   : > { %v946_v7 = vrot.slane %v944_v6, 7 }
 0x15d   : > { %v2394_v26 = vrot.slane %v2392_v14, 1  ;;  %v587_v6 = vmax.f32 %v539_v59, 0.0  ;;  %v15674_v14 = vld [vmem:[#allocation2 + $0x20] sm:$0xff] }
 0x15e   : > { %v2475_v35 = vpop.f32.mrf.mxu0  ;;  %v949_v1 = vor.u32 %v947_v30, %v946_v7  ;;  %v951_v48 = vrot.slane %v946_v7, 4 }
 0x15f   : > { %v2114_v34 = vpop.f32.mrf.mxu3  ;;  %v15639_v0 = vpop.f32.mrf.mxu1 }
 0x160   : > { %v1860_v54 = vpop.f32.mrf.mxu2 }
 0x161   : > { %v1916_v27 = vadd.f32 %v1860_v54, %v15540_v18  ;;  %2514 = vmatmul.bf16.gmra.mxu0 %v2387_v58  ;;  %v14229_v18 = vld [vmem:[#allocation9 + $0x38] sm:$0xff]  ;;  %v950_v58 = vsel %vm15333_vm5, %v942_v8, %v949_v1  ;;  %v2594_v54 = vsel %vm1758_vm7, %v2591_v25, %v2593_v2  ;;  %v2395_v25 = vsel %vm1378_vm6, %v2390_v43, %v2394_v26  ;;  %v14675_v43 = vld [vmem:[#allocation2 + $0x18] sm:$0xf0] }
 0x162   : > { %2713 = vmatmul.bf16.gmra.mxu1 %v2592_v28  ;;  %4365 = vmatpush.bf16.msrb.mxu2 %v14229_v18  ;;  %v14265_v28 = vld [vmem:[#allocation9 + $0xf8] sm:$0xff]  ;;  %1229 = vst [vmem:[#allocation2 + $0x70] sm:$0xf] %v950_v58  ;;  %v15676_v18 = vld [vmem:[#allocation2 + $0x68] sm:$0xff] }
 0x163   : > { %v2170_v39 = vadd.f32 %v2114_v34, %v1916_v27  ;;  %v14674_v27 = vld [vmem:[#allocation2 + $0x18] sm:$0xff]   ;;  %4792 = vmatpush.bf16.msrb.mxu0 %v14265_v28 }
 0x164   : > { %2156 = vmatmul.bf16.gmra.mxu3 %v14127_v36  ;;  %v3110_v30 = vshll.u32 %v14674_v27, 16  ;;  %v3108_v1 = vshrl.u32 %v14674_v27, 16 }
 0x165   : > { %1902 = vmatmul.bf16.gmra.mxu2 %v1781_v38  ;;  %v2528_v24 = vadd.f32 %v2472_v40, %v2170_v39 }
 0x166   : > { %v2477_v3 = vpop.f32.mrf.mxu0 }
 0x167   : > { %v2117_v55 = vpop.f32.mrf.mxu3  ;;  %v2676_v63 = vpop.f32.mrf.mxu1  ;;  %v15655_v34 = vadd.f32 %v2671_v12, %v2528_v24  ;;  %v959_v12 = vsel %vm15333_vm5, %v951_v48, %v15304_v21  ;;  %v3112_v48 = vrot.slane %v3110_v30, 1 }
 0x168   : > { %v1863_v36 = vpop.f32.mrf.mxu2  ;;  %v14678_v63 = vld [vmem:[#allocation2 + $0x60] sm:$0xff]   ;;  %1230 = vst [vmem:[#allocation2 + $0x74] sm:$0xf] %v959_v12 }
 0x169   : > { %v1917_v40 = vadd.f32 %v1863_v36, %v15545_v32  ;;  %v538_v32 = vadd.f32 %v15584_v10, %v486_v23  ;;  %v4079_v15 = vshll.u32 %v14678_v63, 16  ;;  %v3115_v36 = vshll.u32 %v15674_v14, 16  ;;  %v14676_v23 = vld [vmem:[#allocation2 + $0x18] sm:$0xe] }
 0x16a   : > { %v4077_v28 = vshrl.u32 %v14678_v63, 16 }
 0x16b   : > { %v2171_v38 = vadd.f32 %v2117_v55, %v1917_v40  ;;  %v586_v39 = vmax.f32 %v538_v32, 0.0  ;;  %v696_v55 = vpack.c.bf16 %v587_v6, %v587_v6  ;;  %v4081_v44 = vrot.slane %v4079_v15, 1 }
 0x16c   : > { %v3113_v32 = vor.u32 %v3112_v48, %v3108_v1  ;;  %v3117_v59 = vrot.slane %v3115_v36, 1  ;;  %v14228_v1 = vld [vmem:[#allocation9 + $0x30] sm:$0xff] }
 0x16d   : > { %v2529_v13 = vadd.f32 %v2475_v35, %v2171_v38  ;;  %v695_v7 = vpack.c.bf16 %v586_v39, %v586_v39  ;;  %v971_v20 = vshrl.u32 %v696_v55, 16  ;;  %v974_v53 = vshll.u32 %v696_v55, 16  ;;  %v437_v39 = vld [vmem:[%s15273_s5 + $0xf0] sm:$0xff]  ;;  %4366 = vmatpush.bf16.msrb.mxu2 %v14228_v1 }
 0x16e   : > { %v2480_v8 = vpop.f32.mrf.mxu0  ;;  %v489_v11 = vmul.f32 %v15575_v57, %v437_v39  ;;  %v14244_v48 = vld [vmem:[#allocation9 + $0xb0] sm:$0xff] }
 0x16f   : > { %v2119_v47 = vpop.f32.mrf.mxu3  ;;  %v15665_v49 = vpop.f32.mrf.mxu1  ;;  %v15679_v24 = vadd.f32 %v15639_v0, %v2529_v13  ;;  %v962_v2 = vshrl.u32 %v695_v7, 16  ;;  %v4084_v0 = vshll.u32 %v15676_v18, 16  ;;  %v965_v40 = vshll.u32 %v695_v7, 16  ;;  %4540 = vmatpush.bf16.msrb.mxu3 %v14244_v48  ;;  %v14283_v39 = vld [vmem:[#allocation9 + $0x130] sm:$0xff] }
 0x170   : > { %v1865_v3 = vpop.f32.mrf.mxu2  ;;  %v15688_v62 = vrot.slane %v971_v20, 7  ;;  %v3382_v7 = vrot.slane %v15674_v14, 1  ;;  %5150 = vmatpush.bf16.msrb.mxu1 %v14283_v39 }
 0x171   : > { %2519 = vmatmul.bf16.gmra.mxu0 %v2395_v25  ;;  %v964_v46 = vrot.slane %v962_v2, 7  ;;  %v4086_v27 = vrot.slane %v4084_v0, 1  ;;  %v541_v3 = vadd.f32 %v15584_v10, %v489_v11  ;;  %v15708_v0 = vld [vmem:[#allocation2 + $0x28] sm:$0xff] }
 0x172   : > { %2718 = vmatmul.bf16.gmra.mxu1 %v2594_v54  ;;  %v976_v58 = vor.u32 %v974_v53, %v15688_v62  ;;  %v4082_v54 = vor.u32 %v4081_v44, %v4077_v28  ;;  %v15706_v28 = vld [vmem:[#allocation2 + $0x70] sm:$0xff]  ;;  %v3384_v1 = vrot.slane %v15708_v0, 1 }
 0x173   : > { %v967_v47 = vor.u32 %v965_v40, %v964_v46  ;;  %v969_v26 = vrot.slane %v964_v46, 4  ;;  %v589_v20 = vmax.f32 %v541_v3, 0.0  ;;  %v438_v3 = vld [vmem:[%s15273_s5 + $0xf8] sm:$0xff] }
 0x174   : > { %2161 = vmatmul.bf16.gmra.mxu3 %v14128_v52  ;;  %v14677_v52 = vor.u32 %v14676_v23, %v14675_v43  ;;  %v4087_v55 = vsel %vm1378_vm6, %v4082_v54, %v4086_v27 }
 0x175   : > { %1907 = vmatmul.bf16.gmra.mxu2 %v1783_v9  ;;  %v968_v38 = vsel %vm15333_vm5, %v15318_v41, %v967_v47  ;;  %v977_v63 = vsel %vm15333_vm5, %v969_v26, %v976_v58  ;;  %v3118_v9 = vsel %vm1378_vm6, %v3113_v32, %v3117_v59  ;;  %v698_v44 = vpack.c.bf16 %v589_v20, %v589_v20 }
 0x176   : > { %v2482_v12 = vpop.f32.mrf.mxu0  ;;  %1231 = vst [vmem:[#allocation2 + $0x78] sm:$0xf] %v968_v38  ;;  %v3381_v15 = vrot.slane %v14677_v52, 1  ;;  %v3119_v26 = vshrl.u32 %v15674_v14, 16  ;;  %v4088_v58 = vshrl.u32 %v15676_v18, 16  ;;  %v4092_v52 = vshll.u32 %v15706_v28, 16 }
 0x177   : > { %v2122_v35 = vpop.f32.mrf.mxu3  ;;  %v15684_v22 = vpop.f32.mrf.mxu1  ;;  %1232 = vst [vmem:[#allocation2 + $0x7c] sm:$0xf] %v977_v63  ;;  %v989_v53 = vshrl.u32 %v698_v44, 16  ;;  %v3123_v32 = vshll.u32 %v15708_v0, 16  ;;  %v992_v38 = vshll.u32 %v698_v44, 16  ;;  %v14264_v63 = vld [vmem:[#allocation9 + $0xf0] sm:$0xff] }
 0x178   : > { %v1868_v6 = vpop.f32.mrf.mxu2  ;;  %v3383_v43 = vsel %vm1758_vm7, %v3381_v15, %v3382_v7  ;;  %v4090_v18 = vor.u32 %v4088_v58, %v4086_v27  ;;  %v4094_v15 = vrot.slane %v4092_v52, 1  ;;  %4793 = vmatpush.bf16.msrb.mxu0 %v14264_v63  ;;  %v490_v27 = vmul.f32 %v15575_v57, %v438_v3 }
 0x179   : > { %v1919_v30 = vadd.f32 %v1868_v6, %v15555_v4 }
 0x17a   : > { %v4095_v48 = vsel %vm1378_vm6, %v4090_v18, %v4094_v15  ;;  %v542_v20 = vadd.f32 %v15584_v10, %v490_v27 }
 0x17b   : > { %v2173_v2 = vadd.f32 %v2122_v35, %v1919_v30 }
 0x17d   : > { %v2531_v36 = vadd.f32 %v2480_v8, %v2173_v2  ;;  %v14164_v8 = vld [vmem:[#allocation2 + $0x18] sm:$0xff] }
 0x17e   : > { %v2485_v4 = vpop.f32.mrf.mxu0  ;;  %v15746_v44 = vld [vmem:[#allocation2 + $0x78] sm:$0xff] }
 0x17f   : > { %v2124_v13 = vpop.f32.mrf.mxu3  ;;  %v2684_v25 = vpop.f32.mrf.mxu1  ;;  %v15711_v35 = vadd.f32 %v15665_v49, %v2531_v36  ;;  %v15720_v49 = vrot.slane %v989_v53, 7  ;;  %v590_v4 = vmax.f32 %v542_v20, 0.0  ;;  %v4100_v14 = vshll.u32 %v15746_v44, 16 }
 0x180   : > { %v1870_v23 = vpop.f32.mrf.mxu2  ;;  %v3121_v25 = vor.u32 %v3119_v26, %v3117_v59  ;;  %v14165_v26 = vld [vmem:[#allocation2 + $0x20] sm:$0xff] }
 0x181   : > { %v1920_v46 = vadd.f32 %v1870_v23, %v15558_v16  ;;  %3474 = vmatmul.bf16.vlgmr.msra.gmra.mxu0 %v3383_v43  ;;  %v978_v16 = vrot.slane %v15688_v62, 4  ;;  %v994_v6 = vor.u32 %v992_v38, %v15720_v49  ;;  %v699_v23 = vpack.c.bf16 %v590_v4, %v590_v4 }
 0x182   : > { %4244 = vmatmul.bf16.vlgmr.msra.gmra.mxu1 %v4087_v55  ;;  %v3125_v55 = vrot.slane %v3123_v32, 1  ;;  %v4096_v32 = vshrl.u32 %v15706_v28, 16  ;;  %v996_v39 = vrot.slane %v15720_v49, 4  ;;  %v4102_v3 = vrot.slane %v4100_v14, 1 }
 0x183   : > { %v2174_v54 = vadd.f32 %v2124_v13, %v1920_v46  ;;  %v986_v13 = vsel %vm15333_vm5, %v978_v16, %v15304_v21  ;;  %v995_v62 = vsel %vm15333_vm5, %v15318_v41, %v994_v6  ;;  %v15748_v46 = vld [vmem:[#allocation2 + $0x30] sm:$0xff]  ;;  %v1001_v63 = vshll.u32 %v699_v23, 16  ;;  %v14243_v6 = vld [vmem:[#allocation9 + $0xa8] sm:$0xff] }
 0x184   : > { %3275 = vmatmul.bf16.vlgmr.msra.gmra.mxu3 %v3118_v9  ;;  %1233 = vst [vmem:[#allocation2 + $0x80] sm:$0xf] %v986_v13  ;;  %v3126_v36 = vsel %vm1378_vm6, %v3121_v25, %v3125_v55  ;;  %v3131_v38 = vshll.u32 %v15748_v46, 16  ;;  %v4098_v28 = vor.u32 %v4096_v32, %v4094_v15 }
 0x185   : > { %2917 = vmatmul.bf16.vlgmr.msra.gmra.mxu2 %v14164_v8  ;;  %v2532_v11 = vadd.f32 %v2482_v12, %v2174_v54  ;;  %1234 = vst [vmem:[#allocation2 + $0x84] sm:$0xf] %v995_v62  ;;  %v3127_v54 = vshrl.u32 %v15708_v0, 16  ;;  %4541 = vmatpush.bf16.msrb.mxu3 %v14243_v6  ;;  %v3135_v0 = vshrl.u32 %v15748_v46, 16 }
 0x186   : > { %v2487_v30 = vpop.f32.mrf.mxu0 }
 0x187   : > { %v2127_v40 = vpop.f32.mrf.mxu3  ;;  %v15714_v47 = vpop.f32.mrf.mxu1  ;;  %v15732_v2 = vadd.f32 %v15684_v22, %v2532_v11  ;;  %v3385_v22 = vsel %vm1758_vm7, %v3382_v7, %v3384_v1  ;;  %v3129_v62 = vor.u32 %v3127_v54, %v3125_v55  ;;  %v14282_v55 = vld [vmem:[#allocation9 + $0x128] sm:$0xff] }
 0x188   : > { %v1873_v12 = vpop.f32.mrf.mxu2  ;;  %v998_v40 = vshrl.u32 %v699_v23, 16  ;;  %5151 = vmatpush.bf16.msrb.mxu1 %v14282_v55 }
 0x189   : > { %v3133_v12 = vrot.slane %v3131_v38, 1 }
 0x18a   : > { %v1000_v16 = vrot.slane %v998_v40, 7  ;;  %v3386_v40 = vrot.slane %v15748_v46, 1 }
 0x18b   : > { %v3134_v54 = vsel %vm1378_vm6, %v3129_v62, %v3133_v12 }
 0x18c   : > { %v1003_v11 = vor.u32 %v1001_v63, %v1000_v16  ;;  %v1005_v25 = vrot.slane %v1000_v16, 4  ;;  %v3387_v38 = vsel %vm1758_vm7, %v3384_v1, %v3386_v40  ;;  %v15781_v16 = vld [vmem:[#allocation2 + $0x80] sm:$0xff]  ;;  %v4104_v1 = vshrl.u32 %v15746_v44, 16 }
 0x18d   : > { %v4108_v62 = vshll.u32 %v15781_v16, 16 }
 0x18e   : > { %v2490_v43 = vpop.f32.mrf.mxu0  ;;  %v1004_v27 = vsel %vm15333_vm5, %v996_v39, %v1003_v11  ;;  %v1013_v49 = vsel %vm15333_vm5, %v1005_v25, %v15304_v21  ;;  %v4106_v55 = vor.u32 %v4104_v1, %v4102_v3 }
 0x18f   : > { %v2129_v59 = vpop.f32.mrf.mxu3  ;;  %v15735_v9 = vpop.f32.mrf.mxu1  ;;  %1235 = vst [vmem:[#allocation2 + $0x88] sm:$0xf] %v1004_v27 }
 0x190   : > { %v1875_v8 = vpop.f32.mrf.mxu2  ;;  %1236 = vst [vmem:[#allocation2 + $0x8c] sm:$0xf] %v1013_v49 }
 0x191   : > { %v1922_v53 = vadd.f32 %v1875_v8, %v15572_v51  ;;  %3479 = vmatmul.bf16.gmra.mxu0 %v3385_v22  ;;  %v14227_v51 = vld [vmem:[#allocation9 + $0x28] sm:$0xff] }
 0x192   : > { %4249 = vmatmul.bf16.gmra.mxu1 %v4095_v48  ;;  %4367 = vmatpush.bf16.msrb.mxu2 %v14227_v51  ;;  %v441_v48 = vld [vmem:[%s15273_s5 + $0x110] sm:$0xff]  ;;  %v15783_v51 = vld [vmem:[#allocation2 + $0x38] sm:$0xff] }
 0x193   : > { %v2176_v7 = vadd.f32 %v2129_v59, %v1922_v53  ;;  %v440_v59 = vld [vmem:[%s15273_s5 + $0x108] sm:$0xff]  ;;  %v493_v4 = vmul.f32 %v15575_v57, %v441_v48  ;;  %v4103_v53 = vsel %vm1378_vm6, %v4098_v28, %v4102_v3  ;;  %v3139_v28 = vshll.u32 %v15783_v51, 16 }
 0x194   : > { %3280 = vmatmul.bf16.gmra.mxu3 %v3126_v36  ;;  %v14263_v36 = vld [vmem:[#allocation9 + $0xe8] sm:$0xff]  ;;  %v492_v15 = vmul.f32 %v15575_v57, %v440_v59  ;;  %v3143_v46 = vshrl.u32 %v15783_v51, 16 }
 0x195   : > { %2922 = vmatmul.bf16.gmra.mxu2 %v14165_v26  ;;  %v2534_v18 = vadd.f32 %v2487_v30, %v2176_v7  ;;  %4794 = vmatpush.bf16.msrb.mxu0 %v14263_v36  ;;  %v545_v26 = vadd.f32 %v15584_v10, %v493_v4  ;;  %v3141_v44 = vrot.slane %v3139_v28, 1 }
 0x196   : > { %v2492_v13 = vpop.f32.mrf.mxu0 }
 0x197   : > { %v2132_v58 = vpop.f32.mrf.mxu3  ;;  %v2691_v52 = vpop.f32.mrf.mxu1  ;;  %v15764_v20 = vadd.f32 %v15714_v47, %v2534_v18  ;;  %v544_v47 = vadd.f32 %v15584_v10, %v492_v15  ;;  %v593_v14 = vmax.f32 %v545_v26, 0.0  ;;  %v4110_v15 = vrot.slane %v4108_v62, 1 }
 0x198   : > { %v1878_v30 = vpop.f32.mrf.mxu2 }
 0x199   : > { %v1923_v22 = vadd.f32 %v1878_v30, %v15589_v31  ;;  %v592_v32 = vmax.f32 %v544_v47, 0.0  ;;  %v702_v39 = vpack.c.bf16 %v593_v14, %v593_v14  ;;  %v4111_v14 = vsel %vm1378_vm6, %v4106_v55, %v4110_v15 }
 0x19b   : > { %v2177_v52 = vadd.f32 %v2132_v58, %v1923_v22  ;;  %v701_v63 = vpack.c.bf16 %v592_v32, %v592_v32  ;;  %v1025_v18 = vshrl.u32 %v702_v39, 16  ;;  %v1028_v59 = vshll.u32 %v702_v39, 16  ;;  %v14226_v39 = vld [vmem:[#allocation9 + $0x20] sm:$0xff] }
 0x19c   : > { %v3137_v22 = vor.u32 %v3135_v0, %v3133_v12  ;;  %v3388_v12 = vrot.slane %v15783_v51, 1  ;;  %4368 = vmatpush.bf16.msrb.mxu2 %v14226_v39  ;;  %v15814_v0 = vld [vmem:[#allocation2 + $0x88] sm:$0xff] }
 0x19d   : > { %v2535_v31 = vadd.f32 %v2490_v43, %v2177_v52  ;;  %v1016_v11 = vshrl.u32 %v701_v63, 16  ;;  %v14166_v43 = vld [vmem:[#allocation2 + $0x28] sm:$0xff]  ;;  %v15794_v49 = vrot.slane %v1025_v18, 7 }
 0x19e   : > { %v2495_v7 = vpop.f32.mrf.mxu0 }
 0x19f   : > { %v2134_v23 = vpop.f32.mrf.mxu3  ;;  %v15769_v8 = vpop.f32.mrf.mxu1  ;;  %v15786_v58 = vadd.f32 %v15735_v9, %v2535_v31  ;;  %v1018_v27 = vrot.slane %v1016_v11, 7  ;;  %v1019_v9 = vshll.u32 %v701_v63, 16  ;;  %v1030_v4 = vor.u32 %v1028_v59, %v15794_v49 }
 0x1a0   : > { %v1880_v6 = vpop.f32.mrf.mxu2  ;;  %v3142_v63 = vsel %vm1378_vm6, %v3137_v22, %v3141_v44 }
 0x1a1   : > { %3484 = vmatmul.bf16.gmra.mxu0 %v3387_v38  ;;  %v1021_v48 = vor.u32 %v1019_v9, %v1018_v27  ;;  %v1023_v30 = vrot.slane %v1018_v27, 4  ;;  %v14242_v6 = vld [vmem:[#allocation9 + $0xa0] sm:$0xff]  ;;  %v14167_v27 = vld [vmem:[#allocation2 + $0x30] sm:$0xff] }
 0x1a2   : > { %4254 = vmatmul.bf16.gmra.mxu1 %v4103_v53  ;;  %v443_v53 = vld [vmem:[%s15273_s5 + $0x120] sm:$0xff]  ;;  %4542 = vmatpush.bf16.msrb.mxu3 %v14242_v6 }
 0x1a3   : > { %v1022_v23 = vsel %vm15333_vm5, %v15318_v41, %v1021_v48  ;;  %v1031_v26 = vsel %vm15333_vm5, %v1023_v30, %v1030_v4  ;;  %v495_v52 = vmul.f32 %v15575_v57, %v443_v53  ;;  %v4116_v30 = vshll.u32 %v15814_v0, 16  ;;  %v14281_v53 = vld [vmem:[#allocation9 + $0x120] sm:$0xff] }
 0x1a4   : > { %3285 = vmatmul.bf16.gmra.mxu3 %v3134_v54  ;;  %1237 = vst [vmem:[#allocation2 + $0x90] sm:$0xf] %v1022_v23  ;;  %v14262_v23 = vld [vmem:[#allocation9 + $0xe0] sm:$0xff]  ;;  %5152 = vmatpush.bf16.msrb.mxu1 %v14281_v53 }
 0x1a5   : > { %2927 = vmatmul.bf16.gmra.mxu2 %v14166_v43  ;;  %1238 = vst [vmem:[#allocation2 + $0x94] sm:$0xf] %v1031_v26  ;;  %v547_v31 = vadd.f32 %v15584_v10, %v495_v52  ;;  %4795 = vmatpush.bf16.msrb.mxu0 %v14262_v23  ;;  %v14241_v23 = vld [vmem:[#allocation9 + $0x98] sm:$0xff] }
 0x1a6   : > { %v2497_v36 = vpop.f32.mrf.mxu0  ;;  %4543 = vmatpush.bf16.msrb.mxu3 %v14241_v23 }
 0x1a7   : > { %v2137_v25 = vpop.f32.mrf.mxu3  ;;  %v15788_v13 = vpop.f32.mrf.mxu1  ;;  %v595_v11 = vmax.f32 %v547_v31, 0.0  ;;  %v444_v31 = vld [vmem:[%s15273_s5 + $0x128] sm:$0xff] }
 0x1a8   : > { %v1883_v47 = vpop.f32.mrf.mxu2 }
 0x1a9   : > { %v1925_v54 = vadd.f32 %v1883_v47, %v15532_v50  ;;  %v3389_v50 = vsel %vm1758_vm7, %v3386_v40, %v3388_v12  ;;  %v704_v1 = vpack.c.bf16 %v595_v11, %v595_v11  ;;  %v4112_v40 = vshrl.u32 %v15781_v16, 16 }
 0x1ab   : > { %v2179_v38 = vadd.f32 %v2137_v25, %v1925_v54  ;;  %v15816_v25 = vld [vmem:[#allocation2 + $0x40] sm:$0xff]  ;;  %v1043_v59 = vshrl.u32 %v704_v1, 16  ;;  %v1046_v22 = vshll.u32 %v704_v1, 16  ;;  %v3145_v54 = vor.u32 %v3143_v46, %v3141_v44 }
 0x1ac   : > { %v3147_v4 = vshll.u32 %v15816_v25, 16  ;;  %v4114_v16 = vor.u32 %v4112_v40, %v4110_v15  ;;  %v496_v15 = vmul.f32 %v15575_v57, %v444_v31  ;;  %v3390_v39 = vrot.slane %v15816_v25, 1 }
 0x1ad   : > { %v2537_v43 = vadd.f32 %v2495_v7, %v2179_v38  ;;  %v3151_v40 = vshrl.u32 %v15816_v25, 16 }
 0x1ae   : > { %v2500_v18 = vpop.f32.mrf.mxu0  ;;  %v548_v11 = vadd.f32 %v15584_v10, %v496_v15  ;;  %v3391_v57 = vsel %vm1758_vm7, %v3388_v12, %v3390_v39  ;;  %v447_v15 = vld [vmem:[%s15273_s5 + $0x140] sm:$0xff] }
 0x1af   : > { %v2139_v3 = vpop.f32.mrf.mxu3  ;;  %v2699_v32 = vpop.f32.mrf.mxu1  ;;  %v15819_v62 = vadd.f32 %v15769_v8, %v2537_v43  ;;  %v15828_v8 = vrot.slane %v1043_v59, 7 }
 0x1b0   : > { %v1885_v28 = vpop.f32.mrf.mxu2  ;;  %v4118_v32 = vrot.slane %v4116_v30, 1  ;;  %v596_v18 = vmax.f32 %v548_v11, 0.0  ;;  %v4120_v30 = vshrl.u32 %v15814_v0, 16 }
 0x1b1   : > { %v1926_v7 = vadd.f32 %v1885_v28, %v15537_v5  ;;  %3489 = vmatmul.bf16.gmra.mxu0 %v3389_v50  ;;  %v1032_v5 = vrot.slane %v15794_v49, 4  ;;  %v1048_v47 = vor.u32 %v1046_v22, %v15828_v8  ;;  %v15856_v28 = vld [vmem:[#allocation2 + $0x48] sm:$0xff] }
 0x1b2   : > { %4259 = vmatmul.bf16.gmra.mxu1 %v4111_v14  ;;  %v3149_v14 = vrot.slane %v3147_v4, 1  ;;  %v4119_v6 = vsel %vm1378_vm6, %v4114_v16, %v4118_v32  ;;  %v705_v1 = vpack.c.bf16 %v596_v18, %v596_v18  ;;  %v4122_v0 = vor.u32 %v4120_v30, %v4118_v32  ;;  %v15874_v32 = vld [vmem:[#allocation7] ss:$0 sm:$0xff] }
 0x1b3   : > { %v2180_v55 = vadd.f32 %v2139_v3, %v1926_v7  ;;  %v1040_v3 = vsel %vm15333_vm5, %v1032_v5, %v15304_v21  ;;  %v1049_v49 = vsel %vm15333_vm5, %v15318_v41, %v1048_v47  ;;  %v1050_v5 = vrot.slane %v15828_v8, 4 }
 0x1b4   : > { %3290 = vmatmul.bf16.gmra.mxu3 %v3142_v63  ;;  %1239 = vst [vmem:[#allocation2 + $0x98] sm:$0xf] %v1040_v3  ;;  %v3150_v43 = vsel %vm1378_vm6, %v3145_v54, %v3149_v14  ;;  %v1055_v22 = vshll.u32 %v705_v1, 16  ;;  %v3153_v16 = vor.u32 %v3151_v40, %v3149_v14  ;;  %v14280_v14 = vld [vmem:[#allocation9 + $0x118] sm:$0xff]  ;;  %v3159_v25 = vshrl.u32 %v15856_v28, 16 }
 0x1b5   : > { %2932 = vmatmul.bf16.gmra.mxu2 %v14167_v27  ;;  %v2538_v26 = vadd.f32 %v2497_v36, %v2180_v55  ;;  %1240 = vst [vmem:[#allocation2 + $0x9c] sm:$0xf] %v1049_v49  ;;  %v1052_v27 = vshrl.u32 %v705_v1, 16  ;;  %v3155_v55 = vshll.u32 %v15856_v28, 16  ;;  %5153 = vmatpush.bf16.msrb.mxu1 %v14280_v14 }
 0x1b6   : > { %v2502_v52 = vpop.f32.mrf.mxu0 }
 0x1b7   : > { %v2142_v9 = vpop.f32.mrf.mxu3  ;;  %v15822_v48 = vpop.f32.mrf.mxu1  ;;  %v15840_v38 = vadd.f32 %v15788_v13, %v2538_v26  ;;  %v15854_v13 = vld [vmem:[#allocation2 + $0x90] sm:$0xff]  ;;  %v1054_v4 = vrot.slane %v1052_v27, 7  ;;  %v3157_v49 = vrot.slane %v3155_v55, 1  ;;  %v15886_v27 = vld [vmem:[%s17425_s2] ss:$0 sm:$0xff] }
 0x1b8   : > { %v1888_v36 = vpop.f32.mrf.mxu2  ;;  %v14168_v9 = vld [vmem:[#allocation2 + $0x38] sm:$0xff]  ;;  %v4124_v51 = vshll.u32 %v15854_v13, 16 }
 0x1b9   : > { %v1057_v53 = vor.u32 %v1055_v22, %v1054_v4  ;;  %v1059_v47 = vrot.slane %v1054_v4, 4  ;;  %v446_v36 = vld [vmem:[%s15273_s5 + $0x138] sm:$0xff] }
 0x1ba   : > { %v4126_v3 = vrot.slane %v4124_v51, 1  ;;  %v498_v11 = vmul.f32 %v15874_v32, %v446_v36 }
 0x1bb   : > { %v1058_v31 = vsel %vm15333_vm5, %v1050_v5, %v1057_v53  ;;  %v1067_v8 = vsel %vm15333_vm5, %v1059_v47, %v15304_v21 }
 0x1bc   : > { %1241 = vst [vmem:[#allocation2 + $0xa0] sm:$0xf] %v1058_v31  ;;  %v15896_v4 = vld [vmem:[#allocation2 + $0x98] sm:$0xff] }
 0x1bd   : > { %1242 = vst [vmem:[#allocation2 + $0xa4] sm:$0xf] %v1067_v8 }
 0x1be   : > { %v2505_v50 = vpop.f32.mrf.mxu0 }
 0x1bf   : > { %v2144_v44 = vpop.f32.mrf.mxu3  ;;  %v15843_v63 = vpop.f32.mrf.mxu1 }
 0x1c0   : > { %v1890_v7 = vpop.f32.mrf.mxu2 }
 0x1c1   : > { %v1928_v10 = vadd.f32 %v1890_v7, %v15547_v33  ;;  %3494 = vmatmul.bf16.gmra.mxu0 %v3391_v57  ;;  %v14225_v33 = vld [vmem:[#allocation9 + $0x18] sm:$0xff]  ;;  %v3392_v7 = vrot.slane %v15856_v28, 1 }
 0x1c2   : > { %4264 = vmatmul.bf16.gmra.mxu1 %v4119_v6  ;;  %4369 = vmatpush.bf16.msrb.mxu2 %v14225_v33  ;;  %v14261_v6 = vld [vmem:[#allocation9 + $0xd8] sm:$0xff] }
 0x1c3   : > { %v2182_v12 = vadd.f32 %v2144_v44, %v1928_v10  ;;  %4796 = vmatpush.bf16.msrb.mxu0 %v14261_v6  ;;  %v550_v10 = vadd.f32 %v15886_v27, %v498_v11  ;;  %v3393_v55 = vsel %vm1758_vm7, %v3390_v39, %v3392_v7  ;;  %v15898_v33 = vld [vmem:[#allocation2 + $0x50] sm:$0xff]  ;;  %v4128_v39 = vshrl.u32 %v15854_v13, 16 }
 0x1c4   : > { %3295 = vmatmul.bf16.gmra.mxu3 %v3150_v43  ;;  %v499_v43 = vmul.f32 %v15874_v32, %v447_v15  ;;  %v3167_v28 = vshrl.u32 %v15898_v33, 16 }
 0x1c5   : > { %2937 = vmatmul.bf16.gmra.mxu2 %v14168_v9  ;;  %v2540_v26 = vadd.f32 %v2502_v52, %v2182_v12  ;;  %v598_v40 = vmax.f32 %v550_v10, 0.0  ;;  %v4130_v14 = vor.u32 %v4128_v39, %v4126_v3 }
 0x1c6   : > { %v2507_v54 = vpop.f32.mrf.mxu0  ;;  %v551_v9 = vadd.f32 %v15886_v27, %v499_v43 }
 0x1c7   : > { %v2147_v59 = vpop.f32.mrf.mxu3  ;;  %v2706_v46 = vpop.f32.mrf.mxu1  ;;  %v15872_v44 = vadd.f32 %v15822_v48, %v2540_v26  ;;  %v4127_v48 = vsel %vm1378_vm6, %v4122_v0, %v4126_v3  ;;  %v707_v22 = vpack.c.bf16 %v598_v40, %v598_v40  ;;  %v3163_v0 = vshll.u32 %v15898_v33, 16 }
 0x1c8   : > { %v1893_v52 = vpop.f32.mrf.mxu2  ;;  %v3158_v46 = vsel %vm1378_vm6, %v3153_v16, %v3157_v49  ;;  %v599_v30 = vmax.f32 %v551_v9, 0.0  ;;  %v4132_v16 = vshll.u32 %v15896_v4, 16  ;;  %v449_v9 = vld [vmem:[%s15273_s5 + $0x150] sm:$0xff] }
 0x1c9   : > { %v1929_v18 = vadd.f32 %v1893_v52, %v15550_v42  ;;  %v1070_v53 = vshrl.u32 %v707_v22, 16  ;;  %v1073_v8 = vshll.u32 %v707_v22, 16  ;;  %v3165_v13 = vrot.slane %v3163_v0, 1  ;;  %v14224_v22 = vld [vmem:[#allocation9 + $0x10] sm:$0xff] }
 0x1ca   : > { %v708_v5 = vpack.c.bf16 %v599_v30, %v599_v30  ;;  %v4134_v11 = vrot.slane %v4132_v16, 1  ;;  %v501_v3 = vmul.f32 %v15874_v32, %v449_v9  ;;  %4370 = vmatpush.bf16.msrb.mxu2 %v14224_v22 }
 0x1cb   : > { %v2183_v42 = vadd.f32 %v2147_v59, %v1929_v18  ;;  %v1072_v31 = vrot.slane %v1070_v53, 7  ;;  %v3161_v18 = vor.u32 %v3159_v25, %v3157_v49  ;;  %v3394_v49 = vrot.slane %v15898_v33, 1  ;;  %v15929_v25 = vld [vmem:[#allocation2 + $0xa0] sm:$0xff] }
 0x1cc   : > { %v1079_v26 = vshrl.u32 %v708_v5, 16  ;;  %v1082_v36 = vshll.u32 %v708_v5, 16  ;;  %v4135_v30 = vsel %vm1378_vm6, %v4130_v14, %v4134_v11  ;;  %v14240_v5 = vld [vmem:[#allocation9 + $0x90] sm:$0xff] }
 0x1cd   : > { %v2541_v51 = vadd.f32 %v2505_v50, %v2183_v42  ;;  %v14169_v50 = vld [vmem:[#allocation2 + $0x40] sm:$0xff]  ;;  %v1075_v15 = vor.u32 %v1073_v8, %v1072_v31  ;;  %v1077_v52 = vrot.slane %v1072_v31, 4  ;;  %4544 = vmatpush.bf16.msrb.mxu3 %v14240_v5  ;;  %v14170_v31 = vld [vmem:[#allocation2 + $0x48] sm:$0xff] }
 0x1ce   : > { %v2510_v12 = vpop.f32.mrf.mxu0 }
 0x1cf   : > { %v2149_v57 = vpop.f32.mrf.mxu3  ;;  %v15879_v1 = vpop.f32.mrf.mxu1  ;;  %v15901_v59 = vadd.f32 %v15843_v63, %v2541_v51  ;;  %v15909_v63 = vrot.slane %v1079_v26, 7  ;;  %v3395_v26 = vsel %vm1758_vm7, %v3392_v7, %v3394_v49  ;;  %v4136_v7 = vshrl.u32 %v15896_v4, 16 }
 0x1d0   : > { %v1895_v23 = vpop.f32.mrf.mxu2  ;;  %v1076_v57 = vsel %vm15333_vm5, %v15318_v41, %v1075_v15 }
 0x1d1   : > { %3499 = vmatmul.bf16.gmra.mxu0 %v3393_v55  ;;  %v1084_v43 = vor.u32 %v1082_v36, %v15909_v63  ;;  %1243 = vst [vmem:[#allocation2 + $0xa8] sm:$0xf] %v1076_v57  ;;  %v3166_v55 = vsel %vm1378_vm6, %v3161_v18, %v3165_v13  ;;  %v553_v23 = vadd.f32 %v15886_v27, %v501_v3  ;;  %v14279_v57 = vld [vmem:[#allocation9 + $0x110] sm:$0xff] }
 0x1d2   : > { %4269 = vmatmul.bf16.gmra.mxu1 %v4127_v48  ;;  %v4138_v3 = vor.u32 %v4136_v7, %v4134_v11  ;;  %v4144_v7 = vshrl.u32 %v15929_v25, 16 }
 0x1d3   : > { %v1085_v10 = vsel %vm15333_vm5, %v1077_v52, %v1084_v43  ;;  %v601_v53 = vmax.f32 %v553_v23, 0.0  ;;  %v4140_v52 = vshll.u32 %v15929_v25, 16  ;;  %5154 = vmatpush.bf16.msrb.mxu1 %v14279_v57 }
 0x1d4   : > { %3300 = vmatmul.bf16.gmra.mxu3 %v3158_v46  ;;  %1244 = vst [vmem:[#allocation2 + $0xac] sm:$0xf] %v1085_v10 }
 0x1d5   : > { %2942 = vmatmul.bf16.gmra.mxu2 %v14169_v50  ;;  %v710_v39 = vpack.c.bf16 %v601_v53, %v601_v53  ;;  %v4142_v4 = vrot.slane %v4140_v52, 1 }
 0x1d6   : > { %v2512_v6 = vpop.f32.mrf.mxu0 }
 0x1d7   : > { %v2152_v47 = vpop.f32.mrf.mxu3  ;;  %v15903_v54 = vpop.f32.mrf.mxu1  ;;  %v1097_v36 = vshrl.u32 %v710_v39, 16  ;;  %v1100_v18 = vshll.u32 %v710_v39, 16  ;;  %v4143_v23 = vsel %vm1378_vm6, %v4138_v3, %v4142_v4 }
 0x1d8   : > { %v1898_v48 = vpop.f32.mrf.mxu2 }
 0x1d9   : > { %v1931_v42 = vadd.f32 %v1898_v48, %v15560_v17  ;;  %v1086_v48 = vrot.slane %v15909_v63, 4  ;;  %v450_v63 = vld [vmem:[%s15273_s5 + $0x158] sm:$0xff] }
 0x1db   : > { %v2185_v51 = vadd.f32 %v2152_v47, %v1931_v42  ;;  %v15931_v47 = vld [vmem:[#allocation2 + $0x58] sm:$0xff]  ;;  %v15967_v39 = vld [vmem:[#allocation2 + $0xa8] sm:$0xff] }
 0x1dc   : > { %v3171_v43 = vshll.u32 %v15931_v47, 16  ;;  %v3396_v5 = vrot.slane %v15931_v47, 1 }
 0x1dd   : > { %v2543_v17 = vadd.f32 %v2510_v12, %v2185_v51 }
 0x1de   : > { %v2515_v50 = vpop.f32.mrf.mxu0 }
 0x1df   : > { %v2154_v46 = vpop.f32.mrf.mxu3  ;;  %v2714_v40 = vpop.f32.mrf.mxu1  ;;  %v15934_v16 = vadd.f32 %v15879_v1, %v2543_v17  ;;  %v15943_v1 = vrot.slane %v1097_v36, 7  ;;  %v14171_v36 = vld [vmem:[#allocation2 + $0x50] sm:$0xff] }
 0x1e0   : > { %v1900_v0 = vpop.f32.mrf.mxu2  ;;  %v3169_v40 = vor.u32 %v3167_v28, %v3165_v13  ;;  %v502_v13 = vmul.f32 %v15874_v32, %v450_v63 }
 0x1e1   : > { %v1932_v12 = vadd.f32 %v1900_v0, %v15565_v37  ;;  %3504 = vmatmul.bf16.gmra.mxu0 %v3395_v26  ;;  %v14260_v37 = vld [vmem:[#allocation9 + $0xd0] sm:$0xff]  ;;  %v1102_v10 = vor.u32 %v1100_v18, %v15943_v1  ;;  %v15969_v0 = vld [vmem:[#allocation2 + $0x60] sm:$0xff] }
 0x1e2   : > { %4274 = vmatmul.bf16.gmra.mxu1 %v4135_v30  ;;  %v3173_v30 = vrot.slane %v3171_v43, 1  ;;  %4797 = vmatpush.bf16.msrb.mxu0 %v14260_v37  ;;  %v554_v17 = vadd.f32 %v15886_v27, %v502_v13  ;;  %v3179_v18 = vshll.u32 %v15969_v0, 16 }
 0x1e3   : > { %v2186_v14 = vadd.f32 %v2154_v46, %v1932_v12  ;;  %v1094_v46 = vsel %vm15333_vm5, %v1086_v48, %v15304_v21  ;;  %v1103_v51 = vsel %vm15333_vm5, %v15318_v41, %v1102_v10  ;;  %v4146_v48 = vor.u32 %v4144_v7, %v4142_v4  ;;  %v452_v10 = vld [vmem:[%s15273_s5 + $0x168] sm:$0xff] }
 0x1e4   : > { %3305 = vmatmul.bf16.gmra.mxu3 %v3166_v55  ;;  %1245 = vst [vmem:[#allocation2 + $0xb0] sm:$0xf] %v1094_v46  ;;  %v3174_v53 = vsel %vm1378_vm6, %v3169_v40, %v3173_v30  ;;  %v602_v50 = vmax.f32 %v554_v17, 0.0  ;;  %v3181_v63 = vrot.slane %v3179_v18, 1 }
 0x1e5   : > { %2947 = vmatmul.bf16.gmra.mxu2 %v14170_v31  ;;  %v2544_v9 = vadd.f32 %v2512_v6, %v2186_v14  ;;  %1246 = vst [vmem:[#allocation2 + $0xb4] sm:$0xf] %v1103_v51  ;;  %v4148_v14 = vshll.u32 %v15967_v39, 16  ;;  %v504_v51 = vmul.f32 %v15874_v32, %v452_v10 }
 0x1e6   : > { %v2517_v42 = vpop.f32.mrf.mxu0  ;;  %v711_v12 = vpack.c.bf16 %v602_v50, %v602_v50 }
 0x1e7   : > { %v2157_v8 = vpop.f32.mrf.mxu3  ;;  %v15937_v15 = vpop.f32.mrf.mxu1  ;;  %v15955_v6 = vadd.f32 %v15903_v54, %v2544_v9  ;;  %v3397_v54 = vsel %vm1758_vm7, %v3394_v49, %v3396_v5  ;;  %v3175_v49 = vshrl.u32 %v15931_v47, 16  ;;  %v4150_v40 = vrot.slane %v4148_v14, 1 }
 0x1e8   : > { %v1903_v55 = vpop.f32.mrf.mxu2  ;;  %v1106_v33 = vshrl.u32 %v711_v12, 16  ;;  %v1109_v57 = vshll.u32 %v711_v12, 16 }
 0x1e9   : > { %v3177_v55 = vor.u32 %v3175_v49, %v3173_v30  ;;  %v3398_v30 = vrot.slane %v15969_v0, 1  ;;  %v4152_v49 = vshrl.u32 %v15967_v39, 16  ;;  %v14223_v39 = vld [vmem:[#allocation9 + $0x8] sm:$0xff] }
 0x1ea   : > { %v1108_v37 = vrot.slane %v1106_v33, 7  ;;  %v14172_v33 = vld [vmem:[#allocation2 + $0x58] sm:$0xff]  ;;  %4371 = vmatpush.bf16.msrb.mxu2 %v14223_v39 }
 0x1eb   : > { %v3182_v50 = vsel %vm1378_vm6, %v3177_v55, %v3181_v63  ;;  %v14278_v55 = vld [vmem:[#allocation9 + $0x108] sm:$0xff] }
 0x1ec   : > { %v1111_v25 = vor.u32 %v1109_v57, %v1108_v37  ;;  %v1113_v46 = vrot.slane %v1108_v37, 4  ;;  %v3183_v37 = vshrl.u32 %v15969_v0, 16  ;;  %5155 = vmatpush.bf16.msrb.mxu1 %v14278_v55 }
 0x1ee   : > { %v2520_v26 = vpop.f32.mrf.mxu0 }
 0x1ef   : > { %v2159_v11 = vpop.f32.mrf.mxu3  ;;  %v15958_v22 = vpop.f32.mrf.mxu1 }
 0x1f0   : > { %v1905_v31 = vpop.f32.mrf.mxu2 }
 0x1f1   : > { %v1934_v8 = vadd.f32 %v1905_v31, %v15591_v19  ;;  %3509 = vmatmul.bf16.gmra.mxu0 %v3397_v54  ;;  %v1104_v19 = vrot.slane %v15943_v1, 4  ;;  %v1121_v1 = vsel %vm15333_vm5, %v1113_v46, %v15304_v21  ;;  %v14259_v46 = vld [vmem:[#allocation9 + $0xc8] sm:$0xff] }
 0x1f2   : > { %4279 = vmatmul.bf16.gmra.mxu1 %v4143_v23  ;;  %1248 = vst [vmem:[#allocation2 + $0xbc] sm:$0xf] %v1121_v1  ;;  %4798 = vmatpush.bf16.msrb.mxu0 %v14259_v46  ;;  %v3026_v46 = vld [vmem:[#allocation2 + $0x78] sm:$0x1] }
 0x1f3   : > { %v2188_v43 = vadd.f32 %v2159_v11, %v1934_v8  ;;  %v1112_v13 = vsel %vm15333_vm5, %v1104_v19, %v1111_v25  ;;  %v4154_v19 = vor.u32 %v4152_v49, %v4150_v40  ;;  %v14239_v25 = vld [vmem:[#allocation9 + $0x88] sm:$0xff] }
 0x1f4   : > { %3310 = vmatmul.bf16.gmra.mxu3 %v3174_v53  ;;  %1247 = vst [vmem:[#allocation2 + $0xb8] sm:$0xf] %v1112_v13 }
 0x1f5   : > { %2952 = vmatmul.bf16.gmra.mxu2 %v14171_v36  ;;  %v2546_v9 = vadd.f32 %v2517_v42, %v2188_v43  ;;  %v556_v42 = vadd.f32 %v15886_v27, %v504_v51  ;;  %v15995_v27 = vld [vmem:[#allocation2 + $0xb0] sm:$0xff]  ;;  %v15997_v36 = vld [vmem:[#allocation2 + $0x68] sm:$0xff]  ;;  %4545 = vmatpush.bf16.msrb.mxu3 %v14239_v25 }
 0x1f6   : > { %v2522_v3 = vpop.f32.mrf.mxu0  ;;  %v3400_v1 = vrot.slane %v15997_v36, 1 }
 0x1f7   : > { %v2162_v28 = vpop.f32.mrf.mxu3  ;;  %v2721_v52 = vpop.f32.mrf.mxu1  ;;  %v15980_v47 = vadd.f32 %v15937_v15, %v2546_v9  ;;  %v4151_v15 = vsel %vm1378_vm6, %v4146_v48, %v4150_v40  ;;  %v604_v53 = vmax.f32 %v556_v42, 0.0  ;;  %v3185_v9 = vor.u32 %v3183_v37, %v3181_v63  ;;  %v16020_v63 = vld [vmem:[%s17426_s3] ss:$0 sm:$0xff] }
 0x1f8   : > { %v1908_v11 = vpop.f32.mrf.mxu2 }
 0x1f9   : > { %v1935_v4 = vadd.f32 %v1908_v11, %v15608_v60  ;;  %v713_v54 = vpack.c.bf16 %v604_v53, %v604_v53  ;;  %v3399_v60 = vsel %vm1758_vm7, %v3396_v5, %v3398_v30  ;;  %v4156_v5 = vshll.u32 %v15995_v27, 16 }
 0x1fa   : > { %v3401_v53 = vsel %vm1758_vm7, %v3398_v30, %v3400_v1 }
 0x1fb   : > { %v2189_v17 = vadd.f32 %v2162_v28, %v1935_v4  ;;  %v1124_v8 = vshrl.u32 %v713_v54, 16  ;;  %v1127_v28 = vshll.u32 %v713_v54, 16  ;;  %v4158_v10 = vrot.slane %v4156_v5, 1  ;;  %v16032_v54 = vld [vmem:[#allocation2 + $0x70] sm:$0xff] }
 0x1fc   : > { %v3191_v5 = vshrl.u32 %v15997_v36, 16 }
 0x1fd   : > { %v2547_v12 = vadd.f32 %v2520_v26, %v2189_v17  ;;  %v16002_v14 = vrot.slane %v1124_v8, 7  ;;  %v4159_v42 = vsel %vm1378_vm6, %v4154_v19, %v4158_v10  ;;  %v16029_v17 = vld [vmem:[#allocation2 + $0xb8] sm:$0xff]  ;;  %v14173_v8 = vld [vmem:[#allocation2 + $0x60] sm:$0xff] }
 0x1fe   : > { %v3475_v31 = vpop.f32.mrf.mxu0  ;;  %v4164_v30 = vshll.u32 %v16029_v17, 16 }
 0x1ff   : > { %v2164_v23 = vpop.f32.mrf.mxu3  ;;  %v15989_v32 = vpop.f32.mrf.mxu1  ;;  %v16000_v7 = vadd.f32 %v15958_v22, %v2547_v12  ;;  %v1129_v18 = vor.u32 %v1127_v28, %v16002_v14  ;;  %v3187_v22 = vshll.u32 %v15997_v36, 16 }
 0x200   : > { %v1910_v52 = vpop.f32.mrf.mxu2  ;;  %v16042_v19 = vrot.slane %v4164_v30, 1  ;;  %v14222_v30 = vld [vmem:[#allocation9] sm:$0xff] }
 0x201   : > { %3514 = vmatmul.bf16.gmra.mxu0 %v3399_v60  ;;  %v1130_v57 = vsel %vm15333_vm5, %v15318_v41, %v1129_v18  ;;  %v3189_v3 = vrot.slane %v3187_v22, 1  ;;  %v3195_v18 = vshll.u32 %v16032_v54, 16  ;;  %4372 = vmatpush.bf16.msrb.mxu2 %v14222_v30 }
 0x202   : > { %4284 = vmatmul.bf16.gmra.mxu1 %v4151_v15  ;;  %1249 = vst [vmem:[#allocation2 + $0xc0] sm:$0xf] %v1130_v57 }
 0x203   : > { %v3190_v4 = vsel %vm1378_vm6, %v3185_v9, %v3189_v3  ;;  %v3193_v25 = vor.u32 %v3191_v5, %v3189_v3 }
 0x204   : > { %3315 = vmatmul.bf16.gmra.mxu3 %v3182_v50 }
 0x205   : > { %2957 = vmatmul.bf16.gmra.mxu2 %v14172_v33  ;;  %v4160_v33 = vshrl.u32 %v15995_v27, 16  ;;  %v16045_v27 = vrot.slane %v3195_v18, 1  ;;  %v14277_v18 = vld [vmem:[#allocation9 + $0x100] sm:$0xff] }
 0x206   : > { %v3477_v48 = vpop.f32.mrf.mxu0  ;;  %5156 = vmatpush.bf16.msrb.mxu1 %v14277_v18 }
 0x207   : > { %v3276_v43 = vpop.f32.mrf.mxu3  ;;  %v16004_v26 = vpop.f32.mrf.mxu1 }
 0x208   : > { %v2918_v51 = vpop.f32.mrf.mxu2 }
 0x209   : > { %v2978_v0 = vadd.f32 %v2918_v51, %v15627_v29  ;;  %v16026_v29 = vld [vmem:[%s17427_s4] ss:$0 sm:$0xff] }
 0x20a   : > { %v3996_v51 = vld [vmem:[#allocation2 + $0xc0] sm:$0x1] }
 0x20b   : > { %v3336_v40 = vadd.f32 %v3276_v43, %v2978_v0  ;;  %v4062_v3 = vunpack.c.l.b16 %v3996_v51  ;;  %v4168_v51 = vshrl.u32 %v16029_v17, 16 }
 0x20d   : > { %v3535_v23 = vadd.f32 %v3475_v31, %v3336_v40 }
 0x20e   : > { %v3480_v15 = vpop.f32.mrf.mxu0 }
 0x20f   : > { %v3278_v11 = vpop.f32.mrf.mxu3  ;;  %v4250_v13 = vpop.f32.mrf.mxu1  ;;  %v3563_v50 = vmul.f32 %v16020_v63, %v3535_v23 }
 0x210   : > { %v2920_v12 = vpop.f32.mrf.mxu2 }
 0x211   : > { %v3591_v60 = vadd.f32 %v16026_v29, %v3563_v50  ;;  %v2979_v31 = vadd.f32 %v2920_v12, %v15636_v45  ;;  %3519 = vmatmul.bf16.gmra.mxu0 %v3401_v53  ;;  %v4162_v45 = vor.u32 %v4160_v33, %v4158_v10  ;;  %v3402_v10 = vrot.slane %v16032_v54, 1 }
 0x212   : > { %4289 = vmatmul.bf16.gmra.mxu1 %v4159_v42  ;;  %v3198_v53 = vsel %vm1378_vm6, %v3193_v25, %v16045_v27 }
 0x213   : > { %v3615_v43 = vmax.f32 %v3591_v60, 0.0  ;;  %v3337_v49 = vadd.f32 %v3278_v11, %v2979_v31  ;;  %v4167_v40 = vsel %vm1378_vm6, %v4162_v45, %v16042_v19  ;;  %v3403_v31 = vsel %vm1758_vm7, %v3400_v1, %v3402_v10 }
 0x214   : > { %3320 = vmatmul.bf16.gmra.mxu3 %v3190_v4  ;;  %v3093_v4 = vunpack.c.l.b16 %v3026_v46  ;;  %v3199_v1 = vshrl.u32 %v16032_v54, 16 }
 0x215   : > { %v3663_v37 = vpack.c.bf16 %v3615_v43, %v3615_v43  ;;  %v3536_v22 = vadd.f32 %v3477_v48, %v3337_v49  ;;  %2962 = vmatmul.bf16.gmra.mxu2 %v14173_v8  ;;  %v3927_v48 = vld [vmem:[#allocation3 + $0xc] sm:$0xf]  ;;  %v14238_v43 = vld [vmem:[#allocation9 + $0x80] sm:$0xff] }
 0x216   : > { %v3482_v57 = vpop.f32.mrf.mxu0  ;;  %v3106_v8 = vpack.c.b16 %v3093_v4, %v3093_v4  ;;  %v14258_v49 = vld [vmem:[#allocation9 + $0xc0] sm:$0xff]  ;;  %4546 = vmatpush.bf16.msrb.mxu3 %v14238_v43  ;;  %v16066_v4 = vld [vmem:[#allocation2 + $0x6c] sm:$0xf0] }
 0x217   : > { %v3281_v52 = vpop.f32.mrf.mxu3  ;;  %v16036_v28 = vpop.f32.mrf.mxu1  ;;  %v3688_v9 = vshrl.u32 %v3663_v37, 16  ;;  %v3564_v39 = vmul.f32 %v16020_v63, %v3536_v22  ;;  %v3691_v36 = vshll.u32 %v3663_v37, 16  ;;  %4799 = vmatpush.bf16.msrb.mxu0 %v14258_v49 }
 0x218   : > { %v2923_v55 = vpop.f32.mrf.mxu2  ;;  %v16060_v52 = vpack.c.b16 %v4062_v3, %v4062_v3  ;;  %v3203_v46 = vshll.u32 %v3106_v8, 16 }
 0x219   : > { %v3690_v0 = vrot.slane %v3688_v9, 7  ;;  %v3592_v11 = vadd.f32 %v16026_v29, %v3564_v39  ;;  %v14174_v9 = vld [vmem:[#allocation2 + $0x68] sm:$0xff] }
 0x21a   : > { %v4172_v55 = vshll.u32 %v16060_v52, 16 }
 0x21b   : > { %v3693_v23 = vor.u32 %v3691_v36, %v3690_v0  ;;  %v3616_v15 = vmax.f32 %v3592_v11, 0.0  ;;  %v3694_v36 = vrot.slane %v3690_v0, 4  ;;  %v4170_v0 = vor.u32 %v4168_v51, %v16042_v19  ;;  %v14680_v51 = vld [vmem:[#allocation2 + $0x60] sm:$0xe] }
 0x21d   : > { %v3928_v50 = vsel %vm15326_vm4, %v3693_v23, %v3927_v48  ;;  %v3664_v12 = vpack.c.bf16 %v3616_v15, %v3616_v15 }
 0x21e   : > { %3929 = vst [vmem:[#allocation3 + $0xc] sm:$0xf] %v3928_v50  ;;  %v3485_v60 = vpop.f32.mrf.mxu0  ;;  %v3201_v50 = vor.u32 %v3199_v1, %v16045_v27 }
 0x21f   : > { %v3283_v13 = vpop.f32.mrf.mxu3  ;;  %v16048_v42 = vpop.f32.mrf.mxu1  ;;  %v3696_v33 = vshrl.u32 %v3664_v12, 16  ;;  %v3699_v22 = vshll.u32 %v3664_v12, 16  ;;  %v3205_v12 = vrot.slane %v3203_v46, 1  ;;  %v14679_v46 = vld [vmem:[#allocation2 + $0x60] sm:$0xf0] }
 0x220   : > { %v2925_v5 = vpop.f32.mrf.mxu2  ;;  %v14681_v54 = vor.u32 %v14680_v51, %v14679_v46 }
 0x221   : > { %v3698_v37 = vrot.slane %v3696_v33, 7  ;;  %v2981_v45 = vadd.f32 %v2925_v5, %v15655_v34  ;;  %3524 = vmatmul.bf16.gmra.mxu0 %v3403_v31  ;;  %v4885_v34 = vld [vmem:[#allocation2 + $0x6c] sm:$0xff]  }
 0x222   : > { %4294 = vmatmul.bf16.gmra.mxu1 %v4167_v40 }
 0x223   : > { %v3701_v11 = vor.u32 %v3699_v22, %v3698_v37  ;;  %v3703_v48 = vrot.slane %v3698_v37, 4  ;;  %v3339_v40 = vadd.f32 %v3283_v13, %v2981_v45  ;;  %v3206_v37 = vsel %vm1378_vm6, %v3201_v50, %v3205_v12  ;;  %v16095_v12 = vld [vmem:[#allocation2 + $0x68] sm:$0xff] }
 0x224   : > { %3325 = vmatmul.bf16.gmra.mxu3 %v3198_v53  ;;  %v4174_v53 = vrot.slane %v4172_v55, 1  ;;  %v4454_v50 = vrot.slane %v14681_v54, 1  ;;  %v14246_v54 = vld [vmem:[#allocation2 + $0x6c] sm:$0xff] }
 0x225   : > { %v3702_v3 = vsel %vm15333_vm5, %v3694_v36, %v3701_v11  ;;  %v3711_v23 = vsel %vm15333_vm5, %v3703_v48, %v15304_v21  ;;  %v3538_v15 = vadd.f32 %v3482_v57, %v3339_v40  ;;  %2967 = vmatmul.bf16.gmra.mxu2 %v14174_v9  ;;  %v3404_v57 = vrot.slane %v3106_v8, 1  ;;  %v14175_v11 = vld [vmem:[#allocation2 + $0x70] sm:$0xff] }
 0x226   : > { %3930 = vst [vmem:[#allocation3 + $0x10] sm:$0xf] %v3702_v3  ;;  %v3487_v17 = vpop.f32.mrf.mxu0  ;;  %v4175_v5 = vsel %vm1378_vm6, %v4170_v0, %v4174_v53 }
 0x227   : > { %v3286_v39 = vpop.f32.mrf.mxu3  ;;  %v4257_v25 = vpop.f32.mrf.mxu1  ;;  %3931 = vst [vmem:[#allocation3 + $0x14] sm:$0xf] %v3711_v23  ;;  %v3566_v13 = vmul.f32 %v16020_v63, %v3538_v15  ;;  %v3405_v9 = vsel %vm1758_vm7, %v3402_v10, %v3404_v57  ;;  %v4990_v10 = vshrl.u32 %v4885_v34, 16  ;;  %v14312_v57 = vld [vmem:[#allocation9 + $0x1b8] sm:$0xff] }
 0x228   : > { %v2928_v31 = vpop.f32.mrf.mxu2  ;;  %v4992_v25 = vshll.u32 %v4885_v34, 16  ;;  %5600 = vmatpush.bf16.msra.mxu3 %v14312_v57  ;;  %v14825_v57 = vld [vmem:[#allocation2 + $0x60] sm:$0xff]  }
 0x229   : > { %v3594_v33 = vadd.f32 %v16026_v29, %v3566_v13  ;;  %v2982_v30 = vadd.f32 %v2928_v31, %v15679_v24  ;;  %v16085_v24 = vld [vmem:[#allocation2 + $0x74] sm:$0xff]  ;;  %v4455_v31 = vrot.slane %v16095_v12, 1 }
 0x22a   : > { %v4994_v3 = vrot.slane %v4992_v25, 1  ;;  %v4997_v23 = vshll.u32 %v16085_v24, 16 }
 0x22b   : > { %v3618_v18 = vmax.f32 %v3594_v33, 0.0  ;;  %v3340_v19 = vadd.f32 %v3286_v39, %v2982_v30 }
 0x22c   : > { %v4995_v33 = vor.u32 %v4994_v3, %v4990_v10  ;;  %v4999_v34 = vrot.slane %v4997_v23, 1  ;;  %v16108_v3 = vld [vmem:[#allocation2 + $0x7c] sm:$0xff] }
 0x22d   : > { %v3666_v22 = vpack.c.bf16 %v3618_v18, %v3618_v18  ;;  %v3539_v45 = vadd.f32 %v3485_v60, %v3340_v19  ;;  %v14339_v19 = vld [vmem:[#allocation9 + $0x238] sm:$0xff] }
 0x22e   : > { %v3490_v27 = vpop.f32.mrf.mxu0  ;;  %6155 = vmatpush.bf16.msra.mxu1 %v14339_v19 }
 0x22f   : > { %v3288_v43 = vpop.f32.mrf.mxu3  ;;  %v16078_v49 = vpop.f32.mrf.mxu1  ;;  %v3714_v1 = vshrl.u32 %v3666_v22, 16  ;;  %v3567_v8 = vmul.f32 %v16020_v63, %v3539_v45  ;;  %v3717_v36 = vshll.u32 %v3666_v22, 16 }
 0x230   : > { %v2930_v39 = vpop.f32.mrf.mxu2  ;;  %v14292_v43 = vld [vmem:[#allocation9 + $0x178] sm:$0xff] }
 0x231   : > { %v3716_v55 = vrot.slane %v3714_v1, 7  ;;  %v3595_v60 = vadd.f32 %v16026_v29, %v3567_v8  ;;  %3529 = vmatmul.bf16.gmra.mxu0 %v3405_v9  ;;  %5347 = vmatpush.bf16.msra.mxu2 %v14292_v43  ;;  %v4456_v1 = vsel %vm1758_vm7, %v4454_v50, %v4455_v31  ;;  %v5000_v8 = vsel %vm1378_vm6, %v4995_v33, %v4999_v34 }
 0x232   : > { %4299 = vmatmul.bf16.gmra.mxu1 %v4175_v5  ;;  %v14331_v5 = vld [vmem:[#allocation9 + $0x1f8] sm:$0xff] }
 0x233   : > { %v3719_v15 = vor.u32 %v3717_v36, %v3716_v55  ;;  %v3619_v17 = vmax.f32 %v3595_v60, 0.0  ;;  %5957 = vmatpush.bf16.msra.mxu0 %v14331_v5  ;;  %v3721_v46 = vrot.slane %v3716_v55, 4 }
 0x234   : > { %3330 = vmatmul.bf16.gmra.mxu3 %v3206_v37 }
 0x235   : > { %v3720_v0 = vsel %vm15333_vm5, %v15318_v41, %v3719_v15  ;;  %v3667_v53 = vpack.c.bf16 %v3619_v17, %v3619_v17  ;;  %2972 = vmatmul.bf16.gmra.mxu2 %v14175_v11 }
 0x236   : > { %3932 = vst [vmem:[#allocation3 + $0x18] sm:$0xf] %v3720_v0  ;;  %v3492_v13 = vpop.f32.mrf.mxu0 }
 0x237   : > { %v3291_v48 = vpop.f32.mrf.mxu3  ;;  %v16089_v40 = vpop.f32.mrf.mxu1  ;;  %v3723_v30 = vshrl.u32 %v3667_v53, 16  ;;  %v3726_v22 = vshll.u32 %v3667_v53, 16  ;;  %v5005_v53 = vshll.u32 %v16108_v3, 16 }
 0x238   : > { %v2933_v18 = vpop.f32.mrf.mxu2 }
 0x239   : > { %v3725_v37 = vrot.slane %v3723_v30, 7  ;;  %v2984_v45 = vadd.f32 %v2933_v18, %v15711_v35  ;;  %v5007_v19 = vrot.slane %v5005_v53, 1 }
 0x23b   : > { %v3728_v51 = vor.u32 %v3726_v22, %v3725_v37  ;;  %v3730_v39 = vrot.slane %v3725_v37, 4  ;;  %v3342_v36 = vadd.f32 %v3291_v48, %v2984_v45  ;;  %v16118_v22 = vld [vmem:[#allocation2 + $0x70] sm:$0xff] }
 0x23c   : > { %v4457_v45 = vrot.slane %v16118_v22, 1 }
 0x23d   : > { %v3729_v60 = vsel %vm15333_vm5, %v3721_v46, %v3728_v51  ;;  %v3738_v35 = vsel %vm15333_vm5, %v3730_v39, %v15304_v21  ;;  %v3541_v11 = vadd.f32 %v3490_v27, %v3342_v36  ;;  %v5001_v27 = vshrl.u32 %v16085_v24, 16 }
 0x23e   : > { %3933 = vst [vmem:[#allocation3 + $0x1c] sm:$0xf] %v3729_v60  ;;  %v3495_v10 = vpop.f32.mrf.mxu0  ;;  %v4458_v39 = vsel %vm1758_vm7, %v4455_v31, %v4457_v45 }
 0x23f   : > { %v3293_v9 = vpop.f32.mrf.mxu3  ;;  %v4265_v25 = vpop.f32.mrf.mxu1  ;;  %3934 = vst [vmem:[#allocation3 + $0x20] sm:$0xf] %v3738_v35  ;;  %v3569_v55 = vmul.f32 %v16020_v63, %v3541_v11  ;;  %v5003_v18 = vor.u32 %v5001_v27, %v4999_v34  ;;  %v14247_v35 = vld [vmem:[#allocation2 + $0x74] sm:$0xff] }
 0x240   : > { %v2935_v23 = vpop.f32.mrf.mxu2 }
 0x241   : > { %v3597_v48 = vadd.f32 %v16026_v29, %v3569_v55  ;;  %v2985_v15 = vadd.f32 %v2935_v23, %v15732_v2  ;;  %4800 = vmatmul.bf16.vlgmr.msrb.gmra.mxu0 %v14246_v54  ;;  %v16131_v54 = vld [vmem:[#allocation2 + $0x84] sm:$0xff] }
 0x242   : > { %5157 = vmatmul.bf16.vlgmr.msrb.gmra.mxu1 %v5000_v8  ;;  %v14291_v55 = vld [vmem:[#allocation9 + $0x170] sm:$0xff] }
 0x243   : > { %v3621_v50 = vmax.f32 %v3597_v48, 0.0  ;;  %v3343_v33 = vadd.f32 %v3293_v9, %v2985_v15  ;;  %v14311_v23 = vld [vmem:[#allocation9 + $0x1b0] sm:$0xff]  ;;  %5348 = vmatpush.bf16.msra.mxu2 %v14291_v55 }
 0x244   : > { %4547 = vmatmul.bf16.vlgmr.msrb.gmra.mxu3 %v4456_v1  ;;  %v14330_v48 = vld [vmem:[#allocation9 + $0x1f0] sm:$0xff] }
 0x245   : > { %v3669_v30 = vpack.c.bf16 %v3621_v50, %v3621_v50  ;;  %v3542_v43 = vadd.f32 %v3492_v13, %v3343_v33  ;;  %4373 = vmatmul.bf16.vlgmr.msrb.gmra.mxu2 %v14825_v57  ;;  %v5008_v13 = vsel %vm1378_vm6, %v5003_v18, %v5007_v19  ;;  %5601 = vmatpush.bf16.msra.mxu3 %v14311_v23 }
 0x246   : > { %v3497_v5 = vpop.f32.mrf.mxu0  ;;  %5958 = vmatpush.bf16.msra.mxu0 %v14330_v48  ;;  %v14248_v48 = vld [vmem:[#allocation2 + $0x7c] sm:$0xff] }
 0x247   : > { %v3296_v17 = vpop.f32.mrf.mxu3  ;;  %v16113_v0 = vpop.f32.mrf.mxu1  ;;  %v3741_v37 = vshrl.u32 %v3669_v30, 16  ;;  %v3570_v2 = vmul.f32 %v16020_v63, %v3542_v43  ;;  %v3744_v1 = vshll.u32 %v3669_v30, 16  ;;  %v5009_v30 = vshrl.u32 %v16108_v3, 16 }
 0x248   : > { %v2938_v25 = vpop.f32.mrf.mxu2  ;;  %v14338_v17 = vld [vmem:[#allocation9 + $0x230] sm:$0xff]  ;;  %v5013_v43 = vshll.u32 %v16131_v54, 16 }
 0x249   : > { %v3743_v24 = vrot.slane %v3741_v37, 7  ;;  %v3598_v8 = vadd.f32 %v16026_v29, %v3570_v2  ;;  %6156 = vmatpush.bf16.msra.mxu1 %v14338_v17  ;;  %v16152_v17 = vld [vmem:[#allocation2 + $0x8c] sm:$0xff] }
 0x24b   : > { %v3746_v51 = vor.u32 %v3744_v1, %v3743_v24  ;;  %v3622_v34 = vmax.f32 %v3598_v8, 0.0  ;;  %v3748_v57 = vrot.slane %v3743_v24, 4  ;;  %v5011_v8 = vor.u32 %v5009_v30, %v5007_v19 }
 0x24d   : > { %v3747_v36 = vsel %vm15333_vm5, %v15318_v41, %v3746_v51  ;;  %v3670_v60 = vpack.c.bf16 %v3622_v34, %v3622_v34  ;;  %v16143_v51 = vld [vmem:[#allocation2 + $0x78] sm:$0xff] }
 0x24e   : > { %3935 = vst [vmem:[#allocation3 + $0x24] sm:$0xf] %v3747_v36  ;;  %v3500_v11 = vpop.f32.mrf.mxu0 }
 0x24f   : > { %v3298_v9 = vpop.f32.mrf.mxu3  ;;  %v16122_v46 = vpop.f32.mrf.mxu1  ;;  %v3750_v10 = vshrl.u32 %v3670_v60, 16  ;;  %v3753_v31 = vshll.u32 %v3670_v60, 16 }
 0x250   : > { %v2940_v15 = vpop.f32.mrf.mxu2 }
 0x251   : > { %v3752_v27 = vrot.slane %v3750_v10, 7  ;;  %v2987_v53 = vadd.f32 %v2940_v15, %v15764_v20  ;;  %4805 = vmatmul.bf16.gmra.mxu0 %v14247_v35 }
 0x252   : > { %5162 = vmatmul.bf16.gmra.mxu1 %v5008_v13  ;;  %v5015_v13 = vrot.slane %v5013_v43, 1 }
 0x253   : > { %v3755_v18 = vor.u32 %v3753_v31, %v3752_v27  ;;  %v3757_v37 = vrot.slane %v3752_v27, 4  ;;  %v3345_v2 = vadd.f32 %v3298_v9, %v2987_v53  ;;  %v4459_v9 = vrot.slane %v16143_v51, 1 }
 0x254   : > { %4552 = vmatmul.bf16.gmra.mxu3 %v4458_v39 }
 0x255   : > { %v3756_v25 = vsel %vm15333_vm5, %v3748_v57, %v3755_v18  ;;  %v3765_v20 = vsel %vm15333_vm5, %v3757_v37, %v15304_v21  ;;  %v3544_v1 = vadd.f32 %v3497_v5, %v3345_v2  ;;  %4378 = vmatmul.bf16.gmra.mxu2 %v16095_v12  ;;  %v5016_v12 = vsel %vm1378_vm6, %v5011_v8, %v5015_v13  ;;  %v16160_v37 = vld [vmem:[#allocation3 + $0x20] sm:$0xff] }
 0x256   : > { %3936 = vst [vmem:[#allocation3 + $0x28] sm:$0xf] %v3756_v25  ;;  %v3502_v3 = vpop.f32.mrf.mxu0  ;;  %v4460_v10 = vsel %vm1758_vm7, %v4457_v45, %v4459_v9  ;;  %v5017_v45 = vshrl.u32 %v16131_v54, 16 }
 0x257   : > { %v3301_v50 = vpop.f32.mrf.mxu3  ;;  %v4272_v33 = vpop.f32.mrf.mxu1  ;;  %3937 = vst [vmem:[#allocation3 + $0x2c] sm:$0xf] %v3765_v20  ;;  %v3572_v24 = vmul.f32 %v16020_v63, %v3544_v1  ;;  %v16168_v3 = vld [vmem:[#allocation2 + $0x80] sm:$0xff] }
 0x258   : > { %v2943_v34 = vpop.f32.mrf.mxu2  ;;  %v4461_v54 = vrot.slane %v16168_v3, 1  ;;  %v5019_v8 = vor.u32 %v5017_v45, %v5015_v13 }
 0x259   : > { %v3600_v39 = vadd.f32 %v16026_v29, %v3572_v24  ;;  %v2988_v36 = vadd.f32 %v2943_v34, %v15786_v58 }
 0x25b   : > { %v3624_v35 = vmax.f32 %v3600_v39, 0.0  ;;  %v3346_v19 = vadd.f32 %v3301_v50, %v2988_v36  ;;  %v14290_v39 = vld [vmem:[#allocation9 + $0x168] sm:$0xff] }
 0x25c   : > { %v14310_v36 = vld [vmem:[#allocation9 + $0x1a8] sm:$0xff]  ;;  %5349 = vmatpush.bf16.msra.mxu2 %v14290_v39 }
 0x25d   : > { %v3672_v55 = vpack.c.bf16 %v3624_v35, %v3624_v35  ;;  %v3545_v23 = vadd.f32 %v3500_v11, %v3346_v19  ;;  %v5021_v11 = vshll.u32 %v16152_v17, 16  ;;  %5602 = vmatpush.bf16.msra.mxu3 %v14310_v36 }
 0x25e   : > { %v3505_v15 = vpop.f32.mrf.mxu0  ;;  %v16162_v2 = vld [vmem:[#allocation3 + $0x28] sm:$0xff] }
 0x25f   : > { %v3303_v60 = vpop.f32.mrf.mxu3  ;;  %v16148_v5 = vpop.f32.mrf.mxu1  ;;  %v3768_v27 = vshrl.u32 %v3672_v55, 16  ;;  %v3573_v58 = vmul.f32 %v16020_v63, %v3545_v23  ;;  %v3771_v33 = vshll.u32 %v3672_v55, 16  ;;  %v5023_v24 = vrot.slane %v5021_v11, 1 }
 0x260   : > { %v2945_v31 = vpop.f32.mrf.mxu2  ;;  %v14329_v60 = vld [vmem:[#allocation9 + $0x1e8] sm:$0xff]  ;;  %v8658_v35 = vrot.slane %v16162_v2, 1 }
 0x261   : > { %v3770_v53 = vrot.slane %v3768_v27, 7  ;;  %v3601_v30 = vadd.f32 %v16026_v29, %v3573_v58  ;;  %4810 = vmatmul.bf16.gmra.mxu0 %v14248_v48  ;;  %v4462_v58 = vsel %vm1758_vm7, %v4459_v9, %v4461_v54  ;;  %v5024_v31 = vsel %vm1378_vm6, %v5019_v8, %v5023_v24 }
 0x262   : > { %5167 = vmatmul.bf16.gmra.mxu1 %v5016_v12  ;;  %v17432_v12 = vrot.slane %v16160_v37, 1  ;;  %5959 = vmatpush.bf16.msra.mxu0 %v14329_v60 }
 0x263   : > { %v3773_v57 = vor.u32 %v3771_v33, %v3770_v53  ;;  %v3625_v18 = vmax.f32 %v3601_v30, 0.0 }
 0x264   : > { %4557 = vmatmul.bf16.gmra.mxu3 %v4460_v10  ;;  %v14337_v10 = vld [vmem:[#allocation9 + $0x228] sm:$0xff]  ;;  %v16179_v13 = vsel %vm1758_vm7, %v17432_v12, %v8658_v35 }
 0x265   : > { %v3774_v25 = vsel %vm15333_vm5, %v15318_v41, %v3773_v57  ;;  %v3673_v20 = vpack.c.bf16 %v3625_v18, %v3625_v18  ;;  %4383 = vmatmul.bf16.gmra.mxu2 %v16118_v22  ;;  %6157 = vmatpush.bf16.msra.mxu1 %v14337_v10 }
 0x266   : > { %3938 = vst [vmem:[#allocation3 + $0x30] sm:$0xf] %v3774_v25  ;;  %v3507_v1 = vpop.f32.mrf.mxu0  ;;  %v14249_v25 = vld [vmem:[#allocation2 + $0x84] sm:$0xff] }
 0x267   : > { %v3306_v50 = vpop.f32.mrf.mxu3  ;;  %v16156_v43 = vpop.f32.mrf.mxu1  ;;  %v3777_v34 = vshrl.u32 %v3673_v20, 16  ;;  %v3780_v22 = vshll.u32 %v3673_v20, 16  ;;  %v16190_v20 = vld [vmem:[#allocation2 + $0x94] sm:$0xff] }
 0x268   : > { %v2948_v19 = vpop.f32.mrf.mxu2  ;;  %v5029_v60 = vshll.u32 %v16190_v20, 16 }
 0x269   : > { %v3779_v55 = vrot.slane %v3777_v34, 7  ;;  %v2990_v23 = vadd.f32 %v2948_v19, %v15819_v62  ;;  %v3775_v62 = vrot.slane %v3770_v53, 4 }
 0x26b   : > { %v3782_v33 = vor.u32 %v3780_v22, %v3779_v55  ;;  %v3784_v30 = vrot.slane %v3779_v55, 4  ;;  %v3348_v45 = vadd.f32 %v3306_v50, %v2990_v23 }
 0x26d   : > { %v3783_v11 = vsel %vm15333_vm5, %v3775_v62, %v3782_v33  ;;  %v3792_v57 = vsel %vm15333_vm5, %v3784_v30, %v15304_v21  ;;  %v3547_v18 = vadd.f32 %v3505_v15, %v3348_v45  ;;  %v5025_v15 = vshrl.u32 %v16152_v17, 16  ;;  %v16201_v62 = vld [vmem:[#allocation2 + $0x88] sm:$0xff] }
 0x26e   : > { %3939 = vst [vmem:[#allocation3 + $0x34] sm:$0xf] %v3783_v11  ;;  %v3510_v9 = vpop.f32.mrf.mxu0  ;;  %v4463_v33 = vrot.slane %v16201_v62, 1 }
 0x26f   : > { %v3308_v48 = vpop.f32.mrf.mxu3  ;;  %v4280_v27 = vpop.f32.mrf.mxu1  ;;  %3940 = vst [vmem:[#allocation3 + $0x38] sm:$0xf] %v3792_v57  ;;  %v3575_v53 = vmul.f32 %v16020_v63, %v3547_v18 }
 0x270   : > { %v2950_v8 = vpop.f32.mrf.mxu2  ;;  %v5027_v27 = vor.u32 %v5025_v15, %v5023_v24 }
 0x271   : > { %v3603_v50 = vadd.f32 %v16026_v29, %v3575_v53  ;;  %v2991_v34 = vadd.f32 %v2950_v8, %v15840_v38  ;;  %4815 = vmatmul.bf16.gmra.mxu0 %v14249_v25  ;;  %v4464_v25 = vsel %vm1758_vm7, %v4461_v54, %v4463_v33  ;;  %v14250_v8 = vld [vmem:[#allocation2 + $0x8c] sm:$0xff] }
 0x272   : > { %5172 = vmatmul.bf16.gmra.mxu1 %v5024_v31 }
 0x273   : > { %v3627_v19 = vmax.f32 %v3603_v50, 0.0  ;;  %v3349_v10 = vadd.f32 %v3308_v48, %v2991_v34 }
 0x274   : > { %4562 = vmatmul.bf16.gmra.mxu3 %v4462_v58  ;;  %v5031_v58 = vrot.slane %v5029_v60, 1  ;;  %v14289_v60 = vld [vmem:[#allocation9 + $0x160] sm:$0xff] }
 0x275   : > { %v3675_v55 = vpack.c.bf16 %v3627_v19, %v3627_v19  ;;  %v3548_v22 = vadd.f32 %v3507_v1, %v3349_v10  ;;  %4388 = vmatmul.bf16.gmra.mxu2 %v16143_v51  ;;  %v14444_v57 = vld [vmem:[#allocation3 + $0x30] sm:$0xff]  ;;  %v14309_v19 = vld [vmem:[#allocation9 + $0x1a0] sm:$0xff] }
 0x276   : > { %v3512_v23 = vpop.f32.mrf.mxu0  ;;  %v5032_v51 = vsel %vm1378_vm6, %v5027_v27, %v5031_v58  ;;  %v8660_v50 = vrot.slane %v14444_v57, 1  ;;  %v14328_v10 = vld [vmem:[#allocation9 + $0x1e0] sm:$0xff]  ;;  %5350 = vmatpush.bf16.msra.mxu2 %v14289_v60  ;;  %5603 = vmatpush.bf16.msra.mxu3 %v14309_v19 }
 0x277   : > { %v3311_v39 = vpop.f32.mrf.mxu3  ;;  %v16195_v36 = vpop.f32.mrf.mxu1  ;;  %v3795_v31 = vshrl.u32 %v3675_v55, 16  ;;  %v3576_v38 = vmul.f32 %v16020_v63, %v3548_v22  ;;  %v3798_v45 = vshll.u32 %v3675_v55, 16  ;;  %v14336_v22 = vld [vmem:[#allocation9 + $0x220] sm:$0xff]  ;;  %5960 = vmatpush.bf16.msra.mxu0 %v14328_v10 }
 0x278   : > { %v2953_v30 = vpop.f32.mrf.mxu2  ;;  %v16216_v39 = vld [vmem:[#allocation2 + $0x9c] sm:$0xff]  ;;  %v16221_v54 = vsel %vm1758_vm7, %v8658_v35, %v8660_v50  ;;  %6158 = vmatpush.bf16.msra.mxu1 %v14336_v22 }
 0x279   : > { %v3797_v17 = vrot.slane %v3795_v31, 7  ;;  %v3604_v11 = vadd.f32 %v16026_v29, %v3576_v38  ;;  %v5037_v57 = vshll.u32 %v16216_v39, 16 }
 0x27b   : > { %v3800_v24 = vor.u32 %v3798_v45, %v3797_v17  ;;  %v3628_v18 = vmax.f32 %v3604_v11, 0.0  ;;  %v5033_v11 = vshrl.u32 %v16190_v20, 16 }
 0x27d   : > { %v3801_v9 = vsel %vm15333_vm5, %v15318_v41, %v3800_v24  ;;  %v3676_v53 = vpack.c.bf16 %v3628_v18, %v3628_v18 }
 0x27e   : > { %3941 = vst [vmem:[#allocation3 + $0x3c] sm:$0xf] %v3801_v9  ;;  %v3515_v34 = vpop.f32.mrf.mxu0 }
 0x27f   : > { %v3313_v48 = vpop.f32.mrf.mxu3  ;;  %v16205_v1 = vpop.f32.mrf.mxu1  ;;  %v3804_v15 = vshrl.u32 %v3676_v53, 16  ;;  %v3807_v31 = vshll.u32 %v3676_v53, 16  ;;  %v5035_v53 = vor.u32 %v5033_v11, %v5031_v58 }
 0x280   : > { %v2955_v55 = vpop.f32.mrf.mxu2 }
 0x281   : > { %v3806_v27 = vrot.slane %v3804_v15, 7  ;;  %v2993_v38 = vadd.f32 %v2955_v55, %v15872_v44  ;;  %4820 = vmatmul.bf16.gmra.mxu0 %v14250_v8  ;;  %v16235_v8 = vld [vmem:[#allocation2 + $0x90] sm:$0xff] }
 0x282   : > { %5177 = vmatmul.bf16.gmra.mxu1 %v5032_v51  ;;  %v3802_v51 = vrot.slane %v3797_v17, 4  ;;  %v5039_v17 = vrot.slane %v5037_v57, 1  ;;  %v4465_v15 = vrot.slane %v16235_v8, 1  ;;  %v14251_v57 = vld [vmem:[#allocation2 + $0x94] sm:$0xff] }
 0x283   : > { %v3809_v24 = vor.u32 %v3807_v31, %v3806_v27  ;;  %v3811_v2 = vrot.slane %v3806_v27, 4  ;;  %v3351_v18 = vadd.f32 %v3313_v48, %v2993_v38 }
 0x284   : > { %4567 = vmatmul.bf16.gmra.mxu3 %v4464_v25  ;;  %v5040_v58 = vsel %vm1378_vm6, %v5035_v53, %v5039_v17  ;;  %v4466_v38 = vsel %vm1758_vm7, %v4463_v33, %v4465_v15  ;;  %v5041_v33 = vshrl.u32 %v16216_v39, 16 }
 0x285   : > { %v3810_v35 = vsel %vm15333_vm5, %v3802_v51, %v3809_v24  ;;  %v3819_v44 = vsel %vm15333_vm5, %v3811_v2, %v15304_v21  ;;  %v3550_v25 = vadd.f32 %v3512_v23, %v3351_v18  ;;  %4393 = vmatmul.bf16.gmra.mxu2 %v16168_v3  ;;  %v16232_v9 = vld [vmem:[#allocation3 + $0x38] sm:$0xff] }
 0x286   : > { %3942 = vst [vmem:[#allocation3 + $0x40] sm:$0xf] %v3810_v35  ;;  %v3517_v20 = vpop.f32.mrf.mxu0  ;;  %v8662_v19 = vrot.slane %v16232_v9, 1  ;;  %v5043_v39 = vor.u32 %v5041_v33, %v5039_v17 }
 0x287   : > { %v3316_v30 = vpop.f32.mrf.mxu3  ;;  %v4287_v45 = vpop.f32.mrf.mxu1  ;;  %3943 = vst [vmem:[#allocation3 + $0x44] sm:$0xf] %v3819_v44  ;;  %v3578_v48 = vmul.f32 %v16020_v63, %v3550_v25 }
 0x288   : > { %v2958_v60 = vpop.f32.mrf.mxu2  ;;  %v16245_v22 = vsel %vm1758_vm7, %v8660_v50, %v8662_v19 }
 0x289   : > { %v3606_v23 = vadd.f32 %v16026_v29, %v3578_v48  ;;  %v2994_v3 = vadd.f32 %v2958_v60, %v15901_v59  ;;  %v16250_v59 = vld [vmem:[#allocation2 + $0xa4] sm:$0xff] }
 0x28b   : > { %v3630_v27 = vmax.f32 %v3606_v23, 0.0  ;;  %v3352_v31 = vadd.f32 %v3316_v30, %v2994_v3  ;;  %v16264_v3 = vld [vmem:[#allocation2 + $0x98] sm:$0xff] }
 0x28d   : > { %v3678_v45 = vpack.c.bf16 %v3630_v27, %v3630_v27  ;;  %v3551_v11 = vadd.f32 %v3515_v34, %v3352_v31  ;;  %v5045_v34 = vshll.u32 %v16250_v59, 16  ;;  %v14288_v31 = vld [vmem:[#allocation9 + $0x158] sm:$0xff] }
 0x28e   : > { %v3520_v51 = vpop.f32.mrf.mxu0  ;;  %v16258_v53 = vld [vmem:[#allocation3 + $0x40] sm:$0xff]  ;;  %5351 = vmatpush.bf16.msra.mxu2 %v14288_v31 }
 0x28f   : > { %v3318_v10 = vpop.f32.mrf.mxu3  ;;  %v16241_v55 = vpop.f32.mrf.mxu1  ;;  %v3822_v24 = vshrl.u32 %v3678_v45, 16  ;;  %v3579_v2 = vmul.f32 %v16020_v63, %v3551_v11  ;;  %v3825_v35 = vshll.u32 %v3678_v45, 16  ;;  %v14327_v45 = vld [vmem:[#allocation9 + $0x1d8] sm:$0xff]  ;;  %v8664_v11 = vrot.slane %v16258_v53, 1  ;;  %v14252_v31 = vld [vmem:[#allocation2 + $0x9c] sm:$0xff] }
 0x290   : > { %v2960_v18 = vpop.f32.mrf.mxu2  ;;  %v4467_v10 = vrot.slane %v16264_v3, 1  ;;  %5961 = vmatpush.bf16.msra.mxu0 %v14327_v45 }
 0x291   : > { %v3824_v50 = vrot.slane %v3822_v24, 7  ;;  %v3607_v30 = vadd.f32 %v16026_v29, %v3579_v2  ;;  %4825 = vmatmul.bf16.gmra.mxu0 %v14251_v57  ;;  %v14335_v24 = vld [vmem:[#allocation9 + $0x218] sm:$0xff]  ;;  %v16272_v17 = vsel %vm1758_vm7, %v8662_v19, %v8664_v11 }
 0x292   : > { %5182 = vmatmul.bf16.gmra.mxu1 %v5040_v58  ;;  %v5047_v58 = vrot.slane %v5045_v34, 1  ;;  %v4468_v33 = vsel %vm1758_vm7, %v4465_v15, %v4467_v10 }
 0x293   : > { %v3827_v9 = vor.u32 %v3825_v35, %v3824_v50  ;;  %v3631_v20 = vmax.f32 %v3607_v30, 0.0  ;;  %6159 = vmatpush.bf16.msra.mxu1 %v14335_v24 }
 0x294   : > { %4572 = vmatmul.bf16.gmra.mxu3 %v4466_v38  ;;  %v14308_v38 = vld [vmem:[#allocation9 + $0x198] sm:$0xff]  ;;  %v5048_v34 = vsel %vm1378_vm6, %v5043_v39, %v5047_v58 }
 0x295   : > { %v3828_v48 = vsel %vm15333_vm5, %v15318_v41, %v3827_v9  ;;  %v3679_v60 = vpack.c.bf16 %v3631_v20, %v3631_v20  ;;  %4398 = vmatmul.bf16.gmra.mxu2 %v16201_v62  ;;  %5604 = vmatpush.bf16.msra.mxu3 %v14308_v38  ;;  %v3829_v9 = vrot.slane %v3824_v50, 4  ;;  %v16283_v39 = vld [vmem:[#allocation2 + $0xac] sm:$0xff] }
 0x296   : > { %3944 = vst [vmem:[#allocation3 + $0x48] sm:$0xf] %v3828_v48  ;;  %v3522_v23 = vpop.f32.mrf.mxu0 }
 0x297   : > { %v3321_v44 = vpop.f32.mrf.mxu3  ;;  %v16254_v25 = vpop.f32.mrf.mxu1  ;;  %v3831_v27 = vshrl.u32 %v3679_v60, 16  ;;  %v3834_v18 = vshll.u32 %v3679_v60, 16 }
 0x298   : > { %v2963_v57 = vpop.f32.mrf.mxu2 }
 0x299   : > { %v3833_v2 = vrot.slane %v3831_v27, 7  ;;  %v2996_v62 = vadd.f32 %v2963_v57, %v15934_v16 }
 0x29b   : > { %v3836_v20 = vor.u32 %v3834_v18, %v3833_v2  ;;  %v3838_v16 = vrot.slane %v3833_v2, 4  ;;  %v3354_v48 = vadd.f32 %v3321_v44, %v2996_v62  ;;  %v5053_v2 = vshll.u32 %v16283_v39, 16 }
 0x29d   : > { %v3837_v60 = vsel %vm15333_vm5, %v3829_v9, %v3836_v20  ;;  %v3846_v19 = vsel %vm15333_vm5, %v3838_v16, %v15304_v21  ;;  %v3553_v27 = vadd.f32 %v3520_v51, %v3354_v48  ;;  %v5049_v51 = vshrl.u32 %v16250_v59, 16  ;;  %v16296_v48 = vld [vmem:[#allocation2 + $0xa0] sm:$0xff] }
 0x29e   : > { %3945 = vst [vmem:[#allocation3 + $0x4c] sm:$0xf] %v3837_v60  ;;  %v3525_v15 = vpop.f32.mrf.mxu0  ;;  %v5055_v20 = vrot.slane %v5053_v2, 1  ;;  %v4469_v60 = vrot.slane %v16296_v48, 1 }
 0x29f   : > { %v3323_v35 = vpop.f32.mrf.mxu3  ;;  %v4295_v30 = vpop.f32.mrf.mxu1  ;;  %3946 = vst [vmem:[#allocation3 + $0x50] sm:$0xf] %v3846_v19  ;;  %v3581_v50 = vmul.f32 %v16020_v63, %v3553_v27  ;;  %v5051_v9 = vor.u32 %v5049_v51, %v5047_v58  ;;  %v453_v19 = vld [vmem:[%s15273_s5 + $0x170] sm:$0xff]  ;;  %v14833_v15 = vld [vmem:[#allocation7] ss:$0 sm:$0xff]  ;;  %s11711_s5 = sshll.u32 %s11708_s7, 4  ;;  %s11712_s5 = int_to_ptr.hbm [resolvable:$true] %s11711_s5 }
 0x2a0   : > { %v2965_v38 = vpop.f32.mrf.mxu2  ;;  %s15037_s11 = sshra.s32 %s11712_s5, 4  ;;  %s15038_s11 = int_to_ptr.hbm [resolvable:$true] %s15037_s11 }
 0x2a1   : > { %v3609_v44 = vadd.f32 %v16026_v29, %v3581_v50  ;;  %v2997_v45 = vadd.f32 %v2965_v38, %v15955_v6  ;;  %4830 = vmatmul.bf16.gmra.mxu0 %v14252_v31  ;;  %v5056_v58 = vsel %vm1378_vm6, %v5051_v9, %v5055_v20  ;;  %s15039_s16 = scalar_lea.hbm %s15038_s11, 256  ;;  %p15044_p9 = scmp.lt.s32.totalorder %s15038_s11, %s17431_s8 }
 0x2a2   : > { %5187 = vmatmul.bf16.gmra.mxu1 %v5048_v34  ;;  %p15040_p1 = scmp.ne.s32.totalorder %s15038_s11, %s15039_s16  ;;  %p15045_p10 = scmp.lt.s32.totalorder %s15043_s23, %s15039_s16 }
 0x2a3   : > { %v3633_v18 = vmax.f32 %v3609_v44, 0.0  ;;  %v3355_v62 = vadd.f32 %v3323_v35, %v2997_v45  ;;  %v4470_v45 = vsel %vm1758_vm7, %v4467_v10, %v4469_v60 }
 0x2a4   : > { %4577 = vmatmul.bf16.gmra.mxu3 %v4468_v33  ;;  %p15041_p4 = pnand %p15040_p1, %p15239_p3  ;;  %p15046_p2 = por %p15045_p10, %p15044_p9 }
 0x2a5   : > { %v3681_v30 = vpack.c.bf16 %v3633_v18, %v3633_v18  ;;  %v3554_v33 = vadd.f32 %v3522_v23, %v3355_v62  ;;  %4403 = vmatmul.bf16.gmra.mxu2 %v16235_v8  ;;  %v505_v8 = vmul.f32 %v14833_v15, %v453_v19  ;;  %v16304_v38 = vld [vmem:[#allocation3 + $0x48] sm:$0xff] }
 0x2a6   : > { %v16293_v34 = vpop.f32.mrf.mxu0  ;;  %v14253_v18 = vld [vmem:[#allocation2 + $0xa4] sm:$0xff]  ;;  %v17433_v10 = vrot.slane %v16304_v38, 1  ;;  %p15042_p8 = pneg %p15041_p4 }
 0x2a7   : > { %v3326_v57 = vpop.f32.mrf.mxu3  ;;  %v16288_v24 = vpop.f32.mrf.mxu1  ;;  %v3849_v6 = vshrl.u32 %v3681_v30, 16  ;;  %v3582_v16 = vmul.f32 %v16020_v63, %v3554_v33  ;;  %v3852_v31 = vshll.u32 %v3681_v30, 16  ;;  %v16319_v33 = vld [vmem:[#allocation2 + $0xb4] sm:$0xff]  ;;  %v14334_v15 = vld [vmem:[#allocation9 + $0x210] sm:$0xff] }
 0x2a8   : > { %v2968_v59 = vpop.f32.mrf.mxu2  ;;  %6160 = vmatpush.bf16.msra.mxu1 %v14334_v15  ;;  %p15047_p11 = pnand %p15046_p2, %p15042_p8 }
 0x2a9   : > { %v3851_v27 = vrot.slane %v3849_v6, 7  ;;  %v3610_v35 = vadd.f32 %v16026_v29, %v3582_v16  ;;  %v14834_v29 = vld [vmem:[%s17425_s2] ss:$0 sm:$0xff]  ;;  %v14287_v6 = vld [vmem:[#allocation9 + $0x150] sm:$0xff] }
 0x2aa   : > { %v557_v57 = vadd.f32 %v14834_v29, %v505_v8  ;;  %v14307_v16 = vld [vmem:[#allocation9 + $0x190] sm:$0xff]  ;;  %v16328_v8 = vsel %vm1758_vm7, %v8664_v11, %v17433_v10  ;;  %5352 = vmatpush.bf16.msra.mxu2 %v14287_v6  ;;  %v14286_v6 = vld [vmem:[#allocation9 + $0x148] sm:$0xff] }
 0x2ab   : > { %v3854_v63 = vor.u32 %v3852_v31, %v3851_v27  ;;  %v3634_v44 = vmax.f32 %v3610_v35, 0.0  ;;  %v14326_v59 = vld [vmem:[#allocation9 + $0x1d0] sm:$0xff]  ;;  %v5057_v35 = vshrl.u32 %v16283_v39, 16  ;;  %5605 = vmatpush.bf16.msra.mxu3 %v14307_v16  ;;  %v5061_v39 = vshll.u32 %v16319_v33, 16 }
 0x2ac   : > { %v605_v62 = vmax.f32 %v557_v57, 0.0  ;;  %5962 = vmatpush.bf16.msra.mxu0 %v14326_v59  ;;  %v1131_v59 = vrot.slane %v16002_v14, 4 }
 0x2ad   : > { %v3855_v51 = vsel %vm15333_vm5, %v15318_v41, %v3854_v63  ;;  %v3682_v2 = vpack.c.bf16 %v3634_v44, %v3634_v44 }
 0x2ae   : > { %3947 = vst [vmem:[#allocation3 + $0x54] sm:$0xf] %v3855_v51  ;;  %v16317_v30 = vpop.f32.mrf.mxu0  ;;  %v714_v19 = vpack.c.bf16 %v605_v62, %v605_v62  ;;  %v3856_v51 = vrot.slane %v3851_v27, 4  ;;  %v14306_v27 = vld [vmem:[#allocation9 + $0x188] sm:$0xff]  ;;  %5353 = vmatpush.bf16.msra.mxu2 %v14286_v6 }
 0x2af   : > { %v3328_v23 = vpop.f32.mrf.mxu3  ;;  %v16301_v50 = vpop.f32.mrf.mxu1  ;;  %v3858_v9 = vshrl.u32 %v3682_v2, 16  ;;  %v3861_v63 = vshll.u32 %v3682_v2, 16  ;;  %5606 = vmatpush.bf16.msra.mxu3 %v14306_v27  ;;  %v14254_v27 = vld [vmem:[#allocation2 + $0xac] sm:$0xff] }
 0x2b0   : > { %v2970_v31 = vpop.f32.mrf.mxu2  ;;  %v1133_v29 = vshrl.u32 %v714_v19, 16  ;;  %v1136_v10 = vshll.u32 %v714_v19, 16 }
 0x2b1   : > { %v2999_v44 = vadd.f32 %v2970_v31, %v15980_v47  ;;  %4835 = vmatmul.bf16.gmra.mxu0 %v14253_v18 }
 0x2b2   : > { %5192 = vmatmul.bf16.gmra.mxu1 %v5056_v58  ;;  %v3860_v58 = vrot.slane %v3858_v9, 7  ;;  %v1135_v11 = vrot.slane %v1133_v29, 7  ;;  %v5059_v9 = vor.u32 %v5057_v35, %v5055_v20 }
 0x2b3   : > { %v3357_v53 = vadd.f32 %v3328_v23, %v2999_v44  ;;  %v16339_v23 = vrot.slane %v5061_v39, 1  ;;  %v14837_v44 = vld [vmem:[%s17427_s4] ss:$0 sm:$0xff] }
 0x2b4   : > { %4582 = vmatmul.bf16.gmra.mxu3 %v4470_v45  ;;  %v3863_v62 = vor.u32 %v3861_v63, %v3860_v58  ;;  %v3865_v12 = vrot.slane %v3860_v58, 4  ;;  %v1138_v19 = vor.u32 %v1136_v10, %v1135_v11  ;;  %v1140_v31 = vrot.slane %v1135_v11, 4  ;;  %v14325_v58 = vld [vmem:[#allocation9 + $0x1c8] sm:$0xff] }
 0x2b5   : > { %v3556_v18 = vadd.f32 %v16293_v34, %v3357_v53  ;;  %4408 = vmatmul.bf16.gmra.mxu2 %v16264_v3  ;;  %v16342_v15 = vld [vmem:[#allocation3 + $0x50] sm:$0xff]  ;;  %v14333_v63 = vld [vmem:[#allocation9 + $0x208] sm:$0xff]  ;;  %5963 = vmatpush.bf16.msra.mxu0 %v14325_v58  ;;  %v5065_v58 = vshrl.u32 %v16319_v33, 16 }
 0x2b6   : > { %v3864_v2 = vsel %vm15333_vm5, %v3856_v51, %v3863_v62  ;;  %v3873_v47 = vsel %vm15333_vm5, %v3865_v12, %v15304_v21  ;;  %v3532_v16 = vpop.f32.mrf.mxu0  ;;  %v14835_v12 = vld [vmem:[%s17426_s3] ss:$0 sm:$0xff]  ;;  %v16347_v3 = vld [vmem:[#allocation2 + $0xa8] sm:$0xff]  ;;  %v1139_v14 = vsel %vm15333_vm5, %v1131_v59, %v1138_v19  ;;  %v1148_v10 = vsel %vm15333_vm5, %v1140_v31, %v15304_v21  ;;  %6161 = vmatpush.bf16.msra.mxu1 %v14333_v63 }
 0x2b7   : > { %v3331_v45 = vpop.f32.mrf.mxu3  ;;  %v4302_v57 = vpop.f32.mrf.mxu1  ;;  %3948 = vst [vmem:[#allocation3 + $0x58] sm:$0xf] %v3864_v2  ;;  %v3584_v34 = vmul.f32 %v14835_v12, %v3556_v18  ;;  %v4471_v20 = vrot.slane %v16347_v3, 1  ;;  %v5064_v62 = vsel %vm1378_vm6, %v5059_v9, %v16339_v23  ;;  %v8668_v53 = vrot.slane %v16342_v15, 1  ;;  %v16375_v59 = vld [vmem:[#allocation2 + $0xbc] sm:$0xff] }
 0x2b8   : > { %3949 = vst [vmem:[#allocation3 + $0x5c] sm:$0xf] %v3873_v47  ;;  %v2973_v35 = vpop.f32.mrf.mxu2  ;;  %v17453_v47 = vrot.slane %v16304_v38, 1 }
 0x2b9   : > { %v3612_v29 = vadd.f32 %v14837_v44, %v3584_v34  ;;  %v3000_v57 = vadd.f32 %v2973_v35, %v16000_v7  ;;  %1250 = vst [vmem:[#allocation2 + $0xc4] sm:$0xf] %v1139_v14  ;;  %v4472_v7 = vsel %vm1758_vm7, %v4469_v60, %v4471_v20 }
 0x2ba   : > { %1251 = vst [vmem:[#allocation2 + $0xc8] sm:$0xf] %v1148_v10  ;;  %v16372_v18 = vsel %vm1758_vm7, %v17453_v47, %v8668_v53  ;;  %v14454_v10 = vld [vmem:[#allocation10 + $0x1c8] sm:$0xff] }
 0x2bb   : > { %v3636_v11 = vmax.f32 %v3612_v29, 0.0  ;;  %v3358_v2 = vadd.f32 %v3331_v45, %v3000_v57 }
 0x2bd   : > { %v3684_v6 = vpack.c.bf16 %v3636_v11, %v3636_v11  ;;  %v3557_v9 = vadd.f32 %v16317_v30, %v3358_v2  ;;  %v5069_v30 = vshll.u32 %v16375_v59, 16  ;;  %v16395_v11 = vld [vmem:[#allocation2 + $0xb0] sm:$0xff] }
 0x2be   : > { %v4801_v16 = vpop.f32.mrf.mxu0  ;;  %v4473_v2 = vrot.slane %v16395_v11, 1 }
 0x2bf   : > { %v3333_v39 = vpop.f32.mrf.mxu3  ;;  %v16359_v51 = vpop.f32.mrf.mxu1  ;;  %v3876_v45 = vshrl.u32 %v3684_v6, 16  ;;  %v3585_v19 = vmul.f32 %v14835_v12, %v3557_v9  ;;  %v3879_v34 = vshll.u32 %v3684_v6, 16  ;;  %v1254_v12 = vld [vmem:[#allocation2 + $0xcc] sm:$0x1]  ;;  %v16389_v29 = vld [vmem:[#allocation3 + $0x58] sm:$0xff]  ;;  %v5071_v47 = vrot.slane %v5069_v30, 1 }
 0x2c0   : > { %v2975_v31 = vpop.f32.mrf.mxu2 }
 0x2c1   : > { %v3878_v15 = vrot.slane %v3876_v45, 7  ;;  %v3613_v60 = vadd.f32 %v14837_v44, %v3585_v19  ;;  %4840 = vmatmul.bf16.gmra.mxu0 %v14254_v27  ;;  %v1255_v44 = vsel %vm16382_vm9, %v15318_v41, %v1254_v12  ;;  %v8670_v27 = vrot.slane %v16389_v29, 1  ;;  %v14305_v29 = vld [vmem:[#allocation9 + $0x180] sm:$0xff] }
 0x2c2   : > { %5197 = vmatmul.bf16.gmra.mxu1 %v5064_v62  ;;  %1256 = vst [vmem:[#allocation2 + $0xcc] sm:$0x1] %v1255_v44  ;;  %v14285_v44 = vld [vmem:[#allocation9 + $0x140] sm:$0xff]  ;;  %5607 = vmatpush.bf16.msra.mxu3 %v14305_v29 }
 0x2c3   : > { %v3881_v63 = vor.u32 %v3879_v34, %v3878_v15  ;;  %v3637_v14 = vmax.f32 %v3613_v60, 0.0  ;;  %v4474_v60 = vsel %vm1758_vm7, %v4471_v20, %v4473_v2  ;;  %5354 = vmatpush.bf16.msra.mxu2 %v14285_v44 }
 0x2c4   : > { %4587 = vmatmul.bf16.gmra.mxu3 %v4472_v7  ;;  %v5067_v7 = vor.u32 %v5065_v58, %v16339_v23  ;;  %v16408_v23 = vsel %vm1758_vm7, %v8668_v53, %v8670_v27  ;;  %v3883_v58 = vrot.slane %v3878_v15, 4  ;;  %v16415_v15 = vld [vmem:[#allocation2 + $0xc4] sm:$0xff] }
 0x2c5   : > { %v3882_v57 = vsel %vm15333_vm5, %v15318_v41, %v3881_v63  ;;  %v3685_v39 = vpack.c.bf16 %v3637_v14, %v3637_v14  ;;  %4413 = vmatmul.bf16.gmra.mxu2 %v16296_v48 }
 0x2c6   : > { %3950 = vst [vmem:[#allocation3 + $0x60] sm:$0xf] %v3882_v57  ;;  %v4803_v62 = vpop.f32.mrf.mxu0  ;;  %v5072_v63 = vsel %vm1378_vm6, %v5067_v7, %v5071_v47 }
 0x2c7   : > { %v4548_v38 = vpop.f32.mrf.mxu3  ;;  %v16377_v35 = vpop.f32.mrf.mxu1  ;;  %v3885_v6 = vshrl.u32 %v3685_v39, 16  ;;  %v3888_v19 = vshll.u32 %v3685_v39, 16  ;;  %v14255_v39 = vld [vmem:[#allocation2 + $0xb4] sm:$0xff] }
 0x2c8   : > { %v4374_v9 = vpop.f32.mrf.mxu2 }
 0x2c9   : > { %v3887_v45 = vrot.slane %v3885_v6, 7  ;;  %v4375_v31 = vadd.f32 %v4374_v9, %v15989_v32  ;;  %v4909_v44 = vld [vmem:[#allocation2 + $0xcc] sm:$0x1] }
 0x2cb   : > { %v3890_v30 = vor.u32 %v3888_v19, %v3887_v45  ;;  %v3892_v14 = vrot.slane %v3887_v45, 4  ;;  %v4608_v12 = vadd.f32 %v4548_v38, %v4375_v31  ;;  %v5073_v19 = vshrl.u32 %v16375_v59, 16 }
 0x2cd   : > { %v3891_v32 = vsel %vm15333_vm5, %v3883_v58, %v3890_v30  ;;  %v3900_v57 = vsel %vm15333_vm5, %v3892_v14, %v15304_v21  ;;  %v4861_v20 = vadd.f32 %v4801_v16, %v4608_v12  ;;  %v5077_v16 = vshll.u32 %v16415_v15, 16  ;;  %v16426_v12 = vld [vmem:[#allocation2 + $0xb8] sm:$0xff] }
 0x2ce   : > { %3951 = vst [vmem:[#allocation3 + $0x64] sm:$0xf] %v3891_v32  ;;  %v4806_v53 = vpop.f32.mrf.mxu0  ;;  %v5075_v30 = vor.u32 %v5073_v19, %v5071_v47 }
 0x2cf   : > { %v4550_v34 = vpop.f32.mrf.mxu3  ;;  %v5163_v48 = vpop.f32.mrf.mxu1  ;;  %3952 = vst [vmem:[#allocation3 + $0x68] sm:$0xf] %v3900_v57  ;;  %v16418_v38 = vadd.f32 %v16359_v51, %v4861_v20  ;;  %v5079_v14 = vrot.slane %v5077_v16, 1  ;;  %v14256_v53 = vld [vmem:[#allocation2 + $0xbc] sm:$0xff]  ;;  %v5081_v16 = vshrl.u32 %v16415_v15, 16 }
 0x2d0   : > { %v4376_v7 = vpop.f32.mrf.mxu2  ;;  %v14324_v48 = vld [vmem:[#allocation9 + $0x1c0] sm:$0xff] }
 0x2d1   : > { %v4377_v6 = vadd.f32 %v4376_v7, %v16004_v26  ;;  %4845 = vmatmul.bf16.gmra.mxu0 %v14255_v39  ;;  %v4475_v26 = vrot.slane %v16426_v12, 1  ;;  %v5080_v57 = vsel %vm1378_vm6, %v5075_v30, %v5079_v14  ;;  %v4975_v39 = vunpack.c.l.b16 %v4909_v44 }
 0x2d2   : > { %5202 = vmatmul.bf16.gmra.mxu1 %v5072_v63  ;;  %5964 = vmatpush.bf16.msra.mxu0 %v14324_v48  ;;  %v5083_v44 = vor.u32 %v5081_v16, %v5079_v14 }
 0x2d3   : > { %v4609_v31 = vadd.f32 %v4550_v34, %v4377_v6  ;;  %v4476_v20 = vsel %vm1758_vm7, %v4473_v2, %v4475_v26  ;;  %v16442_v7 = vpack.c.b16 %v4975_v39, %v4975_v39  ;;  %v14366_v2 = vld [vmem:[#allocation10 + $0x78] sm:$0xff] }
 0x2d4   : > { %4592 = vmatmul.bf16.gmra.mxu3 %v4474_v60  ;;  %v14332_v60 = vld [vmem:[#allocation9 + $0x200] sm:$0xff]  ;;  %6926 = vmatpush.bf16.msrb.mxu2 %v14366_v2 }
 0x2d5   : > { %4418 = vmatmul.bf16.gmra.mxu2 %v16347_v3  ;;  %v4862_v63 = vadd.f32 %v4803_v62, %v4609_v31  ;;  %v16424_v58 = vld [vmem:[#allocation3 + $0x60] sm:$0xff]  ;;  %6162 = vmatpush.bf16.msra.mxu1 %v14332_v60  ;;  %v5085_v31 = vshll.u32 %v16442_v7, 16  ;;  %v14358_v60 = vld [vmem:[#allocation10 + $0x38] sm:$0xff] }
 0x2d6   : > { %v4808_v51 = vpop.f32.mrf.mxu0  ;;  %v17434_v3 = vrot.slane %v16424_v58, 1  ;;  %7047 = vmatpush.bf16.msrb.mxu3 %v14358_v60 }
 0x2d7   : > { %v4553_v9 = vpop.f32.mrf.mxu3  ;;  %v5165_v45 = vpop.f32.mrf.mxu1  ;;  %v16430_v29 = vadd.f32 %v16377_v35, %v4862_v63 }
 0x2d8   : > { %v4379_v34 = vpop.f32.mrf.mxu2  ;;  %v16436_v62 = vsel %vm1758_vm7, %v8670_v27, %v17434_v3 }
 0x2d9   : > { %v5087_v34 = vrot.slane %v5085_v31, 1  ;;  %v14683_v31 = vld [vmem:[#allocation2 + $0x78] sm:$0xf0] }
 0x2de   : > { %v4811_v35 = vpop.f32.mrf.mxu0 }
 0x2df   : > { %v4555_v32 = vpop.f32.mrf.mxu3  ;;  %v5168_v47 = vpop.f32.mrf.mxu1 }
 0x2e0   : > { %v4381_v6 = vpop.f32.mrf.mxu2 }
 0x2e1   : > { %v4382_v9 = vadd.f32 %v4381_v6, %v16036_v28  ;;  %4850 = vmatmul.bf16.gmra.mxu0 %v14256_v53  ;;  %v14394_v53 = vld [vmem:[#allocation10 + $0xf8] sm:$0xff] }
 0x2e2   : > { %5207 = vmatmul.bf16.gmra.mxu1 %v5080_v57  ;;  %v4477_v57 = vrot.slane %v16060_v52, 1 }
 0x2e3   : > { %v4611_v48 = vadd.f32 %v4555_v32, %v4382_v9  ;;  %7452 = vmatpush.bf16.msrb.mxu1 %v14394_v53 }
 0x2e4   : > { %4597 = vmatmul.bf16.gmra.mxu3 %v4476_v20  ;;  %v14374_v20 = vld [vmem:[#allocation10 + $0xb8] sm:$0xff]  ;;  %v4478_v14 = vsel %vm1758_vm7, %v4475_v26, %v4477_v57 }
 0x2e5   : > { %4423 = vmatmul.bf16.gmra.mxu2 %v16395_v11  ;;  %v4864_v63 = vadd.f32 %v4808_v51, %v4611_v48  ;;  %v5088_v11 = vsel %vm1378_vm6, %v5083_v44, %v5087_v34  ;;  %7214 = vmatpush.bf16.msrb.mxu0 %v14374_v20  ;;  %v14684_v48 = vld [vmem:[#allocation2 + $0x78] sm:$0xe] }
 0x2e6   : > { %v4813_v30 = vpop.f32.mrf.mxu0  ;;  %v14685_v34 = vor.u32 %v14684_v48, %v14683_v31 }
 0x2e7   : > { %v4558_v27 = vpop.f32.mrf.mxu3  ;;  %v5170_v19 = vpop.f32.mrf.mxu1  ;;  %v16449_v28 = vadd.f32 %v5165_v45, %v4864_v63  ;;  %v14682_v45 = vld [vmem:[#allocation2 + $0x78] sm:$0xff]   ;;  %v14313_v30 = vld [vmem:[#allocation2 + $0x80] sm:$0xff] }
 0x2e8   : > { %v4384_v39 = vpop.f32.mrf.mxu2  ;;  %v14257_v19 = vld [vmem:[#allocation2 + $0xc4] sm:$0xff]  ;;  %v5800_v44 = vshll.u32 %v14682_v45, 16  ;;  %v5798_v26 = vshrl.u32 %v14682_v45, 16  ;;  %v6070_v20 = vrot.slane %v14685_v34, 1  ;;  %v6071_v53 = vrot.slane %v14313_v30, 1 }
 0x2e9   : > { %v4385_v6 = vadd.f32 %v4384_v39, %v16048_v42  ;;  %v5805_v39 = vshll.u32 %v14313_v30, 16  ;;  %v14357_v45 = vld [vmem:[#allocation10 + $0x30] sm:$0xff] }
 0x2ea   : > { %7048 = vmatpush.bf16.msrb.mxu3 %v14357_v45 }
 0x2eb   : > { %v4612_v51 = vadd.f32 %v4558_v27, %v4385_v6  ;;  %v14865_v27 = vld [vmem:[#allocation2 + $0x6c] sm:$0xe] }
 0x2ec   : > { %v14866_v31 = vor.u32 %v14865_v27, %v16066_v4 }
 0x2ed   : > { %v4865_v52 = vadd.f32 %v4811_v35, %v4612_v51  ;;  %v5802_v35 = vrot.slane %v5800_v44, 1  ;;  %v14293_v51 = vld [vmem:[#allocation2 + $0x78] sm:$0xff] }
 0x2ee   : > { %v4816_v16 = vpop.f32.mrf.mxu0 }
 0x2ef   : > { %v4560_v32 = vpop.f32.mrf.mxu3  ;;  %v5173_v9 = vpop.f32.mrf.mxu1  ;;  %v16454_v2 = vadd.f32 %v5168_v47, %v4865_v52  ;;  %v6072_v52 = vsel %vm1758_vm7, %v6070_v20, %v6071_v53  ;;  %v14314_v20 = vld [vmem:[#allocation2 + $0x88] sm:$0xff] }
 0x2f0   : > { %v4386_v42 = vpop.f32.mrf.mxu2 }
 0x2f1   : > { %4855 = vmatmul.bf16.gmra.mxu0 %v14257_v19  ;;  %v5807_v19 = vrot.slane %v5805_v39, 1 }
 0x2f2   : > { %5212 = vmatmul.bf16.gmra.mxu1 %v5088_v11 }
 0x2f4   : > { %4602 = vmatmul.bf16.gmra.mxu3 %v4478_v14  ;;  %v5803_v14 = vor.u32 %v5802_v35, %v5798_v26 }
 0x2f5   : > { %4428 = vmatmul.bf16.gmra.mxu2 %v16426_v12  ;;  %v14365_v12 = vld [vmem:[#allocation10 + $0x70] sm:$0xff] }
 0x2f6   : > { %v4818_v57 = vpop.f32.mrf.mxu0  ;;  %6927 = vmatpush.bf16.msrb.mxu2 %v14365_v12  ;;  %v5808_v34 = vsel %vm1378_vm6, %v5803_v14, %v5807_v19  ;;  %v6073_v12 = vrot.slane %v14314_v20, 1 }
 0x2f7   : > { %v4563_v60 = vpop.f32.mrf.mxu3  ;;  %v5175_v63 = vpop.f32.mrf.mxu1 }
 0x2f8   : > { %v4389_v6 = vpop.f32.mrf.mxu2 }
 0x2f9   : > { %v4390_v47 = vadd.f32 %v4389_v6, %v16078_v49  ;;  %v5262_v49 = vrot.slane %v14866_v31, 1  ;;  %v14840_v6 = vld [vmem:[#allocation2 + $0x74] sm:$0xff]  ;;  %v5809_v31 = vshrl.u32 %v14313_v30, 16  ;;  %v14841_v30 = vld [vmem:[#allocation2 + $0x7c] sm:$0xff] }
 0x2fb   : > { %v4614_v48 = vadd.f32 %v4563_v60, %v4390_v47  ;;  %v14373_v47 = vld [vmem:[#allocation10 + $0xb0] sm:$0xff] }
 0x2fc   : > { %7215 = vmatpush.bf16.msrb.mxu0 %v14373_v47  ;;  %v14315_v47 = vld [vmem:[#allocation2 + $0x90] sm:$0xff] }
 0x2fd   : > { %v4867_v42 = vadd.f32 %v4816_v16, %v4614_v48  ;;  %v5813_v48 = vshll.u32 %v14314_v20, 16 }
 0x2fe   : > { %v4821_v44 = vpop.f32.mrf.mxu0 }
 0x2ff   : > { %v4565_v32 = vpop.f32.mrf.mxu3  ;;  %v5178_v11 = vpop.f32.mrf.mxu1  ;;  %v16461_v26 = vadd.f32 %v5173_v9, %v4867_v42  ;;  %v14294_v44 = vld [vmem:[#allocation2 + $0x80] sm:$0xff] }
 0x300   : > { %v5263_v11 = vrot.slane %v14840_v6, 1  ;;  %v4391_v35 = vpop.f32.mrf.mxu2 }
 0x301   : > { %v4392_v39 = vadd.f32 %v4391_v35, %v16089_v40  ;;  %5965 = vmatmul.bf16.vlgmr.msra.gmra.mxu0 %v5808_v34  ;;  %v5811_v34 = vor.u32 %v5809_v31, %v5807_v19  ;;  %v5265_v35 = vrot.slane %v14841_v30, 1 }
 0x302   : > { %6163 = vmatmul.bf16.vlgmr.msra.gmra.mxu1 %v6072_v52  ;;  %v5264_v60 = vsel %vm1758_vm7, %v5262_v49, %v5263_v11  ;;  %v5815_v49 = vrot.slane %v5813_v48, 1  ;;  %v5817_v48 = vshrl.u32 %v14314_v20, 16 }
 0x303   : > { %v4615_v16 = vadd.f32 %v4565_v32, %v4392_v39  ;;  %v6074_v32 = vsel %vm1758_vm7, %v6071_v53, %v6073_v12  ;;  %v14356_v53 = vld [vmem:[#allocation10 + $0x28] sm:$0xff] }
 0x304   : > { %5608 = vmatmul.bf16.vlgmr.msra.gmra.mxu3 %v14293_v51  ;;  %v14393_v51 = vld [vmem:[#allocation10 + $0xf0] sm:$0xff] }
 0x305   : > { %5355 = vmatmul.bf16.vlgmr.msra.gmra.mxu2 %v5264_v60  ;;  %v4868_v14 = vadd.f32 %v4818_v57, %v4615_v16  ;;  %7453 = vmatpush.bf16.msrb.mxu1 %v14393_v51  ;;  %v5816_v57 = vsel %vm1378_vm6, %v5811_v34, %v5815_v49  ;;  %v5266_v60 = vsel %vm1758_vm7, %v5263_v11, %v5265_v35  ;;  %v14364_v51 = vld [vmem:[#allocation10 + $0x68] sm:$0xff] }
 0x306   : > { %v4823_v52 = vpop.f32.mrf.mxu0  ;;  %6928 = vmatpush.bf16.msrb.mxu2 %v14364_v51  ;;  %7049 = vmatpush.bf16.msrb.mxu3 %v14356_v53  ;;  %v14842_v51 = vld [vmem:[#allocation2 + $0x84] sm:$0xff] }
 0x307   : > { %v4568_v4 = vpop.f32.mrf.mxu3  ;;  %v5180_v27 = vpop.f32.mrf.mxu1  ;;  %v16465_v9 = vadd.f32 %v5175_v63, %v4868_v14  ;;  %v5267_v53 = vrot.slane %v14842_v51, 1 }
 0x308   : > { %v4394_v40 = vpop.f32.mrf.mxu2 }
 0x309   : > { %v5821_v40 = vshll.u32 %v14315_v47, 16 }
 0x30e   : > { %v4826_v6 = vpop.f32.mrf.mxu0 }
 0x30f   : > { %v4570_v45 = vpop.f32.mrf.mxu3  ;;  %v5183_v42 = vpop.f32.mrf.mxu1 }
 0x310   : > { %v4396_v39 = vpop.f32.mrf.mxu2 }
 0x311   : > { %v4397_v4 = vadd.f32 %v4396_v39, %v16113_v0  ;;  %5970 = vmatmul.bf16.gmra.mxu0 %v5816_v57  ;;  %v14392_v57 = vld [vmem:[#allocation10 + $0xe8] sm:$0xff] }
 0x312   : > { %6168 = vmatmul.bf16.gmra.mxu1 %v6074_v32  ;;  %v14372_v32 = vld [vmem:[#allocation10 + $0xa8] sm:$0xff] }
 0x313   : > { %v4617_v19 = vadd.f32 %v4570_v45, %v4397_v4  ;;  %v14295_v45 = vld [vmem:[#allocation2 + $0x88] sm:$0xff]  ;;  %v5819_v4 = vor.u32 %v5817_v48, %v5815_v49  ;;  %7216 = vmatpush.bf16.msrb.mxu0 %v14372_v32  ;;  %7454 = vmatpush.bf16.msrb.mxu1 %v14392_v57  ;;  %v5268_v49 = vsel %vm1758_vm7, %v5265_v35, %v5267_v53  ;;  %v14355_v35 = vld [vmem:[#allocation10 + $0x20] sm:$0xff] }
 0x314   : > { %5613 = vmatmul.bf16.gmra.mxu3 %v14294_v44  ;;  %v6075_v44 = vrot.slane %v14315_v47, 1 }
 0x315   : > { %5360 = vmatmul.bf16.gmra.mxu2 %v5266_v60  ;;  %v4870_v14 = vadd.f32 %v4823_v52, %v4617_v19  ;;  %v5823_v60 = vrot.slane %v5821_v40, 1  ;;  %7050 = vmatpush.bf16.msrb.mxu3 %v14355_v35 }
 0x316   : > { %v4828_v31 = vpop.f32.mrf.mxu0  ;;  %v6076_v52 = vsel %vm1758_vm7, %v6073_v12, %v6075_v44  ;;  %v14316_v12 = vld [vmem:[#allocation2 + $0x98] sm:$0xff] }
 0x317   : > { %v4573_v63 = vpop.f32.mrf.mxu3  ;;  %v5185_v16 = vpop.f32.mrf.mxu1  ;;  %v16471_v34 = vadd.f32 %v5180_v27, %v4870_v14  ;;  %v5824_v27 = vsel %vm1378_vm6, %v5819_v4, %v5823_v60 }
 0x318   : > { %v4399_v0 = vpop.f32.mrf.mxu2 }
 0x319   : > { %v4400_v11 = vadd.f32 %v4399_v0, %v16122_v46  ;;  %v5829_v0 = vshll.u32 %v14316_v12, 16 }
 0x31b   : > { %v4618_v20 = vadd.f32 %v4573_v63, %v4400_v11  ;;  %v5825_v63 = vshrl.u32 %v14315_v47, 16  ;;  %v5831_v4 = vrot.slane %v5829_v0, 1  ;;  %v14317_v0 = vld [vmem:[#allocation2 + $0xa0] sm:$0xff] }
 0x31d   : > { %v4871_v16 = vadd.f32 %v4826_v6, %v4618_v20  ;;  %v6077_v6 = vrot.slane %v14316_v12, 1 }
 0x31e   : > { %v4831_v19 = vpop.f32.mrf.mxu0 }
 0x31f   : > { %v4575_v30 = vpop.f32.mrf.mxu3  ;;  %v5188_v39 = vpop.f32.mrf.mxu1  ;;  %v16476_v14 = vadd.f32 %v5183_v42, %v4871_v16  ;;  %v5827_v42 = vor.u32 %v5825_v63, %v5823_v60  ;;  %v14363_v16 = vld [vmem:[#allocation10 + $0x60] sm:$0xff] }
 0x320   : > { %v4401_v46 = vpop.f32.mrf.mxu2  ;;  %6929 = vmatpush.bf16.msrb.mxu2 %v14363_v16  ;;  %v6079_v16 = vrot.slane %v14317_v0, 1 }
 0x321   : > { %5975 = vmatmul.bf16.gmra.mxu0 %v5824_v27  ;;  %v5832_v47 = vsel %vm1378_vm6, %v5827_v42, %v5831_v4  ;;  %v14843_v46 = vld [vmem:[#allocation2 + $0x8c] sm:$0xff] }
 0x322   : > { %6173 = vmatmul.bf16.gmra.mxu1 %v6076_v52  ;;  %v6078_v52 = vsel %vm1758_vm7, %v6075_v44, %v6077_v6 }
 0x324   : > { %5618 = vmatmul.bf16.gmra.mxu3 %v14295_v45  ;;  %v14296_v45 = vld [vmem:[#allocation2 + $0x90] sm:$0xff] }
 0x325   : > { %5365 = vmatmul.bf16.gmra.mxu2 %v5268_v49  ;;  %v5269_v49 = vrot.slane %v14843_v46, 1 }
 0x326   : > { %v4833_v40 = vpop.f32.mrf.mxu0 }
 0x327   : > { %v4578_v31 = vpop.f32.mrf.mxu3  ;;  %v5190_v48 = vpop.f32.mrf.mxu1 }
 0x328   : > { %v4404_v32 = vpop.f32.mrf.mxu2 }
 0x329   : > { %v4405_v57 = vadd.f32 %v4404_v32, %v16148_v5 }
 0x32b   : > { %v4620_v20 = vadd.f32 %v4578_v31, %v4405_v57  ;;  %v5270_v31 = vsel %vm1758_vm7, %v5267_v53, %v5269_v49 }
 0x32d   : > { %v4873_v27 = vadd.f32 %v4831_v19, %v4620_v20  ;;  %v14371_v19 = vld [vmem:[#allocation10 + $0xa0] sm:$0xff]  ;;  %v5837_v20 = vshll.u32 %v14317_v0, 16 }
 0x32e   : > { %v4836_v51 = vpop.f32.mrf.mxu0  ;;  %7217 = vmatpush.bf16.msrb.mxu0 %v14371_v19  ;;  %v14318_v19 = vld [vmem:[#allocation2 + $0xa8] sm:$0xff] }
 0x32f   : > { %v4580_v11 = vpop.f32.mrf.mxu3  ;;  %v5193_v30 = vpop.f32.mrf.mxu1  ;;  %v16482_v5 = vadd.f32 %v5188_v39, %v4873_v27  ;;  %v14297_v51 = vld [vmem:[#allocation2 + $0x98] sm:$0xff] }
 0x330   : > { %v4406_v32 = vpop.f32.mrf.mxu2  ;;  %v14391_v30 = vld [vmem:[#allocation10 + $0xe0] sm:$0xff] }
 0x331   : > { %v4407_v60 = vadd.f32 %v4406_v32, %v16156_v43  ;;  %5980 = vmatmul.bf16.gmra.mxu0 %v5832_v47  ;;  %7455 = vmatpush.bf16.msrb.mxu1 %v14391_v30  ;;  %v5839_v47 = vrot.slane %v5837_v20, 1  ;;  %v14362_v30 = vld [vmem:[#allocation10 + $0x58] sm:$0xff]  ;;  %v5841_v20 = vshrl.u32 %v14317_v0, 16 }
 0x332   : > { %6178 = vmatmul.bf16.gmra.mxu1 %v6078_v52  ;;  %v5833_v52 = vshrl.u32 %v14316_v12, 16  ;;  %v14844_v12 = vld [vmem:[#allocation2 + $0x94] sm:$0xff]  ;;  %6930 = vmatpush.bf16.msrb.mxu2 %v14362_v30  ;;  %v14845_v30 = vld [vmem:[#allocation2 + $0x9c] sm:$0xff] }
 0x333   : > { %v4621_v57 = vadd.f32 %v4580_v11, %v4407_v60  ;;  %v6080_v11 = vsel %vm1758_vm7, %v6077_v6, %v6079_v16  ;;  %v5271_v32 = vrot.slane %v14844_v12, 1  ;;  %v14354_v6 = vld [vmem:[#allocation10 + $0x18] sm:$0xff] }
 0x334   : > { %5623 = vmatmul.bf16.gmra.mxu3 %v14296_v45  ;;  %v5835_v53 = vor.u32 %v5833_v52, %v5831_v4 }
 0x335   : > { %5370 = vmatmul.bf16.gmra.mxu2 %v5270_v31  ;;  %v4874_v45 = vadd.f32 %v4833_v40, %v4621_v57  ;;  %v5272_v31 = vsel %vm1758_vm7, %v5269_v49, %v5271_v32  ;;  %7051 = vmatpush.bf16.msrb.mxu3 %v14354_v6  ;;  %v5273_v6 = vrot.slane %v14845_v30, 1 }
 0x336   : > { %v4838_v42 = vpop.f32.mrf.mxu0  ;;  %v5840_v40 = vsel %vm1378_vm6, %v5835_v53, %v5839_v47 }
 0x337   : > { %v4583_v44 = vpop.f32.mrf.mxu3  ;;  %v5195_v63 = vpop.f32.mrf.mxu1  ;;  %v16486_v39 = vadd.f32 %v5190_v48, %v4874_v45 }
 0x338   : > { %v4409_v43 = vpop.f32.mrf.mxu2 }
 0x339   : > { %v5845_v43 = vshll.u32 %v14318_v19, 16 }
 0x33e   : > { %v4841_v46 = vpop.f32.mrf.mxu0 }
 0x33f   : > { %v4585_v35 = vpop.f32.mrf.mxu3  ;;  %v5198_v27 = vpop.f32.mrf.mxu1 }
 0x340   : > { %v4411_v60 = vpop.f32.mrf.mxu2 }
 0x341   : > { %v4412_v44 = vadd.f32 %v4411_v60, %v16195_v36  ;;  %5985 = vmatmul.bf16.gmra.mxu0 %v5840_v40  ;;  %v14390_v40 = vld [vmem:[#allocation10 + $0xd8] sm:$0xff] }
 0x342   : > { %6183 = vmatmul.bf16.gmra.mxu1 %v6080_v11  ;;  %v14370_v11 = vld [vmem:[#allocation10 + $0x98] sm:$0xff] }
 0x343   : > { %v4623_v4 = vadd.f32 %v4585_v35, %v4412_v44  ;;  %v14298_v35 = vld [vmem:[#allocation2 + $0xa0] sm:$0xff]  ;;  %v5843_v44 = vor.u32 %v5841_v20, %v5839_v47  ;;  %7218 = vmatpush.bf16.msrb.mxu0 %v14370_v11  ;;  %7456 = vmatpush.bf16.msrb.mxu1 %v14390_v40  ;;  %v5274_v47 = vsel %vm1758_vm7, %v5271_v32, %v5273_v6  ;;  %v14353_v32 = vld [vmem:[#allocation10 + $0x10] sm:$0xff] }
 0x344   : > { %5628 = vmatmul.bf16.gmra.mxu3 %v14297_v51  ;;  %v6081_v51 = vrot.slane %v14318_v19, 1 }
 0x345   : > { %5375 = vmatmul.bf16.gmra.mxu2 %v5272_v31  ;;  %v4876_v45 = vadd.f32 %v4838_v42, %v4623_v4  ;;  %v5847_v31 = vrot.slane %v5845_v43, 1  ;;  %7052 = vmatpush.bf16.msrb.mxu3 %v14353_v32 }
 0x346   : > { %v4843_v52 = vpop.f32.mrf.mxu0  ;;  %v6082_v42 = vsel %vm1758_vm7, %v6079_v16, %v6081_v51  ;;  %v14319_v16 = vld [vmem:[#allocation2 + $0xb0] sm:$0xff] }
 0x347   : > { %v4588_v48 = vpop.f32.mrf.mxu3  ;;  %v5200_v57 = vpop.f32.mrf.mxu1  ;;  %v16492_v53 = vadd.f32 %v5195_v63, %v4876_v45  ;;  %v5848_v63 = vsel %vm1378_vm6, %v5843_v44, %v5847_v31 }
 0x348   : > { %v4414_v36 = vpop.f32.mrf.mxu2 }
 0x349   : > { %v4415_v49 = vadd.f32 %v4414_v36, %v16205_v1  ;;  %v5853_v36 = vshll.u32 %v14319_v16, 16 }
 0x34b   : > { %v4624_v0 = vadd.f32 %v4588_v48, %v4415_v49  ;;  %v5849_v48 = vshrl.u32 %v14318_v19, 16  ;;  %v5855_v44 = vrot.slane %v5853_v36, 1  ;;  %v14320_v36 = vld [vmem:[#allocation2 + $0xb8] sm:$0xff] }
 0x34d   : > { %v4877_v57 = vadd.f32 %v4841_v46, %v4624_v0  ;;  %v6083_v46 = vrot.slane %v14319_v16, 1 }
 0x34e   : > { %v4846_v4 = vpop.f32.mrf.mxu0 }
 0x34f   : > { %v4590_v12 = vpop.f32.mrf.mxu3  ;;  %v5203_v60 = vpop.f32.mrf.mxu1  ;;  %v16497_v45 = vadd.f32 %v5198_v27, %v4877_v57  ;;  %v5851_v27 = vor.u32 %v5849_v48, %v5847_v31  ;;  %v14361_v57 = vld [vmem:[#allocation10 + $0x50] sm:$0xff] }
 0x350   : > { %v4416_v1 = vpop.f32.mrf.mxu2  ;;  %6931 = vmatpush.bf16.msrb.mxu2 %v14361_v57  ;;  %v5861_v57 = vshll.u32 %v14320_v36, 16 }
 0x351   : > { %5990 = vmatmul.bf16.gmra.mxu0 %v5848_v63  ;;  %v5856_v19 = vsel %vm1378_vm6, %v5851_v27, %v5855_v44  ;;  %v14846_v1 = vld [vmem:[#allocation2 + $0xa4] sm:$0xff] }
 0x352   : > { %6188 = vmatmul.bf16.gmra.mxu1 %v6082_v42  ;;  %v6084_v42 = vsel %vm1758_vm7, %v6081_v51, %v6083_v46 }
 0x354   : > { %5633 = vmatmul.bf16.gmra.mxu3 %v14298_v35  ;;  %v14299_v35 = vld [vmem:[#allocation2 + $0xa8] sm:$0xff] }
 0x355   : > { %5380 = vmatmul.bf16.gmra.mxu2 %v5274_v47  ;;  %v5275_v47 = vrot.slane %v14846_v1, 1  ;;  %v5863_v1 = vrot.slane %v5861_v57, 1 }
 0x356   : > { %v4848_v43 = vpop.f32.mrf.mxu0 }
 0x357   : > { %v4593_v52 = vpop.f32.mrf.mxu3  ;;  %v5205_v20 = vpop.f32.mrf.mxu1 }
 0x358   : > { %v4419_v11 = vpop.f32.mrf.mxu2 }
 0x359   : > { %v4420_v40 = vadd.f32 %v4419_v11, %v16241_v55 }
 0x35b   : > { %v4626_v0 = vadd.f32 %v4593_v52, %v4420_v40  ;;  %v5276_v52 = vsel %vm1758_vm7, %v5273_v6, %v5275_v47 }
 0x35d   : > { %v4879_v63 = vadd.f32 %v4846_v4, %v4626_v0  ;;  %v14369_v4 = vld [vmem:[#allocation10 + $0x90] sm:$0xff]  ;;  %v5857_v0 = vshrl.u32 %v14319_v16, 16 }
 0x35e   : > { %v4851_v30 = vpop.f32.mrf.mxu0  ;;  %7219 = vmatpush.bf16.msrb.mxu0 %v14369_v4 }
 0x35f   : > { %v4595_v49 = vpop.f32.mrf.mxu3  ;;  %v5208_v12 = vpop.f32.mrf.mxu1  ;;  %v16503_v55 = vadd.f32 %v5203_v60, %v4879_v63  ;;  %v6085_v60 = vrot.slane %v14320_v36, 1  ;;  %v14300_v30 = vld [vmem:[#allocation2 + $0xb0] sm:$0xff] }
 0x360   : > { %v4421_v11 = vpop.f32.mrf.mxu2  ;;  %v14389_v12 = vld [vmem:[#allocation10 + $0xd0] sm:$0xff] }
 0x361   : > { %v4422_v31 = vadd.f32 %v4421_v11, %v16254_v25  ;;  %5995 = vmatmul.bf16.gmra.mxu0 %v5856_v19  ;;  %7457 = vmatpush.bf16.msrb.mxu1 %v14389_v12  ;;  %v5859_v19 = vor.u32 %v5857_v0, %v5855_v44  ;;  %v5865_v0 = vshrl.u32 %v14320_v36, 16 }
 0x362   : > { %6193 = vmatmul.bf16.gmra.mxu1 %v6084_v42 }
 0x363   : > { %v4627_v40 = vadd.f32 %v4595_v49, %v4422_v31  ;;  %v5864_v11 = vsel %vm1378_vm6, %v5859_v19, %v5863_v1  ;;  %v14847_v31 = vld [vmem:[#allocation2 + $0xac] sm:$0xff] }
 0x364   : > { %5638 = vmatmul.bf16.gmra.mxu3 %v14299_v35  ;;  %v3953_v35 = vld [vmem:[#allocation3 + $0x6c] sm:$0x1] }
 0x365   : > { %5385 = vmatmul.bf16.gmra.mxu2 %v5276_v52  ;;  %v4880_v27 = vadd.f32 %v4848_v43, %v4627_v40  ;;  %v3954_v25 = vsel %vm16382_vm9, %v15318_v41, %v3953_v35  ;;  %v6086_v43 = vsel %vm1758_vm7, %v6083_v46, %v6085_v60  ;;  %v14321_v35 = vld [vmem:[#allocation2 + $0xc0] sm:$0xff] }
 0x366   : > { %v4853_v42 = vpop.f32.mrf.mxu0  ;;  %3955 = vst [vmem:[#allocation3 + $0x6c] sm:$0x1] %v3954_v25  ;;  %v5869_v57 = vshll.u32 %v14321_v35, 16  ;;  %v6087_v25 = vrot.slane %v14321_v35, 1 }
 0x367   : > { %v4598_v51 = vpop.f32.mrf.mxu3  ;;  %v5210_v48 = vpop.f32.mrf.mxu1  ;;  %v16510_v6 = vadd.f32 %v5205_v20, %v4880_v27 }
 0x368   : > { %v4424_v32 = vpop.f32.mrf.mxu2  ;;  %v5277_v51 = vrot.slane %v14847_v31, 1  ;;  %v5867_v31 = vor.u32 %v5865_v0, %v5863_v1 }
 0x36a   : > { %v5278_v4 = vsel %vm1758_vm7, %v5275_v47, %v5277_v51  ;;  %v6088_v47 = vsel %vm1758_vm7, %v6085_v60, %v6087_v25 }
 0x36e   : > { %v4856_v16 = vpop.f32.mrf.mxu0 }
 0x36f   : > { %v4600_v49 = vpop.f32.mrf.mxu3  ;;  %v5213_v63 = vpop.f32.mrf.mxu1 }
 0x370   : > { %v4426_v52 = vpop.f32.mrf.mxu2 }
 0x371   : > { %v4427_v40 = vadd.f32 %v4426_v52, %v16288_v24  ;;  %6000 = vmatmul.bf16.gmra.mxu0 %v5864_v11  ;;  %v14301_v11 = vld [vmem:[#allocation2 + $0xb8] sm:$0xff]  ;;  %v5871_v52 = vrot.slane %v5869_v57, 1 }
 0x372   : > { %6198 = vmatmul.bf16.gmra.mxu1 %v6086_v43 }
 0x373   : > { %v4629_v44 = vadd.f32 %v4600_v49, %v4427_v40  ;;  %v5872_v36 = vsel %vm1378_vm6, %v5867_v31, %v5871_v52 }
 0x374   : > { %5643 = vmatmul.bf16.gmra.mxu3 %v14300_v30 }
 0x375   : > { %5390 = vmatmul.bf16.gmra.mxu2 %v5278_v4  ;;  %v4882_v27 = vadd.f32 %v4853_v42, %v4629_v44 }
 0x376   : > { %v4858_v46 = vpop.f32.mrf.mxu0 }
 0x377   : > { %v4603_v20 = vpop.f32.mrf.mxu3  ;;  %v5215_v12 = vpop.f32.mrf.mxu1  ;;  %v16516_v32 = vadd.f32 %v5210_v48, %v4882_v27  ;;  %v5279_v48 = vrot.slane %v16319_v33, 1  ;;  %v14322_v27 = vld [vmem:[#allocation2 + $0xc8] sm:$0xff] }
 0x378   : > { %v4429_v30 = vpop.f32.mrf.mxu2  ;;  %v5877_v46 = vshll.u32 %v14322_v27, 16  ;;  %v14352_v33 = vld [vmem:[#allocation10 + $0x8] sm:$0xff] }
 0x379   : > { %v4430_v19 = vadd.f32 %v4429_v30, %v16301_v50  ;;  %v5280_v44 = vsel %vm1758_vm7, %v5277_v51, %v5279_v48  ;;  %7053 = vmatpush.bf16.msrb.mxu3 %v14352_v33 }
 0x37b   : > { %v4630_v12 = vadd.f32 %v4603_v20, %v4430_v19  ;;  %v5873_v20 = vshrl.u32 %v14321_v35, 16  ;;  %v14360_v19 = vld [vmem:[#allocation10 + $0x48] sm:$0xff] }
 0x37c   : > { %6932 = vmatpush.bf16.msrb.mxu2 %v14360_v19  ;;  %v16544_v19 = vld [vmem:[#allocation2 + $0xd0] sm:$0xff] }
 0x37d   : > { %v4883_v49 = vadd.f32 %v4856_v16, %v4630_v12  ;;  %v6089_v16 = vrot.slane %v14322_v27, 1  ;;  %v5875_v31 = vor.u32 %v5873_v20, %v5871_v52  ;;  %v14388_v12 = vld [vmem:[#allocation10 + $0xc8] sm:$0xff] }
 0x37e   : > { %v5966_v42 = vpop.f32.mrf.mxu0  ;;  %7458 = vmatpush.bf16.msrb.mxu1 %v14388_v12 }
 0x37f   : > { %v4605_v43 = vpop.f32.mrf.mxu3  ;;  %v6164_v24 = vpop.f32.mrf.mxu1  ;;  %v16522_v40 = vadd.f32 %v5213_v63, %v4883_v49  ;;  %v14368_v63 = vld [vmem:[#allocation10 + $0x88] sm:$0xff]  ;;  %v6090_v51 = vsel %vm1758_vm7, %v6087_v25, %v6089_v16 }
 0x380   : > { %v4431_v4 = vpop.f32.mrf.mxu2  ;;  %7220 = vmatpush.bf16.msrb.mxu0 %v14368_v63 }
 0x381   : > { %6005 = vmatmul.bf16.gmra.mxu0 %v5872_v36  ;;  %v5281_v4 = vrot.slane %v16375_v59, 1 }
 0x382   : > { %6203 = vmatmul.bf16.gmra.mxu1 %v6088_v47  ;;  %v5879_v47 = vrot.slane %v5877_v46, 1 }
 0x384   : > { %5648 = vmatmul.bf16.gmra.mxu3 %v14301_v11  ;;  %v14302_v11 = vld [vmem:[#allocation2 + $0xc0] sm:$0xff]  ;;  %v5880_v52 = vsel %vm1378_vm6, %v5875_v31, %v5879_v47  ;;  %v5885_v31 = vshll.u32 %v16544_v19, 16 }
 0x385   : > { %5395 = vmatmul.bf16.gmra.mxu2 %v5280_v44 }
 0x386   : > { %v5968_v60 = vpop.f32.mrf.mxu0 }
 0x387   : > { %v5609_v50 = vpop.f32.mrf.mxu3  ;;  %v6166_v1 = vpop.f32.mrf.mxu1 }
 0x388   : > { %v5356_v0 = vpop.f32.mrf.mxu2 }
 0x389   : > { %v5416_v57 = vadd.f32 %v5356_v0, %v16418_v38  ;;  %v16530_v38 = vld [vmem:[%s17426_s3] ss:$0 sm:$0xff]  ;;  %v5282_v0 = vsel %vm1758_vm7, %v5279_v48, %v5281_v4 }
 0x38b   : > { %v5669_v49 = vadd.f32 %v5609_v50, %v5416_v57  ;;  %v16537_v50 = vld [vmem:[%s17427_s4] ss:$0 sm:$0xff] }
 0x38d   : > { %v6026_v35 = vadd.f32 %v5966_v42, %v5669_v49 }
 0x38e   : > { %v5971_v36 = vpop.f32.mrf.mxu0 }
 0x38f   : > { %v5611_v30 = vpop.f32.mrf.mxu3  ;;  %v6169_v43 = vpop.f32.mrf.mxu1  ;;  %v6224_v25 = vadd.f32 %v6164_v24, %v6026_v35 }
 0x390   : > { %v5358_v44 = vpop.f32.mrf.mxu2 }
 0x391   : > { %v6252_v42 = vmul.f32 %v16530_v38, %v6224_v25  ;;  %v5417_v20 = vadd.f32 %v5358_v44, %v16430_v29  ;;  %6010 = vmatmul.bf16.gmra.mxu0 %v5880_v52  ;;  %v6091_v29 = vrot.slane %v16544_v19, 1  ;;  %v14303_v25 = vld [vmem:[#allocation2 + $0xc8] sm:$0xff]  ;;  %v5887_v44 = vrot.slane %v5885_v31, 1 }
 0x392   : > { %6208 = vmatmul.bf16.gmra.mxu1 %v6090_v51 }
 0x393   : > { %v6280_v59 = vadd.f32 %v16537_v50, %v6252_v42  ;;  %v5670_v24 = vadd.f32 %v5611_v30, %v5417_v20 }
 0x394   : > { %5653 = vmatmul.bf16.gmra.mxu3 %v14302_v11  ;;  %v5881_v11 = vshrl.u32 %v14322_v27, 16  ;;  %v6092_v27 = vsel %vm1758_vm7, %v6089_v16, %v6091_v29 }
 0x395   : > { %v6304_v33 = vmax.f32 %v6280_v59, 0.0  ;;  %v6027_v63 = vadd.f32 %v5968_v60, %v5670_v24  ;;  %5400 = vmatmul.bf16.gmra.mxu2 %v5282_v0 }
 0x396   : > { %v5973_v43 = vpop.f32.mrf.mxu0  ;;  %v5883_v30 = vor.u32 %v5881_v11, %v5879_v47  ;;  %v5283_v47 = vrot.slane %v16415_v15, 1 }
 0x397   : > { %v5614_v46 = vpop.f32.mrf.mxu3  ;;  %v16542_v57 = vpop.f32.mrf.mxu1  ;;  %v6352_v51 = vpack.c.bf16 %v6304_v33, %v6304_v33  ;;  %v6225_v12 = vadd.f32 %v6166_v1, %v6027_v63  ;;  %v6616_v1 = vld [vmem:[#allocation3 + $0x6c] sm:$0xf] }
 0x398   : > { %v5361_v49 = vpop.f32.mrf.mxu2  ;;  %v5717_v46 = vld [vmem:[#allocation2 + $0xd8] sm:$0x1]  ;;  %v5888_v33 = vsel %vm1378_vm6, %v5883_v30, %v5887_v44 }
 0x399   : > { %v6377_v48 = vshrl.u32 %v6352_v51, 16  ;;  %v6253_v35 = vmul.f32 %v16530_v38, %v6225_v12  ;;  %v6380_v42 = vshll.u32 %v6352_v51, 16  ;;  %v5783_v63 = vunpack.c.l.b16 %v5717_v46 }
 0x39b   : > { %v6379_v60 = vrot.slane %v6377_v48, 7  ;;  %v6281_v20 = vadd.f32 %v16537_v50, %v6253_v35  ;;  %v14359_v48 = vld [vmem:[#allocation10 + $0x40] sm:$0xff] }
 0x39c   : > { %v14351_v35 = vld [vmem:[#allocation10] sm:$0xff]  ;;  %6933 = vmatpush.bf16.msrb.mxu2 %v14359_v48 }
 0x39d   : > { %v6382_v0 = vor.u32 %v6380_v42, %v6379_v60  ;;  %v6305_v59 = vmax.f32 %v6281_v20, 0.0  ;;  %v5796_v42 = vpack.c.b16 %v5783_v63, %v5783_v63  ;;  %v14387_v20 = vld [vmem:[#allocation10 + $0xc0] sm:$0xff]  ;;  %7054 = vmatpush.bf16.msrb.mxu3 %v14351_v35 }
 0x39e   : > { %v5976_v24 = vpop.f32.mrf.mxu0  ;;  %7459 = vmatpush.bf16.msrb.mxu1 %v14387_v20 }
 0x39f   : > { %v5616_v36 = vpop.f32.mrf.mxu3  ;;  %v16550_v52 = vpop.f32.mrf.mxu1  ;;  %v6617_v11 = vsel %vm15326_vm4, %v6382_v0, %v6616_v1  ;;  %v6353_v16 = vpack.c.bf16 %v6305_v59, %v6305_v59  ;;  %v5893_v3 = vshll.u32 %v5796_v42, 16 }
 0x3a0   : > { %6618 = vst [vmem:[#allocation3 + $0x6c] sm:$0xf] %v6617_v11  ;;  %v5363_v31 = vpop.f32.mrf.mxu2 }
 0x3a1   : > { %v6385_v51 = vshrl.u32 %v6353_v16, 16  ;;  %v5419_v12 = vadd.f32 %v5363_v31, %v16449_v28  ;;  %6015 = vmatmul.bf16.gmra.mxu0 %v5888_v33  ;;  %v6388_v46 = vshll.u32 %v6353_v16, 16  ;;  %v6383_v28 = vrot.slane %v6379_v60, 4 }
 0x3a2   : > { %6213 = vmatmul.bf16.gmra.mxu1 %v6092_v27  ;;  %v14367_v27 = vld [vmem:[#allocation10 + $0x80] sm:$0xff]  ;;  %v5889_v31 = vshrl.u32 %v16544_v19, 16  ;;  %v5285_v19 = vrot.slane %v16442_v7, 1 }
 0x3a3   : > { %v6387_v56 = vrot.slane %v6385_v51, 7  ;;  %v5672_v1 = vadd.f32 %v5616_v36, %v5419_v12  ;;  %7221 = vmatpush.bf16.msrb.mxu0 %v14367_v27  ;;  %v14304_v27 = vld [vmem:[#allocation2 + $0xd0] sm:$0xff] }
 0x3a4   : > { %5658 = vmatmul.bf16.gmra.mxu3 %v14303_v25  ;;  %v5284_v25 = vsel %vm1758_vm7, %v5281_v4, %v5283_v47  ;;  %v6093_v4 = vrot.slane %v5796_v42, 1 }
 0x3a5   : > { %v6390_v0 = vor.u32 %v6388_v46, %v6387_v56  ;;  %v6392_v59 = vrot.slane %v6387_v56, 4  ;;  %v6029_v33 = vadd.f32 %v5973_v43, %v5672_v1  ;;  %5405 = vmatmul.bf16.gmra.mxu2 %v5284_v25  ;;  %v5891_v25 = vor.u32 %v5889_v31, %v5887_v44 }
 0x3a6   : > { %v5978_v11 = vpop.f32.mrf.mxu0  ;;  %v6094_v42 = vsel %vm1758_vm7, %v6091_v29, %v6093_v4  ;;  %v17456_v46 = vrot.slane %v16424_v58, 1 }
 0x3a7   : > { %v5619_v49 = vpop.f32.mrf.mxu3  ;;  %v6176_v30 = vpop.f32.mrf.mxu1  ;;  %v6391_v63 = vsel %vm15333_vm5, %v6383_v28, %v6390_v0  ;;  %v6400_v36 = vsel %vm15333_vm5, %v6392_v59, %v15304_v21  ;;  %v6227_v16 = vadd.f32 %v16542_v57, %v6029_v33  ;;  %v14451_v51 = vld [vmem:[#allocation3 + $0x68] sm:$0xff] }
 0x3a8   : > { %6619 = vst [vmem:[#allocation3 + $0x70] sm:$0xf] %v6391_v63  ;;  %v5366_v60 = vpop.f32.mrf.mxu2  ;;  %v5895_v30 = vrot.slane %v5893_v3, 1  ;;  %v8674_v20 = vrot.slane %v14451_v51, 1  ;;  %v14656_v51 = vld [vmem:[#allocation3] sm:$0xff]  }
 0x3a9   : > { %6620 = vst [vmem:[#allocation3 + $0x74] sm:$0xf] %v6400_v36  ;;  %v6255_v43 = vmul.f32 %v16530_v38, %v6227_v16  ;;  %v5420_v12 = vadd.f32 %v5366_v60, %v16454_v2  ;;  %v14686_v60 = vld [vmem:[#allocation3] sm:$0xf0] }
 0x3aa   : > { %v16582_v1 = vsel %vm1758_vm7, %v17456_v46, %v8674_v20  ;;  %v5896_v3 = vsel %vm1378_vm6, %v5891_v25, %v5895_v30  ;;  %v6769_v25 = vshll.u32 %v14656_v51, 16  ;;  %v16605_v30 = vld [vmem:[#allocation3 + $0x8] sm:$0xff] }
 0x3ab   : > { %v6283_v57 = vadd.f32 %v16537_v50, %v6255_v43  ;;  %v5673_v56 = vadd.f32 %v5619_v49, %v5420_v12  ;;  %v14687_v43 = vld [vmem:[#allocation3] sm:$0xe] }
 0x3ad   : > { %v6307_v2 = vmax.f32 %v6283_v57, 0.0  ;;  %v6030_v28 = vadd.f32 %v5976_v24, %v5673_v56  ;;  %v5286_v24 = vsel %vm1758_vm7, %v5283_v47, %v5285_v19  ;;  %v14460_v19 = vld [vmem:[#allocation10 + $0x1f8] sm:$0xff] }
 0x3ae   : > { %v5981_v0 = vpop.f32.mrf.mxu0  ;;  %8557 = vmatpush.bf16.msra.mxu1 %v14460_v19 }
 0x3af   : > { %v5621_v48 = vpop.f32.mrf.mxu3  ;;  %v16573_v35 = vpop.f32.mrf.mxu1  ;;  %v6355_v44 = vpack.c.bf16 %v6307_v2, %v6307_v2  ;;  %v6228_v29 = vadd.f32 %v16550_v52, %v6030_v28  ;;  %v14413_v2 = vld [vmem:[#allocation10 + $0x138] sm:$0xff] }
 0x3b0   : > { %v5368_v59 = vpop.f32.mrf.mxu2  ;;  %v16587_v33 = vld [vmem:[#allocation3 + $0x70] sm:$0xff]  ;;  %7794 = vmatpush.bf16.msra.mxu2 %v14413_v2 }
 0x3b1   : > { %v6403_v49 = vshrl.u32 %v6355_v44, 16  ;;  %v6256_v58 = vmul.f32 %v16530_v38, %v6228_v29  ;;  %6020 = vmatmul.bf16.gmra.mxu0 %v5896_v3  ;;  %v6406_v63 = vshll.u32 %v6355_v44, 16  ;;  %v8676_v52 = vrot.slane %v16587_v33, 1  ;;  %v14421_v28 = vld [vmem:[#allocation10 + $0x178] sm:$0xff] }
 0x3b2   : > { %6218 = vmatmul.bf16.gmra.mxu1 %v6094_v42  ;;  %v14688_v42 = vor.u32 %v14687_v43, %v14686_v60  ;;  %7977 = vmatpush.bf16.msra.mxu3 %v14421_v28  ;;  %v14376_v33 = vld [vmem:[#allocation3 + $0x14] sm:$0xff] }
 0x3b3   : > { %v6405_v4 = vrot.slane %v6403_v49, 7  ;;  %v6284_v7 = vadd.f32 %v16537_v50, %v6256_v58  ;;  %v16600_v15 = vsel %vm1758_vm7, %v8674_v20, %v8676_v52  ;;  %v14441_v20 = vld [vmem:[#allocation10 + $0x1b8] sm:$0xff]  ;;  %v6767_v49 = vshrl.u32 %v14656_v51, 16  ;;  %v14375_v58 = vld [vmem:[#allocation3 + $0xc] sm:$0xff] }
 0x3b4   : > { %5663 = vmatmul.bf16.gmra.mxu3 %v14304_v27  ;;  %8215 = vmatpush.bf16.msra.mxu0 %v14441_v20 }
 0x3b5   : > { %v6408_v36 = vor.u32 %v6406_v63, %v6405_v4  ;;  %v6308_v16 = vmax.f32 %v6284_v7, 0.0  ;;  %5410 = vmatmul.bf16.gmra.mxu2 %v5286_v24  ;;  %v6771_v24 = vrot.slane %v6769_v25, 1  ;;  %v7129_v63 = vrot.slane %v14688_v42, 1 }
 0x3b6   : > { %v5983_v47 = vpop.f32.mrf.mxu0  ;;  %v7130_v7 = vrot.slane %v16605_v30, 1 }
 0x3b7   : > { %v5624_v11 = vpop.f32.mrf.mxu3  ;;  %v16593_v31 = vpop.f32.mrf.mxu1  ;;  %v6409_v12 = vsel %vm15333_vm5, %v15318_v41, %v6408_v36  ;;  %v6356_v48 = vpack.c.bf16 %v6308_v16, %v6308_v16  ;;  %v6774_v36 = vshll.u32 %v16605_v30, 16 }
 0x3b8   : > { %6621 = vst [vmem:[#allocation3 + $0x78] sm:$0xf] %v6409_v12  ;;  %v5371_v27 = vpop.f32.mrf.mxu2 }
 0x3b9   : > { %v6412_v57 = vshrl.u32 %v6356_v48, 16  ;;  %v5422_v56 = vadd.f32 %v5371_v27, %v16461_v26  ;;  %v6415_v29 = vshll.u32 %v6356_v48, 16  ;;  %v6410_v26 = vrot.slane %v6405_v4, 4 }
 0x3ba   : > { %v7131_v4 = vsel %vm1758_vm7, %v7129_v63, %v7130_v7 }
 0x3bb   : > { %v6414_v44 = vrot.slane %v6412_v57, 7  ;;  %v5675_v59 = vadd.f32 %v5624_v11, %v5422_v56  ;;  %v6772_v57 = vor.u32 %v6771_v24, %v6767_v49  ;;  %v6776_v56 = vrot.slane %v6774_v36, 1 }
 0x3bd   : > { %v6417_v16 = vor.u32 %v6415_v29, %v6414_v44  ;;  %v6419_v60 = vrot.slane %v6414_v44, 4  ;;  %v6032_v43 = vadd.f32 %v5981_v0, %v5675_v59  ;;  %v6777_v44 = vsel %vm1378_vm6, %v6772_v57, %v6776_v56 }
 0x3be   : > { %v5986_v12 = vpop.f32.mrf.mxu0 }
 0x3bf   : > { %v5626_v46 = vpop.f32.mrf.mxu3  ;;  %v6184_v3 = vpop.f32.mrf.mxu1  ;;  %v6418_v11 = vsel %vm15333_vm5, %v6410_v26, %v6417_v16  ;;  %v6427_v48 = vsel %vm15333_vm5, %v6419_v60, %v15304_v21  ;;  %v6230_v27 = vadd.f32 %v16573_v35, %v6032_v43  ;;  %v8316_v25 = vld [vmem:[#allocation3 + $0x78] sm:$0x1]  ;;  %v16632_v26 = vld [vmem:[#allocation3 + $0x10] sm:$0xff] }
 0x3c0   : > { %6622 = vst [vmem:[#allocation3 + $0x7c] sm:$0xf] %v6418_v11  ;;  %v5373_v42 = vpop.f32.mrf.mxu2  ;;  %v8383_v0 = vunpack.c.l.b16 %v8316_v25 }
 0x3c1   : > { %6623 = vst [vmem:[#allocation3 + $0x80] sm:$0xf] %v6427_v48  ;;  %v5423_v2 = vadd.f32 %v5373_v42, %v16465_v9  ;;  %7222 = vmatmul.bf16.vlgmr.msrb.gmra.mxu0 %v7131_v4  ;;  %v6782_v48 = vshll.u32 %v16632_v26, 16 }
 0x3c2   : > { %7460 = vmatmul.bf16.vlgmr.msrb.gmra.mxu1 %v14375_v58  ;;  %v16621_v3 = vpack.c.b16 %v8383_v0, %v8383_v0 }
 0x3c3   : > { %v5676_v19 = vadd.f32 %v5626_v46, %v5423_v2  ;;  %v6784_v2 = vrot.slane %v6782_v48, 1 }
 0x3c4   : > { %7055 = vmatmul.bf16.vlgmr.msrb.gmra.mxu3 %v14656_v51  ;;  %v6258_v51 = vmul.f32 %v16530_v38, %v6230_v27  ;;  %v8678_v29 = vrot.slane %v16621_v3, 1 }
 0x3c5   : > { %v6033_v49 = vadd.f32 %v5983_v47, %v5676_v19  ;;  %6934 = vmatmul.bf16.vlgmr.msrb.gmra.mxu2 %v6777_v44  ;;  %v14412_v44 = vld [vmem:[#allocation10 + $0x130] sm:$0xff] }
 0x3c6   : > { %v6286_v35 = vadd.f32 %v16537_v50, %v6258_v51  ;;  %v5988_v58 = vpop.f32.mrf.mxu0  ;;  %v16629_v9 = vsel %vm1758_vm7, %v8676_v52, %v8678_v29  ;;  %v7132_v52 = vrot.slane %v16632_v26, 1  ;;  %v6778_v51 = vshrl.u32 %v16605_v30, 16  ;;  %v14420_v29 = vld [vmem:[#allocation10 + $0x170] sm:$0xff]  ;;  %7795 = vmatpush.bf16.msra.mxu2 %v14412_v44 }
 0x3c7   : > { %v5629_v28 = vpop.f32.mrf.mxu3  ;;  %v16619_v20 = vpop.f32.mrf.mxu1  ;;  %v6231_v63 = vadd.f32 %v16593_v31, %v6033_v49  ;;  %7978 = vmatpush.bf16.msra.mxu3 %v14420_v29 }
 0x3c8   : > { %v6310_v59 = vmax.f32 %v6286_v35, 0.0  ;;  %v5376_v36 = vpop.f32.mrf.mxu2  ;;  %v7133_v0 = vsel %vm1758_vm7, %v7130_v7, %v7132_v52  ;;  %v6780_v49 = vor.u32 %v6778_v51, %v6776_v56  ;;  %v14377_v51 = vld [vmem:[#allocation3 + $0x1c] sm:$0xff] }
 0x3c9   : > { %v6259_v16 = vmul.f32 %v16530_v38, %v6231_v63  ;;  %v14459_v63 = vld [vmem:[#allocation10 + $0x1f0] sm:$0xff] }
 0x3ca   : > { %v6358_v24 = vpack.c.bf16 %v6310_v59, %v6310_v59  ;;  %v14440_v59 = vld [vmem:[#allocation10 + $0x1b0] sm:$0xff]  ;;  %v6785_v7 = vsel %vm1378_vm6, %v6780_v49, %v6784_v2  ;;  %8558 = vmatpush.bf16.msra.mxu1 %v14459_v63 }
 0x3cb   : > { %v6287_v11 = vadd.f32 %v16537_v50, %v6259_v16  ;;  %8216 = vmatpush.bf16.msra.mxu0 %v14440_v59 }
 0x3cc   : > { %v6430_v46 = vshrl.u32 %v6358_v24, 16  ;;  %v6433_v12 = vshll.u32 %v6358_v24, 16 }
 0x3cd   : > { %v6311_v31 = vmax.f32 %v6287_v11, 0.0 }
 0x3ce   : > { %v6432_v47 = vrot.slane %v6430_v46, 7  ;;  %v5991_v25 = vpop.f32.mrf.mxu0 }
 0x3cf   : > { %v5631_v60 = vpop.f32.mrf.mxu3  ;;  %v16635_v43 = vpop.f32.mrf.mxu1  ;;  %v6359_v57 = vpack.c.bf16 %v6311_v31, %v6311_v31  ;;  %v16656_v31 = vld [vmem:[#allocation3 + $0x18] sm:$0xff] }
 0x3d0   : > { %v6435_v27 = vor.u32 %v6433_v12, %v6432_v47  ;;  %v5378_v4 = vpop.f32.mrf.mxu2 }
 0x3d1   : > { %v6439_v28 = vshrl.u32 %v6359_v57, 16  ;;  %v5425_v35 = vadd.f32 %v5378_v4, %v16471_v34  ;;  %7227 = vmatmul.bf16.gmra.mxu0 %v7133_v0  ;;  %v6442_v46 = vshll.u32 %v6359_v57, 16 }
 0x3d2   : > { %7465 = vmatmul.bf16.gmra.mxu1 %v14376_v33  ;;  %v6436_v42 = vsel %vm15333_vm5, %v15318_v41, %v6435_v27 }
 0x3d3   : > { %6624 = vst [vmem:[#allocation3 + $0x84] sm:$0xf] %v6436_v42  ;;  %v6441_v36 = vrot.slane %v6439_v28, 7  ;;  %v5678_v16 = vadd.f32 %v5631_v60, %v5425_v35  ;;  %v7134_v28 = vrot.slane %v16656_v31, 1 }
 0x3d4   : > { %7060 = vmatmul.bf16.gmra.mxu3 %v16605_v30  ;;  %v6437_v30 = vrot.slane %v6432_v47, 4 }
 0x3d5   : > { %v6444_v12 = vor.u32 %v6442_v46, %v6441_v36  ;;  %v6446_v34 = vrot.slane %v6441_v36, 4  ;;  %v6035_v11 = vadd.f32 %v5988_v58, %v5678_v16  ;;  %6939 = vmatmul.bf16.gmra.mxu2 %v6785_v7 }
 0x3d6   : > { %v5993_v33 = vpop.f32.mrf.mxu0 }
 0x3d7   : > { %v5634_v19 = vpop.f32.mrf.mxu3  ;;  %v6191_v24 = vpop.f32.mrf.mxu1  ;;  %v6445_v56 = vsel %vm15333_vm5, %v6437_v30, %v6444_v12  ;;  %v6454_v48 = vsel %vm15333_vm5, %v6446_v34, %v15304_v21  ;;  %v6233_v60 = vadd.f32 %v16619_v20, %v6035_v11  ;;  %v6790_v20 = vshll.u32 %v16656_v31, 16 }
 0x3d8   : > { %6625 = vst [vmem:[#allocation3 + $0x88] sm:$0xf] %v6445_v56  ;;  %v5381_v27 = vpop.f32.mrf.mxu2  ;;  %v6786_v24 = vshrl.u32 %v16632_v26, 16 }
 0x3d9   : > { %6626 = vst [vmem:[#allocation3 + $0x8c] sm:$0xf] %v6454_v48  ;;  %v6261_v47 = vmul.f32 %v16530_v38, %v6233_v60  ;;  %v5426_v58 = vadd.f32 %v5381_v27, %v16476_v14  ;;  %v6792_v63 = vrot.slane %v6790_v20, 1  ;;  %v16679_v60 = vld [vmem:[#allocation3 + $0x20] sm:$0xff] }
 0x3da   : > { %v6788_v16 = vor.u32 %v6786_v24, %v6784_v2 }
 0x3db   : > { %v6289_v4 = vadd.f32 %v16537_v50, %v6261_v47  ;;  %v5679_v0 = vadd.f32 %v5634_v19, %v5426_v58  ;;  %v7135_v19 = vsel %vm1758_vm7, %v7132_v52, %v7134_v28  ;;  %v14411_v58 = vld [vmem:[#allocation10 + $0x128] sm:$0xff] }
 0x3dc   : > { %v6793_v34 = vsel %vm1378_vm6, %v6788_v16, %v6792_v63  ;;  %7796 = vmatpush.bf16.msra.mxu2 %v14411_v58 }
 0x3dd   : > { %v6313_v35 = vmax.f32 %v6289_v4, 0.0  ;;  %v6036_v44 = vadd.f32 %v5991_v25, %v5679_v0  ;;  %v14439_v4 = vld [vmem:[#allocation10 + $0x1a8] sm:$0xff] }
 0x3de   : > { %v5996_v29 = vpop.f32.mrf.mxu0  ;;  %8217 = vmatpush.bf16.msra.mxu0 %v14439_v4 }
 0x3df   : > { %v5636_v42 = vpop.f32.mrf.mxu3  ;;  %v16660_v57 = vpop.f32.mrf.mxu1  ;;  %v6361_v59 = vpack.c.bf16 %v6313_v35, %v6313_v35  ;;  %v6234_v14 = vadd.f32 %v16635_v43, %v6036_v44 }
 0x3e0   : > { %v5383_v49 = vpop.f32.mrf.mxu2  ;;  %v14419_v42 = vld [vmem:[#allocation10 + $0x168] sm:$0xff] }
 0x3e1   : > { %v6457_v36 = vshrl.u32 %v6361_v59, 16  ;;  %v6262_v25 = vmul.f32 %v16530_v38, %v6234_v14  ;;  %7231 = vmatmul.bf16.gmra.mxu0 %v7135_v19  ;;  %v6460_v12 = vshll.u32 %v6361_v59, 16  ;;  %v14378_v59 = vld [vmem:[#allocation3 + $0x24] sm:$0xff]  ;;  %7979 = vmatpush.bf16.msra.mxu3 %v14419_v42  ;;  %v7136_v14 = vrot.slane %v16679_v60, 1 }
 0x3e2   : > { %7469 = vmatmul.bf16.gmra.mxu1 %v14377_v51  ;;  %v14458_v51 = vld [vmem:[#allocation10 + $0x1e8] sm:$0xff]  ;;  %v6798_v49 = vshll.u32 %v16679_v60, 16 }
 0x3e3   : > { %v6459_v30 = vrot.slane %v6457_v36, 7  ;;  %v6290_v43 = vadd.f32 %v16537_v50, %v6262_v25  ;;  %8559 = vmatpush.bf16.msra.mxu1 %v14458_v51  ;;  %v16699_v51 = vld [vmem:[#allocation3 + $0x28] sm:$0xff] }
 0x3e4   : > { %7064 = vmatmul.bf16.gmra.mxu3 %v16632_v26 }
 0x3e5   : > { %v6462_v11 = vor.u32 %v6460_v12, %v6459_v30  ;;  %v6314_v33 = vmax.f32 %v6290_v43, 0.0  ;;  %6943 = vmatmul.bf16.gmra.mxu2 %v6793_v34  ;;  %v6464_v19 = vrot.slane %v6459_v30, 4  ;;  %v7137_v30 = vsel %vm1758_vm7, %v7134_v28, %v7136_v14 }
 0x3e6   : > { %v5998_v52 = vpop.f32.mrf.mxu0  ;;  %v6800_v34 = vrot.slane %v6798_v49, 1  ;;  %v14379_v49 = vld [vmem:[#allocation3 + $0x2c] sm:$0xff] }
 0x3e7   : > { %v5639_v46 = vpop.f32.mrf.mxu3  ;;  %v6196_v7 = vpop.f32.mrf.mxu1  ;;  %v6463_v26 = vsel %vm15333_vm5, %v15318_v41, %v6462_v11  ;;  %v6362_v56 = vpack.c.bf16 %v6314_v33, %v6314_v33 }
 0x3e8   : > { %6627 = vst [vmem:[#allocation3 + $0x90] sm:$0xf] %v6463_v26  ;;  %v5386_v48 = vpop.f32.mrf.mxu2 }
 0x3e9   : > { %v6466_v2 = vshrl.u32 %v6362_v56, 16  ;;  %v5428_v27 = vadd.f32 %v5386_v48, %v16482_v5  ;;  %v6469_v35 = vshll.u32 %v6362_v56, 16 }
 0x3eb   : > { %v6468_v20 = vrot.slane %v6466_v2, 7  ;;  %v5681_v44 = vadd.f32 %v5639_v46, %v5428_v27 }
 0x3ed   : > { %v6471_v5 = vor.u32 %v6469_v35, %v6468_v20  ;;  %v6473_v24 = vrot.slane %v6468_v20, 4  ;;  %v6038_v36 = vadd.f32 %v5996_v29, %v5681_v44  ;;  %v6794_v29 = vshrl.u32 %v16656_v31, 16 }
 0x3ee   : > { %v6001_v25 = vpop.f32.mrf.mxu0 }
 0x3ef   : > { %v5641_v47 = vpop.f32.mrf.mxu3  ;;  %v6199_v0 = vpop.f32.mrf.mxu1  ;;  %v6472_v46 = vsel %vm15333_vm5, %v6464_v19, %v6471_v5  ;;  %v6481_v16 = vsel %vm15333_vm5, %v6473_v24, %v15304_v21  ;;  %v6236_v12 = vadd.f32 %v16660_v57, %v6038_v36  ;;  %v6796_v56 = vor.u32 %v6794_v29, %v6792_v63 }
 0x3f0   : > { %6628 = vst [vmem:[#allocation3 + $0x94] sm:$0xf] %v6472_v46  ;;  %v5388_v43 = vpop.f32.mrf.mxu2  ;;  %v6806_v19 = vshll.u32 %v16699_v51, 16 }
 0x3f1   : > { %6629 = vst [vmem:[#allocation3 + $0x98] sm:$0xf] %v6481_v16  ;;  %v6264_v11 = vmul.f32 %v16530_v38, %v6236_v12  ;;  %v5429_v33 = vadd.f32 %v5388_v43, %v16486_v39  ;;  %7235 = vmatmul.bf16.gmra.mxu0 %v7137_v30  ;;  %v6801_v27 = vsel %vm1378_vm6, %v6796_v56, %v6800_v34  ;;  %v6802_v12 = vshrl.u32 %v16679_v60, 16  ;;  %v14438_v56 = vld [vmem:[#allocation10 + $0x1a0] sm:$0xff] }
 0x3f2   : > { %7473 = vmatmul.bf16.gmra.mxu1 %v14378_v59  ;;  %v6808_v43 = vrot.slane %v6806_v19, 1  ;;  %8218 = vmatpush.bf16.msra.mxu0 %v14438_v56 }
 0x3f3   : > { %v6292_v57 = vadd.f32 %v16537_v50, %v6264_v11  ;;  %v5682_v2 = vadd.f32 %v5641_v47, %v5429_v33  ;;  %v14410_v33 = vld [vmem:[#allocation10 + $0x120] sm:$0xff] }
 0x3f4   : > { %7068 = vmatmul.bf16.gmra.mxu3 %v16656_v31  ;;  %7797 = vmatpush.bf16.msra.mxu2 %v14410_v33  ;;  %v6810_v33 = vshrl.u32 %v16699_v51, 16 }
 0x3f5   : > { %v6316_v58 = vmax.f32 %v6292_v57, 0.0  ;;  %v6039_v42 = vadd.f32 %v5998_v52, %v5682_v2  ;;  %6947 = vmatmul.bf16.gmra.mxu2 %v6801_v27  ;;  %v7138_v52 = vrot.slane %v16699_v51, 1  ;;  %v6804_v57 = vor.u32 %v6802_v12, %v6800_v34  ;;  %v14457_v27 = vld [vmem:[#allocation10 + $0x1e0] sm:$0xff] }
 0x3f6   : > { %v6003_v28 = vpop.f32.mrf.mxu0  ;;  %8560 = vmatpush.bf16.msra.mxu1 %v14457_v27 }
 0x3f7   : > { %v5644_v26 = vpop.f32.mrf.mxu3  ;;  %v6201_v48 = vpop.f32.mrf.mxu1  ;;  %v6364_v31 = vpack.c.bf16 %v6316_v58, %v6316_v58  ;;  %v6237_v4 = vadd.f32 %v6196_v7, %v6039_v42  ;;  %v7139_v16 = vsel %vm1758_vm7, %v7136_v14, %v7138_v52  ;;  %v6809_v14 = vsel %vm1378_vm6, %v6804_v57, %v6808_v43 }
 0x3f8   : > { %v5391_v0 = vpop.f32.mrf.mxu2  ;;  %v14418_v26 = vld [vmem:[#allocation10 + $0x160] sm:$0xff] }
 0x3f9   : > { %v6484_v20 = vshrl.u32 %v6364_v31, 16  ;;  %v6265_v39 = vmul.f32 %v16530_v38, %v6237_v4  ;;  %v6487_v59 = vshll.u32 %v6364_v31, 16  ;;  %7980 = vmatpush.bf16.msra.mxu3 %v14418_v26 }
 0x3fb   : > { %v6486_v44 = vrot.slane %v6484_v20, 7  ;;  %v6293_v47 = vadd.f32 %v16537_v50, %v6265_v39 }
 0x3fd   : > { %v6489_v5 = vor.u32 %v6487_v59, %v6486_v44  ;;  %v6317_v7 = vmax.f32 %v6293_v47, 0.0  ;;  %v16722_v47 = vld [vmem:[#allocation3 + $0x30] sm:$0xff] }
 0x3fe   : > { %v6006_v24 = vpop.f32.mrf.mxu0 }
 0x3ff   : > { %v5646_v35 = vpop.f32.mrf.mxu3  ;;  %v16702_v63 = vpop.f32.mrf.mxu1  ;;  %v6490_v36 = vsel %vm15333_vm5, %v15318_v41, %v6489_v5  ;;  %v6365_v25 = vpack.c.bf16 %v6317_v7, %v6317_v7 }
 0x400   : > { %6630 = vst [vmem:[#allocation3 + $0x9c] sm:$0xf] %v6490_v36  ;;  %v5393_v46 = vpop.f32.mrf.mxu2  ;;  %v14380_v36 = vld [vmem:[#allocation3 + $0x34] sm:$0xff] }
 0x401   : > { %v6493_v30 = vshrl.u32 %v6365_v25, 16  ;;  %v5431_v29 = vadd.f32 %v5393_v46, %v16492_v53  ;;  %7240 = vmatmul.bf16.gmra.mxu0 %v7139_v16  ;;  %v6496_v42 = vshll.u32 %v6365_v25, 16  ;;  %v7140_v25 = vrot.slane %v16722_v47, 1 }
 0x402   : > { %7478 = vmatmul.bf16.gmra.mxu1 %v14379_v49 }
 0x403   : > { %v6495_v58 = vrot.slane %v6493_v30, 7  ;;  %v5684_v31 = vadd.f32 %v5646_v35, %v5431_v29 }
 0x404   : > { %7073 = vmatmul.bf16.gmra.mxu3 %v16679_v60  ;;  %v6491_v60 = vrot.slane %v6486_v44, 4 }
 0x405   : > { %v6498_v4 = vor.u32 %v6496_v42, %v6495_v58  ;;  %v6500_v53 = vrot.slane %v6495_v58, 4  ;;  %v6041_v0 = vadd.f32 %v6003_v28, %v5684_v31  ;;  %6952 = vmatmul.bf16.gmra.mxu2 %v6809_v14 }
 0x406   : > { %v6008_v20 = vpop.f32.mrf.mxu0 }
 0x407   : > { %v5649_v11 = vpop.f32.mrf.mxu3  ;;  %v6206_v2 = vpop.f32.mrf.mxu1  ;;  %v6499_v34 = vsel %vm15333_vm5, %v6491_v60, %v6498_v4  ;;  %v6508_v39 = vsel %vm15333_vm5, %v6500_v53, %v15304_v21  ;;  %v6239_v35 = vadd.f32 %v6201_v48, %v6041_v0  ;;  %v6814_v48 = vshll.u32 %v16722_v47, 16  ;;  %v16745_v0 = vld [vmem:[#allocation3 + $0x38] sm:$0xff] }
 0x408   : > { %6631 = vst [vmem:[#allocation3 + $0xa0] sm:$0xf] %v6499_v34  ;;  %v5396_v59 = vpop.f32.mrf.mxu2  ;;  %v6812_v2 = vor.u32 %v6810_v33, %v6808_v43 }
 0x409   : > { %6632 = vst [vmem:[#allocation3 + $0xa4] sm:$0xf] %v6508_v39  ;;  %v6267_v44 = vmul.f32 %v16530_v38, %v6239_v35  ;;  %v5432_v49 = vadd.f32 %v5396_v59, %v16497_v45  ;;  %v6816_v26 = vrot.slane %v6814_v48, 1  ;;  %v14409_v39 = vld [vmem:[#allocation10 + $0x118] sm:$0xff]  ;;  %v7142_v48 = vrot.slane %v16745_v0, 1 }
 0x40a   : > { %v14417_v35 = vld [vmem:[#allocation10 + $0x158] sm:$0xff]  ;;  %7798 = vmatpush.bf16.msra.mxu2 %v14409_v39  ;;  %v16767_v39 = vld [vmem:[#allocation3 + $0x40] sm:$0xff] }
 0x40b   : > { %v6295_v5 = vadd.f32 %v16537_v50, %v6267_v44  ;;  %v5685_v7 = vadd.f32 %v5649_v11, %v5432_v49  ;;  %v7141_v11 = vsel %vm1758_vm7, %v7138_v52, %v7140_v25  ;;  %v6817_v31 = vsel %vm1378_vm6, %v6812_v2, %v6816_v26  ;;  %v14437_v59 = vld [vmem:[#allocation10 + $0x198] sm:$0xff]  ;;  %7981 = vmatpush.bf16.msra.mxu3 %v14417_v35 }
 0x40c   : > { %v14456_v49 = vld [vmem:[#allocation10 + $0x1d8] sm:$0xff]  ;;  %8219 = vmatpush.bf16.msra.mxu0 %v14437_v59 }
 0x40d   : > { %v6319_v46 = vmax.f32 %v6295_v5, 0.0  ;;  %v6042_v16 = vadd.f32 %v6006_v24, %v5685_v7  ;;  %8561 = vmatpush.bf16.msra.mxu1 %v14456_v49 }
 0x40e   : > { %v6011_v12 = vpop.f32.mrf.mxu0 }
 0x40f   : > { %v5651_v28 = vpop.f32.mrf.mxu3  ;;  %v16726_v19 = vpop.f32.mrf.mxu1  ;;  %v6367_v30 = vpack.c.bf16 %v6319_v46, %v6319_v46  ;;  %v6240_v45 = vadd.f32 %v16702_v63, %v6042_v16  ;;  %v6822_v46 = vshll.u32 %v16745_v0, 16 }
 0x410   : > { %v5398_v29 = vpop.f32.mrf.mxu2 }
 0x411   : > { %v6511_v56 = vshrl.u32 %v6367_v30, 16  ;;  %v6268_v24 = vmul.f32 %v16530_v38, %v6240_v45  ;;  %7244 = vmatmul.bf16.gmra.mxu0 %v7141_v11  ;;  %v6514_v42 = vshll.u32 %v6367_v30, 16  ;;  %v6824_v2 = vrot.slane %v6822_v46, 1 }
 0x412   : > { %7482 = vmatmul.bf16.gmra.mxu1 %v14380_v36  ;;  %v14381_v36 = vld [vmem:[#allocation3 + $0x3c] sm:$0xff] }
 0x413   : > { %v6513_v58 = vrot.slane %v6511_v56, 7  ;;  %v6296_v63 = vadd.f32 %v16537_v50, %v6268_v24 }
 0x414   : > { %7077 = vmatmul.bf16.gmra.mxu3 %v16699_v51 }
 0x415   : > { %v6516_v14 = vor.u32 %v6514_v42, %v6513_v58  ;;  %v6320_v60 = vmax.f32 %v6296_v63, 0.0  ;;  %6956 = vmatmul.bf16.gmra.mxu2 %v6817_v31  ;;  %v6518_v16 = vrot.slane %v6513_v58, 4 }
 0x416   : > { %v6013_v52 = vpop.f32.mrf.mxu0 }
 0x417   : > { %v5654_v57 = vpop.f32.mrf.mxu3  ;;  %v6211_v27 = vpop.f32.mrf.mxu1  ;;  %v6517_v51 = vsel %vm15333_vm5, %v15318_v41, %v6516_v14  ;;  %v6368_v4 = vpack.c.bf16 %v6320_v60, %v6320_v60 }
 0x418   : > { %6633 = vst [vmem:[#allocation3 + $0xa8] sm:$0xf] %v6517_v51  ;;  %v5401_v53 = vpop.f32.mrf.mxu2 }
 0x419   : > { %v6520_v43 = vshrl.u32 %v6368_v4, 16  ;;  %v5434_v20 = vadd.f32 %v5401_v53, %v16503_v55  ;;  %v6523_v5 = vshll.u32 %v6368_v4, 16 }
 0x41b   : > { %v6522_v28 = vrot.slane %v6520_v43, 7  ;;  %v5687_v7 = vadd.f32 %v5654_v57, %v5434_v20  ;;  %v7143_v57 = vsel %vm1758_vm7, %v7140_v25, %v7142_v48 }
 0x41d   : > { %v6525_v55 = vor.u32 %v6523_v5, %v6522_v28  ;;  %v6527_v30 = vrot.slane %v6522_v28, 4  ;;  %v6044_v45 = vadd.f32 %v6011_v12, %v5687_v7  ;;  %v6818_v12 = vshrl.u32 %v16722_v47, 16  ;;  %v14382_v28 = vld [vmem:[#allocation3 + $0x44] sm:$0xff] }
 0x41e   : > { %v6016_v29 = vpop.f32.mrf.mxu0  ;;  %v6830_v5 = vshll.u32 %v16767_v39, 16 }
 0x41f   : > { %v5656_v34 = vpop.f32.mrf.mxu3  ;;  %v6214_v44 = vpop.f32.mrf.mxu1  ;;  %v6526_v11 = vsel %vm15333_vm5, %v6518_v16, %v6525_v55  ;;  %v6535_v33 = vsel %vm15333_vm5, %v6527_v30, %v15304_v21  ;;  %v6242_v56 = vadd.f32 %v16726_v19, %v6044_v45  ;;  %v6820_v31 = vor.u32 %v6818_v12, %v6816_v26 }
 0x420   : > { %6634 = vst [vmem:[#allocation3 + $0xac] sm:$0xf] %v6526_v11  ;;  %v5403_v24 = vpop.f32.mrf.mxu2  ;;  %v6826_v55 = vshrl.u32 %v16745_v0, 16  ;;  %v16785_v30 = vrot.slane %v6830_v5, 1 }
 0x421   : > { %6635 = vst [vmem:[#allocation3 + $0xb0] sm:$0xf] %v6535_v33  ;;  %v6270_v58 = vmul.f32 %v16530_v38, %v6242_v56  ;;  %v5435_v42 = vadd.f32 %v5403_v24, %v16510_v6  ;;  %7248 = vmatmul.bf16.gmra.mxu0 %v7143_v57  ;;  %v6825_v51 = vsel %vm1378_vm6, %v6820_v31, %v6824_v2  ;;  %v14408_v33 = vld [vmem:[#allocation10 + $0x110] sm:$0xff] }
 0x422   : > { %7486 = vmatmul.bf16.gmra.mxu1 %v14381_v36  ;;  %v14416_v56 = vld [vmem:[#allocation10 + $0x150] sm:$0xff]  ;;  %v6828_v57 = vor.u32 %v6826_v55, %v6824_v2  ;;  %7799 = vmatpush.bf16.msra.mxu2 %v14408_v33  ;;  %v14415_v2 = vld [vmem:[#allocation10 + $0x148] sm:$0xff] }
 0x423   : > { %v6298_v19 = vadd.f32 %v16537_v50, %v6270_v58  ;;  %v5688_v60 = vadd.f32 %v5656_v34, %v5435_v42  ;;  %v14436_v24 = vld [vmem:[#allocation10 + $0x190] sm:$0xff]  ;;  %7982 = vmatpush.bf16.msra.mxu3 %v14416_v56  ;;  %v6834_v56 = vshrl.u32 %v16767_v39, 16 }
 0x424   : > { %7081 = vmatmul.bf16.gmra.mxu3 %v16722_v47  ;;  %v14455_v58 = vld [vmem:[#allocation10 + $0x1d0] sm:$0xff]  ;;  %8220 = vmatpush.bf16.msra.mxu0 %v14436_v24 }
 0x425   : > { %v6322_v4 = vmax.f32 %v6298_v19, 0.0  ;;  %v6045_v25 = vadd.f32 %v6013_v52, %v5688_v60  ;;  %6960 = vmatmul.bf16.gmra.mxu2 %v6825_v51  ;;  %v7144_v52 = vrot.slane %v16767_v39, 1  ;;  %8562 = vmatpush.bf16.msra.mxu1 %v14455_v58 }
 0x426   : > { %v6018_v47 = vpop.f32.mrf.mxu0 }
 0x427   : > { %v5659_v63 = vpop.f32.mrf.mxu3  ;;  %v16763_v14 = vpop.f32.mrf.mxu1  ;;  %v6370_v53 = vpack.c.bf16 %v6322_v4, %v6322_v4  ;;  %v6243_v43 = vadd.f32 %v6211_v27, %v6045_v25  ;;  %v14407_v4 = vld [vmem:[#allocation10 + $0x108] sm:$0xff]  ;;  %7983 = vmatpush.bf16.msra.mxu3 %v14415_v2 }
 0x428   : > { %v5406_v20 = vpop.f32.mrf.mxu2  ;;  %7800 = vmatpush.bf16.msra.mxu2 %v14407_v4 }
 0x429   : > { %v6538_v6 = vshrl.u32 %v6370_v53, 16  ;;  %v6271_v35 = vmul.f32 %v16530_v38, %v6243_v43  ;;  %v6541_v49 = vshll.u32 %v6370_v53, 16  ;;  %8563 = vmatpush.bf16.msra.mxu1 %v14454_v10 }
 0x42b   : > { %v6540_v44 = vrot.slane %v6538_v6, 7  ;;  %v6299_v34 = vadd.f32 %v16537_v50, %v6271_v35  ;;  %v7145_v50 = vsel %vm1758_vm7, %v7142_v48, %v7144_v52  ;;  %v16799_v35 = vld [vmem:[#allocation3 + $0x48] sm:$0xff] }
 0x42d   : > { %v6543_v7 = vor.u32 %v6541_v49, %v6540_v44  ;;  %v6323_v27 = vmax.f32 %v6299_v34, 0.0  ;;  %v6545_v48 = vrot.slane %v6540_v44, 4  ;;  %v14848_v44 = vld [vmem:[%s17426_s3] ss:$0 sm:$0xff] }
 0x42e   : > { %v16775_v36 = vpop.f32.mrf.mxu0 }
 0x42f   : > { %v5661_v26 = vpop.f32.mrf.mxu3  ;;  %v16770_v59 = vpop.f32.mrf.mxu1  ;;  %v6544_v38 = vsel %vm15333_vm5, %v15318_v41, %v6543_v7  ;;  %v6371_v46 = vpack.c.bf16 %v6323_v27, %v6323_v27 }
 0x430   : > { %6636 = vst [vmem:[#allocation3 + $0xb4] sm:$0xf] %v6544_v38  ;;  %v5408_v16 = vpop.f32.mrf.mxu2  ;;  %v14383_v38 = vld [vmem:[#allocation3 + $0x4c] sm:$0xff] }
 0x431   : > { %v6547_v45 = vshrl.u32 %v6371_v46, 16  ;;  %v5437_v29 = vadd.f32 %v5408_v16, %v16516_v32  ;;  %7253 = vmatmul.bf16.gmra.mxu0 %v7145_v50  ;;  %v6550_v63 = vshll.u32 %v6371_v46, 16  ;;  %v6642_v32 = vld [vmem:[#allocation3 + $0xcc] sm:$0x1]  ;;  %v7146_v46 = vrot.slane %v16799_v35, 1 }
 0x432   : > { %7491 = vmatmul.bf16.gmra.mxu1 %v14382_v28  ;;  %v6643_v25 = vsel %vm16382_vm9, %v15318_v41, %v6642_v32  ;;  %v6838_v16 = vshll.u32 %v16799_v35, 16 }
 0x433   : > { %v6549_v42 = vrot.slane %v6547_v45, 7  ;;  %v5690_v31 = vadd.f32 %v5661_v26, %v5437_v29  ;;  %6644 = vst [vmem:[#allocation3 + $0xcc] sm:$0x1] %v6643_v25  ;;  %v14435_v26 = vld [vmem:[#allocation10 + $0x188] sm:$0xff] }
 0x434   : > { %7086 = vmatmul.bf16.gmra.mxu3 %v16745_v0  ;;  %v6833_v0 = vsel %vm1378_vm6, %v6828_v57, %v16785_v30  ;;  %8221 = vmatpush.bf16.msra.mxu0 %v14435_v26  ;;  %v6840_v24 = vrot.slane %v6838_v16, 1  ;;  %v14414_v26 = vld [vmem:[#allocation10 + $0x140] sm:$0xff] }
 0x435   : > { %v6552_v19 = vor.u32 %v6550_v63, %v6549_v42  ;;  %v6554_v60 = vrot.slane %v6549_v42, 4  ;;  %v6047_v51 = vadd.f32 %v6018_v47, %v5690_v31  ;;  %6965 = vmatmul.bf16.gmra.mxu2 %v6833_v0  ;;  %7984 = vmatpush.bf16.msra.mxu3 %v14414_v26  ;;  %v14507_v26 = vld [vmem:[#allocation10 + $0x38] sm:$0xff] }
 0x436   : > { %v6023_v53 = vpop.f32.mrf.mxu0 }
 0x437   : > { %v5664_v11 = vpop.f32.mrf.mxu3  ;;  %v6221_v12 = vpop.f32.mrf.mxu1  ;;  %v6553_v43 = vsel %vm15333_vm5, %v6545_v48, %v6552_v19  ;;  %v6562_v20 = vsel %vm15333_vm5, %v6554_v60, %v15304_v21  ;;  %v6245_v6 = vadd.f32 %v16763_v14, %v6047_v51  ;;  %v14849_v14 = vld [vmem:[%s17427_s4] ss:$0 sm:$0xff]  ;;  %v16822_v51 = vld [vmem:[#allocation3 + $0x50] sm:$0xff] }
 0x438   : > { %6637 = vst [vmem:[#allocation3 + $0xb8] sm:$0xf] %v6553_v43  ;;  %v5411_v47 = vpop.f32.mrf.mxu2  ;;  %v7148_v10 = vrot.slane %v16822_v51, 1  ;;  %8222 = vmatpush.bf16.msra.mxu0 %v14434_v61 }
 0x439   : > { %6638 = vst [vmem:[#allocation3 + $0xbc] sm:$0xf] %v6562_v20  ;;  %v6273_v49 = vmul.f32 %v14848_v44, %v6245_v6  ;;  %v5438_v34 = vadd.f32 %v5411_v47, %v16522_v40  ;;  %v14384_v6 = vld [vmem:[#allocation3 + $0x54] sm:$0xff]  ;;  %v14406_v47 = vld [vmem:[#allocation10 + $0x100] sm:$0xff] }
 0x43a   : > { %7801 = vmatpush.bf16.msra.mxu2 %v14406_v47  ;;  %v7149_v16 = vsel %vm1758_vm7, %v7146_v46, %v7148_v10  ;;  %v14515_v47 = vld [vmem:[#allocation10 + $0x78] sm:$0xff] }
 0x43b   : > { %v6301_v7 = vadd.f32 %v14849_v14, %v6273_v49  ;;  %v5691_v27 = vadd.f32 %v5664_v11, %v5438_v34  ;;  %v7147_v11 = vsel %vm1758_vm7, %v7144_v52, %v7146_v46 }
 0x43c   : > { %9454 = vmatpush.bf16.msrb.mxu0 %v14515_v47 }
 0x43d   : > { %v6325_v50 = vmax.f32 %v6301_v7, 0.0  ;;  %v6048_v55 = vadd.f32 %v16775_v36, %v5691_v27  ;;  %v6836_v36 = vor.u32 %v6834_v56, %v16785_v30 }
 0x43e   : > { %v7223_v40 = vpop.f32.mrf.mxu0 }
 0x43f   : > { %v5666_v28 = vpop.f32.mrf.mxu3  ;;  %v7461_v5 = vpop.f32.mrf.mxu1  ;;  %v6373_v45 = vpack.c.bf16 %v6325_v50, %v6325_v50  ;;  %v6246_v29 = vadd.f32 %v16770_v59, %v6048_v55  ;;  %v6841_v59 = vsel %vm1378_vm6, %v6836_v36, %v6840_v24  ;;  %v6842_v50 = vshrl.u32 %v16799_v35, 16  ;;  %v14385_v36 = vld [vmem:[#allocation3 + $0x5c] sm:$0xff] }
 0x440   : > { %v5413_v33 = vpop.f32.mrf.mxu2 }
 0x441   : > { %v6565_v57 = vshrl.u32 %v6373_v45, 16  ;;  %v6274_v12 = vmul.f32 %v14848_v44, %v6246_v29  ;;  %7257 = vmatmul.bf16.gmra.mxu0 %v7147_v11  ;;  %v6568_v31 = vshll.u32 %v6373_v45, 16  ;;  %v6846_v44 = vshll.u32 %v16822_v51, 16 }
 0x442   : > { %7495 = vmatmul.bf16.gmra.mxu1 %v14383_v38  ;;  %v6844_v45 = vor.u32 %v6842_v50, %v6840_v24  ;;  %v14867_v50 = vld [vmem:[#allocation3 + $0xc] sm:$0xf0] }
 0x443   : > { %v6567_v63 = vrot.slane %v6565_v57, 7  ;;  %v6302_v48 = vadd.f32 %v14849_v14, %v6274_v12  ;;  %v6848_v55 = vrot.slane %v6846_v44, 1 }
 0x444   : > { %7090 = vmatmul.bf16.gmra.mxu3 %v16767_v39 }
 0x445   : > { %v6570_v0 = vor.u32 %v6568_v31, %v6567_v63  ;;  %v6326_v32 = vmax.f32 %v6302_v48, 0.0  ;;  %6969 = vmatmul.bf16.gmra.mxu2 %v6841_v59  ;;  %v6849_v11 = vsel %vm1378_vm6, %v6844_v45, %v6848_v55 }
 0x446   : > { %v7225_v19 = vpop.f32.mrf.mxu0 }
 0x447   : > { %v7056_v58 = vpop.f32.mrf.mxu3  ;;  %v7463_v42 = vpop.f32.mrf.mxu1  ;;  %v6571_v39 = vsel %vm15333_vm5, %v15318_v41, %v6570_v0  ;;  %v6374_v52 = vpack.c.bf16 %v6326_v32, %v6326_v32  ;;  %v6572_v41 = vrot.slane %v6567_v63, 4 }
 0x448   : > { %6639 = vst [vmem:[#allocation3 + $0xc0] sm:$0xf] %v6571_v39  ;;  %v6935_v60 = vpop.f32.mrf.mxu2  ;;  %v6685_v39 = vld [vmem:[#allocation3 + $0x60] sm:$0x1] }
 0x449   : > { %v6574_v30 = vshrl.u32 %v6374_v52, 16  ;;  %v7057_v4 = vadd.f32 %v7056_v58, %v6935_v60  ;;  %v6577_v43 = vshll.u32 %v6374_v52, 16 }
 0x44b   : > { %v6576_v53 = vrot.slane %v6574_v30, 7  ;;  %v7275_v20 = vadd.f32 %v7223_v40, %v7057_v4 }
 0x44d   : > { %v6579_v49 = vor.u32 %v6577_v43, %v6576_v53  ;;  %v6581_v34 = vrot.slane %v6576_v53, 4  ;;  %v16826_v28 = vadd.f32 %v7461_v5, %v7275_v20  ;;  %v14488_v53 = vld [vmem:[#allocation12 + $0x38] sm:$0xff] }
 0x44e   : > { %v7228_v14 = vpop.f32.mrf.mxu0  ;;  %9081 = vmatpush.bf16.msrb.mxu3 %v14488_v53 }
 0x44f   : > { %v7058_v2 = vpop.f32.mrf.mxu3  ;;  %v7466_v25 = vpop.f32.mrf.mxu1  ;;  %v6580_v7 = vsel %vm15333_vm5, %v6572_v41, %v6579_v49  ;;  %v6589_v27 = vsel %vm15333_vm5, %v6581_v34, %v15304_v21  ;;  %v14453_v21 = vld [vmem:[#allocation10 + $0x1c0] sm:$0xff] }
 0x450   : > { %6640 = vst [vmem:[#allocation3 + $0xc4] sm:$0xf] %v6580_v7  ;;  %v6937_v38 = vpop.f32.mrf.mxu2  ;;  %8564 = vmatpush.bf16.msra.mxu1 %v14453_v21  ;;  %v14468_v25 = vld [vmem:[#allocation10 + $0x238] sm:$0xff]  ;;  %v14386_v34 = vld [vmem:[#allocation3 + $0x64] sm:$0xff]  ;;  %v14868_v21 = vld [vmem:[#allocation3 + $0xc] sm:$0xe] }
 0x451   : > { %6641 = vst [vmem:[#allocation3 + $0xc8] sm:$0xf] %v6589_v27  ;;  %v7059_v5 = vadd.f32 %v7058_v2, %v6937_v38  ;;  %7261 = vmatmul.bf16.gmra.mxu0 %v7149_v16  ;;  %v6752_v2 = vunpack.c.l.b16 %v6685_v39  ;;  %8740 = vmatpush.bf16.msrb.mxu2 %v14468_v25  ;;  %v7530_v16 = vld [vmem:[#allocation3 + $0xc] sm:$0xff]  }
 0x452   : > { %7499 = vmatmul.bf16.gmra.mxu1 %v14384_v6 }
 0x453   : > { %v7276_v33 = vadd.f32 %v7225_v19, %v7059_v5  ;;  %v6765_v6 = vpack.c.b16 %v6752_v2, %v6752_v2  ;;  %v14487_v2 = vld [vmem:[#allocation12 + $0x30] sm:$0xff] }
 0x454   : > { %7094 = vmatmul.bf16.gmra.mxu3 %v16799_v35  ;;  %v14350_v35 = vld [vmem:[#allocation3 + $0x58] sm:$0xff]  ;;  %9575 = vmatpush.bf16.msrb.mxu1 %v14507_v26 }
 0x455   : > { %6973 = vmatmul.bf16.gmra.mxu2 %v6849_v11  ;;  %v16837_v56 = vadd.f32 %v7463_v42, %v7276_v33  ;;  %v7150_v63 = vrot.slane %v14350_v35, 1  ;;  %v6854_v31 = vshll.u32 %v14350_v35, 16  ;;  %v6850_v42 = vshrl.u32 %v16822_v51, 16  ;;  %v14422_v26 = vld [vmem:[#allocation3 + $0x18] sm:$0xff]  ;;  %9082 = vmatpush.bf16.msrb.mxu3 %v14487_v2  ;;  %v14852_v2 = vld [vmem:[#allocation3 + $0x30] sm:$0xff] }
 0x456   : > { %v7229_v57 = vpop.f32.mrf.mxu0  ;;  %v7152_v14 = vrot.slane %v6765_v6, 1  ;;  %v6862_v7 = vshll.u32 %v6765_v6, 16  ;;  %v6858_v45 = vshrl.u32 %v14350_v35, 16 }
 0x457   : > { %v7061_v40 = vpop.f32.mrf.mxu3  ;;  %v7467_v29 = vpop.f32.mrf.mxu1  ;;  %v7151_v59 = vsel %vm1758_vm7, %v7148_v10, %v7150_v63  ;;  %v6856_v0 = vrot.slane %v6854_v31, 1  ;;  %v6852_v52 = vor.u32 %v6850_v42, %v6848_v55  ;;  %v14689_v55 = vld [vmem:[#allocation3 + $0x18] sm:$0xff]  }
 0x458   : > { %v6940_v46 = vpop.f32.mrf.mxu2  ;;  %v7153_v40 = vsel %vm1758_vm7, %v7150_v63, %v7152_v14  ;;  %v8398_v63 = vshrl.u32 %v14689_v55, 16 }
 0x459   : > { %v6857_v4 = vsel %vm1378_vm6, %v6852_v52, %v6856_v0  ;;  %v6860_v11 = vor.u32 %v6858_v45, %v6856_v0  ;;  %v7637_v52 = vshll.u32 %v7530_v16, 16  ;;  %v14514_v45 = vld [vmem:[#allocation10 + $0x70] sm:$0xff] }
 0x45a   : > { %9455 = vmatpush.bf16.msrb.mxu0 %v14514_v45 }
 0x45b   : > { %v7639_v47 = vrot.slane %v7637_v52, 1 }
 0x45e   : > { %v7232_v24 = vpop.f32.mrf.mxu0 }
 0x45f   : > { %v7062_v12 = vpop.f32.mrf.mxu3  ;;  %v7470_v58 = vpop.f32.mrf.mxu1 }
 0x460   : > { %v6941_v48 = vpop.f32.mrf.mxu2 }
 0x461   : > { %v7063_v32 = vadd.f32 %v7062_v12, %v6941_v48  ;;  %7266 = vmatmul.bf16.gmra.mxu0 %v7151_v59  ;;  %v14850_v12 = vld [vmem:[#allocation3 + $0x20] sm:$0xff]  ;;  %v14869_v48 = vor.u32 %v14868_v21, %v14867_v50 }
 0x462   : > { %7504 = vmatmul.bf16.gmra.mxu1 %v14385_v36  ;;  %v16849_v36 = vld [vmem:[#allocation3 + $0x14] sm:$0xff]  ;;  %v8409_v21 = vshrl.u32 %v14850_v12, 16 }
 0x463   : > { %v7277_v30 = vadd.f32 %v7229_v57, %v7063_v32  ;;  %v8400_v57 = vshll.u32 %v14689_v55, 16  ;;  %v7893_v0 = vrot.slane %v16849_v36, 1  ;;  %v7642_v53 = vshll.u32 %v16849_v36, 16 }
 0x464   : > { %7099 = vmatmul.bf16.gmra.mxu3 %v16822_v51 }
 0x465   : > { %6978 = vmatmul.bf16.gmra.mxu2 %v6857_v4  ;;  %v16843_v43 = vadd.f32 %v7467_v29, %v7277_v30  ;;  %v6864_v29 = vrot.slane %v6862_v7, 1  ;;  %v7892_v30 = vrot.slane %v14869_v48, 1  ;;  %v14467_v4 = vld [vmem:[#allocation10 + $0x230] sm:$0xff] }
 0x466   : > { %v7234_v20 = vpop.f32.mrf.mxu0  ;;  %8741 = vmatpush.bf16.msrb.mxu2 %v14467_v4 }
 0x467   : > { %v7065_v19 = vpop.f32.mrf.mxu3  ;;  %v7472_v60 = vpop.f32.mrf.mxu1  ;;  %v6865_v46 = vsel %vm1378_vm6, %v6860_v11, %v6864_v29  ;;  %v7894_v20 = vsel %vm1758_vm7, %v7892_v30, %v7893_v0  ;;  %v14506_v29 = vld [vmem:[#allocation10 + $0x30] sm:$0xff] }
 0x468   : > { %v6944_v51 = vpop.f32.mrf.mxu2  ;;  %9576 = vmatpush.bf16.msrb.mxu1 %v14506_v29 }
 0x469   : > { %v7066_v10 = vadd.f32 %v7065_v19, %v6944_v51 }
 0x46b   : > { %v7278_v49 = vadd.f32 %v7232_v24, %v7066_v10  ;;  %v8402_v24 = vrot.slane %v8400_v57, 1 }
 0x46d   : > { %v16845_v27 = vadd.f32 %v7470_v58, %v7278_v49  ;;  %v8405_v58 = vshll.u32 %v14850_v12, 16  ;;  %v8403_v39 = vor.u32 %v8402_v24, %v8398_v63  ;;  %v7644_v49 = vrot.slane %v7642_v53, 1  ;;  %v14466_v53 = vld [vmem:[#allocation10 + $0x228] sm:$0xff] }
 0x46e   : > { %v7236_v38 = vpop.f32.mrf.mxu0  ;;  %8742 = vmatpush.bf16.msrb.mxu2 %v14466_v53 }
 0x46f   : > { %v7067_v44 = vpop.f32.mrf.mxu3  ;;  %v7474_v41 = vpop.f32.mrf.mxu1 }
 0x470   : > { %v6946_v5 = vpop.f32.mrf.mxu2  ;;  %v7635_v44 = vshrl.u32 %v7530_v16, 16 }
 0x471   : > { %7270 = vmatmul.bf16.gmra.mxu0 %v7153_v40  ;;  %v14851_v5 = vld [vmem:[#allocation3 + $0x28] sm:$0xff] }
 0x472   : > { %7508 = vmatmul.bf16.gmra.mxu1 %v14386_v34  ;;  %v7640_v7 = vor.u32 %v7639_v47, %v7635_v44  ;;  %v8413_v40 = vshll.u32 %v14851_v5, 16  ;;  %v14513_v44 = vld [vmem:[#allocation10 + $0x68] sm:$0xff] }
 0x473   : > { %9456 = vmatpush.bf16.msrb.mxu0 %v14513_v44 }
 0x474   : > { %7103 = vmatmul.bf16.gmra.mxu3 %v14350_v35  ;;  %v8407_v35 = vrot.slane %v8405_v58, 1  ;;  %v7645_v55 = vsel %vm1378_vm6, %v7640_v7, %v7644_v49  ;;  %v8415_v57 = vrot.slane %v8413_v40, 1 }
 0x475   : > { %6982 = vmatmul.bf16.gmra.mxu2 %v6865_v46 }
 0x476   : > { %v7238_v31 = vpop.f32.mrf.mxu0  ;;  %v8408_v25 = vsel %vm1378_vm6, %v8403_v39, %v8407_v35  ;;  %v8411_v24 = vor.u32 %v8409_v21, %v8407_v35 }
 0x477   : > { %v7069_v33 = vpop.f32.mrf.mxu3  ;;  %v7476_v61 = vpop.f32.mrf.mxu1 }
 0x478   : > { %v6948_v59 = vpop.f32.mrf.mxu2  ;;  %v8416_v48 = vsel %vm1378_vm6, %v8411_v24, %v8415_v57 }
 0x479   : > { %v7070_v42 = vadd.f32 %v7069_v33, %v6948_v59 }
 0x47b   : > { %v7279_v60 = vadd.f32 %v7236_v38, %v7070_v42  ;;  %v14423_v42 = vld [vmem:[#allocation3 + $0x20] sm:$0xff] }
 0x47d   : > { %v16855_v51 = vadd.f32 %v7474_v41, %v7279_v60  ;;  %v16858_v41 = vld [vmem:[#allocation3 + $0x1c] sm:$0xff] }
 0x47e   : > { %v7241_v6 = vpop.f32.mrf.mxu0  ;;  %v7895_v58 = vrot.slane %v16858_v41, 1  ;;  %v7650_v59 = vshll.u32 %v16858_v41, 16 }
 0x47f   : > { %v7071_v32 = vpop.f32.mrf.mxu3  ;;  %v7479_v19 = vpop.f32.mrf.mxu1 }
 0x480   : > { %v6950_v10 = vpop.f32.mrf.mxu2  ;;  %v7896_v63 = vsel %vm1758_vm7, %v7893_v0, %v7895_v58  ;;  %v7646_v19 = vshrl.u32 %v16849_v36, 16  ;;  %v7652_v12 = vrot.slane %v7650_v59, 1  ;;  %v16868_v0 = vld [vmem:[#allocation3 + $0x24] sm:$0xff] }
 0x481   : > { %v7072_v34 = vadd.f32 %v7071_v32, %v6950_v10  ;;  %8223 = vmatmul.bf16.vlgmr.msra.gmra.mxu0 %v14422_v26  ;;  %v8417_v26 = vshrl.u32 %v14851_v5, 16  ;;  %v7897_v7 = vrot.slane %v16868_v0, 1  ;;  %v7658_v45 = vshll.u32 %v16868_v0, 16 }
 0x482   : > { %8565 = vmatmul.bf16.vlgmr.msra.gmra.mxu1 %v8408_v25  ;;  %v7648_v60 = vor.u32 %v7646_v19, %v7644_v49  ;;  %v8421_v25 = vshll.u32 %v14852_v2, 16  ;;  %v14505_v49 = vld [vmem:[#allocation10 + $0x28] sm:$0xff]  ;;  %v8425_v19 = vshrl.u32 %v14852_v2, 16 }
 0x483   : > { %v7280_v50 = vadd.f32 %v7238_v31, %v7072_v34  ;;  %9577 = vmatpush.bf16.msrb.mxu1 %v14505_v49  ;;  %v7898_v29 = vsel %vm1758_vm7, %v7895_v58, %v7897_v7  ;;  %v7660_v24 = vrot.slane %v7658_v45, 1  ;;  %v16880_v58 = vld [vmem:[#allocation3 + $0x2c] sm:$0xff]  ;;  %v14854_v45 = vld [vmem:[#allocation3 + $0x40] sm:$0xff] }
 0x484   : > { %7985 = vmatmul.bf16.vlgmr.msra.gmra.mxu3 %v7894_v20  ;;  %v7653_v4 = vsel %vm1378_vm6, %v7648_v60, %v7652_v12  ;;  %v14486_v20 = vld [vmem:[#allocation12 + $0x28] sm:$0xff]  ;;  %v8423_v10 = vrot.slane %v8421_v25, 1  ;;  %v14485_v25 = vld [vmem:[#allocation12 + $0x20] sm:$0xff] }
 0x485   : > { %7802 = vmatmul.bf16.vlgmr.msra.gmra.mxu2 %v7645_v55  ;;  %v16860_v33 = vadd.f32 %v7476_v61, %v7280_v50  ;;  %9083 = vmatpush.bf16.msrb.mxu3 %v14486_v20  ;;  %v8419_v55 = vor.u32 %v8417_v26, %v8415_v57  ;;  %v7666_v20 = vshll.u32 %v16880_v58, 16  ;;  %v14425_v26 = vld [vmem:[#allocation3 + $0x30] sm:$0xff] }
 0x486   : > { %v7242_v11 = vpop.f32.mrf.mxu0 }
 0x487   : > { %v7074_v14 = vpop.f32.mrf.mxu3  ;;  %v7480_v38 = vpop.f32.mrf.mxu1  ;;  %v7668_v49 = vrot.slane %v7666_v20, 1 }
 0x488   : > { %v6953_v16 = vpop.f32.mrf.mxu2 }
 0x489   : > { %v14424_v16 = vld [vmem:[#allocation3 + $0x28] sm:$0xff]  ;;  %9084 = vmatpush.bf16.msrb.mxu3 %v14485_v25 }
 0x48e   : > { %v7245_v61 = vpop.f32.mrf.mxu0 }
 0x48f   : > { %v7075_v46 = vpop.f32.mrf.mxu3  ;;  %v7483_v31 = vpop.f32.mrf.mxu1 }
 0x490   : > { %v6954_v32 = vpop.f32.mrf.mxu2 }
 0x491   : > { %v7076_v39 = vadd.f32 %v7075_v46, %v6954_v32  ;;  %8228 = vmatmul.bf16.gmra.mxu0 %v14423_v42  ;;  %v7654_v46 = vshrl.u32 %v16858_v41, 16  ;;  %v7899_v41 = vrot.slane %v16880_v58, 1 }
 0x492   : > { %8570 = vmatmul.bf16.gmra.mxu1 %v8416_v48 }
 0x493   : > { %v7281_v35 = vadd.f32 %v7242_v11, %v7076_v39  ;;  %v7656_v48 = vor.u32 %v7654_v46, %v7652_v12  ;;  %v14465_v12 = vld [vmem:[#allocation10 + $0x220] sm:$0xff] }
 0x494   : > { %7990 = vmatmul.bf16.gmra.mxu3 %v7896_v63  ;;  %8743 = vmatpush.bf16.msrb.mxu2 %v14465_v12 }
 0x495   : > { %7807 = vmatmul.bf16.gmra.mxu2 %v7653_v4  ;;  %v16870_v6 = vadd.f32 %v7480_v38, %v7281_v35  ;;  %v8424_v38 = vsel %vm1378_vm6, %v8419_v55, %v8423_v10  ;;  %v7661_v63 = vsel %vm1378_vm6, %v7656_v48, %v7660_v24  ;;  %v8427_v35 = vor.u32 %v8425_v19, %v8423_v10 }
 0x496   : > { %v7247_v47 = vpop.f32.mrf.mxu0  ;;  %v7662_v10 = vshrl.u32 %v16868_v0, 16 }
 0x497   : > { %v7078_v52 = vpop.f32.mrf.mxu3  ;;  %v7485_v30 = vpop.f32.mrf.mxu1  ;;  %v7900_v47 = vsel %vm1758_vm7, %v7897_v7, %v7899_v41 }
 0x498   : > { %v6957_v36 = vpop.f32.mrf.mxu2  ;;  %v7664_v55 = vor.u32 %v7662_v10, %v7660_v24 }
 0x499   : > { %v7079_v34 = vadd.f32 %v7078_v52, %v6957_v36 }
 0x49a   : > { %v7669_v7 = vsel %vm1378_vm6, %v7664_v55, %v7668_v49 }
 0x49b   : > { %v7282_v40 = vadd.f32 %v7245_v61, %v7079_v34  ;;  %v14853_v61 = vld [vmem:[#allocation3 + $0x38] sm:$0xff] }
 0x49c   : > { %v8429_v42 = vshll.u32 %v14853_v61, 16 }
 0x49d   : > { %v16876_v5 = vadd.f32 %v7483_v31, %v7282_v40 }
 0x49e   : > { %v7249_v11 = vpop.f32.mrf.mxu0  ;;  %v8431_v39 = vrot.slane %v8429_v42, 1 }
 0x49f   : > { %v7080_v14 = vpop.f32.mrf.mxu3  ;;  %v7487_v50 = vpop.f32.mrf.mxu1 }
 0x4a0   : > { %v6959_v21 = vpop.f32.mrf.mxu2  ;;  %v8432_v53 = vsel %vm1378_vm6, %v8427_v35, %v8431_v39  ;;  %v7670_v35 = vshrl.u32 %v16880_v58, 16 }
 0x4a1   : > { %8232 = vmatmul.bf16.gmra.mxu0 %v14424_v16  ;;  %v14504_v16 = vld [vmem:[#allocation10 + $0x20] sm:$0xff] }
 0x4a2   : > { %8574 = vmatmul.bf16.gmra.mxu1 %v8424_v38  ;;  %v7672_v25 = vor.u32 %v7670_v35, %v7668_v49  ;;  %v14511_v49 = vld [vmem:[#allocation10 + $0x58] sm:$0xff] }
 0x4a3   : > { %9578 = vmatpush.bf16.msrb.mxu1 %v14504_v16 }
 0x4a4   : > { %7994 = vmatmul.bf16.gmra.mxu3 %v7898_v29  ;;  %v8437_v29 = vshll.u32 %v14854_v45, 16 }
 0x4a5   : > { %7811 = vmatmul.bf16.gmra.mxu2 %v7661_v63 }
 0x4a6   : > { %v7251_v31 = vpop.f32.mrf.mxu0  ;;  %v8439_v48 = vrot.slane %v8437_v29, 1 }
 0x4a7   : > { %v7082_v57 = vpop.f32.mrf.mxu3  ;;  %v7489_v59 = vpop.f32.mrf.mxu1 }
 0x4a8   : > { %v6961_v32 = vpop.f32.mrf.mxu2 }
 0x4a9   : > { %v7083_v52 = vadd.f32 %v7082_v57, %v6961_v32  ;;  %v8433_v57 = vshrl.u32 %v14853_v61, 16 }
 0x4ab   : > { %v7283_v4 = vadd.f32 %v7249_v11, %v7083_v52  ;;  %v14512_v11 = vld [vmem:[#allocation10 + $0x60] sm:$0xff] }
 0x4ac   : > { %9457 = vmatpush.bf16.msrb.mxu0 %v14512_v11 }
 0x4ad   : > { %v16886_v36 = vadd.f32 %v7487_v50, %v7283_v4  ;;  %v16890_v50 = vld [vmem:[#allocation3 + $0x34] sm:$0xff] }
 0x4ae   : > { %v7254_v2 = vpop.f32.mrf.mxu0  ;;  %v7901_v63 = vrot.slane %v16890_v50, 1  ;;  %v7674_v19 = vshll.u32 %v16890_v50, 16 }
 0x4af   : > { %v7084_v60 = vpop.f32.mrf.mxu3  ;;  %v7492_v30 = vpop.f32.mrf.mxu1 }
 0x4b0   : > { %v6963_v44 = vpop.f32.mrf.mxu2  ;;  %v7902_v52 = vsel %vm1758_vm7, %v7899_v41, %v7901_v63  ;;  %v7676_v61 = vrot.slane %v7674_v19, 1  ;;  %v16900_v41 = vld [vmem:[#allocation3 + $0x3c] sm:$0xff]  ;;  %9458 = vmatpush.bf16.msrb.mxu0 %v14511_v49 }
 0x4b1   : > { %v7085_v34 = vadd.f32 %v7084_v60, %v6963_v44  ;;  %8236 = vmatmul.bf16.gmra.mxu0 %v14425_v26  ;;  %v14426_v60 = vld [vmem:[#allocation3 + $0x38] sm:$0xff]  ;;  %v7903_v11 = vrot.slane %v16900_v41, 1 }
 0x4b2   : > { %8578 = vmatmul.bf16.gmra.mxu1 %v8432_v53  ;;  %v7677_v20 = vsel %vm1378_vm6, %v7672_v25, %v7676_v61  ;;  %v14464_v26 = vld [vmem:[#allocation10 + $0x218] sm:$0xff] }
 0x4b3   : > { %v7284_v38 = vadd.f32 %v7251_v31, %v7085_v34  ;;  %v8435_v31 = vor.u32 %v8433_v57, %v8431_v39  ;;  %v14484_v44 = vld [vmem:[#allocation12 + $0x18] sm:$0xff]  ;;  %8744 = vmatpush.bf16.msrb.mxu2 %v14464_v26  ;;  %v7682_v57 = vshll.u32 %v16900_v41, 16 }
 0x4b4   : > { %7998 = vmatmul.bf16.gmra.mxu3 %v7900_v47  ;;  %v14855_v47 = vld [vmem:[#allocation3 + $0x48] sm:$0xff] }
 0x4b5   : > { %7815 = vmatmul.bf16.gmra.mxu2 %v7669_v7  ;;  %v16892_v21 = vadd.f32 %v7489_v59, %v7284_v38  ;;  %v8440_v32 = vsel %vm1378_vm6, %v8435_v31, %v8439_v48  ;;  %v8445_v2 = vshll.u32 %v14855_v47, 16  ;;  %9085 = vmatpush.bf16.msrb.mxu3 %v14484_v44  ;;  %v14503_v38 = vld [vmem:[#allocation10 + $0x18] sm:$0xff] }
 0x4b6   : > { %v7255_v46 = vpop.f32.mrf.mxu0  ;;  %9579 = vmatpush.bf16.msrb.mxu1 %v14503_v38 }
 0x4b7   : > { %v7087_v14 = vpop.f32.mrf.mxu3  ;;  %v7493_v40 = vpop.f32.mrf.mxu1  ;;  %v8447_v55 = vrot.slane %v8445_v2, 1 }
 0x4b8   : > { %v6966_v0 = vpop.f32.mrf.mxu2  ;;  %v8441_v14 = vshrl.u32 %v14854_v45, 16 }
 0x4be   : > { %v7258_v59 = vpop.f32.mrf.mxu0 }
 0x4bf   : > { %v7088_v24 = vpop.f32.mrf.mxu3  ;;  %v7496_v42 = vpop.f32.mrf.mxu1 }
 0x4c0   : > { %v6967_v30 = vpop.f32.mrf.mxu2 }
 0x4c1   : > { %v7089_v4 = vadd.f32 %v7088_v24, %v6967_v30  ;;  %8241 = vmatmul.bf16.gmra.mxu0 %v14426_v60  ;;  %v7904_v24 = vsel %vm1758_vm7, %v7901_v63, %v7903_v11  ;;  %v7684_v60 = vrot.slane %v7682_v57, 1  ;;  %v16912_v63 = vld [vmem:[#allocation3 + $0x44] sm:$0xff] }
 0x4c2   : > { %8583 = vmatmul.bf16.gmra.mxu1 %v8440_v32  ;;  %v14427_v32 = vld [vmem:[#allocation3 + $0x40] sm:$0xff]  ;;  %v7690_v49 = vshll.u32 %v16912_v63, 16 }
 0x4c3   : > { %v7285_v39 = vadd.f32 %v7255_v46, %v7089_v4  ;;  %v8443_v46 = vor.u32 %v8441_v14, %v8439_v48  ;;  %v14856_v4 = vld [vmem:[#allocation3 + $0x50] sm:$0xff] }
 0x4c4   : > { %8003 = vmatmul.bf16.gmra.mxu3 %v7902_v52  ;;  %v7678_v52 = vshrl.u32 %v16890_v50, 16  ;;  %v7905_v50 = vrot.slane %v16912_v63, 1 }
 0x4c5   : > { %7820 = vmatmul.bf16.gmra.mxu2 %v7677_v20  ;;  %v16902_v10 = vadd.f32 %v7493_v40, %v7285_v39  ;;  %v8448_v40 = vsel %vm1378_vm6, %v8443_v46, %v8447_v55 }
 0x4c6   : > { %v7260_v34 = vpop.f32.mrf.mxu0  ;;  %v7680_v30 = vor.u32 %v7678_v52, %v7676_v61  ;;  %v14463_v61 = vld [vmem:[#allocation10 + $0x210] sm:$0xff]  ;;  %v7906_v38 = vsel %vm1758_vm7, %v7903_v11, %v7905_v50 }
 0x4c7   : > { %v7091_v12 = vpop.f32.mrf.mxu3  ;;  %v7498_v53 = vpop.f32.mrf.mxu1  ;;  %8745 = vmatpush.bf16.msrb.mxu2 %v14463_v61  ;;  %v14429_v61 = vld [vmem:[#allocation3 + $0x50] sm:$0xff] }
 0x4c8   : > { %v6970_v58 = vpop.f32.mrf.mxu2  ;;  %v7685_v35 = vsel %vm1378_vm6, %v7680_v30, %v7684_v60  ;;  %v8449_v53 = vshrl.u32 %v14855_v47, 16  ;;  %v14502_v30 = vld [vmem:[#allocation10 + $0x10] sm:$0xff] }
 0x4c9   : > { %v7092_v7 = vadd.f32 %v7091_v12, %v6970_v58  ;;  %v8453_v12 = vshll.u32 %v14856_v4, 16  ;;  %v14483_v58 = vld [vmem:[#allocation12 + $0x10] sm:$0xff]  ;;  %9580 = vmatpush.bf16.msrb.mxu1 %v14502_v30  ;;  %v14501_v30 = vld [vmem:[#allocation10 + $0x8] sm:$0xff] }
 0x4ca   : > { %v8451_v44 = vor.u32 %v8449_v53, %v8447_v55  ;;  %9086 = vmatpush.bf16.msrb.mxu3 %v14483_v58  ;;  %v7686_v55 = vshrl.u32 %v16900_v41, 16 }
 0x4cb   : > { %v7286_v0 = vadd.f32 %v7258_v59, %v7092_v7  ;;  %v8455_v39 = vrot.slane %v8453_v12, 1 }
 0x4cd   : > { %v16908_v45 = vadd.f32 %v7496_v42, %v7286_v0  ;;  %v8456_v14 = vsel %vm1378_vm6, %v8451_v44, %v8455_v39  ;;  %v7692_v0 = vrot.slane %v7690_v49, 1  ;;  %9581 = vmatpush.bf16.msrb.mxu1 %v14501_v30  ;;  %v14461_v30 = vld [vmem:[#allocation10 + $0x200] sm:$0xff] }
 0x4ce   : > { %v7262_v31 = vpop.f32.mrf.mxu0 }
 0x4cf   : > { %v7093_v29 = vpop.f32.mrf.mxu3  ;;  %v7500_v16 = vpop.f32.mrf.mxu1 }
 0x4d0   : > { %v6972_v19 = vpop.f32.mrf.mxu2  ;;  %v14428_v29 = vld [vmem:[#allocation3 + $0x48] sm:$0xff] }
 0x4d1   : > { %8245 = vmatmul.bf16.gmra.mxu0 %v14427_v32  ;;  %v14857_v19 = vld [vmem:[#allocation3 + $0x58] sm:$0xff] }
 0x4d2   : > { %8587 = vmatmul.bf16.gmra.mxu1 %v8448_v40  ;;  %v8461_v52 = vshll.u32 %v14857_v19, 16 }
 0x4d4   : > { %8007 = vmatmul.bf16.gmra.mxu3 %v7904_v24  ;;  %v7688_v24 = vor.u32 %v7686_v55, %v7684_v60  ;;  %v8463_v53 = vrot.slane %v8461_v52, 1  ;;  %v14858_v55 = vld [vmem:[#allocation3 + $0x60] sm:$0xff]  ;;  %v8465_v52 = vshrl.u32 %v14857_v19, 16 }
 0x4d5   : > { %7824 = vmatmul.bf16.gmra.mxu2 %v7685_v35 }
 0x4d6   : > { %v7264_v42 = vpop.f32.mrf.mxu0  ;;  %v7693_v11 = vsel %vm1378_vm6, %v7688_v24, %v7692_v0  ;;  %v14482_v24 = vld [vmem:[#allocation12 + $0x8] sm:$0xff] }
 0x4d7   : > { %v7095_v48 = vpop.f32.mrf.mxu3  ;;  %v7502_v59 = vpop.f32.mrf.mxu1  ;;  %9087 = vmatpush.bf16.msrb.mxu3 %v14482_v24 }
 0x4d8   : > { %v6974_v25 = vpop.f32.mrf.mxu2 }
 0x4d9   : > { %v7096_v20 = vadd.f32 %v7095_v48, %v6974_v25  ;;  %v14510_v48 = vld [vmem:[#allocation10 + $0x50] sm:$0xff]  ;;  %v8457_v25 = vshrl.u32 %v14856_v4, 16 }
 0x4da   : > { %9459 = vmatpush.bf16.msrb.mxu0 %v14510_v48 }
 0x4db   : > { %v7287_v34 = vadd.f32 %v7262_v31, %v7096_v20 }
 0x4dd   : > { %v16918_v7 = vadd.f32 %v7500_v16, %v7287_v34  ;;  %v16922_v16 = vld [vmem:[#allocation3 + $0x4c] sm:$0xff] }
 0x4de   : > { %v7267_v47 = vpop.f32.mrf.mxu0  ;;  %v7698_v44 = vshll.u32 %v16922_v16, 16 }
 0x4df   : > { %v7097_v2 = vpop.f32.mrf.mxu3  ;;  %v7505_v26 = vpop.f32.mrf.mxu1 }
 0x4e0   : > { %v6976_v46 = vpop.f32.mrf.mxu2  ;;  %v7700_v4 = vrot.slane %v7698_v44, 1 }
 0x4e1   : > { %v7098_v40 = vadd.f32 %v7097_v2, %v6976_v46  ;;  %8249 = vmatmul.bf16.gmra.mxu0 %v14428_v29  ;;  %v8459_v2 = vor.u32 %v8457_v25, %v8455_v39 }
 0x4e2   : > { %8591 = vmatmul.bf16.gmra.mxu1 %v8456_v14  ;;  %v7694_v14 = vshrl.u32 %v16912_v63, 16 }
 0x4e3   : > { %v7288_v32 = vadd.f32 %v7264_v42, %v7098_v40  ;;  %v7907_v42 = vrot.slane %v16922_v16, 1  ;;  %v8464_v26 = vsel %vm1378_vm6, %v8459_v2, %v8463_v53  ;;  %v8469_v40 = vshll.u32 %v14858_v55, 16 }
 0x4e4   : > { %8011 = vmatmul.bf16.gmra.mxu3 %v7906_v38  ;;  %v7696_v47 = vor.u32 %v7694_v14, %v7692_v0  ;;  %v14509_v0 = vld [vmem:[#allocation10 + $0x48] sm:$0xff]  ;;  %v8467_v2 = vor.u32 %v8465_v52, %v8463_v53 }
 0x4e5   : > { %7828 = vmatmul.bf16.gmra.mxu2 %v7693_v11  ;;  %v16924_v35 = vadd.f32 %v7502_v59, %v7288_v32  ;;  %v7908_v34 = vsel %vm1758_vm7, %v7905_v50, %v7907_v42  ;;  %v16932_v50 = vld [vmem:[#allocation3 + $0x54] sm:$0xff]  ;;  %v8471_v48 = vrot.slane %v8469_v40, 1  ;;  %9460 = vmatpush.bf16.msrb.mxu0 %v14509_v0 }
 0x4e6   : > { %v7268_v12 = vpop.f32.mrf.mxu0  ;;  %v7701_v46 = vsel %vm1378_vm6, %v7696_v47, %v7700_v4  ;;  %v7909_v25 = vrot.slane %v16932_v50, 1  ;;  %v7706_v44 = vshll.u32 %v16932_v50, 16 }
 0x4e7   : > { %v7100_v57 = vpop.f32.mrf.mxu3  ;;  %v7506_v31 = vpop.f32.mrf.mxu1 }
 0x4e8   : > { %v6979_v41 = vpop.f32.mrf.mxu2  ;;  %v14462_v57 = vld [vmem:[#allocation10 + $0x208] sm:$0xff] }
 0x4e9   : > { %8746 = vmatpush.bf16.msrb.mxu2 %v14462_v57  ;;  %v8473_v57 = vshrl.u32 %v14858_v55, 16 }
 0x4eb   : > { %v8475_v0 = vor.u32 %v8473_v57, %v8471_v48  ;;  %v14500_v57 = vld [vmem:[#allocation10] sm:$0xff] }
 0x4ec   : > { %9582 = vmatpush.bf16.msrb.mxu1 %v14500_v57 }
 0x4ed   : > { %8747 = vmatpush.bf16.msrb.mxu2 %v14461_v30 }
 0x4ee   : > { %v7271_v59 = vpop.f32.mrf.mxu0 }
 0x4ef   : > { %v7101_v60 = vpop.f32.mrf.mxu3  ;;  %v7509_v20 = vpop.f32.mrf.mxu1 }
 0x4f0   : > { %v6980_v58 = vpop.f32.mrf.mxu2 }
 0x4f1   : > { %v7102_v49 = vadd.f32 %v7101_v60, %v6980_v58  ;;  %8254 = vmatmul.bf16.gmra.mxu0 %v14429_v61  ;;  %v14430_v58 = vld [vmem:[#allocation3 + $0x58] sm:$0xff] }
 0x4f2   : > { %8596 = vmatmul.bf16.gmra.mxu1 %v8464_v26 }
 0x4f3   : > { %v7289_v39 = vadd.f32 %v7268_v12, %v7102_v49  ;;  %v7702_v49 = vshrl.u32 %v16922_v16, 16 }
 0x4f4   : > { %8016 = vmatmul.bf16.gmra.mxu3 %v7908_v34  ;;  %v7910_v34 = vsel %vm1758_vm7, %v7907_v42, %v7909_v25  ;;  %v16944_v42 = vld [vmem:[#allocation3 + $0x5c] sm:$0xff] }
 0x4f5   : > { %7833 = vmatmul.bf16.gmra.mxu2 %v7701_v46  ;;  %v16934_v32 = vadd.f32 %v7506_v31, %v7289_v39  ;;  %v8472_v31 = vsel %vm1378_vm6, %v8467_v2, %v8471_v48  ;;  %v7704_v47 = vor.u32 %v7702_v49, %v7700_v4  ;;  %v14859_v39 = vld [vmem:[#allocation3 + $0x68] sm:$0xff]  ;;  %v7911_v16 = vrot.slane %v16944_v42, 1 }
 0x4f6   : > { %v7273_v11 = vpop.f32.mrf.mxu0  ;;  %v8477_v46 = vshll.u32 %v14859_v39, 16  ;;  %v7714_v2 = vshll.u32 %v16944_v42, 16  ;;  %v7710_v48 = vshrl.u32 %v16932_v50, 16 }
 0x4f7   : > { %v7104_v38 = vpop.f32.mrf.mxu3  ;;  %v7511_v29 = vpop.f32.mrf.mxu1 }
 0x4f8   : > { %v6983_v63 = vpop.f32.mrf.mxu2  ;;  %v8479_v24 = vrot.slane %v8477_v46, 1 }
 0x4f9   : > { %v7105_v12 = vadd.f32 %v7104_v38, %v6983_v63  ;;  %v7708_v38 = vrot.slane %v7706_v44, 1 }
 0x4fb   : > { %v7290_v26 = vadd.f32 %v7271_v59, %v7105_v12  ;;  %v7709_v29 = vsel %vm1378_vm6, %v7704_v47, %v7708_v38  ;;  %v14481_v12 = vld [vmem:[#allocation12] sm:$0xff] }
 0x4fc   : > { %9088 = vmatpush.bf16.msrb.mxu3 %v14481_v12 }
 0x4fd   : > { %v16940_v19 = vadd.f32 %v7509_v20, %v7290_v26  ;;  %v7912_v26 = vsel %vm1758_vm7, %v7909_v25, %v7911_v16 }
 0x4fe   : > { %v8224_v61 = vpop.f32.mrf.mxu0 }
 0x4ff   : > { %v7106_v41 = vpop.f32.mrf.mxu3  ;;  %v8566_v60 = vpop.f32.mrf.mxu1 }
 0x500   : > { %v6985_v14 = vpop.f32.mrf.mxu2  ;;  %v8480_v41 = vsel %vm1378_vm6, %v8475_v0, %v8479_v24  ;;  %v8481_v0 = vshrl.u32 %v14859_v39, 16  ;;  %v7718_v39 = vshrl.u32 %v16944_v42, 16 }
 0x501   : > { %8258 = vmatmul.bf16.gmra.mxu0 %v14430_v58  ;;  %v7716_v58 = vrot.slane %v7714_v2, 1 }
 0x502   : > { %8600 = vmatmul.bf16.gmra.mxu1 %v8472_v31  ;;  %v8483_v12 = vor.u32 %v8481_v0, %v8479_v24 }
 0x504   : > { %8020 = vmatmul.bf16.gmra.mxu3 %v7910_v34 }
 0x505   : > { %7837 = vmatmul.bf16.gmra.mxu2 %v7709_v29 }
 0x506   : > { %v8226_v20 = vpop.f32.mrf.mxu0 }
 0x507   : > { %v7986_v53 = vpop.f32.mrf.mxu3  ;;  %v8568_v59 = vpop.f32.mrf.mxu1 }
 0x508   : > { %v7803_v40 = vpop.f32.mrf.mxu2 }
 0x509   : > { %v7855_v11 = vadd.f32 %v7803_v40, %v16826_v28  ;;  %v14431_v28 = vld [vmem:[#allocation3 + $0x60] sm:$0xff] }
 0x50a   : > { %v16956_v40 = vld [vmem:[#allocation3 + $0x64] sm:$0xff] }
 0x50b   : > { %v8038_v4 = vadd.f32 %v7986_v53, %v7855_v11  ;;  %v7712_v53 = vor.u32 %v7710_v48, %v7708_v38  ;;  %v7722_v2 = vshll.u32 %v16956_v40, 16 }
 0x50d   : > { %v8276_v55 = vadd.f32 %v8224_v61, %v8038_v4  ;;  %v7717_v29 = vsel %vm1378_vm6, %v7712_v53, %v7716_v58  ;;  %v14860_v61 = vld [vmem:[#allocation3 + $0x70] sm:$0xff] }
 0x50e   : > { %v8229_v31 = vpop.f32.mrf.mxu0  ;;  %v8485_v46 = vshll.u32 %v14860_v61, 16 }
 0x50f   : > { %v7988_v63 = vpop.f32.mrf.mxu3  ;;  %v8571_v52 = vpop.f32.mrf.mxu1  ;;  %v16951_v44 = vadd.f32 %v8566_v60, %v8276_v55  ;;  %v14508_v60 = vld [vmem:[#allocation10 + $0x40] sm:$0xff]  ;;  %v7553_v55 = vld [vmem:[#allocation3 + $0x6c] sm:$0x1] }
 0x510   : > { %v7805_v34 = vpop.f32.mrf.mxu2  ;;  %9461 = vmatpush.bf16.msrb.mxu0 %v14508_v60  ;;  %v8487_v38 = vrot.slane %v8485_v46, 1  ;;  %v7620_v24 = vunpack.c.l.b16 %v7553_v55  ;;  %v14523_v46 = vld [vmem:[#allocation10 + $0xb8] sm:$0xff] }
 0x511   : > { %v7856_v14 = vadd.f32 %v7805_v34, %v16837_v56  ;;  %8262 = vmatmul.bf16.gmra.mxu0 %v14431_v28  ;;  %v7724_v28 = vrot.slane %v7722_v2, 1  ;;  %v14543_v60 = vld [vmem:[#allocation10 + $0xf8] sm:$0xff]  ;;  %9741 = vmatpush.bf16.msra.mxu2 %v14523_v46  ;;  %v14693_v46 = vld [vmem:[#allocation3 + $0x60] sm:$0xff]  }
 0x512   : > { %8604 = vmatmul.bf16.gmra.mxu1 %v8480_v41  ;;  %v8488_v41 = vsel %vm1378_vm6, %v8483_v12, %v8487_v38  ;;  %9978 = vmatpush.bf16.msra.mxu3 %v14543_v60  ;;  %v14570_v12 = vld [vmem:[#allocation10 + $0x178] sm:$0xff] }
 0x513   : > { %v8039_v25 = vadd.f32 %v7988_v63, %v7856_v14  ;;  %v7913_v63 = vrot.slane %v16956_v40, 1  ;;  %v7720_v14 = vor.u32 %v7718_v39, %v7716_v58  ;;  %v14562_v58 = vld [vmem:[#allocation10 + $0x138] sm:$0xff]  ;;  %10501 = vmatpush.bf16.msra.mxu1 %v14570_v12 }
 0x514   : > { %8024 = vmatmul.bf16.gmra.mxu3 %v7912_v26  ;;  %10319 = vmatpush.bf16.msra.mxu0 %v14562_v58 }
 0x515   : > { %7841 = vmatmul.bf16.gmra.mxu2 %v7717_v29  ;;  %v8277_v11 = vadd.f32 %v8226_v20, %v8039_v25  ;;  %v7914_v26 = vsel %vm1758_vm7, %v7911_v16, %v7913_v63  ;;  %v7725_v25 = vsel %vm1378_vm6, %v7720_v14, %v7724_v28  ;;  %v8493_v16 = vshll.u32 %v16621_v3, 16 }
 0x516   : > { %v8230_v52 = vpop.f32.mrf.mxu0  ;;  %v7633_v29 = vpack.c.b16 %v7620_v24, %v7620_v24  ;;  %v16973_v24 = vld [vmem:[#allocation2 + $0x14] sm:$0xff] }
 0x517   : > { %v7991_v49 = vpop.f32.mrf.mxu3  ;;  %v8572_v47 = vpop.f32.mrf.mxu1  ;;  %v16958_v50 = vadd.f32 %v8568_v59, %v8277_v11  ;;  %v14432_v59 = vld [vmem:[#allocation3 + $0x68] sm:$0xff]  ;;  %v8495_v0 = vrot.slane %v8493_v16, 1 }
 0x518   : > { %v7808_v56 = vpop.f32.mrf.mxu2  ;;  %v7915_v2 = vrot.slane %v7633_v29, 1 }
 0x519   : > { %v8489_v56 = vshrl.u32 %v14860_v61, 16 }
 0x51e   : > { %v8233_v20 = vpop.f32.mrf.mxu0 }
 0x51f   : > { %v7992_v4 = vpop.f32.mrf.mxu3  ;;  %v8575_v30 = vpop.f32.mrf.mxu1 }
 0x520   : > { %v7809_v31 = vpop.f32.mrf.mxu2 }
 0x521   : > { %v7857_v34 = vadd.f32 %v7809_v31, %v16843_v43  ;;  %8267 = vmatmul.bf16.gmra.mxu0 %v14432_v59  ;;  %v7730_v31 = vshll.u32 %v7633_v29, 16 }
 0x522   : > { %8609 = vmatmul.bf16.gmra.mxu1 %v8488_v41 }
 0x523   : > { %v8040_v53 = vadd.f32 %v7992_v4, %v7857_v34  ;;  %v14433_v34 = vld [vmem:[#allocation3 + $0x70] sm:$0xff] }
 0x524   : > { %8029 = vmatmul.bf16.gmra.mxu3 %v7914_v26  ;;  %v8491_v26 = vor.u32 %v8489_v56, %v8487_v38 }
 0x525   : > { %7846 = vmatmul.bf16.gmra.mxu2 %v7725_v25  ;;  %v8278_v57 = vadd.f32 %v8230_v52, %v8040_v53  ;;  %v14469_v52 = vld [vmem:[#allocation2 + $0xc] sm:$0xff] }
 0x526   : > { %v8235_v11 = vpop.f32.mrf.mxu0  ;;  %v8496_v59 = vsel %vm1378_vm6, %v8491_v26, %v8495_v0  ;;  %v8922_v29 = vshrl.u32 %v14469_v52, 16  ;;  %v14690_v26 = vld [vmem:[#allocation3 + $0x18] sm:$0xf0] }
 0x527   : > { %v7995_v48 = vpop.f32.mrf.mxu3  ;;  %v8577_v49 = vpop.f32.mrf.mxu1  ;;  %v16968_v42 = vadd.f32 %v8572_v47, %v8278_v57  ;;  %v7916_v47 = vsel %vm1758_vm7, %v7913_v63, %v7915_v2  ;;  %v16980_v57 = vld [vmem:[#allocation3 + $0x68] sm:$0xff]  ;;  %v9297_v11 = vshll.u32 %v14693_v46, 16 }
 0x528   : > { %v7812_v43 = vpop.f32.mrf.mxu2  ;;  %v7726_v49 = vshrl.u32 %v16956_v40, 16  ;;  %v9302_v0 = vshll.u32 %v16980_v57, 16 }
 0x529   : > { %v7858_v4 = vadd.f32 %v7812_v43, %v16845_v27  ;;  %v8924_v27 = vshll.u32 %v14469_v52, 16  ;;  %v14542_v52 = vld [vmem:[#allocation10 + $0xf0] sm:$0xff] }
 0x52a   : > { %v7728_v25 = vor.u32 %v7726_v49, %v7724_v28  ;;  %9979 = vmatpush.bf16.msra.mxu3 %v14542_v52 }
 0x52b   : > { %v8041_v55 = vadd.f32 %v7995_v48, %v7858_v4  ;;  %v7732_v48 = vrot.slane %v7730_v31, 1  ;;  %v8926_v63 = vrot.slane %v8924_v27, 1  ;;  %v9299_v4 = vrot.slane %v9297_v11, 1 }
 0x52c   : > { %v9304_v31 = vrot.slane %v9302_v0, 1  ;;  %v17457_v11 = vrot.slane %v16160_v37, 1  ;;  %v14569_v0 = vld [vmem:[#allocation10 + $0x170] sm:$0xff] }
 0x52d   : > { %v8279_v61 = vadd.f32 %v8233_v20, %v8041_v55  ;;  %v8929_v20 = vshll.u32 %v16973_v24, 16  ;;  %v7733_v60 = vsel %vm1378_vm6, %v7728_v25, %v7732_v48  ;;  %v8927_v43 = vor.u32 %v8926_v63, %v8922_v29  ;;  %v14522_v55 = vld [vmem:[#allocation10 + $0xb0] sm:$0xff]  ;;  %10502 = vmatpush.bf16.msra.mxu1 %v14569_v0 }
 0x52e   : > { %v8237_v39 = vpop.f32.mrf.mxu0  ;;  %9742 = vmatpush.bf16.msra.mxu2 %v14522_v55  ;;  %v9306_v55 = vshrl.u32 %v16980_v57, 16 }
 0x52f   : > { %v7997_v41 = vpop.f32.mrf.mxu3  ;;  %v8579_v3 = vpop.f32.mrf.mxu1  ;;  %v16975_v14 = vadd.f32 %v8575_v30, %v8279_v61  ;;  %v8931_v56 = vrot.slane %v8929_v20, 1 }
 0x530   : > { %v7814_v38 = vpop.f32.mrf.mxu2 }
 0x531   : > { %8271 = vmatmul.bf16.gmra.mxu0 %v14433_v34  ;;  %v8932_v2 = vsel %vm1378_vm6, %v8927_v43, %v8931_v56 }
 0x532   : > { %8613 = vmatmul.bf16.gmra.mxu1 %v8496_v59  ;;  %v9295_v59 = vshrl.u32 %v14693_v46, 16 }
 0x534   : > { %8033 = vmatmul.bf16.gmra.mxu3 %v7916_v47  ;;  %v14691_v47 = vld [vmem:[#allocation3 + $0x18] sm:$0xe]  ;;  %v9300_v27 = vor.u32 %v9299_v4, %v9295_v59  ;;  %v14472_v59 = vld [vmem:[#allocation2 + $0x24] sm:$0xff] }
 0x535   : > { %7850 = vmatmul.bf16.gmra.mxu2 %v7733_v60  ;;  %v14692_v38 = vor.u32 %v14691_v47, %v14690_v26 }
 0x536   : > { %v8239_v30 = vpop.f32.mrf.mxu0 }
 0x537   : > { %v7999_v53 = vpop.f32.mrf.mxu3  ;;  %v8581_v16 = vpop.f32.mrf.mxu1  ;;  %v8655_v63 = vrot.slane %v14692_v38, 1 }
 0x538   : > { %v7816_v40 = vpop.f32.mrf.mxu2 }
 0x539   : > { %v7859_v28 = vadd.f32 %v7816_v40, %v16855_v51  ;;  %v14471_v51 = vld [vmem:[#allocation2 + $0x1c] sm:$0xff]  ;;  %v8657_v43 = vsel %vm1758_vm7, %v8655_v63, %v17457_v11  ;;  %v16993_v40 = vld [vmem:[#allocation3 + $0x70] sm:$0xff] }
 0x53a   : > { %v8937_v60 = vshll.u32 %v14471_v51, 16  ;;  %v14541_v63 = vld [vmem:[#allocation10 + $0xe8] sm:$0xff] }
 0x53b   : > { %v8042_v41 = vadd.f32 %v7999_v53, %v7859_v28  ;;  %v9305_v53 = vsel %vm1378_vm6, %v9300_v27, %v9304_v31  ;;  %9980 = vmatpush.bf16.msra.mxu3 %v14541_v63 }
 0x53c   : > { %v8939_v4 = vrot.slane %v8937_v60, 1 }
 0x53d   : > { %v8280_v61 = vadd.f32 %v8237_v39, %v8042_v41  ;;  %v8933_v39 = vshrl.u32 %v16973_v24, 16  ;;  %v9310_v24 = vshll.u32 %v16993_v40, 16 }
 0x53e   : > { %v8242_v34 = vpop.f32.mrf.mxu0 }
 0x53f   : > { %v8001_v58 = vpop.f32.mrf.mxu3  ;;  %v8584_v12 = vpop.f32.mrf.mxu1  ;;  %v16985_v49 = vadd.f32 %v8579_v3, %v8280_v61  ;;  %v14561_v3 = vld [vmem:[#allocation10 + $0x130] sm:$0xff]  ;;  %v9312_v52 = vrot.slane %v9310_v24, 1 }
 0x540   : > { %v7818_v48 = vpop.f32.mrf.mxu2  ;;  %10320 = vmatpush.bf16.msra.mxu0 %v14561_v3  ;;  %v14560_v3 = vld [vmem:[#allocation10 + $0x128] sm:$0xff] }
 0x541   : > { %v7860_v25 = vadd.f32 %v7818_v48, %v16860_v33  ;;  %9462 = vmatmul.bf16.vlgmr.msrb.gmra.mxu0 %v9305_v53  ;;  %v8935_v33 = vor.u32 %v8933_v39, %v8931_v56  ;;  %v9308_v56 = vor.u32 %v9306_v55, %v9304_v31  ;;  %v8941_v48 = vshrl.u32 %v14471_v51, 16  ;;  %v14568_v51 = vld [vmem:[#allocation10 + $0x168] sm:$0xff] }
 0x542   : > { %9583 = vmatmul.bf16.vlgmr.msrb.gmra.mxu1 %v14693_v46  ;;  %v8945_v53 = vshll.u32 %v14472_v59, 16 }
 0x543   : > { %v8043_v46 = vadd.f32 %v8001_v58, %v7860_v25  ;;  %v8940_v26 = vsel %vm1378_vm6, %v8935_v33, %v8939_v4  ;;  %v17003_v25 = vld [vmem:[#allocation3 + $0x78] sm:$0xff]  ;;  %v8943_v39 = vor.u32 %v8941_v48, %v8939_v4  ;;  %10503 = vmatpush.bf16.msra.mxu1 %v14568_v51  ;;  %v9314_v4 = vshrl.u32 %v16993_v40, 16 }
 0x544   : > { %9089 = vmatmul.bf16.vlgmr.msrb.gmra.mxu3 %v8932_v2  ;;  %v8947_v60 = vrot.slane %v8945_v53, 1  ;;  %10321 = vmatpush.bf16.msra.mxu0 %v14560_v3  ;;  %v14474_v51 = vld [vmem:[#allocation2 + $0x34] sm:$0xff] }
 0x545   : > { %8748 = vmatmul.bf16.vlgmr.msrb.gmra.mxu2 %v8657_v43  ;;  %v8281_v28 = vadd.f32 %v8239_v30, %v8043_v46  ;;  %v9318_v43 = vshll.u32 %v17003_v25, 16 }
 0x546   : > { %v8243_v12 = vpop.f32.mrf.mxu0 }
 0x547   : > { %v8004_v29 = vpop.f32.mrf.mxu3  ;;  %v8585_v20 = vpop.f32.mrf.mxu1  ;;  %v16995_v41 = vadd.f32 %v8581_v16, %v8281_v28  ;;  %v9313_v16 = vsel %vm1378_vm6, %v9308_v56, %v9312_v52 }
 0x548   : > { %v7821_v58 = vpop.f32.mrf.mxu2  ;;  %v14521_v29 = vld [vmem:[#allocation10 + $0xa8] sm:$0xff] }
 0x549   : > { %9743 = vmatpush.bf16.msra.mxu2 %v14521_v29  ;;  %v9320_v58 = vrot.slane %v9318_v43, 1 }
 0x54e   : > { %v8246_v30 = vpop.f32.mrf.mxu0 }
 0x54f   : > { %v8005_v2 = vpop.f32.mrf.mxu3  ;;  %v8588_v37 = vpop.f32.mrf.mxu1 }
 0x550   : > { %v7822_v47 = vpop.f32.mrf.mxu2 }
 0x551   : > { %v7861_v61 = vadd.f32 %v7822_v47, %v16870_v6  ;;  %9467 = vmatmul.bf16.gmra.mxu0 %v9313_v16 }
 0x552   : > { %9588 = vmatmul.bf16.gmra.mxu1 %v16980_v57 }
 0x553   : > { %v8044_v38 = vadd.f32 %v8005_v2, %v7861_v61  ;;  %v9316_v2 = vor.u32 %v9314_v4, %v9312_v52  ;;  %v8949_v61 = vshrl.u32 %v14472_v59, 16  ;;  %v14540_v59 = vld [vmem:[#allocation10 + $0xe0] sm:$0xff] }
 0x554   : > { %9094 = vmatmul.bf16.gmra.mxu3 %v8940_v26  ;;  %v14473_v26 = vld [vmem:[#allocation2 + $0x2c] sm:$0xff] }
 0x555   : > { %8753 = vmatmul.bf16.gmra.mxu2 %v16179_v13  ;;  %v8282_v46 = vadd.f32 %v8243_v12, %v8044_v38  ;;  %v8948_v12 = vsel %vm1378_vm6, %v8943_v39, %v8947_v60  ;;  %v9321_v56 = vsel %vm1378_vm6, %v9316_v2, %v9320_v58  ;;  %v14520_v39 = vld [vmem:[#allocation10 + $0xa0] sm:$0xff]  ;;  %9981 = vmatpush.bf16.msra.mxu3 %v14540_v59  ;;  %v8957_v2 = vshrl.u32 %v14473_v26, 16 }
 0x556   : > { %v8248_v31 = vpop.f32.mrf.mxu0  ;;  %9744 = vmatpush.bf16.msra.mxu2 %v14520_v39 }
 0x557   : > { %v8008_v34 = vpop.f32.mrf.mxu3  ;;  %v8590_v27 = vpop.f32.mrf.mxu1  ;;  %v17006_v11 = vadd.f32 %v8585_v20, %v8282_v46 }
 0x558   : > { %v7825_v6 = vpop.f32.mrf.mxu2  ;;  %v17016_v27 = vld [vmem:[#allocation3 + $0x80] sm:$0xff] }
 0x559   : > { %v7862_v0 = vadd.f32 %v7825_v6, %v16876_v5  ;;  %v9326_v52 = vshll.u32 %v17016_v27, 16  ;;  %v9322_v6 = vshrl.u32 %v17003_v25, 16 }
 0x55b   : > { %v8045_v13 = vadd.f32 %v8008_v34, %v7862_v0  ;;  %v8953_v34 = vshll.u32 %v14473_v26, 16  ;;  %v9328_v43 = vrot.slane %v9326_v52, 1  ;;  %v9324_v3 = vor.u32 %v9322_v6, %v9320_v58  ;;  %v14559_v58 = vld [vmem:[#allocation10 + $0x120] sm:$0xff] }
 0x55c   : > { %10322 = vmatpush.bf16.msra.mxu0 %v14559_v58  ;;  %v14558_v58 = vld [vmem:[#allocation10 + $0x118] sm:$0xff] }
 0x55d   : > { %v8283_v20 = vadd.f32 %v8246_v30, %v8045_v13  ;;  %v8951_v30 = vor.u32 %v8949_v61, %v8947_v60  ;;  %v8955_v48 = vrot.slane %v8953_v34, 1 }
 0x55e   : > { %v8250_v24 = vpop.f32.mrf.mxu0 }
 0x55f   : > { %v8010_v28 = vpop.f32.mrf.mxu3  ;;  %v8592_v33 = vpop.f32.mrf.mxu1  ;;  %v17013_v55 = vadd.f32 %v8588_v37, %v8283_v20  ;;  %v8956_v31 = vsel %vm1378_vm6, %v8951_v30, %v8955_v48  ;;  %v8959_v61 = vor.u32 %v8957_v2, %v8955_v48 }
 0x560   : > { %v7827_v5 = vpop.f32.mrf.mxu2  ;;  %v9329_v28 = vsel %vm1378_vm6, %v9324_v3, %v9328_v43  ;;  %v17039_v3 = vld [vmem:[#allocation3 + $0x90] sm:$0xff]  ;;  %10323 = vmatpush.bf16.msra.mxu0 %v14558_v58 }
 0x561   : > { %9471 = vmatmul.bf16.gmra.mxu0 %v9321_v56  ;;  %v8961_v5 = vshll.u32 %v14474_v51, 16  ;;  %v17028_v56 = vld [vmem:[#allocation3 + $0x88] sm:$0xff] }
 0x562   : > { %9592 = vmatmul.bf16.gmra.mxu1 %v16993_v40 }
 0x563   : > { %v8963_v34 = vrot.slane %v8961_v5, 1  ;;  %v9342_v5 = vshll.u32 %v17039_v3, 16 }
 0x564   : > { %9098 = vmatmul.bf16.gmra.mxu3 %v8948_v12 }
 0x565   : > { %8757 = vmatmul.bf16.gmra.mxu2 %v16221_v54 }
 0x566   : > { %v8252_v38 = vpop.f32.mrf.mxu0 }
 0x567   : > { %v8012_v47 = vpop.f32.mrf.mxu3  ;;  %v8594_v16 = vpop.f32.mrf.mxu1 }
 0x568   : > { %v7829_v53 = vpop.f32.mrf.mxu2 }
 0x569   : > { %v7863_v37 = vadd.f32 %v7829_v53, %v16886_v36  ;;  %v9334_v53 = vshll.u32 %v17028_v56, 16 }
 0x56b   : > { %v8046_v46 = vadd.f32 %v8012_v47, %v7863_v37  ;;  %v8964_v37 = vsel %vm1378_vm6, %v8959_v61, %v8963_v34 }
 0x56d   : > { %v8284_v54 = vadd.f32 %v8250_v24, %v8046_v46  ;;  %v14567_v24 = vld [vmem:[#allocation10 + $0x160] sm:$0xff] }
 0x56e   : > { %v8255_v60 = vpop.f32.mrf.mxu0  ;;  %10504 = vmatpush.bf16.msra.mxu1 %v14567_v24 }
 0x56f   : > { %v8014_v29 = vpop.f32.mrf.mxu3  ;;  %v8597_v63 = vpop.f32.mrf.mxu1  ;;  %v17024_v36 = vadd.f32 %v8592_v33, %v8284_v54  ;;  %v8965_v54 = vshrl.u32 %v14474_v51, 16  ;;  %v14566_v51 = vld [vmem:[#allocation10 + $0x158] sm:$0xff] }
 0x570   : > { %v7831_v0 = vpop.f32.mrf.mxu2  ;;  %v14475_v63 = vld [vmem:[#allocation2 + $0x3c] sm:$0xff] }
 0x571   : > { %v7864_v13 = vadd.f32 %v7831_v0, %v16892_v21  ;;  %9475 = vmatmul.bf16.gmra.mxu0 %v9329_v28  ;;  %v8969_v60 = vshll.u32 %v14475_v63, 16  ;;  %v14519_v0 = vld [vmem:[#allocation10 + $0x98] sm:$0xff] }
 0x572   : > { %9596 = vmatmul.bf16.gmra.mxu1 %v17003_v25  ;;  %v14539_v28 = vld [vmem:[#allocation10 + $0xd8] sm:$0xff]  ;;  %9745 = vmatpush.bf16.msra.mxu2 %v14519_v0 }
 0x573   : > { %v8047_v20 = vadd.f32 %v8014_v29, %v7864_v13  ;;  %v9330_v29 = vshrl.u32 %v17016_v27, 16  ;;  %9982 = vmatpush.bf16.msra.mxu3 %v14539_v28  ;;  %10505 = vmatpush.bf16.msra.mxu1 %v14566_v51  ;;  %v14477_v51 = vld [vmem:[#allocation2 + $0x4c] sm:$0xff] }
 0x574   : > { %9102 = vmatmul.bf16.gmra.mxu3 %v8956_v31 }
 0x575   : > { %8761 = vmatmul.bf16.gmra.mxu2 %v16245_v22  ;;  %v8285_v47 = vadd.f32 %v8252_v38, %v8047_v20  ;;  %v9336_v22 = vrot.slane %v9334_v53, 1  ;;  %v9332_v48 = vor.u32 %v9330_v29, %v9328_v43  ;;  %v8971_v20 = vrot.slane %v8969_v60, 1 }
 0x576   : > { %v8256_v33 = vpop.f32.mrf.mxu0 }
 0x577   : > { %v8017_v12 = vpop.f32.mrf.mxu3  ;;  %v8598_v4 = vpop.f32.mrf.mxu1  ;;  %v17031_v30 = vadd.f32 %v8594_v16, %v8285_v47  ;;  %v9337_v16 = vsel %vm1378_vm6, %v9332_v48, %v9336_v22 }
 0x578   : > { %v7834_v21 = vpop.f32.mrf.mxu2  ;;  %v8967_v12 = vor.u32 %v8965_v54, %v8963_v34  ;;  %v9338_v34 = vshrl.u32 %v17028_v56, 16 }
 0x579   : > { %v9344_v21 = vrot.slane %v9342_v5, 1 }
 0x57e   : > { %v8259_v38 = vpop.f32.mrf.mxu0 }
 0x57f   : > { %v8018_v52 = vpop.f32.mrf.mxu3  ;;  %v8601_v26 = vpop.f32.mrf.mxu1 }
 0x580   : > { %v7835_v46 = vpop.f32.mrf.mxu2 }
 0x581   : > { %v7865_v31 = vadd.f32 %v7835_v46, %v16902_v10  ;;  %9480 = vmatmul.bf16.gmra.mxu0 %v9337_v16 }
 0x582   : > { %9601 = vmatmul.bf16.gmra.mxu1 %v17016_v27 }
 0x583   : > { %v8048_v6 = vadd.f32 %v8018_v52, %v7865_v31  ;;  %v9340_v52 = vor.u32 %v9338_v34, %v9336_v22  ;;  %v8973_v31 = vshrl.u32 %v14475_v63, 16  ;;  %v14538_v63 = vld [vmem:[#allocation10 + $0xd0] sm:$0xff] }
 0x584   : > { %9107 = vmatmul.bf16.gmra.mxu3 %v8964_v37  ;;  %v14476_v37 = vld [vmem:[#allocation2 + $0x44] sm:$0xff] }
 0x585   : > { %8766 = vmatmul.bf16.gmra.mxu2 %v16272_v17  ;;  %v8286_v13 = vadd.f32 %v8256_v33, %v8048_v6  ;;  %v8972_v33 = vsel %vm1378_vm6, %v8967_v12, %v8971_v20  ;;  %v9345_v48 = vsel %vm1378_vm6, %v9340_v52, %v9344_v21  ;;  %v14518_v12 = vld [vmem:[#allocation10 + $0x90] sm:$0xff]  ;;  %9983 = vmatpush.bf16.msra.mxu3 %v14538_v63  ;;  %v8981_v52 = vshrl.u32 %v14476_v37, 16 }
 0x586   : > { %v8261_v43 = vpop.f32.mrf.mxu0  ;;  %9746 = vmatpush.bf16.msra.mxu2 %v14518_v12 }
 0x587   : > { %v8021_v39 = vpop.f32.mrf.mxu3  ;;  %v8603_v59 = vpop.f32.mrf.mxu1  ;;  %v17042_v2 = vadd.f32 %v8598_v4, %v8286_v13 }
 0x588   : > { %v7838_v10 = vpop.f32.mrf.mxu2  ;;  %v17052_v59 = vld [vmem:[#allocation3 + $0x98] sm:$0xff] }
 0x589   : > { %v7866_v24 = vadd.f32 %v7838_v10, %v16908_v45  ;;  %v9350_v22 = vshll.u32 %v17052_v59, 16  ;;  %v9346_v10 = vshrl.u32 %v17039_v3, 16 }
 0x58b   : > { %v8049_v17 = vadd.f32 %v8021_v39, %v7866_v24  ;;  %v8977_v39 = vshll.u32 %v14476_v37, 16  ;;  %v9352_v5 = vrot.slane %v9350_v22, 1  ;;  %v9348_v58 = vor.u32 %v9346_v10, %v9344_v21  ;;  %v14557_v21 = vld [vmem:[#allocation10 + $0x110] sm:$0xff] }
 0x58c   : > { %10324 = vmatpush.bf16.msra.mxu0 %v14557_v21  ;;  %v14556_v21 = vld [vmem:[#allocation10 + $0x108] sm:$0xff] }
 0x58d   : > { %v8287_v4 = vadd.f32 %v8259_v38, %v8049_v17  ;;  %v8975_v38 = vor.u32 %v8973_v31, %v8971_v20  ;;  %v8979_v54 = vrot.slane %v8977_v39, 1 }
 0x58e   : > { %v8263_v53 = vpop.f32.mrf.mxu0 }
 0x58f   : > { %v8023_v47 = vpop.f32.mrf.mxu3  ;;  %v8605_v61 = vpop.f32.mrf.mxu1  ;;  %v17049_v29 = vadd.f32 %v8601_v26, %v8287_v4  ;;  %v8980_v43 = vsel %vm1378_vm6, %v8975_v38, %v8979_v54  ;;  %v8983_v31 = vor.u32 %v8981_v52, %v8979_v54 }
 0x590   : > { %v7840_v45 = vpop.f32.mrf.mxu2  ;;  %v9353_v47 = vsel %vm1378_vm6, %v9348_v58, %v9352_v5  ;;  %v17075_v58 = vld [vmem:[#allocation3 + $0xa8] sm:$0xff]  ;;  %10325 = vmatpush.bf16.msra.mxu0 %v14556_v21 }
 0x591   : > { %9484 = vmatmul.bf16.gmra.mxu0 %v9345_v48  ;;  %v8985_v45 = vshll.u32 %v14477_v51, 16  ;;  %v17064_v48 = vld [vmem:[#allocation3 + $0xa0] sm:$0xff] }
 0x592   : > { %9605 = vmatmul.bf16.gmra.mxu1 %v17028_v56 }
 0x593   : > { %v8987_v39 = vrot.slane %v8985_v45, 1  ;;  %v9366_v45 = vshll.u32 %v17075_v58, 16 }
 0x594   : > { %9111 = vmatmul.bf16.gmra.mxu3 %v8972_v33 }
 0x595   : > { %8770 = vmatmul.bf16.gmra.mxu2 %v16328_v8 }
 0x596   : > { %v8265_v6 = vpop.f32.mrf.mxu0 }
 0x597   : > { %v8025_v46 = vpop.f32.mrf.mxu3  ;;  %v8607_v16 = vpop.f32.mrf.mxu1 }
 0x598   : > { %v7842_v60 = vpop.f32.mrf.mxu2 }
 0x599   : > { %v7867_v26 = vadd.f32 %v7842_v60, %v16918_v7  ;;  %v9358_v60 = vshll.u32 %v17064_v48, 16 }
 0x59b   : > { %v8050_v13 = vadd.f32 %v8025_v46, %v7867_v26  ;;  %v8988_v26 = vsel %vm1378_vm6, %v8983_v31, %v8987_v39 }
 0x59d   : > { %v8288_v8 = vadd.f32 %v8263_v53, %v8050_v13  ;;  %v14565_v53 = vld [vmem:[#allocation10 + $0x150] sm:$0xff] }
 0x59e   : > { %v8268_v20 = vpop.f32.mrf.mxu0  ;;  %10506 = vmatpush.bf16.msra.mxu1 %v14565_v53 }
 0x59f   : > { %v8027_v0 = vpop.f32.mrf.mxu3  ;;  %v8610_v28 = vpop.f32.mrf.mxu1  ;;  %v17060_v7 = vadd.f32 %v8605_v61, %v8288_v8  ;;  %v8989_v8 = vshrl.u32 %v14477_v51, 16  ;;  %v14564_v51 = vld [vmem:[#allocation10 + $0x148] sm:$0xff] }
 0x5a0   : > { %v7844_v24 = vpop.f32.mrf.mxu2  ;;  %v14478_v28 = vld [vmem:[#allocation2 + $0x54] sm:$0xff] }
 0x5a1   : > { %v7868_v17 = vadd.f32 %v7844_v24, %v16924_v35  ;;  %9488 = vmatmul.bf16.gmra.mxu0 %v9353_v47  ;;  %v8993_v20 = vshll.u32 %v14478_v28, 16  ;;  %v14517_v24 = vld [vmem:[#allocation10 + $0x88] sm:$0xff] }
 0x5a2   : > { %9609 = vmatmul.bf16.gmra.mxu1 %v17039_v3  ;;  %v14537_v47 = vld [vmem:[#allocation10 + $0xc8] sm:$0xff]  ;;  %9747 = vmatpush.bf16.msra.mxu2 %v14517_v24 }
 0x5a3   : > { %v8051_v4 = vadd.f32 %v8027_v0, %v7868_v17  ;;  %v9354_v0 = vshrl.u32 %v17052_v59, 16  ;;  %9984 = vmatpush.bf16.msra.mxu3 %v14537_v47  ;;  %10507 = vmatpush.bf16.msra.mxu1 %v14564_v51  ;;  %v14480_v51 = vld [vmem:[#allocation2 + $0x64] sm:$0xff] }
 0x5a4   : > { %9115 = vmatmul.bf16.gmra.mxu3 %v8980_v43 }
 0x5a5   : > { %8774 = vmatmul.bf16.gmra.mxu2 %v16372_v18  ;;  %v8289_v46 = vadd.f32 %v8265_v6, %v8051_v4  ;;  %v9360_v18 = vrot.slane %v9358_v60, 1  ;;  %v9356_v54 = vor.u32 %v9354_v0, %v9352_v5  ;;  %v8995_v4 = vrot.slane %v8993_v20, 1 }
 0x5a6   : > { %v8269_v61 = vpop.f32.mrf.mxu0 }
 0x5a7   : > { %v8030_v33 = vpop.f32.mrf.mxu3  ;;  %v8611_v34 = vpop.f32.mrf.mxu1  ;;  %v17067_v38 = vadd.f32 %v8607_v16, %v8289_v46  ;;  %v9361_v16 = vsel %vm1378_vm6, %v9356_v54, %v9360_v18 }
 0x5a8   : > { %v7847_v35 = vpop.f32.mrf.mxu2  ;;  %v8991_v33 = vor.u32 %v8989_v8, %v8987_v39  ;;  %v9362_v39 = vshrl.u32 %v17064_v48, 16 }
 0x5a9   : > { %v9368_v35 = vrot.slane %v9366_v45, 1 }
 0x5ae   : > { %v8272_v6 = vpop.f32.mrf.mxu0 }
 0x5af   : > { %v8031_v22 = vpop.f32.mrf.mxu3  ;;  %v8614_v37 = vpop.f32.mrf.mxu1 }
 0x5b0   : > { %v7848_v13 = vpop.f32.mrf.mxu2 }
 0x5b1   : > { %v7869_v43 = vadd.f32 %v7848_v13, %v16934_v32  ;;  %9493 = vmatmul.bf16.gmra.mxu0 %v9361_v16 }
 0x5b2   : > { %9614 = vmatmul.bf16.gmra.mxu1 %v17052_v59 }
 0x5b3   : > { %v8052_v10 = vadd.f32 %v8031_v22, %v7869_v43  ;;  %v9364_v22 = vor.u32 %v9362_v39, %v9360_v18 }
 0x5b4   : > { %9120 = vmatmul.bf16.gmra.mxu3 %v8988_v26 }
 0x5b5   : > { %8779 = vmatmul.bf16.gmra.mxu2 %v16408_v23  ;;  %v8290_v17 = vadd.f32 %v8269_v61, %v8052_v10  ;;  %v8996_v61 = vsel %vm1378_vm6, %v8991_v33, %v8995_v4  ;;  %v9369_v13 = vsel %vm1378_vm6, %v9364_v22, %v9368_v35  ;;  %v17090_v10 = vld [vmem:[#allocation3 + $0xb0] sm:$0xff]  ;;  %v17106_v22 = vld [vmem:[#allocation3 + $0xb8] sm:$0xff] }
 0x5b6   : > { %v8274_v5 = vpop.f32.mrf.mxu0  ;;  %v9374_v24 = vshll.u32 %v17090_v10, 16 }
 0x5b7   : > { %v8034_v12 = vpop.f32.mrf.mxu3  ;;  %v8616_v63 = vpop.f32.mrf.mxu1  ;;  %v17078_v52 = vadd.f32 %v8611_v34, %v8290_v17 }
 0x5b8   : > { %v7851_v32 = vpop.f32.mrf.mxu2  ;;  %v9376_v45 = vrot.slane %v9374_v24, 1 }
 0x5b9   : > { %v7870_v53 = vadd.f32 %v7851_v32, %v16940_v19  ;;  %v14479_v19 = vld [vmem:[#allocation2 + $0x5c] sm:$0xff]  ;;  %v9370_v32 = vshrl.u32 %v17075_v58, 16 }
 0x5ba   : > { %v9001_v63 = vshll.u32 %v14479_v19, 16 }
 0x5bb   : > { %v8053_v23 = vadd.f32 %v8034_v12, %v7870_v53  ;;  %v8997_v12 = vshrl.u32 %v14478_v28, 16 }
 0x5bc   : > { %v9003_v20 = vrot.slane %v9001_v63, 1  ;;  %v9382_v63 = vshll.u32 %v17106_v22, 16 }
 0x5bd   : > { %v8291_v34 = vadd.f32 %v8272_v6, %v8053_v23  ;;  %v8999_v8 = vor.u32 %v8997_v12, %v8995_v4  ;;  %v14536_v4 = vld [vmem:[#allocation10 + $0xc0] sm:$0xff] }
 0x5be   : > { %v9463_v60 = vpop.f32.mrf.mxu0  ;;  %9985 = vmatpush.bf16.msra.mxu3 %v14536_v4 }
 0x5bf   : > { %v8036_v46 = vpop.f32.mrf.mxu3  ;;  %v9584_v31 = vpop.f32.mrf.mxu1  ;;  %v17087_v0 = vadd.f32 %v8614_v37, %v8291_v34  ;;  %v9004_v28 = vsel %vm1378_vm6, %v8999_v8, %v9003_v20  ;;  %v9005_v34 = vshrl.u32 %v14479_v19, 16 }
 0x5c0   : > { %v17085_v26 = vadd.f32 %v9584_v31, %v9463_v60  ;;  %v7853_v54 = vpop.f32.mrf.mxu2  ;;  %v9009_v60 = vshll.u32 %v14480_v51, 16 }
 0x5c1   : > { %9497 = vmatmul.bf16.gmra.mxu0 %v9369_v13  ;;  %v14563_v54 = vld [vmem:[#allocation10 + $0x140] sm:$0xff] }
 0x5c2   : > { %9618 = vmatmul.bf16.gmra.mxu1 %v17064_v48  ;;  %v9011_v12 = vrot.slane %v9009_v60, 1 }
 0x5c3   : > { %10508 = vmatpush.bf16.msra.mxu1 %v14563_v54 }
 0x5c4   : > { %9124 = vmatmul.bf16.gmra.mxu3 %v8996_v61 }
 0x5c5   : > { %8783 = vmatmul.bf16.gmra.mxu2 %v16436_v62  ;;  %v14516_v62 = vld [vmem:[#allocation10 + $0x80] sm:$0xff] }
 0x5c6   : > { %v9465_v6 = vpop.f32.mrf.mxu0  ;;  %9748 = vmatpush.bf16.msra.mxu2 %v14516_v62 }
 0x5c7   : > { %v9090_v16 = vpop.f32.mrf.mxu3  ;;  %v9586_v43 = vpop.f32.mrf.mxu1 }
 0x5c8   : > { %v17094_v18 = vadd.f32 %v9586_v43, %v9465_v6  ;;  %v8749_v37 = vpop.f32.mrf.mxu2  ;;  %v9007_v43 = vor.u32 %v9005_v34, %v9003_v20  ;;  %v8841_v6 = vld [vmem:[#allocation2 + $0x6c] sm:$0x1] }
 0x5c9   : > { %v8801_v47 = vadd.f32 %v8749_v37, %v16951_v44  ;;  %v9372_v44 = vor.u32 %v9370_v32, %v9368_v35  ;;  %v14555_v35 = vld [vmem:[#allocation10 + $0x100] sm:$0xff]  ;;  %v8907_v24 = vunpack.c.l.b16 %v8841_v6 }
 0x5ca   : > { %10326 = vmatpush.bf16.msra.mxu0 %v14555_v35  ;;  %v9012_v37 = vsel %vm1378_vm6, %v9007_v43, %v9011_v12  ;;  %v14637_v43 = vld [vmem:[#allocation12 + $0x38] sm:$0xff] }
 0x5cb   : > { %v9142_v33 = vadd.f32 %v9090_v16, %v8801_v47  ;;  %v9377_v46 = vsel %vm1378_vm6, %v9372_v44, %v9376_v45  ;;  %v9384_v47 = vrot.slane %v9382_v63, 1  ;;  %11602 = vmatpush.bf16.msrb.mxu1 %v14637_v43 }
 0x5cd   : > { %9158 = vst [vmem:[%s17100_s20] sm:$0xff] %v9142_v33 }
 0x5ce   : > { %v9468_v21 = vpop.f32.mrf.mxu0 }
 0x5cf   : > { %v9092_v17 = vpop.f32.mrf.mxu3  ;;  %v9589_v5 = vpop.f32.mrf.mxu1 }
 0x5d0   : > { %v8751_v53 = vpop.f32.mrf.mxu2 }
 0x5d1   : > { %v8802_v31 = vadd.f32 %v8751_v53, %v16958_v50  ;;  %9501 = vmatmul.bf16.gmra.mxu0 %v9377_v46 }
 0x5d2   : > { %9622 = vmatmul.bf16.gmra.mxu1 %v17075_v58 }
 0x5d3   : > { %v9143_v39 = vadd.f32 %v9092_v17, %v8802_v31  ;;  %v9214_v17 = vld [vmem:[#allocation3 + $0xc0] sm:$0x1]  ;;  %v9013_v31 = vshrl.u32 %v14480_v51, 16 }
 0x5d4   : > { %9128 = vmatmul.bf16.gmra.mxu3 %v9004_v28  ;;  %v8920_v28 = vpack.c.b16 %v8907_v24, %v8907_v24  ;;  %v9280_v4 = vunpack.c.l.b16 %v9214_v17 }
 0x5d5   : > { %9159 = vst [vmem:[%s17100_s20 + $0x8] sm:$0xff] %v9143_v39  ;;  %8787 = vmatmul.bf16.gmra.mxu2 %v16582_v1  ;;  %v9378_v1 = vshrl.u32 %v17090_v10, 16  ;;  %v14609_v39 = vld [vmem:[#allocation10 + $0x1f8] sm:$0xff]  ;;  %v9015_v60 = vor.u32 %v9013_v31, %v9011_v12  ;;  %v14870_v12 = vld [vmem:[#allocation3 + $0x6c] sm:$0xf0] }
 0x5d6   : > { %v9469_v13 = vpop.f32.mrf.mxu0  ;;  %11079 = vmatpush.bf16.msrb.mxu3 %v14609_v39 }
 0x5d7   : > { %v9095_v23 = vpop.f32.mrf.mxu3  ;;  %v9590_v61 = vpop.f32.mrf.mxu1  ;;  %v9380_v20 = vor.u32 %v9378_v1, %v9376_v45  ;;  %v14590_v45 = vld [vmem:[#allocation10 + $0x1b8] sm:$0xff] }
 0x5d8   : > { %v17110_v16 = vadd.f32 %v9590_v61, %v9469_v13  ;;  %v8754_v50 = vpop.f32.mrf.mxu2  ;;  %v9017_v23 = vshll.u32 %v8920_v28, 16  ;;  %v17120_v61 = vpack.c.b16 %v9280_v4, %v9280_v4  ;;  %10738 = vmatpush.bf16.msrb.mxu2 %v14590_v45  ;;  %v14617_v13 = vld [vmem:[#allocation10 + $0x238] sm:$0xff]  ;;  %v14871_v28 = vld [vmem:[#allocation3 + $0x6c] sm:$0xe] }
 0x5d9   : > { %v9385_v62 = vsel %vm1378_vm6, %v9380_v20, %v9384_v47  ;;  %11261 = vmatpush.bf16.msrb.mxu0 %v14617_v13 }
 0x5da   : > { %v9019_v35 = vrot.slane %v9017_v23, 1  ;;  %v9390_v54 = vshll.u32 %v17120_v61, 16 }
 0x5dc   : > { %v9020_v6 = vsel %vm1378_vm6, %v9015_v60, %v9019_v35 }
 0x5de   : > { %v9472_v5 = vpop.f32.mrf.mxu0 }
 0x5df   : > { %v9096_v19 = vpop.f32.mrf.mxu3  ;;  %v9593_v8 = vpop.f32.mrf.mxu1 }
 0x5e0   : > { %v17116_v33 = vadd.f32 %v9593_v8, %v9472_v5  ;;  %v8755_v32 = vpop.f32.mrf.mxu2  ;;  %v9386_v8 = vshrl.u32 %v17106_v22, 16 }
 0x5e1   : > { %v8803_v21 = vadd.f32 %v8755_v32, %v16968_v42  ;;  %9506 = vmatmul.bf16.gmra.mxu0 %v9385_v62  ;;  %v17133_v62 = vld [vmem:[#allocation3 + $0x74] sm:$0xff] }
 0x5e2   : > { %9627 = vmatmul.bf16.gmra.mxu1 %v17090_v10  ;;  %v9388_v1 = vor.u32 %v9386_v8, %v9384_v47  ;;  %v10417_v31 = vrot.slane %v17133_v62, 1 }
 0x5e3   : > { %v9144_v46 = vadd.f32 %v9096_v19, %v8803_v21  ;;  %v10055_v19 = vld [vmem:[#allocation3 + $0x6c] sm:$0xff]  }
 0x5e4   : > { %9133 = vmatmul.bf16.gmra.mxu3 %v9012_v37  ;;  %v9392_v37 = vrot.slane %v9390_v54, 1  ;;  %v10162_v21 = vshll.u32 %v10055_v19, 16  ;;  %v10160_v54 = vshrl.u32 %v10055_v19, 16  ;;  %v9657_v19 = vrot.slane %v16980_v57, 1 }
 0x5e5   : > { %9160 = vst [vmem:[%s17100_s20 + $0x10] sm:$0xff] %v9144_v46  ;;  %8792 = vmatmul.bf16.gmra.mxu2 %v16600_v15  ;;  %v10167_v46 = vshll.u32 %v17133_v62, 16 }
 0x5e6   : > { %v9474_v34 = vpop.f32.mrf.mxu0  ;;  %v9393_v5 = vsel %vm1378_vm6, %v9388_v1, %v9392_v37 }
 0x5e7   : > { %v9099_v44 = vpop.f32.mrf.mxu3  ;;  %v9595_v53 = vpop.f32.mrf.mxu1  ;;  %v10164_v34 = vrot.slane %v10162_v21, 1  ;;  %v10169_v13 = vrot.slane %v10167_v46, 1 }
 0x5e8   : > { %v8758_v42 = vpop.f32.mrf.mxu2 }
 0x5e9   : > { %v8804_v51 = vadd.f32 %v8758_v42, %v16975_v14  ;;  %v14694_v42 = vld [vmem:[#allocation3 + $0x60] sm:$0xf0] }
 0x5eb   : > { %v9145_v15 = vadd.f32 %v9099_v44, %v8804_v51  ;;  %v14872_v44 = vor.u32 %v14871_v28, %v14870_v12  ;;  %v14695_v51 = vld [vmem:[#allocation3 + $0x60] sm:$0xe] }
 0x5ec   : > { %v14545_v28 = vld [vmem:[#allocation3 + $0x7c] sm:$0xff] }
 0x5ed   : > { %9161 = vst [vmem:[%s17100_s20 + $0x18] sm:$0xff] %v9145_v15  ;;  %v10416_v60 = vrot.slane %v14872_v44, 1 }
 0x5ee   : > { %v9476_v24 = vpop.f32.mrf.mxu0 }
 0x5ef   : > { %v9101_v50 = vpop.f32.mrf.mxu3  ;;  %v9597_v63 = vpop.f32.mrf.mxu1  ;;  %v10418_v43 = vsel %vm1758_vm7, %v10416_v60, %v10417_v31 }
 0x5f0   : > { %v17130_v17 = vadd.f32 %v9597_v63, %v9476_v24  ;;  %v8760_v14 = vpop.f32.mrf.mxu2  ;;  %v14589_v50 = vld [vmem:[#allocation10 + $0x1b0] sm:$0xff] }
 0x5f1   : > { %9510 = vmatmul.bf16.gmra.mxu0 %v9393_v5  ;;  %v14608_v63 = vld [vmem:[#allocation10 + $0x1f0] sm:$0xff]  ;;  %10739 = vmatpush.bf16.msrb.mxu2 %v14589_v50 }
 0x5f2   : > { %9631 = vmatmul.bf16.gmra.mxu1 %v17106_v22  ;;  %11080 = vmatpush.bf16.msrb.mxu3 %v14608_v63 }
 0x5f4   : > { %9137 = vmatmul.bf16.gmra.mxu3 %v9020_v6  ;;  %v14696_v6 = vor.u32 %v14695_v51, %v14694_v42  ;;  %v9659_v51 = vrot.slane %v16993_v40, 1 }
 0x5f5   : > { %8796 = vmatmul.bf16.gmra.mxu2 %v16629_v9  ;;  %v14524_v9 = vld [vmem:[#allocation3 + $0x6c] sm:$0xff] }
 0x5f6   : > { %v9478_v4 = vpop.f32.mrf.mxu0  ;;  %v9656_v1 = vrot.slane %v14696_v6, 1  ;;  %v14588_v6 = vld [vmem:[#allocation10 + $0x1a8] sm:$0xff] }
 0x5f7   : > { %v9103_v20 = vpop.f32.mrf.mxu3  ;;  %v9599_v32 = vpop.f32.mrf.mxu1  ;;  %10740 = vmatpush.bf16.msrb.mxu2 %v14588_v6 }
 0x5f8   : > { %v17136_v53 = vadd.f32 %v9599_v32, %v9478_v4  ;;  %v8762_v47 = vpop.f32.mrf.mxu2  ;;  %v14616_v32 = vld [vmem:[#allocation10 + $0x230] sm:$0xff] }
 0x5f9   : > { %v8805_v23 = vadd.f32 %v8762_v47, %v16985_v49  ;;  %v10165_v49 = vor.u32 %v10164_v34, %v10160_v54  ;;  %v14636_v4 = vld [vmem:[#allocation12 + $0x30] sm:$0xff]  ;;  %11262 = vmatpush.bf16.msrb.mxu0 %v14616_v32  ;;  %v10175_v47 = vshll.u32 %v14545_v28, 16  ;;  %v10179_v32 = vshrl.u32 %v14545_v28, 16 }
 0x5fa   : > { %11603 = vmatpush.bf16.msrb.mxu1 %v14636_v4 }
 0x5fb   : > { %v9146_v35 = vadd.f32 %v9103_v20, %v8805_v23  ;;  %v10170_v8 = vsel %vm1378_vm6, %v10165_v49, %v10169_v13  ;;  %v9658_v20 = vsel %vm1758_vm7, %v9656_v1, %v9657_v19  ;;  %v10177_v34 = vrot.slane %v10175_v47, 1  ;;  %v14546_v49 = vld [vmem:[#allocation3 + $0x84] sm:$0xff] }
 0x5fc   : > { %v10421_v40 = vrot.slane %v14546_v49, 1 }
 0x5fd   : > { %9162 = vst [vmem:[%s17100_s20 + $0x20] sm:$0xff] %v9146_v35  ;;  %v10181_v47 = vor.u32 %v10179_v32, %v10177_v34  ;;  %v14634_v32 = vld [vmem:[#allocation12 + $0x20] sm:$0xff] }
 0x5fe   : > { %v9481_v15 = vpop.f32.mrf.mxu0 }
 0x5ff   : > { %v9105_v45 = vpop.f32.mrf.mxu3  ;;  %v9602_v39 = vpop.f32.mrf.mxu1 }
 0x600   : > { %v8764_v12 = vpop.f32.mrf.mxu2  ;;  %v14525_v39 = vld [vmem:[#allocation3 + $0x74] sm:$0xff] }
 0x601   : > { %v8806_v37 = vadd.f32 %v8764_v12, %v16995_v41  ;;  %10327 = vmatmul.bf16.vlgmr.msra.gmra.mxu0 %v10170_v8  ;;  %v10419_v41 = vrot.slane %v14545_v28, 1 }
 0x602   : > { %10509 = vmatmul.bf16.vlgmr.msra.gmra.mxu1 %v10418_v43 }
 0x603   : > { %v9147_v5 = vadd.f32 %v9105_v45, %v8806_v37  ;;  %v10171_v45 = vshrl.u32 %v17133_v62, 16  ;;  %v10420_v60 = vsel %vm1758_vm7, %v10417_v31, %v10419_v41  ;;  %v9660_v31 = vsel %vm1758_vm7, %v9657_v19, %v9659_v51 }
 0x604   : > { %9986 = vmatmul.bf16.vlgmr.msra.gmra.mxu3 %v14524_v9  ;;  %v10183_v37 = vshll.u32 %v14546_v49, 16 }
 0x605   : > { %9163 = vst [vmem:[%s17100_s20 + $0x28] sm:$0xff] %v9147_v5  ;;  %9749 = vmatmul.bf16.vlgmr.msra.gmra.mxu2 %v9658_v20  ;;  %v10173_v42 = vor.u32 %v10171_v45, %v10169_v13  ;;  %v14607_v13 = vld [vmem:[#allocation10 + $0x1e8] sm:$0xff]  ;;  %v14526_v20 = vld [vmem:[#allocation3 + $0x7c] sm:$0xff] }
 0x606   : > { %v9482_v21 = vpop.f32.mrf.mxu0  ;;  %11081 = vmatpush.bf16.msrb.mxu3 %v14607_v13  ;;  %v10185_v4 = vrot.slane %v10183_v37, 1 }
 0x607   : > { %v9108_v24 = vpop.f32.mrf.mxu3  ;;  %v9603_v14 = vpop.f32.mrf.mxu1  ;;  %v10178_v43 = vsel %vm1378_vm6, %v10173_v42, %v10177_v34 }
 0x608   : > { %v17148_v44 = vadd.f32 %v9603_v14, %v9482_v21  ;;  %v8767_v57 = vpop.f32.mrf.mxu2  ;;  %v14615_v24 = vld [vmem:[#allocation10 + $0x228] sm:$0xff]  ;;  %v10422_v21 = vsel %vm1758_vm7, %v10419_v41, %v10421_v40 }
 0x609   : > { %11263 = vmatpush.bf16.msrb.mxu0 %v14615_v24 }
 0x60e   : > { %v9485_v35 = vpop.f32.mrf.mxu0 }
 0x60f   : > { %v9109_v46 = vpop.f32.mrf.mxu3  ;;  %v9606_v23 = vpop.f32.mrf.mxu1 }
 0x610   : > { %v17152_v9 = vadd.f32 %v9606_v23, %v9485_v35  ;;  %v8768_v54 = vpop.f32.mrf.mxu2  ;;  %v14547_v35 = vld [vmem:[#allocation3 + $0x8c] sm:$0xff] }
 0x611   : > { %v8807_v50 = vadd.f32 %v8768_v54, %v17006_v11  ;;  %10332 = vmatmul.bf16.gmra.mxu0 %v10178_v43  ;;  %v14635_v11 = vld [vmem:[#allocation12 + $0x28] sm:$0xff]  ;;  %v10191_v34 = vshll.u32 %v14547_v35, 16  ;;  %v10423_v43 = vrot.slane %v14547_v35, 1 }
 0x612   : > { %10514 = vmatmul.bf16.gmra.mxu1 %v10420_v60 }
 0x613   : > { %v9148_v15 = vadd.f32 %v9109_v46, %v8807_v50  ;;  %11604 = vmatpush.bf16.msrb.mxu1 %v14635_v11  ;;  %v10193_v6 = vrot.slane %v10191_v34, 1  ;;  %v10424_v13 = vsel %vm1758_vm7, %v10421_v40, %v10423_v43  ;;  %v9663_v11 = vrot.slane %v17016_v27, 1 }
 0x614   : > { %9991 = vmatmul.bf16.gmra.mxu3 %v14525_v39  ;;  %v9661_v39 = vrot.slane %v17003_v25, 1  ;;  %v14527_v25 = vld [vmem:[#allocation3 + $0x84] sm:$0xff] }
 0x615   : > { %9164 = vst [vmem:[%s17100_s20 + $0x30] sm:$0xff] %v9148_v15  ;;  %9754 = vmatmul.bf16.gmra.mxu2 %v9660_v31  ;;  %v10187_v31 = vshrl.u32 %v14546_v49, 16 }
 0x616   : > { %v9487_v12 = vpop.f32.mrf.mxu0  ;;  %v9662_v28 = vsel %vm1758_vm7, %v9659_v51, %v9661_v39  ;;  %v14587_v51 = vld [vmem:[#allocation10 + $0x1a0] sm:$0xff] }
 0x617   : > { %v9112_v63 = vpop.f32.mrf.mxu3  ;;  %v9608_v62 = vpop.f32.mrf.mxu1  ;;  %v14606_v12 = vld [vmem:[#allocation10 + $0x1e0] sm:$0xff]  ;;  %v10189_v37 = vor.u32 %v10187_v31, %v10185_v4  ;;  %10741 = vmatpush.bf16.msrb.mxu2 %v14587_v51  ;;  %11605 = vmatpush.bf16.msrb.mxu1 %v14634_v32 }
 0x618   : > { %v8771_v8 = vpop.f32.mrf.mxu2  ;;  %11082 = vmatpush.bf16.msrb.mxu3 %v14606_v12  ;;  %v14549_v31 = vld [vmem:[#allocation3 + $0x9c] sm:$0xff] }
 0x619   : > { %v8808_v1 = vadd.f32 %v8771_v8, %v17013_v55  ;;  %v10186_v55 = vsel %vm1378_vm6, %v10181_v47, %v10185_v4 }
 0x61b   : > { %v9149_v19 = vadd.f32 %v9112_v63, %v8808_v1 }
 0x61d   : > { %9165 = vst [vmem:[%s17100_s20 + $0x38] sm:$0xff] %v9149_v19  ;;  %v14548_v19 = vld [vmem:[#allocation3 + $0x94] sm:$0xff] }
 0x61e   : > { %v9489_v57 = vpop.f32.mrf.mxu0  ;;  %v10199_v27 = vshll.u32 %v14548_v19, 16  ;;  %v10425_v47 = vrot.slane %v14548_v19, 1 }
 0x61f   : > { %v9114_v14 = vpop.f32.mrf.mxu3  ;;  %v9610_v5 = vpop.f32.mrf.mxu1 }
 0x620   : > { %v17162_v46 = vadd.f32 %v9610_v5, %v9489_v57  ;;  %v8773_v23 = vpop.f32.mrf.mxu2  ;;  %v9664_v5 = vsel %vm1758_vm7, %v9661_v39, %v9663_v11  ;;  %v10426_v39 = vsel %vm1758_vm7, %v10423_v43, %v10425_v47 }
 0x621   : > { %10336 = vmatmul.bf16.gmra.mxu0 %v10186_v55  ;;  %v14528_v55 = vld [vmem:[#allocation3 + $0x8c] sm:$0xff] }
 0x622   : > { %10518 = vmatmul.bf16.gmra.mxu1 %v10422_v21 }
 0x624   : > { %9995 = vmatmul.bf16.gmra.mxu3 %v14526_v20  ;;  %v14614_v20 = vld [vmem:[#allocation10 + $0x220] sm:$0xff] }
 0x625   : > { %9758 = vmatmul.bf16.gmra.mxu2 %v9662_v28  ;;  %11264 = vmatpush.bf16.msrb.mxu0 %v14614_v20 }
 0x626   : > { %v9491_v41 = vpop.f32.mrf.mxu0 }
 0x627   : > { %v9116_v45 = vpop.f32.mrf.mxu3  ;;  %v9612_v60 = vpop.f32.mrf.mxu1 }
 0x628   : > { %v17167_v42 = vadd.f32 %v9612_v60, %v9491_v41  ;;  %v8775_v54 = vpop.f32.mrf.mxu2  ;;  %v10201_v60 = vrot.slane %v10199_v27, 1  ;;  %v9667_v27 = vrot.slane %v17039_v3, 1  ;;  %v14530_v3 = vld [vmem:[#allocation3 + $0x9c] sm:$0xff] }
 0x629   : > { %v8809_v50 = vadd.f32 %v8775_v54, %v17024_v36  ;;  %v10194_v36 = vsel %vm1378_vm6, %v10189_v37, %v10193_v6  ;;  %v14613_v37 = vld [vmem:[#allocation10 + $0x218] sm:$0xff] }
 0x62a   : > { %11265 = vmatpush.bf16.msrb.mxu0 %v14613_v37 }
 0x62b   : > { %v9150_v15 = vadd.f32 %v9116_v45, %v8809_v50  ;;  %v10195_v45 = vshrl.u32 %v14547_v35, 16 }
 0x62d   : > { %9166 = vst [vmem:[%s17100_s20 + $0x40] sm:$0xff] %v9150_v15  ;;  %v10197_v41 = vor.u32 %v10195_v45, %v10193_v6  ;;  %v14605_v6 = vld [vmem:[#allocation10 + $0x1d8] sm:$0xff] }
 0x62e   : > { %v9494_v8 = vpop.f32.mrf.mxu0  ;;  %11083 = vmatpush.bf16.msrb.mxu3 %v14605_v6 }
 0x62f   : > { %v9118_v63 = vpop.f32.mrf.mxu3  ;;  %v9615_v62 = vpop.f32.mrf.mxu1  ;;  %v10202_v50 = vsel %vm1378_vm6, %v10197_v41, %v10201_v60  ;;  %v10207_v8 = vshll.u32 %v14549_v31, 16 }
 0x630   : > { %v8777_v24 = vpop.f32.mrf.mxu2 }
 0x631   : > { %v8810_v49 = vadd.f32 %v8777_v24, %v17031_v30  ;;  %10340 = vmatmul.bf16.gmra.mxu0 %v10194_v36 }
 0x632   : > { %10522 = vmatmul.bf16.gmra.mxu1 %v10424_v13  ;;  %v14586_v13 = vld [vmem:[#allocation10 + $0x198] sm:$0xff] }
 0x633   : > { %v9151_v14 = vadd.f32 %v9118_v63, %v8810_v49  ;;  %v9665_v63 = vrot.slane %v17028_v56, 1  ;;  %10742 = vmatpush.bf16.msrb.mxu2 %v14586_v13  ;;  %v10427_v56 = vrot.slane %v14549_v31, 1 }
 0x634   : > { %9999 = vmatmul.bf16.gmra.mxu3 %v14527_v25 }
 0x635   : > { %9167 = vst [vmem:[%s17100_s20 + $0x48] sm:$0xff] %v9151_v14  ;;  %9762 = vmatmul.bf16.gmra.mxu2 %v9664_v5  ;;  %v9666_v43 = vsel %vm1758_vm7, %v9663_v11, %v9665_v63  ;;  %v10209_v14 = vrot.slane %v10207_v8, 1  ;;  %v10428_v5 = vsel %vm1758_vm7, %v10425_v47, %v10427_v56 }
 0x636   : > { %v9495_v4 = vpop.f32.mrf.mxu0 }
 0x637   : > { %v9121_v1 = vpop.f32.mrf.mxu3  ;;  %v9616_v40 = vpop.f32.mrf.mxu1 }
 0x638   : > { %v17177_v21 = vadd.f32 %v9616_v40, %v9495_v4  ;;  %v8780_v57 = vpop.f32.mrf.mxu2  ;;  %v14529_v1 = vld [vmem:[#allocation3 + $0x94] sm:$0xff]  ;;  %v10203_v40 = vshrl.u32 %v14548_v19, 16  ;;  %v9668_v19 = vsel %vm1758_vm7, %v9665_v63, %v9667_v27 }
 0x639   : > { %v14585_v63 = vld [vmem:[#allocation10 + $0x190] sm:$0xff] }
 0x63a   : > { %v10205_v32 = vor.u32 %v10203_v40, %v10201_v60  ;;  %10743 = vmatpush.bf16.msrb.mxu2 %v14585_v63  ;;  %v14611_v63 = vld [vmem:[#allocation10 + $0x208] sm:$0xff] }
 0x63e   : > { %v9498_v28 = vpop.f32.mrf.mxu0 }
 0x63f   : > { %v9122_v30 = vpop.f32.mrf.mxu3  ;;  %v9619_v23 = vpop.f32.mrf.mxu1 }
 0x640   : > { %v17180_v54 = vadd.f32 %v9619_v23, %v9498_v28  ;;  %v8781_v34 = vpop.f32.mrf.mxu2 }
 0x641   : > { %v8811_v62 = vadd.f32 %v8781_v34, %v17042_v2  ;;  %10345 = vmatmul.bf16.gmra.mxu0 %v10202_v50  ;;  %v14633_v2 = vld [vmem:[#allocation12 + $0x18] sm:$0xff] }
 0x642   : > { %10527 = vmatmul.bf16.gmra.mxu1 %v10426_v39 }
 0x643   : > { %v9152_v25 = vadd.f32 %v9122_v30, %v8811_v62  ;;  %11606 = vmatpush.bf16.msrb.mxu1 %v14633_v2 }
 0x644   : > { %10004 = vmatmul.bf16.gmra.mxu3 %v14528_v55  ;;  %v14550_v55 = vld [vmem:[#allocation3 + $0xa4] sm:$0xff] }
 0x645   : > { %9168 = vst [vmem:[%s17100_s20 + $0x50] sm:$0xff] %v9152_v25  ;;  %9767 = vmatmul.bf16.gmra.mxu2 %v9666_v43  ;;  %v10215_v60 = vshll.u32 %v14550_v55, 16  ;;  %v10429_v28 = vrot.slane %v14550_v55, 1  ;;  %v14604_v43 = vld [vmem:[#allocation10 + $0x1d0] sm:$0xff] }
 0x646   : > { %v9500_v51 = vpop.f32.mrf.mxu0  ;;  %11084 = vmatpush.bf16.msrb.mxu3 %v14604_v43 }
 0x647   : > { %v9125_v15 = vpop.f32.mrf.mxu3  ;;  %v9621_v35 = vpop.f32.mrf.mxu1  ;;  %v10430_v25 = vsel %vm1758_vm7, %v10427_v56, %v10429_v28 }
 0x648   : > { %v8784_v12 = vpop.f32.mrf.mxu2  ;;  %v10217_v35 = vrot.slane %v10215_v60, 1 }
 0x649   : > { %v8812_v24 = vadd.f32 %v8784_v12, %v17049_v29  ;;  %v10210_v29 = vsel %vm1378_vm6, %v10205_v32, %v10209_v14  ;;  %v9669_v12 = vrot.slane %v17052_v59, 1  ;;  %v10219_v32 = vshrl.u32 %v14550_v55, 16 }
 0x64b   : > { %v9153_v11 = vadd.f32 %v9125_v15, %v8812_v24  ;;  %v10211_v15 = vshrl.u32 %v14549_v31, 16  ;;  %v9670_v2 = vsel %vm1758_vm7, %v9667_v27, %v9669_v12  ;;  %v14551_v24 = vld [vmem:[#allocation3 + $0xac] sm:$0xff] }
 0x64c   : > { %v10223_v59 = vshll.u32 %v14551_v24, 16 }
 0x64d   : > { %9169 = vst [vmem:[%s17100_s20 + $0x58] sm:$0xff] %v9153_v11  ;;  %v10213_v6 = vor.u32 %v10211_v15, %v10209_v14  ;;  %v10431_v14 = vrot.slane %v14551_v24, 1 }
 0x64e   : > { %v9502_v20 = vpop.f32.mrf.mxu0 }
 0x64f   : > { %v9127_v36 = vpop.f32.mrf.mxu3  ;;  %v9623_v49 = vpop.f32.mrf.mxu1 }
 0x650   : > { %v17190_v4 = vadd.f32 %v9623_v49, %v9502_v20  ;;  %v8786_v57 = vpop.f32.mrf.mxu2  ;;  %v14612_v36 = vld [vmem:[#allocation10 + $0x210] sm:$0xff]  ;;  %v14531_v20 = vld [vmem:[#allocation3 + $0xa4] sm:$0xff] }
 0x651   : > { %10349 = vmatmul.bf16.gmra.mxu0 %v10210_v29  ;;  %v14632_v49 = vld [vmem:[#allocation12 + $0x10] sm:$0xff]  ;;  %v10225_v57 = vrot.slane %v10223_v59, 1  ;;  %v10432_v29 = vsel %vm1758_vm7, %v10429_v28, %v10431_v14  ;;  %v14553_v59 = vld [vmem:[#allocation3 + $0xbc] sm:$0xff] }
 0x652   : > { %10531 = vmatmul.bf16.gmra.mxu1 %v10428_v5  ;;  %11266 = vmatpush.bf16.msrb.mxu0 %v14612_v36 }
 0x653   : > { %11607 = vmatpush.bf16.msrb.mxu1 %v14632_v49 }
 0x654   : > { %10008 = vmatmul.bf16.gmra.mxu3 %v14529_v1 }
 0x655   : > { %9771 = vmatmul.bf16.gmra.mxu2 %v9668_v19 }
 0x656   : > { %v9504_v47 = vpop.f32.mrf.mxu0  ;;  %11267 = vmatpush.bf16.msrb.mxu0 %v14611_v63  ;;  %v14610_v63 = vld [vmem:[#allocation10 + $0x200] sm:$0xff] }
 0x657   : > { %v9129_v30 = vpop.f32.mrf.mxu3  ;;  %v9625_v23 = vpop.f32.mrf.mxu1 }
 0x658   : > { %v17195_v45 = vadd.f32 %v9625_v23, %v9504_v47  ;;  %v8788_v39 = vpop.f32.mrf.mxu2 }
 0x659   : > { %v8813_v41 = vadd.f32 %v8788_v39, %v17060_v7  ;;  %v10218_v7 = vsel %vm1378_vm6, %v10213_v6, %v10217_v35  ;;  %v9671_v39 = vrot.slane %v17064_v48, 1 }
 0x65a   : > { %11268 = vmatpush.bf16.msrb.mxu0 %v14610_v63 }
 0x65b   : > { %v9154_v62 = vadd.f32 %v9129_v30, %v8813_v41  ;;  %v10221_v30 = vor.u32 %v10219_v32, %v10217_v35  ;;  %v9672_v28 = vsel %vm1758_vm7, %v9669_v12, %v9671_v39  ;;  %v10227_v12 = vshrl.u32 %v14551_v24, 16 }
 0x65d   : > { %9170 = vst [vmem:[%s17100_s20 + $0x60] sm:$0xff] %v9154_v62  ;;  %v10226_v47 = vsel %vm1378_vm6, %v10221_v30, %v10225_v57  ;;  %v14584_v62 = vld [vmem:[#allocation10 + $0x188] sm:$0xff]  ;;  %v14602_v30 = vld [vmem:[#allocation10 + $0x1c0] sm:$0xff] }
 0x65e   : > { %v9507_v13 = vpop.f32.mrf.mxu0  ;;  %10744 = vmatpush.bf16.msrb.mxu2 %v14584_v62  ;;  %v9675_v62 = vrot.slane %v17090_v10, 1 }
 0x65f   : > { %v9131_v34 = vpop.f32.mrf.mxu3  ;;  %v9628_v50 = vpop.f32.mrf.mxu1 }
 0x660   : > { %v8790_v51 = vpop.f32.mrf.mxu2  ;;  %v14552_v50 = vld [vmem:[#allocation3 + $0xb4] sm:$0xff] }
 0x661   : > { %v8814_v31 = vadd.f32 %v8790_v51, %v17067_v38  ;;  %10353 = vmatmul.bf16.gmra.mxu0 %v10218_v7  ;;  %v10433_v48 = vrot.slane %v14552_v50, 1  ;;  %v14532_v7 = vld [vmem:[#allocation3 + $0xac] sm:$0xff] }
 0x662   : > { %10535 = vmatmul.bf16.gmra.mxu1 %v10430_v25  ;;  %v10231_v25 = vshll.u32 %v14552_v50, 16 }
 0x663   : > { %v9155_v37 = vadd.f32 %v9131_v34, %v8814_v31 }
 0x664   : > { %10012 = vmatmul.bf16.gmra.mxu3 %v14530_v3  ;;  %v14603_v3 = vld [vmem:[#allocation10 + $0x1c8] sm:$0xff]  ;;  %v10233_v31 = vrot.slane %v10231_v25, 1 }
 0x665   : > { %9171 = vst [vmem:[%s17100_s20 + $0x68] sm:$0xff] %v9155_v37  ;;  %9775 = vmatmul.bf16.gmra.mxu2 %v9670_v2  ;;  %11085 = vmatpush.bf16.msrb.mxu3 %v14603_v3  ;;  %v10229_v37 = vor.u32 %v10227_v12, %v10225_v57 }
 0x666   : > { %v9508_v11 = vpop.f32.mrf.mxu0 }
 0x667   : > { %v9134_v8 = vpop.f32.mrf.mxu3  ;;  %v9629_v56 = vpop.f32.mrf.mxu1  ;;  %v10234_v36 = vsel %vm1378_vm6, %v10229_v37, %v10233_v31 }
 0x668   : > { %v17205_v1 = vadd.f32 %v9629_v56, %v9508_v11  ;;  %v8793_v40 = vpop.f32.mrf.mxu2  ;;  %v10434_v8 = vsel %vm1758_vm7, %v10431_v14, %v10433_v48  ;;  %v10239_v14 = vshll.u32 %v14553_v59, 16 }
 0x669   : > { %11086 = vmatpush.bf16.msrb.mxu3 %v14602_v30 }
 0x66e   : > { %v9511_v27 = vpop.f32.mrf.mxu0 }
 0x66f   : > { %v9135_v38 = vpop.f32.mrf.mxu3  ;;  %v9632_v5 = vpop.f32.mrf.mxu1 }
 0x670   : > { %v17208_v23 = vadd.f32 %v9632_v5, %v9511_v27  ;;  %v8794_v19 = vpop.f32.mrf.mxu2  ;;  %v10435_v5 = vrot.slane %v14553_v59, 1  ;;  %v14583_v27 = vld [vmem:[#allocation10 + $0x180] sm:$0xff] }
 0x671   : > { %v8815_v60 = vadd.f32 %v8794_v19, %v17078_v52  ;;  %10358 = vmatmul.bf16.gmra.mxu0 %v10226_v47  ;;  %v14631_v52 = vld [vmem:[#allocation12 + $0x8] sm:$0xff]  ;;  %v14533_v19 = vld [vmem:[#allocation3 + $0xb4] sm:$0xff]  ;;  %v10241_v47 = vrot.slane %v10239_v14, 1  ;;  %10745 = vmatpush.bf16.msrb.mxu2 %v14583_v27 }
 0x672   : > { %10540 = vmatmul.bf16.gmra.mxu1 %v10432_v29 }
 0x673   : > { %v9156_v34 = vadd.f32 %v9135_v38, %v8815_v60  ;;  %11608 = vmatpush.bf16.msrb.mxu1 %v14631_v52  ;;  %v10436_v60 = vsel %vm1758_vm7, %v10433_v48, %v10435_v5  ;;  %v14554_v48 = vld [vmem:[#allocation3 + $0xc4] sm:$0xff] }
 0x674   : > { %10017 = vmatmul.bf16.gmra.mxu3 %v14531_v20  ;;  %v14630_v52 = vld [vmem:[#allocation12] sm:$0xff]  ;;  %v10247_v10 = vshll.u32 %v14554_v48, 16 }
 0x675   : > { %9172 = vst [vmem:[%s17100_s20 + $0x70] sm:$0xff] %v9156_v34  ;;  %9780 = vmatmul.bf16.gmra.mxu2 %v9672_v28 }
 0x676   : > { %v9513_v15 = vpop.f32.mrf.mxu0 }
 0x677   : > { %v9138_v41 = vpop.f32.mrf.mxu3  ;;  %v9634_v55 = vpop.f32.mrf.mxu1  ;;  %11609 = vmatpush.bf16.msrb.mxu1 %v14630_v52  ;;  %v14697_v52 = vld [vmem:[#allocation3 + $0x78] sm:$0xff]  }
 0x678   : > { %v8797_v35 = vpop.f32.mrf.mxu2 }
 0x679   : > { %v8816_v43 = vadd.f32 %v8797_v35, %v17087_v0  ;;  %v9673_v0 = vrot.slane %v17075_v58, 1  ;;  %v10235_v58 = vshrl.u32 %v14552_v50, 16 }
 0x67b   : > { %v9157_v51 = vadd.f32 %v9138_v41, %v8816_v43  ;;  %v9674_v40 = vsel %vm1758_vm7, %v9671_v39, %v9673_v0  ;;  %v10237_v55 = vor.u32 %v10235_v58, %v10233_v31  ;;  %v9676_v25 = vsel %vm1758_vm7, %v9673_v0, %v9675_v62  ;;  %v14534_v31 = vld [vmem:[#allocation3 + $0xbc] sm:$0xff] }
 0x67d   : > { %9173 = vst [vmem:[%s17100_s20 + $0x78] sm:$0xff] %v9157_v51  ;;  %v10242_v28 = vsel %vm1378_vm6, %v10237_v55, %v10241_v47  ;;  %v14535_v55 = vld [vmem:[#allocation3 + $0xc4] sm:$0xff] }
 0x67e   : > { %v10328_v56 = vpop.f32.mrf.mxu0 }
 0x67f   : > { %v9140_v13 = vpop.f32.mrf.mxu3  ;;  %v10510_v6 = vpop.f32.mrf.mxu1 }
 0x680   : > { %v8799_v2 = vpop.f32.mrf.mxu2 }
 0x681   : > { %10362 = vmatmul.bf16.gmra.mxu0 %v10234_v36  ;;  %v10079_v2 = vld [vmem:[#allocation3 + $0xcc] sm:$0x1] }
 0x682   : > { %10544 = vmatmul.bf16.gmra.mxu1 %v10434_v8  ;;  %v10243_v8 = vshrl.u32 %v14553_v59, 16 }
 0x684   : > { %10021 = vmatmul.bf16.gmra.mxu3 %v14532_v7  ;;  %v10437_v7 = vrot.slane %v14554_v48, 1  ;;  %v10245_v0 = vor.u32 %v10243_v8, %v10241_v47 }
 0x685   : > { %9784 = vmatmul.bf16.gmra.mxu2 %v9674_v40 }
 0x686   : > { %v10330_v24 = vpop.f32.mrf.mxu0  ;;  %v10438_v37 = vsel %vm1758_vm7, %v10435_v5, %v10437_v7 }
 0x687   : > { %v9987_v49 = vpop.f32.mrf.mxu3  ;;  %v10512_v11 = vpop.f32.mrf.mxu1 }
 0x688   : > { %v9750_v38 = vpop.f32.mrf.mxu2 }
 0x689   : > { %v9802_v20 = vadd.f32 %v9750_v38, %v17085_v26 }
 0x68b   : > { %v10039_v29 = vadd.f32 %v9987_v49, %v9802_v20 }
 0x68d   : > { %v10380_v39 = vadd.f32 %v10328_v56, %v10039_v29  ;;  %v10249_v56 = vrot.slane %v10247_v10, 1 }
 0x68e   : > { %v10333_v41 = vpop.f32.mrf.mxu0 }
 0x68f   : > { %v9989_v32 = vpop.f32.mrf.mxu3  ;;  %v10515_v57 = vpop.f32.mrf.mxu1  ;;  %v17223_v34 = vadd.f32 %v10510_v6, %v10380_v39  ;;  %v10250_v40 = vsel %vm1378_vm6, %v10245_v0, %v10249_v56  ;;  %v14618_v39 = vld [vmem:[#allocation2 + $0x6c] sm:$0xff] }
 0x690   : > { %v9752_v26 = vpop.f32.mrf.mxu2  ;;  %v11443_v10 = vshrl.u32 %v14618_v39, 16 }
 0x691   : > { %v9803_v3 = vadd.f32 %v9752_v26, %v17094_v18  ;;  %10366 = vmatmul.bf16.gmra.mxu0 %v10242_v28 }
 0x692   : > { %10548 = vmatmul.bf16.gmra.mxu1 %v10436_v60 }
 0x693   : > { %v10040_v35 = vadd.f32 %v9989_v32, %v9803_v3 }
 0x694   : > { %10025 = vmatmul.bf16.gmra.mxu3 %v14533_v19 }
 0x695   : > { %9788 = vmatmul.bf16.gmra.mxu2 %v9676_v25  ;;  %v10381_v43 = vadd.f32 %v10330_v24, %v10040_v35  ;;  %v10145_v24 = vunpack.c.l.b16 %v10079_v2  ;;  %v11445_v35 = vshll.u32 %v14618_v39, 16 }
 0x696   : > { %v10334_v13 = vpop.f32.mrf.mxu0 }
 0x697   : > { %v9992_v50 = vpop.f32.mrf.mxu3  ;;  %v10516_v15 = vpop.f32.mrf.mxu1  ;;  %v17229_v6 = vadd.f32 %v10512_v11, %v10381_v43  ;;  %v9677_v11 = vrot.slane %v17106_v22, 1  ;;  %v10158_v5 = vpack.c.b16 %v10145_v24, %v10145_v24  ;;  %v10920_v24 = vshrl.u32 %v14697_v52, 16 }
 0x698   : > { %v9755_v51 = vpop.f32.mrf.mxu2 }
 0x699   : > { %v9678_v32 = vsel %vm1758_vm7, %v9675_v62, %v9677_v11  ;;  %v10255_v19 = vshll.u32 %v10158_v5, 16  ;;  %v10439_v58 = vrot.slane %v10158_v5, 1 }
 0x69b   : > { %v10257_v28 = vrot.slane %v10255_v19, 1  ;;  %v10440_v62 = vsel %vm1758_vm7, %v10437_v7, %v10439_v58  ;;  %v11447_v7 = vrot.slane %v11445_v35, 1 }
 0x69e   : > { %v10337_v36 = vpop.f32.mrf.mxu0 }
 0x69f   : > { %v9993_v18 = vpop.f32.mrf.mxu3  ;;  %v10519_v12 = vpop.f32.mrf.mxu1 }
 0x6a0   : > { %v9756_v49 = vpop.f32.mrf.mxu2 }
 0x6a1   : > { %v9804_v38 = vadd.f32 %v9756_v49, %v17110_v16  ;;  %10371 = vmatmul.bf16.gmra.mxu0 %v10250_v40  ;;  %v10251_v16 = vshrl.u32 %v14554_v48, 16  ;;  %v9679_v48 = vrot.slane %v17120_v61, 1  ;;  %v14698_v61 = vld [vmem:[#allocation3 + $0x78] sm:$0xf0] }
 0x6a2   : > { %10553 = vmatmul.bf16.gmra.mxu1 %v10438_v37  ;;  %v11448_v37 = vor.u32 %v11447_v7, %v11443_v10 }
 0x6a3   : > { %v10041_v59 = vadd.f32 %v9993_v18, %v9804_v38  ;;  %v10253_v26 = vor.u32 %v10251_v16, %v10249_v56  ;;  %v9680_v8 = vsel %vm1758_vm7, %v9677_v11, %v9679_v48 }
 0x6a4   : > { %10030 = vmatmul.bf16.gmra.mxu3 %v14534_v31  ;;  %v10922_v31 = vshll.u32 %v14697_v52, 16 }
 0x6a5   : > { %9793 = vmatmul.bf16.gmra.mxu2 %v9678_v32  ;;  %v10382_v57 = vadd.f32 %v10334_v13, %v10041_v59  ;;  %v17244_v13 = vld [vmem:[#allocation3 + $0x80] sm:$0xff] }
 0x6a6   : > { %v10339_v29 = vpop.f32.mrf.mxu0  ;;  %v10931_v10 = vshrl.u32 %v17244_v13, 16 }
 0x6a7   : > { %v9996_v14 = vpop.f32.mrf.mxu3  ;;  %v10521_v20 = vpop.f32.mrf.mxu1  ;;  %v17236_v27 = vadd.f32 %v10516_v15, %v10382_v57  ;;  %v14619_v15 = vld [vmem:[#allocation2 + $0x74] sm:$0xff]  ;;  %v11177_v57 = vrot.slane %v17244_v13, 1 }
 0x6a8   : > { %v9759_v30 = vpop.f32.mrf.mxu2  ;;  %v11450_v18 = vshll.u32 %v14619_v15, 16 }
 0x6a9   : > { %v9805_v22 = vadd.f32 %v9759_v30, %v17116_v33  ;;  %v10258_v33 = vsel %vm1378_vm6, %v10253_v26, %v10257_v28  ;;  %v11454_v28 = vshrl.u32 %v14619_v15, 16 }
 0x6aa   : > { %v11452_v2 = vrot.slane %v11450_v18, 1 }
 0x6ab   : > { %v10042_v41 = vadd.f32 %v9996_v14, %v9805_v22  ;;  %v14699_v14 = vld [vmem:[#allocation3 + $0x78] sm:$0xe] }
 0x6ac   : > { %v14700_v59 = vor.u32 %v14699_v14, %v14698_v61  ;;  %v11453_v32 = vsel %vm1378_vm6, %v11448_v37, %v11452_v2  ;;  %v14621_v37 = vld [vmem:[#allocation2 + $0x84] sm:$0xff]  ;;  %v17267_v61 = vld [vmem:[#allocation3 + $0x90] sm:$0xff] }
 0x6ad   : > { %v10383_v3 = vadd.f32 %v10337_v36, %v10042_v41  ;;  %v10924_v36 = vrot.slane %v10922_v31, 1  ;;  %v10943_v14 = vshll.u32 %v17267_v61, 16 }
 0x6ae   : > { %v10341_v50 = vpop.f32.mrf.mxu0  ;;  %v11176_v58 = vrot.slane %v14700_v59, 1 }
 0x6af   : > { %v9998_v47 = vpop.f32.mrf.mxu3  ;;  %v10523_v60 = vpop.f32.mrf.mxu1  ;;  %v17240_v25 = vadd.f32 %v10519_v12, %v10383_v3  ;;  %v10927_v12 = vshll.u32 %v17244_v13, 16  ;;  %v10925_v5 = vor.u32 %v10924_v36, %v10920_v24 }
 0x6b0   : > { %v9761_v63 = vpop.f32.mrf.mxu2  ;;  %v11178_v16 = vsel %vm1758_vm7, %v11176_v58, %v11177_v57 }
 0x6b1   : > { %10375 = vmatmul.bf16.gmra.mxu0 %v10258_v33  ;;  %v10929_v38 = vrot.slane %v10927_v12, 1  ;;  %v11456_v33 = vor.u32 %v11454_v28, %v11452_v2 }
 0x6b2   : > { %10557 = vmatmul.bf16.gmra.mxu1 %v10440_v62 }
 0x6b3   : > { %v10930_v29 = vsel %vm1378_vm6, %v10925_v5, %v10929_v38  ;;  %v10933_v31 = vor.u32 %v10931_v10, %v10929_v38  ;;  %v14572_v38 = vld [vmem:[#allocation3 + $0x80] sm:$0xff] }
 0x6b4   : > { %10034 = vmatmul.bf16.gmra.mxu3 %v14535_v55  ;;  %v17256_v55 = vld [vmem:[#allocation3 + $0x88] sm:$0xff] }
 0x6b5   : > { %9797 = vmatmul.bf16.gmra.mxu2 %v9680_v8  ;;  %v10935_v35 = vshll.u32 %v17256_v55, 16  ;;  %v11179_v8 = vrot.slane %v17256_v55, 1 }
 0x6b6   : > { %v10343_v56 = vpop.f32.mrf.mxu0 }
 0x6b7   : > { %v10000_v43 = vpop.f32.mrf.mxu3  ;;  %v10525_v51 = vpop.f32.mrf.mxu1  ;;  %v10937_v7 = vrot.slane %v10935_v35, 1  ;;  %v14594_v35 = vld [vmem:[#allocation3 + $0x98] sm:$0xff] }
 0x6b8   : > { %v9763_v0 = vpop.f32.mrf.mxu2 }
 0x6b9   : > { %v9806_v49 = vadd.f32 %v9763_v0, %v17130_v17  ;;  %v14620_v17 = vld [vmem:[#allocation2 + $0x7c] sm:$0xff]  ;;  %v10938_v12 = vsel %vm1378_vm6, %v10933_v31, %v10937_v7 }
 0x6ba   : > { %v11458_v62 = vshll.u32 %v14620_v17, 16 }
 0x6bb   : > { %v10043_v11 = vadd.f32 %v10000_v43, %v9806_v49  ;;  %v11462_v49 = vshrl.u32 %v14620_v17, 16 }
 0x6bc   : > { %v11460_v48 = vrot.slane %v11458_v62, 1  ;;  %v14622_v62 = vld [vmem:[#allocation2 + $0x8c] sm:$0xff] }
 0x6bd   : > { %v10384_v30 = vadd.f32 %v10341_v50, %v10043_v11  ;;  %v14571_v50 = vld [vmem:[#allocation3 + $0x78] sm:$0xff] }
 0x6be   : > { %v10346_v19 = vpop.f32.mrf.mxu0  ;;  %v11461_v15 = vsel %vm1378_vm6, %v11456_v33, %v11460_v48  ;;  %v11474_v33 = vshll.u32 %v14622_v62, 16 }
 0x6bf   : > { %v10002_v40 = vpop.f32.mrf.mxu3  ;;  %v10528_v20 = vpop.f32.mrf.mxu1  ;;  %v17252_v22 = vadd.f32 %v10523_v60, %v10384_v30  ;;  %v10939_v30 = vshrl.u32 %v17256_v55, 16  ;;  %v10945_v19 = vrot.slane %v10943_v14, 1 }
 0x6c0   : > { %v9765_v47 = vpop.f32.mrf.mxu2 }
 0x6c1   : > { %v9807_v39 = vadd.f32 %v9765_v47, %v17136_v53  ;;  %11269 = vmatmul.bf16.vlgmr.msrb.gmra.mxu0 %v11178_v16  ;;  %v10941_v16 = vor.u32 %v10939_v30, %v10937_v7  ;;  %v11476_v7 = vrot.slane %v11474_v33, 1 }
 0x6c2   : > { %11610 = vmatmul.bf16.vlgmr.msrb.gmra.mxu1 %v11453_v32  ;;  %v11464_v32 = vor.u32 %v11462_v49, %v11460_v48  ;;  %v14573_v48 = vld [vmem:[#allocation3 + $0x88] sm:$0xff] }
 0x6c3   : > { %v10044_v3 = vadd.f32 %v10002_v40, %v9807_v39  ;;  %v11466_v40 = vshll.u32 %v14621_v37, 16  ;;  %v11181_v39 = vrot.slane %v17267_v61, 1 }
 0x6c4   : > { %11087 = vmatmul.bf16.vlgmr.msrb.gmra.mxu3 %v10930_v29 }
 0x6c5   : > { %10746 = vmatmul.bf16.vlgmr.msrb.gmra.mxu2 %v14571_v50  ;;  %v10385_v63 = vadd.f32 %v10343_v56, %v10044_v3  ;;  %v11468_v11 = vrot.slane %v11466_v40, 1  ;;  %v11182_v55 = vsel %vm1758_vm7, %v11179_v8, %v11181_v39  ;;  %v14623_v40 = vld [vmem:[#allocation2 + $0x94] sm:$0xff] }
 0x6c6   : > { %v10347_v60 = vpop.f32.mrf.mxu0 }
 0x6c7   : > { %v10005_v41 = vpop.f32.mrf.mxu3  ;;  %v10529_v26 = vpop.f32.mrf.mxu1  ;;  %v17259_v52 = vadd.f32 %v10525_v51, %v10385_v63  ;;  %v11180_v51 = vsel %vm1758_vm7, %v11177_v57, %v11179_v8  ;;  %v11469_v17 = vsel %vm1378_vm6, %v11464_v32, %v11468_v11  ;;  %v11478_v32 = vshrl.u32 %v14622_v62, 16 }
 0x6c8   : > { %v9768_v43 = vpop.f32.mrf.mxu2  ;;  %v10946_v41 = vsel %vm1378_vm6, %v10941_v16, %v10945_v19 }
 0x6c9   : > { %v10951_v43 = vshll.u32 %v14594_v35, 16 }
 0x6ce   : > { %v10350_v56 = vpop.f32.mrf.mxu0 }
 0x6cf   : > { %v10006_v53 = vpop.f32.mrf.mxu3  ;;  %v10532_v18 = vpop.f32.mrf.mxu1 }
 0x6d0   : > { %v9769_v2 = vpop.f32.mrf.mxu2 }
 0x6d1   : > { %v9808_v36 = vadd.f32 %v9769_v2, %v17148_v44  ;;  %11274 = vmatmul.bf16.gmra.mxu0 %v11180_v51 }
 0x6d2   : > { %11615 = vmatmul.bf16.gmra.mxu1 %v11461_v15 }
 0x6d3   : > { %v10045_v24 = vadd.f32 %v10006_v53, %v9808_v36 }
 0x6d4   : > { %11092 = vmatmul.bf16.gmra.mxu3 %v10938_v12  ;;  %v10947_v12 = vshrl.u32 %v17267_v61, 16 }
 0x6d5   : > { %10751 = vmatmul.bf16.gmra.mxu2 %v14572_v38  ;;  %v10386_v20 = vadd.f32 %v10347_v60, %v10045_v24  ;;  %v11470_v60 = vshrl.u32 %v14621_v37, 16  ;;  %v11183_v37 = vrot.slane %v14594_v35, 1 }
 0x6d6   : > { %v10352_v59 = vpop.f32.mrf.mxu0  ;;  %v10949_v36 = vor.u32 %v10947_v12, %v10945_v19 }
 0x6d7   : > { %v10009_v13 = vpop.f32.mrf.mxu3  ;;  %v10534_v0 = vpop.f32.mrf.mxu1  ;;  %v17270_v5 = vadd.f32 %v10529_v26, %v10386_v20  ;;  %v11472_v10 = vor.u32 %v11470_v60, %v11468_v11  ;;  %v11184_v38 = vsel %vm1758_vm7, %v11181_v39, %v11183_v37  ;;  %v17288_v20 = vld [vmem:[#allocation3 + $0xa0] sm:$0xff]  ;;  %v11482_v11 = vshll.u32 %v14623_v40, 16 }
 0x6d8   : > { %v9772_v57 = vpop.f32.mrf.mxu2  ;;  %v10955_v39 = vshrl.u32 %v14594_v35, 16  ;;  %v14624_v60 = vld [vmem:[#allocation2 + $0x9c] sm:$0xff] }
 0x6d9   : > { %v9809_v44 = vadd.f32 %v9772_v57, %v17152_v9  ;;  %v11477_v2 = vsel %vm1378_vm6, %v11472_v10, %v11476_v7  ;;  %v11486_v10 = vshrl.u32 %v14623_v40, 16 }
 0x6db   : > { %v10046_v47 = vadd.f32 %v10009_v13, %v9809_v44  ;;  %v14574_v44 = vld [vmem:[#allocation3 + $0x90] sm:$0xff] }
 0x6dd   : > { %v10387_v28 = vadd.f32 %v10350_v56, %v10046_v47  ;;  %v10953_v56 = vrot.slane %v10951_v43, 1  ;;  %v17298_v43 = vld [vmem:[#allocation3 + $0xa8] sm:$0xff] }
 0x6de   : > { %v10354_v26 = vpop.f32.mrf.mxu0 }
 0x6df   : > { %v10011_v29 = vpop.f32.mrf.mxu3  ;;  %v10536_v58 = vpop.f32.mrf.mxu1  ;;  %v17277_v3 = vadd.f32 %v10532_v18, %v10387_v28  ;;  %v10954_v13 = vsel %vm1378_vm6, %v10949_v36, %v10953_v56  ;;  %v10957_v62 = vor.u32 %v10955_v39, %v10953_v56 }
 0x6e0   : > { %v9774_v9 = vpop.f32.mrf.mxu2  ;;  %v10959_v29 = vshll.u32 %v17288_v20, 16 }
 0x6e1   : > { %11278 = vmatmul.bf16.gmra.mxu0 %v11182_v55  ;;  %v11185_v9 = vrot.slane %v17288_v20, 1 }
 0x6e2   : > { %11619 = vmatmul.bf16.gmra.mxu1 %v11469_v17  ;;  %v11484_v17 = vrot.slane %v11482_v11, 1  ;;  %v14625_v11 = vld [vmem:[#allocation2 + $0xa4] sm:$0xff] }
 0x6e4   : > { %11096 = vmatmul.bf16.gmra.mxu3 %v10946_v41  ;;  %v10961_v41 = vrot.slane %v10959_v29, 1  ;;  %v14597_v29 = vld [vmem:[#allocation3 + $0xb0] sm:$0xff] }
 0x6e5   : > { %10755 = vmatmul.bf16.gmra.mxu2 %v14573_v48 }
 0x6e6   : > { %v10356_v53 = vpop.f32.mrf.mxu0  ;;  %v10962_v55 = vsel %vm1378_vm6, %v10957_v62, %v10961_v41 }
 0x6e7   : > { %v10013_v50 = vpop.f32.mrf.mxu3  ;;  %v10538_v63 = vpop.f32.mrf.mxu1 }
 0x6e8   : > { %v9776_v15 = vpop.f32.mrf.mxu2 }
 0x6e9   : > { %v9810_v31 = vadd.f32 %v9776_v15, %v17162_v46 }
 0x6eb   : > { %v10047_v51 = vadd.f32 %v10013_v50, %v9810_v31  ;;  %v14575_v31 = vld [vmem:[#allocation3 + $0x98] sm:$0xff] }
 0x6ed   : > { %v10388_v0 = vadd.f32 %v10354_v26, %v10047_v51 }
 0x6ee   : > { %v10359_v49 = vpop.f32.mrf.mxu0 }
 0x6ef   : > { %v10015_v18 = vpop.f32.mrf.mxu3  ;;  %v10541_v8 = vpop.f32.mrf.mxu1  ;;  %v17284_v24 = vadd.f32 %v10536_v58, %v10388_v0  ;;  %v11480_v58 = vor.u32 %v11478_v32, %v11476_v7  ;;  %v11490_v7 = vshll.u32 %v14624_v60, 16 }
 0x6f0   : > { %v9778_v46 = vpop.f32.mrf.mxu2  ;;  %v11488_v8 = vor.u32 %v11486_v10, %v11484_v17 }
 0x6f1   : > { %v9811_v61 = vadd.f32 %v9778_v46, %v17167_v42  ;;  %11282 = vmatmul.bf16.gmra.mxu0 %v11184_v38  ;;  %v11485_v26 = vsel %vm1378_vm6, %v11480_v58, %v11484_v17  ;;  %v11498_v58 = vshll.u32 %v14625_v11, 16  ;;  %v14576_v17 = vld [vmem:[#allocation3 + $0xa0] sm:$0xff] }
 0x6f2   : > { %11623 = vmatmul.bf16.gmra.mxu1 %v11477_v2  ;;  %v11492_v2 = vrot.slane %v11490_v7, 1  ;;  %v14626_v7 = vld [vmem:[#allocation2 + $0xac] sm:$0xff] }
 0x6f3   : > { %v10048_v57 = vadd.f32 %v10015_v18, %v9811_v61  ;;  %v10967_v18 = vshll.u32 %v17298_v43, 16  ;;  %v11187_v61 = vrot.slane %v17298_v43, 1 }
 0x6f4   : > { %11100 = vmatmul.bf16.gmra.mxu3 %v10954_v13  ;;  %v10963_v13 = vshrl.u32 %v17288_v20, 16  ;;  %v11493_v40 = vsel %vm1378_vm6, %v11488_v8, %v11492_v2  ;;  %v11502_v8 = vshrl.u32 %v14625_v11, 16 }
 0x6f5   : > { %10759 = vmatmul.bf16.gmra.mxu2 %v14574_v44  ;;  %v10389_v30 = vadd.f32 %v10356_v53, %v10048_v57  ;;  %v10969_v0 = vrot.slane %v10967_v18, 1  ;;  %v11188_v20 = vsel %vm1758_vm7, %v11185_v9, %v11187_v61 }
 0x6f6   : > { %v10360_v19 = vpop.f32.mrf.mxu0  ;;  %v10965_v38 = vor.u32 %v10963_v13, %v10961_v41  ;;  %v11500_v41 = vrot.slane %v11498_v58, 1 }
 0x6f7   : > { %v10018_v14 = vpop.f32.mrf.mxu3  ;;  %v10542_v59 = vpop.f32.mrf.mxu1  ;;  %v17291_v47 = vadd.f32 %v10538_v63, %v10389_v30  ;;  %v11186_v63 = vsel %vm1758_vm7, %v11183_v37, %v11185_v9 }
 0x6f8   : > { %v9781_v16 = vpop.f32.mrf.mxu2  ;;  %v10970_v14 = vsel %vm1378_vm6, %v10965_v38, %v10969_v0 }
 0x6f9   : > { %v10975_v16 = vshll.u32 %v14597_v29, 16 }
 0x6fe   : > { %v10363_v50 = vpop.f32.mrf.mxu0 }
 0x6ff   : > { %v10019_v42 = vpop.f32.mrf.mxu3  ;;  %v10545_v28 = vpop.f32.mrf.mxu1 }
 0x700   : > { %v9782_v33 = vpop.f32.mrf.mxu2 }
 0x701   : > { %v9812_v48 = vadd.f32 %v9782_v33, %v17177_v21  ;;  %11287 = vmatmul.bf16.gmra.mxu0 %v11186_v63 }
 0x702   : > { %11628 = vmatmul.bf16.gmra.mxu1 %v11485_v26 }
 0x703   : > { %v10049_v15 = vadd.f32 %v10019_v42, %v9812_v48 }
 0x704   : > { %11105 = vmatmul.bf16.gmra.mxu3 %v10962_v55  ;;  %v10971_v55 = vshrl.u32 %v17298_v43, 16 }
 0x705   : > { %10764 = vmatmul.bf16.gmra.mxu2 %v14575_v31  ;;  %v10390_v12 = vadd.f32 %v10360_v19, %v10049_v15  ;;  %v11494_v19 = vshrl.u32 %v14624_v60, 16  ;;  %v11189_v60 = vrot.slane %v14597_v29, 1 }
 0x706   : > { %v10365_v56 = vpop.f32.mrf.mxu0  ;;  %v10973_v48 = vor.u32 %v10971_v55, %v10969_v0 }
 0x707   : > { %v10022_v35 = vpop.f32.mrf.mxu3  ;;  %v10547_v53 = vpop.f32.mrf.mxu1  ;;  %v17301_v51 = vadd.f32 %v10542_v59, %v10390_v12  ;;  %v11496_v39 = vor.u32 %v11494_v19, %v11492_v2  ;;  %v11190_v31 = vsel %vm1758_vm7, %v11187_v61, %v11189_v60  ;;  %v17319_v12 = vld [vmem:[#allocation3 + $0xb8] sm:$0xff]  ;;  %v11506_v2 = vshll.u32 %v14626_v7, 16 }
 0x708   : > { %v9785_v36 = vpop.f32.mrf.mxu2  ;;  %v10979_v61 = vshrl.u32 %v14597_v29, 16  ;;  %v14627_v19 = vld [vmem:[#allocation2 + $0xb4] sm:$0xff] }
 0x709   : > { %v9813_v21 = vadd.f32 %v9785_v36, %v17180_v54  ;;  %v11501_v33 = vsel %vm1378_vm6, %v11496_v39, %v11500_v41  ;;  %v11510_v39 = vshrl.u32 %v14626_v7, 16 }
 0x70b   : > { %v10050_v46 = vadd.f32 %v10022_v35, %v9813_v21  ;;  %v14577_v21 = vld [vmem:[#allocation3 + $0xa8] sm:$0xff] }
 0x70d   : > { %v10391_v32 = vadd.f32 %v10363_v50, %v10050_v46  ;;  %v10977_v50 = vrot.slane %v10975_v16, 1  ;;  %v17329_v16 = vld [vmem:[#allocation3 + $0xc0] sm:$0xff] }
 0x70e   : > { %v10367_v59 = vpop.f32.mrf.mxu0 }
 0x70f   : > { %v10024_v37 = vpop.f32.mrf.mxu3  ;;  %v10549_v49 = vpop.f32.mrf.mxu1  ;;  %v17308_v57 = vadd.f32 %v10545_v28, %v10391_v32  ;;  %v10978_v35 = vsel %vm1378_vm6, %v10973_v48, %v10977_v50  ;;  %v10981_v11 = vor.u32 %v10979_v61, %v10977_v50 }
 0x710   : > { %v9787_v54 = vpop.f32.mrf.mxu2  ;;  %v10983_v37 = vshll.u32 %v17319_v12, 16 }
 0x711   : > { %11291 = vmatmul.bf16.gmra.mxu0 %v11188_v20  ;;  %v11191_v54 = vrot.slane %v17319_v12, 1 }
 0x712   : > { %11632 = vmatmul.bf16.gmra.mxu1 %v11493_v40  ;;  %v11508_v40 = vrot.slane %v11506_v2, 1  ;;  %v14628_v2 = vld [vmem:[#allocation2 + $0xbc] sm:$0xff] }
 0x714   : > { %11109 = vmatmul.bf16.gmra.mxu3 %v10970_v14  ;;  %v10985_v14 = vrot.slane %v10983_v37, 1 }
 0x715   : > { %10768 = vmatmul.bf16.gmra.mxu2 %v14576_v17 }
 0x716   : > { %v10369_v42 = vpop.f32.mrf.mxu0  ;;  %v10986_v20 = vsel %vm1378_vm6, %v10981_v11, %v10985_v14 }
 0x717   : > { %v10026_v44 = vpop.f32.mrf.mxu3  ;;  %v10551_v30 = vpop.f32.mrf.mxu1 }
 0x718   : > { %v9789_v26 = vpop.f32.mrf.mxu2 }
 0x719   : > { %v9814_v62 = vadd.f32 %v9789_v26, %v17190_v4 }
 0x71b   : > { %v10051_v63 = vadd.f32 %v10026_v44, %v9814_v62  ;;  %v14578_v62 = vld [vmem:[#allocation3 + $0xb0] sm:$0xff] }
 0x71d   : > { %v10392_v53 = vadd.f32 %v10367_v59, %v10051_v63 }
 0x71e   : > { %v10372_v10 = vpop.f32.mrf.mxu0 }
 0x71f   : > { %v10028_v28 = vpop.f32.mrf.mxu3  ;;  %v10554_v9 = vpop.f32.mrf.mxu1  ;;  %v17315_v15 = vadd.f32 %v10549_v49, %v10392_v53  ;;  %v11504_v49 = vor.u32 %v11502_v8, %v11500_v41  ;;  %v11514_v41 = vshll.u32 %v14627_v19, 16 }
 0x720   : > { %v9791_v4 = vpop.f32.mrf.mxu2  ;;  %v11512_v9 = vor.u32 %v11510_v39, %v11508_v40  ;;  %v14629_v39 = vld [vmem:[#allocation2 + $0xc4] sm:$0xff] }
 0x721   : > { %v9815_v43 = vadd.f32 %v9791_v4, %v17195_v45  ;;  %11295 = vmatmul.bf16.gmra.mxu0 %v11190_v31  ;;  %v11509_v59 = vsel %vm1378_vm6, %v11504_v49, %v11508_v40  ;;  %v14579_v49 = vld [vmem:[#allocation3 + $0xb8] sm:$0xff]  ;;  %v17342_v40 = vld [vmem:[#allocation3 + $0xc8] sm:$0xff] }
 0x722   : > { %11636 = vmatmul.bf16.gmra.mxu1 %v11501_v33  ;;  %v11516_v33 = vrot.slane %v11514_v41, 1 }
 0x723   : > { %v10052_v36 = vadd.f32 %v10028_v28, %v9815_v43  ;;  %v10991_v28 = vshll.u32 %v17329_v16, 16  ;;  %v11193_v43 = vrot.slane %v17329_v16, 1 }
 0x724   : > { %11113 = vmatmul.bf16.gmra.mxu3 %v10978_v35  ;;  %v10987_v35 = vshrl.u32 %v17319_v12, 16  ;;  %v11517_v7 = vsel %vm1378_vm6, %v11512_v9, %v11516_v33  ;;  %v11530_v9 = vshll.u32 %v14629_v39, 16 }
 0x725   : > { %10772 = vmatmul.bf16.gmra.mxu2 %v14577_v21  ;;  %v10393_v13 = vadd.f32 %v10369_v42, %v10052_v36  ;;  %v10993_v53 = vrot.slane %v10991_v28, 1  ;;  %v11194_v12 = vsel %vm1758_vm7, %v11191_v54, %v11193_v43 }
 0x726   : > { %v10373_v0 = vpop.f32.mrf.mxu0  ;;  %v10989_v31 = vor.u32 %v10987_v35, %v10985_v14  ;;  %v10995_v14 = vshrl.u32 %v17329_v16, 16 }
 0x727   : > { %v10031_v18 = vpop.f32.mrf.mxu3  ;;  %v10555_v56 = vpop.f32.mrf.mxu1  ;;  %v17322_v46 = vadd.f32 %v10551_v30, %v10393_v13  ;;  %v11192_v30 = vsel %vm1758_vm7, %v11189_v60, %v11191_v54  ;;  %v11518_v13 = vshrl.u32 %v14627_v19, 16 }
 0x728   : > { %v9794_v38 = vpop.f32.mrf.mxu2  ;;  %v10994_v18 = vsel %vm1378_vm6, %v10989_v31, %v10993_v53  ;;  %v11003_v31 = vshrl.u32 %v17342_v40, 16 }
 0x72e   : > { %v10376_v44 = vpop.f32.mrf.mxu0 }
 0x72f   : > { %v10032_v45 = vpop.f32.mrf.mxu3  ;;  %v10558_v32 = vpop.f32.mrf.mxu1 }
 0x730   : > { %v9795_v58 = vpop.f32.mrf.mxu2 }
 0x731   : > { %v9816_v17 = vadd.f32 %v9795_v58, %v17205_v1  ;;  %11300 = vmatmul.bf16.gmra.mxu0 %v11192_v30 }
 0x732   : > { %11641 = vmatmul.bf16.gmra.mxu1 %v11509_v59 }
 0x733   : > { %v10053_v26 = vadd.f32 %v10032_v45, %v9816_v17  ;;  %v11520_v45 = vor.u32 %v11518_v13, %v11516_v33  ;;  %v11195_v17 = vrot.slane %v17342_v40, 1 }
 0x734   : > { %11118 = vmatmul.bf16.gmra.mxu3 %v10986_v20  ;;  %v10997_v20 = vor.u32 %v10995_v14, %v10993_v53 }
 0x735   : > { %10777 = vmatmul.bf16.gmra.mxu2 %v14578_v62  ;;  %v10394_v55 = vadd.f32 %v10373_v0, %v10053_v26  ;;  %v11522_v0 = vshll.u32 %v14628_v2, 16 }
 0x736   : > { %v10378_v50 = vpop.f32.mrf.mxu0 }
 0x737   : > { %v10035_v29 = vpop.f32.mrf.mxu3  ;;  %v10560_v42 = vpop.f32.mrf.mxu1  ;;  %v17332_v63 = vadd.f32 %v10555_v56, %v10394_v55  ;;  %v11524_v61 = vrot.slane %v11522_v0, 1  ;;  %v11526_v50 = vshrl.u32 %v14628_v2, 16 }
 0x738   : > { %v9798_v48 = vpop.f32.mrf.mxu2 }
 0x739   : > { %v9817_v1 = vadd.f32 %v9798_v48, %v17208_v23  ;;  %v11525_v19 = vsel %vm1378_vm6, %v11520_v45, %v11524_v61  ;;  %v14580_v48 = vld [vmem:[#allocation3 + $0xc0] sm:$0xff] }
 0x73b   : > { %v10054_v4 = vadd.f32 %v10035_v29, %v9817_v1  ;;  %v14601_v1 = vld [vmem:[#allocation3 + $0xd0] sm:$0xff] }
 0x73c   : > { %v11007_v35 = vshll.u32 %v14601_v1, 16  ;;  %v11197_v0 = vrot.slane %v14601_v1, 1 }
 0x73d   : > { %v10395_v8 = vadd.f32 %v10376_v44, %v10054_v4 }
 0x73e   : > { %v11270_v56 = vpop.f32.mrf.mxu0  ;;  %v11009_v2 = vrot.slane %v11007_v35, 1 }
 0x73f   : > { %v10037_v60 = vpop.f32.mrf.mxu3  ;;  %v11611_v10 = vpop.f32.mrf.mxu1  ;;  %v17339_v36 = vadd.f32 %v10558_v32, %v10395_v8  ;;  %v10999_v32 = vshll.u32 %v17342_v40, 16 }
 0x740   : > { %v9800_v23 = vpop.f32.mrf.mxu2 }
 0x741   : > { %11304 = vmatmul.bf16.gmra.mxu0 %v11194_v12  ;;  %v11001_v30 = vrot.slane %v10999_v32, 1 }
 0x742   : > { %11645 = vmatmul.bf16.gmra.mxu1 %v11517_v7  ;;  %v11532_v7 = vrot.slane %v11530_v9, 1 }
 0x743   : > { %v11002_v42 = vsel %vm1378_vm6, %v10997_v20, %v11001_v30 }
 0x744   : > { %11122 = vmatmul.bf16.gmra.mxu3 %v10994_v18  ;;  %v10839_v18 = vld [vmem:[#allocation3 + $0xd8] sm:$0x1] }
 0x745   : > { %10781 = vmatmul.bf16.gmra.mxu2 %v14579_v49  ;;  %v10905_v13 = vunpack.c.l.b16 %v10839_v18 }
 0x746   : > { %v11272_v38 = vpop.f32.mrf.mxu0 }
 0x747   : > { %v11088_v21 = vpop.f32.mrf.mxu3  ;;  %v11613_v37 = vpop.f32.mrf.mxu1  ;;  %v10918_v40 = vpack.c.b16 %v10905_v13, %v10905_v13 }
 0x748   : > { %v10747_v59 = vpop.f32.mrf.mxu2 }
 0x749   : > { %v10799_v11 = vadd.f32 %v10747_v59, %v17223_v34  ;;  %v11196_v34 = vsel %vm1758_vm7, %v11193_v43, %v11195_v17  ;;  %v11362_v43 = vld [vmem:[#allocation2 + $0xcc] sm:$0x1] }
 0x74b   : > { %v11140_v58 = vadd.f32 %v11088_v21, %v10799_v11  ;;  %v11428_v21 = vunpack.c.l.b16 %v11362_v43  ;;  %v11534_v11 = vshrl.u32 %v14629_v39, 16 }
 0x74d   : > { %v11322_v29 = vadd.f32 %v11270_v56, %v11140_v58  ;;  %v11005_v56 = vor.u32 %v11003_v31, %v11001_v30  ;;  %v11015_v58 = vshll.u32 %v10918_v40, 16 }
 0x74e   : > { %v11275_v16 = vpop.f32.mrf.mxu0 }
 0x74f   : > { %v11090_v54 = vpop.f32.mrf.mxu3  ;;  %v11616_v44 = vpop.f32.mrf.mxu1  ;;  %v11663_v41 = vadd.f32 %v11611_v10, %v11322_v29  ;;  %v11528_v10 = vor.u32 %v11526_v50, %v11524_v61  ;;  %v11010_v49 = vsel %vm1378_vm6, %v11005_v56, %v11009_v2  ;;  %v11198_v61 = vsel %vm1758_vm7, %v11195_v17, %v11197_v0 }
 0x750   : > { %v10749_v26 = vpop.f32.mrf.mxu2  ;;  %v14581_v44 = vld [vmem:[#allocation3 + $0xc8] sm:$0xff]  ;;  %v11017_v17 = vrot.slane %v11015_v58, 1 }
 0x751   : > { %14061 = vst [vmem:[%s17100_s20 + $0x80] sm:$0xff] %v11663_v41  ;;  %v10800_v62 = vadd.f32 %v10749_v26, %v17229_v6  ;;  %11308 = vmatmul.bf16.gmra.mxu0 %v11196_v34  ;;  %v11533_v12 = vsel %vm1378_vm6, %v11528_v10, %v11532_v7 }
 0x752   : > { %11649 = vmatmul.bf16.gmra.mxu1 %v11525_v19  ;;  %v11011_v19 = vshrl.u32 %v14601_v1, 16 }
 0x753   : > { %v11141_v33 = vadd.f32 %v11090_v54, %v10800_v62 }
 0x754   : > { %11126 = vmatmul.bf16.gmra.mxu3 %v11002_v42  ;;  %v11536_v42 = vor.u32 %v11534_v11, %v11532_v7  ;;  %v11013_v26 = vor.u32 %v11011_v19, %v11009_v2 }
 0x755   : > { %v11323_v60 = vadd.f32 %v11272_v38, %v11141_v33  ;;  %10785 = vmatmul.bf16.gmra.mxu2 %v14580_v48 }
 0x756   : > { %v11276_v53 = vpop.f32.mrf.mxu0  ;;  %v11018_v33 = vsel %vm1378_vm6, %v11013_v26, %v11017_v17 }
 0x757   : > { %v11093_v28 = vpop.f32.mrf.mxu3  ;;  %v11617_v55 = vpop.f32.mrf.mxu1  ;;  %v11664_v4 = vadd.f32 %v11613_v37, %v11323_v60  ;;  %v11441_v37 = vpack.c.b16 %v11428_v21, %v11428_v21 }
 0x758   : > { %v10752_v6 = vpop.f32.mrf.mxu2  ;;  %v11199_v28 = vrot.slane %v10918_v40, 1 }
 0x759   : > { %14062 = vst [vmem:[%s17100_s20 + $0x88] sm:$0xff] %v11664_v4  ;;  %v11538_v54 = vshll.u32 %v11441_v37, 16 }
 0x75b   : > { %v11540_v16 = vrot.slane %v11538_v54, 1 }
 0x75d   : > { %v11541_v50 = vsel %vm1378_vm6, %v11536_v42, %v11540_v16 }
 0x75e   : > { %v11279_v38 = vpop.f32.mrf.mxu0 }
 0x75f   : > { %v11094_v8 = vpop.f32.mrf.mxu3  ;;  %v11620_v23 = vpop.f32.mrf.mxu1 }
 0x760   : > { %v10753_v45 = vpop.f32.mrf.mxu2 }
 0x761   : > { %v10801_v14 = vadd.f32 %v10753_v45, %v17236_v27  ;;  %11313 = vmatmul.bf16.gmra.mxu0 %v11198_v61 }
 0x762   : > { %11654 = vmatmul.bf16.gmra.mxu1 %v11533_v12 }
 0x763   : > { %v11142_v20 = vadd.f32 %v11094_v8, %v10801_v14 }
 0x764   : > { %11131 = vmatmul.bf16.gmra.mxu3 %v11010_v49 }
 0x765   : > { %v11324_v30 = vadd.f32 %v11276_v53, %v11142_v20  ;;  %10790 = vmatmul.bf16.gmra.mxu2 %v14581_v44  ;;  %v14582_v53 = vld [vmem:[#allocation3 + $0xd0] sm:$0xff] }
 0x766   : > { %v11281_v29 = vpop.f32.mrf.mxu0 }
 0x767   : > { %v11097_v32 = vpop.f32.mrf.mxu3  ;;  %v11622_v59 = vpop.f32.mrf.mxu1  ;;  %v11665_v41 = vadd.f32 %v11617_v55, %v11324_v30  ;;  %v11200_v55 = vsel %vm1758_vm7, %v11197_v0, %v11199_v28 }
 0x768   : > { %v10756_v34 = vpop.f32.mrf.mxu2 }
 0x769   : > { %14063 = vst [vmem:[%s17100_s20 + $0x90] sm:$0xff] %v11665_v41  ;;  %v10802_v27 = vadd.f32 %v10756_v34, %v17240_v25 }
 0x76b   : > { %v11143_v9 = vadd.f32 %v11097_v32, %v10802_v27 }
 0x76d   : > { %v11325_v48 = vadd.f32 %v11279_v38, %v11143_v9 }
 0x76e   : > { %v11283_v1 = vpop.f32.mrf.mxu0 }
 0x76f   : > { %v11099_v62 = vpop.f32.mrf.mxu3  ;;  %v11624_v39 = vpop.f32.mrf.mxu1  ;;  %v11666_v60 = vadd.f32 %v11620_v23, %v11325_v48 }
 0x770   : > { %v10758_v35 = vpop.f32.mrf.mxu2 }
 0x771   : > { %14064 = vst [vmem:[%s17100_s20 + $0x98] sm:$0xff] %v11666_v60  ;;  %11317 = vmatmul.bf16.gmra.mxu0 %v11200_v55 }
 0x772   : > { %11658 = vmatmul.bf16.gmra.mxu1 %v11541_v50 }
 0x774   : > { %11135 = vmatmul.bf16.gmra.mxu3 %v11018_v33 }
 0x775   : > { %10794 = vmatmul.bf16.gmra.mxu2 %v14582_v53 }
 0x776   : > { %v11285_v7 = vpop.f32.mrf.mxu0 }
 0x777   : > { %v11101_v25 = vpop.f32.mrf.mxu3  ;;  %v11626_v10 = vpop.f32.mrf.mxu1 }
 0x778   : > { %v10760_v4 = vpop.f32.mrf.mxu2 }
 0x779   : > { %v10803_v31 = vadd.f32 %v10760_v4, %v17252_v22 }
 0x77b   : > { %v11144_v18 = vadd.f32 %v11101_v25, %v10803_v31 }
 0x77d   : > { %v11326_v8 = vadd.f32 %v11283_v1, %v11144_v18 }
 0x77e   : > { %v11288_v56 = vpop.f32.mrf.mxu0 }
 0x77f   : > { %v11103_v43 = vpop.f32.mrf.mxu3  ;;  %v11629_v6 = vpop.f32.mrf.mxu1  ;;  %v11667_v2 = vadd.f32 %v11624_v39, %v11326_v8 }
 0x780   : > { %v10762_v23 = vpop.f32.mrf.mxu2 }
 0x781   : > { %14065 = vst [vmem:[%s17100_s20 + $0xa0] sm:$0xff] %v11667_v2  ;;  %v10804_v12 = vadd.f32 %v10762_v23, %v17259_v52 }
 0x783   : > { %v11145_v0 = vadd.f32 %v11103_v43, %v10804_v12 }
 0x785   : > { %v11327_v49 = vadd.f32 %v11285_v7, %v11145_v0 }
 0x786   : > { %v11289_v38 = vpop.f32.mrf.mxu0 }
 0x787   : > { %v11106_v21 = vpop.f32.mrf.mxu3  ;;  %v11630_v13 = vpop.f32.mrf.mxu1  ;;  %v11668_v37 = vadd.f32 %v11626_v10, %v11327_v49 }
 0x788   : > { %v10765_v40 = vpop.f32.mrf.mxu2 }
 0x789   : > { %14066 = vst [vmem:[%s17100_s20 + $0xa8] sm:$0xff] %v11668_v37 }
 0x78e   : > { %v11292_v61 = vpop.f32.mrf.mxu0 }
 0x78f   : > { %v11107_v22 = vpop.f32.mrf.mxu3  ;;  %v11633_v45 = vpop.f32.mrf.mxu1 }
 0x790   : > { %v10766_v14 = vpop.f32.mrf.mxu2 }
 0x791   : > { %v10805_v32 = vadd.f32 %v10766_v14, %v17270_v5 }
 0x793   : > { %v11146_v54 = vadd.f32 %v11107_v22, %v10805_v32 }
 0x795   : > { %v11328_v52 = vadd.f32 %v11289_v38, %v11146_v54 }
 0x796   : > { %v11294_v20 = vpop.f32.mrf.mxu0 }
 0x797   : > { %v11110_v59 = vpop.f32.mrf.mxu3  ;;  %v11635_v11 = vpop.f32.mrf.mxu1  ;;  %v11669_v44 = vadd.f32 %v11630_v13, %v11328_v52 }
 0x798   : > { %v10769_v19 = vpop.f32.mrf.mxu2 }
 0x799   : > { %14067 = vst [vmem:[%s17100_s20 + $0xb0] sm:$0xff] %v11669_v44  ;;  %v10806_v58 = vadd.f32 %v10769_v19, %v17277_v3 }
 0x79b   : > { %v11147_v42 = vadd.f32 %v11110_v59, %v10806_v58 }
 0x79d   : > { %v11329_v16 = vadd.f32 %v11292_v61, %v11147_v42 }
 0x79e   : > { %v11296_v41 = vpop.f32.mrf.mxu0 }
 0x79f   : > { %v11112_v30 = vpop.f32.mrf.mxu3  ;;  %v11637_v29 = vpop.f32.mrf.mxu1  ;;  %v11670_v26 = vadd.f32 %v11633_v45, %v11329_v16 }
 0x7a0   : > { %v10771_v17 = vpop.f32.mrf.mxu2 }
 0x7a1   : > { %14068 = vst [vmem:[%s17100_s20 + $0xb8] sm:$0xff] %v11670_v26 }
 0x7a6   : > { %v11298_v27 = vpop.f32.mrf.mxu0 }
 0x7a7   : > { %v11114_v5 = vpop.f32.mrf.mxu3  ;;  %v11639_v34 = vpop.f32.mrf.mxu1 }
 0x7a8   : > { %v10773_v62 = vpop.f32.mrf.mxu2 }
 0x7a9   : > { %v10807_v39 = vadd.f32 %v10773_v62, %v17284_v24 }
 0x7ab   : > { %v11148_v9 = vadd.f32 %v11114_v5, %v10807_v39 }
 0x7ad   : > { %v11330_v3 = vadd.f32 %v11296_v41, %v11148_v9 }
 0x7ae   : > { %v11301_v33 = vpop.f32.mrf.mxu0 }
 0x7af   : > { %v11116_v28 = vpop.f32.mrf.mxu3  ;;  %v11642_v50 = vpop.f32.mrf.mxu1  ;;  %v11671_v48 = vadd.f32 %v11637_v29, %v11330_v3 }
 0x7b0   : > { %v10775_v1 = vpop.f32.mrf.mxu2 }
 0x7b1   : > { %14069 = vst [vmem:[%s17100_s20 + $0xc0] sm:$0xff] %v11671_v48  ;;  %v10808_v55 = vadd.f32 %v10775_v1, %v17291_v47 }
 0x7b3   : > { %v11149_v53 = vadd.f32 %v11116_v28, %v10808_v55 }
 0x7b5   : > { %v11331_v25 = vadd.f32 %v11298_v27, %v11149_v53 }
 0x7b6   : > { %v11302_v10 = vpop.f32.mrf.mxu0 }
 0x7b7   : > { %v11119_v60 = vpop.f32.mrf.mxu3  ;;  %v11643_v35 = vpop.f32.mrf.mxu1  ;;  %v11672_v7 = vadd.f32 %v11639_v34, %v11331_v25 }
 0x7b8   : > { %v10778_v4 = vpop.f32.mrf.mxu2 }
 0x7b9   : > { %14070 = vst [vmem:[%s17100_s20 + $0xc8] sm:$0xff] %v11672_v7 }
 0x7be   : > { %v11305_v43 = vpop.f32.mrf.mxu0 }
 0x7bf   : > { %v11120_v24 = vpop.f32.mrf.mxu3  ;;  %v11646_v31 = vpop.f32.mrf.mxu1 }
 0x7c0   : > { %v10779_v6 = vpop.f32.mrf.mxu2 }
 0x7c1   : > { %v10809_v18 = vadd.f32 %v10779_v6, %v17301_v51 }
 0x7c3   : > { %v11150_v2 = vadd.f32 %v11120_v24, %v10809_v18 }
 0x7c5   : > { %v11332_v47 = vadd.f32 %v11302_v10, %v11150_v2 }
 0x7c6   : > { %v11307_v23 = vpop.f32.mrf.mxu0 }
 0x7c7   : > { %v11123_v8 = vpop.f32.mrf.mxu3  ;;  %v11648_v56 = vpop.f32.mrf.mxu1  ;;  %v11673_v12 = vadd.f32 %v11643_v35, %v11332_v47 }
 0x7c8   : > { %v10782_v21 = vpop.f32.mrf.mxu2 }
 0x7c9   : > { %14071 = vst [vmem:[%s17100_s20 + $0xd0] sm:$0xff] %v11673_v12  ;;  %v10810_v13 = vadd.f32 %v10782_v21, %v17308_v57 }
 0x7cb   : > { %v11151_v38 = vadd.f32 %v11123_v8, %v10810_v13 }
 0x7cd   : > { %v11333_v37 = vadd.f32 %v11305_v43, %v11151_v38 }
 0x7ce   : > { %v11309_v40 = vpop.f32.mrf.mxu0 }
 0x7cf   : > { %v11125_v0 = vpop.f32.mrf.mxu3  ;;  %v11650_v49 = vpop.f32.mrf.mxu1  ;;  %v11674_v22 = vadd.f32 %v11646_v31, %v11333_v37 }
 0x7d0   : > { %v10784_v45 = vpop.f32.mrf.mxu2 }
 0x7d1   : > { %14072 = vst [vmem:[%s17100_s20 + $0xd8] sm:$0xff] %v11674_v22 }
 0x7d6   : > { %v11311_v14 = vpop.f32.mrf.mxu0 }
 0x7d7   : > { %v11127_v51 = vpop.f32.mrf.mxu3  ;;  %v11652_v61 = vpop.f32.mrf.mxu1 }
 0x7d8   : > { %v10786_v32 = vpop.f32.mrf.mxu2 }
 0x7d9   : > { %v10811_v59 = vadd.f32 %v10786_v32, %v17315_v15 }
 0x7db   : > { %v11152_v52 = vadd.f32 %v11127_v51, %v10811_v59 }
 0x7dd   : > { %v11334_v57 = vadd.f32 %v11309_v40, %v11152_v52 }
 0x7de   : > { %v11314_v20 = vpop.f32.mrf.mxu0 }
 0x7df   : > { %v11129_v11 = vpop.f32.mrf.mxu3  ;;  %v11655_v54 = vpop.f32.mrf.mxu1  ;;  %v11675_v44 = vadd.f32 %v11650_v49, %v11334_v57 }
 0x7e0   : > { %v10788_v19 = vpop.f32.mrf.mxu2 }
 0x7e1   : > { %14073 = vst [vmem:[%s17100_s20 + $0xe0] sm:$0xff] %v11675_v44  ;;  %v10812_v58 = vadd.f32 %v10788_v19, %v17322_v46 }
 0x7e3   : > { %v11153_v42 = vadd.f32 %v11129_v11, %v10812_v58 }
 0x7e5   : > { %v11335_v16 = vadd.f32 %v11311_v14, %v11153_v42 }
 0x7e6   : > { %v11315_v41 = vpop.f32.mrf.mxu0 }
 0x7e7   : > { %v11132_v30 = vpop.f32.mrf.mxu3  ;;  %v11656_v29 = vpop.f32.mrf.mxu1  ;;  %v11676_v26 = vadd.f32 %v11652_v61, %v11335_v16 }
 0x7e8   : > { %v10791_v17 = vpop.f32.mrf.mxu2 }
 0x7e9   : > { %14074 = vst [vmem:[%s17100_s20 + $0xe8] sm:$0xff] %v11676_v26 }
 0x7ee   : > { %v11318_v34 = vpop.f32.mrf.mxu0 }
 0x7ef   : > { %v11133_v15 = vpop.f32.mrf.mxu3  ;;  %v11659_v5 = vpop.f32.mrf.mxu1 }
 0x7f0   : > { %v10792_v27 = vpop.f32.mrf.mxu2 }
 0x7f1   : > { %v10813_v62 = vadd.f32 %v10792_v27, %v17332_v63 }
 0x7f3   : > { %v11154_v46 = vadd.f32 %v11133_v15, %v10813_v62 }
 0x7f5   : > { %v11336_v50 = vadd.f32 %v11315_v41, %v11154_v46 }
 0x7f6   : > { %v11320_v9 = vpop.f32.mrf.mxu0 }
 0x7f7   : > { %v11136_v39 = vpop.f32.mrf.mxu3  ;;  %v11661_v28 = vpop.f32.mrf.mxu1  ;;  %v11677_v3 = vadd.f32 %v11656_v29, %v11336_v50 }
 0x7f8   : > { %v10795_v33 = vpop.f32.mrf.mxu2 }
 0x7f9   : > { %14075 = vst [vmem:[%s17100_s20 + $0xf0] sm:$0xff] %v11677_v3  ;;  %v10814_v48 = vadd.f32 %v10795_v33, %v17339_v36 }
 0x7fb   : > { %v11155_v63 = vadd.f32 %v11136_v39, %v10814_v48 }
 0x7fd   : > { %v11337_v55 = vadd.f32 %v11318_v34, %v11155_v63 }
 0x7ff   : > { %v11138_v1 = vpop.f32.mrf.mxu3  ;;  %v11678_v60 = vadd.f32 %v11659_v5, %v11337_v55 }
 0x800   : > { %v10797_v35 = vpop.f32.mrf.mxu2 }
 0x801   : > { %14076 = vst [vmem:[%s17100_s20 + $0xf8] sm:$0xff] %v11678_v60 }
 0x802   : > { %15050 = shalt.err (!%p15047_p11)
}
 0x803   : > { %s15108_s6 = smov 128   ;;  %s15109_s24 = smov 8  }
 0x804   : > { %14738 = dma.vmem_to_hbm [thread:$0]  (%p15239_p3), %s11710_s1, 4096, %s11712_s5, %s11697_s9, %s15108_s6, %s15108_s6, %s15109_s24  }
 0x805 PF: > { %s11726_s18 = sand.u32 1, %s15085_s27   ;;  %p17458_p12 = scmp.ge.s32.totalorder %s15097_s30, 2 }
 0x806   : > { %s11727_s20 = scalar_lea.sflag [#allocation6], %s11726_s18 }
 0x807   : > { %p14758_p13 = pnand %p17458_p12, %p15190_p6 }
 0x809   : > { %p14759_p0 = pneg %p14758_p13 }
 0x80b   : > { %15080 = dma.done.wait (%p14759_p0), %s11727_s20, 4096  }
 0x80c   : > { %15082 = vsyncadd (%p14759_p0), %s11727_s20, 4294963200  ;;  %p23_p5 = scmp.ge.s32.totalorder %s15229_s22, 4   ;;  %s17459_s27 = smov %s15089_s28 }
 0x80d   : > { %s17460_s28 = smov %s15093_s29  ;;  %s17461_s29 = smov %s15245_s10 }
 0x80e   : > { %s17462_s30 = smov %s15229_s22  ;;  %25 = sbr.rel (!%p23_p5) target bundleno = 12 (0xc), region = 130 }
 0x813   :  { %11733 = vsyncpa [#allocation5], 1 }
 0x814   :  { %11735 = vsyncpa [#allocation5 + $0x1], 1 }
 0x815   :  { %11736 = vsyncpa [#allocation8], 1 }
 0x816   :  { %11737 = vsyncpa [#allocation11], 1 }
 0x817   :  { %11738 = vsyncpa [#allocation6], 1 }
 0x818   :  { %11740 = vsyncpa [#allocation6 + $0x1], 1 }

</bundles_post_ra>
